<compile_context>
chip_gen: v7x
topology: tpu7x:2x2x1
jax: 0.10.0
libtpu: 0.0.40
codegen_flags: <defaults>
</compile_context>

<pallas_src>
import math
from functools import partial

import numpy as np
import jax
import jax.numpy as jnp
from jax.experimental import pallas as pl
from jax.experimental.pallas import tpu as pltpu


# ----------------------------- shared helpers -----------------------------
def _gelu(x):
    # TODO(synk): PyTorch nn.GELU default is erf-exact; tanh approximation used here.
    return 0.5 * x * (1.0 + jnp.tanh(0.7978845608028654 * (x + 0.044715 * x * x * x)))


def _dot(a, b):
    return jnp.dot(a, b, preferred_element_type=jnp.float32)


# ----------------------------- fused SFNO kernel -----------------------------
def _sfno_kernel(*refs, num_layers, lm, bb, embed, block_meta):
    """Whole-network forward for one block of `bb` batch elements.

    Activation layout: (bb*channels, H*W) -- batch-major channel rows on the
    sublane axis, spatial on the lane axis.  Every point-wise weight is a
    pre-built block-diagonal kron(I_bb, W), so each op is ONE MXU pass with
    M = bb*embed rows; the SHT/iSHT right-multiplications act on lanes and are
    shared across the stacked batch.

    refs = [x, enc_blk, (Tf, Ti, Wmix_blk, W1_blk, W2_blk) * L, dec_blk, out]
    """
    x_ref, enc_ref = refs[0], refs[1]
    blk_refs = refs[2:2 + 5 * num_layers]
    dec_ref = refs[2 + 5 * num_layers]
    o_ref = refs[3 + 5 * num_layers]

    BE = bb * embed

    # encoder 1x1 conv (no bias): block-diag (bb*E, bb*Cin) @ (bb*Cin, HW0)
    h = _dot(enc_ref[...], x_ref[0])                              # (BE, HW0) f32

    # lane sign mask turning roll([cr|ci]) = [ci|cr] into [-ci|cr]
    lane = jax.lax.broadcasted_iota(jnp.int32, (1, 2 * lm), 1)
    sign = jnp.where(lane < lm, -1.0, 1.0)

    for i in range(num_layers):
        tf_ref, ti_ref, wmix_ref, w1_ref, w2_ref = blk_refs[5 * i:5 * i + 5]
        scale_residual = block_meta[i]

        # forward SHT: (BE, HW_in) @ (HW_in, 2*LM)
        coeff = _dot(h.astype(jnp.bfloat16), tf_ref[...])         # (BE, 2LM) f32

        # complex per-mode channel mixing, merged into ONE matmul:
        #   mixed = [kron(I,WrT) | kron(I,WiT)] @ [coeff ; roll(coeff)*sign]
        swapped = pltpu.roll(coeff, shift=lm, axis=1) * sign       # (BE, 2LM)
        mix_in = jnp.concatenate([coeff, swapped], axis=0)         # (2BE, 2LM)
        mixed = _dot(wmix_ref[...], mix_in)                        # (BE, 2LM) f32

        if scale_residual:
            # residual (iSHT of raw coeffs) and pre-GELU activation share Ti:
            both = jnp.concatenate([coeff, mixed], axis=0).astype(jnp.bfloat16)
            z = _dot(both, ti_ref[...])                            # (2BE, HW_out)
            residual = z[:BE, :]
            y = _gelu(z[BE:, :])
        else:
            residual = h
            y = _gelu(_dot(mixed.astype(jnp.bfloat16), ti_ref[...]))

        # MLP (1x1 convs, zero-init biases): fc1 + GELU, fc2; outer_skip='identity'
        h1 = _gelu(_dot(w1_ref[...], y))                           # (bb*hidden, HW_out)
        h = _dot(w2_ref[...], h1) + residual                       # (BE, HW_out)

    # decoder 1x1 conv (no bias): (bb*Cout, bb*E) @ (bb*E, HW0) -> aligned (24,512) tile
    o_ref[0] = _dot(dec_ref[...], h)


def sfno_forward(x_nchw, params, meta):
    """x_nchw: (B, Cin, H0, W0) f32 -> (B, Cout, H0, W0) f32."""
    B, Cin, H0, W0 = x_nchw.shape
    HW0 = H0 * W0
    bb = meta["batch_block"]
    cout = meta["out_chans"]
    num_layers = meta["num_layers"]

    # pad batch to a multiple of the batch block (no-op for the demo sizes)
    Bp = ((B + bb - 1) // bb) * bb
    x_flat = x_nchw.reshape(B, Cin, HW0).astype(jnp.float32)
    if Bp != B:
        x_flat = jnp.concatenate(
            [x_flat, jnp.zeros((Bp - B, Cin, HW0), jnp.float32)], axis=0)
    nsteps = Bp // bb
    x_blk = x_flat.reshape(nsteps, bb * Cin, HW0)     # free reshape, no pad/copy

    inputs = [x_blk, params["enc_blk"]]
    in_specs = [
        pl.BlockSpec((1, bb * Cin, HW0), lambda g: (g, 0, 0)),
        pl.BlockSpec(params["enc_blk"].shape, lambda g: (0, 0)),
    ]
    for blk in params["blocks"]:
        for name in ("Tf", "Ti", "Wmix", "W1", "W2"):
            arr = blk[name]
            inputs.append(arr)
            in_specs.append(pl.BlockSpec(arr.shape, lambda g: (0, 0)))
    inputs.append(params["dec_blk"])
    in_specs.append(pl.BlockSpec(params["dec_blk"].shape, lambda g: (0, 0)))

    out = pl.pallas_call(
        partial(_sfno_kernel, num_layers=num_layers, lm=meta["lm"], bb=bb,
                embed=meta["embed_dim"], block_meta=meta["block_meta"]),
        out_shape=jax.ShapeDtypeStruct((nsteps, bb * cout, HW0), jnp.float32),
        grid=(nsteps,),
        in_specs=in_specs,
        out_specs=pl.BlockSpec((1, bb * cout, HW0), lambda g: (g, 0, 0)),
        compiler_params=pltpu.CompilerParams(dimension_semantics=("parallel",)),
    )(*inputs)

    out = out.reshape(Bp, cout, H0, W0)
    return out[:B] if Bp != B else out


# ------------------- plain-JAX reference (same math, unblocked) -------------------
def sfno_reference(x_nchw, raw, meta):
    B, Cin, H0, W0 = x_nchw.shape
    HW0 = H0 * W0
    lm = meta["lm"]
    x = x_nchw.reshape(B, Cin, HW0).astype(jnp.float32)
    h = jnp.einsum('oc,bcs->bos', raw["enc_wT"], x)
    for blk, scale_res in zip(raw["blocks"], meta["block_meta"]):
        Tf = blk["Tf"].astype(jnp.float32)
        Ti = blk["Ti"].astype(jnp.float32)
        coeff = jnp.einsum('bes,sk->bek', h, Tf)
        cr, ci = coeff[..., :lm], coeff[..., lm:]
        swapped = jnp.concatenate([-ci, cr], axis=-1)
        mixed = (jnp.einsum('oe,bek->bok', blk["WrT"], coeff)
                 + jnp.einsum('oe,bek->bok', blk["WiT"], swapped))
        residual = jnp.einsum('bek,ks->bes', coeff, Ti) if scale_res else h
        y = _gelu(jnp.einsum('bok,ks->bos', mixed, Ti))
        h1 = _gelu(jnp.einsum('he,bes->bhs', blk["W1T"], y))
        h = jnp.einsum('eh,bhs->bes', blk["W2T"], h1) + residual
    out = jnp.einsum('oe,bes->bos', raw["dec_wT"], h)
    return out.reshape(B, -1, H0, W0)


# ------------------- synthetic spherical-harmonic transform matrices -------------------
# TODO(synk): torch_harmonics RealSHT uses associated Legendre polys + grid quadrature;
# here the latitude transform is a deterministic orthonormal cosine basis (DFT in longitude).
def build_forward_sht(H, W, L, M):
    w = np.arange(W)[:, None]
    m = np.arange(M)[None, :]
    ang = 2.0 * np.pi * w * m / W
    Fc, Fs = np.cos(ang), -np.sin(ang)                           # (W, M)
    l = np.arange(L)[:, None]
    h = np.arange(H)[None, :]
    B = np.cos(np.pi * l * (h + 0.5) / H) * np.sqrt(2.0 / H)     # (L, H)
    B[0] *= 1.0 / np.sqrt(2.0)
    TfR = np.einsum('lh,wm->hwlm', B, Fc).reshape(H * W, L * M)
    TfI = np.einsum('lh,wm->hwlm', B, Fs).reshape(H * W, L * M)
    return np.concatenate([TfR, TfI], axis=1).astype(np.float32)  # (H*W, 2*L*M)


def build_inverse_sht(H, W, L, M):
    m = np.arange(M)[:, None]
    w = np.arange(W)[None, :]
    cm = np.where(np.arange(M) == 0, 1.0, 2.0)[:, None]
    ang = 2.0 * np.pi * m * w / W
    Gc = cm * np.cos(ang) / W                                     # multiplies real part
    Gs = -cm * np.sin(ang) / W                                    # multiplies imag part
    l = np.arange(L)[:, None]
    h = np.arange(H)[None, :]
    B = np.cos(np.pi * l * (h + 0.5) / H) * np.sqrt(2.0 / H)      # (L, H)
    B[0] *= 1.0 / np.sqrt(2.0)
    Binv = B.T                                                    # (H, L)
    TiR = np.einsum('hl,mw->lmhw', Binv, Gc).reshape(L * M, H * W)
    TiI = np.einsum('hl,mw->lmhw', Binv, Gs).reshape(L * M, H * W)
    return np.concatenate([TiR, TiI], axis=0).astype(np.float32)  # (2*L*M, H*W)


def _blockdiag(w, bb):
    """kron(I_bb, w): (O, C) -> (bb*O, bb*C) block-diagonal, batch-major blocks."""
    return np.kron(np.eye(bb, dtype=np.float32), np.asarray(w, np.float32))


# --------------------------------- driver ---------------------------------
if __name__ == "__main__":
    img_size = (16, 32)
    scale_factor = 2
    in_chans = out_chans = 3
    embed_dim = 16
    num_layers = 2
    mlp_ratio = 2.0
    batch = 16
    batch_block = 8        # 8 elems/grid step -> M = 128 MXU rows, 2 grid steps (v7x)

    H0, W0 = img_size
    h_int = (H0 - 1) // scale_factor + 1          # 8
    w_int = W0 // scale_factor                    # 16
    modes = min(h_int, w_int // 2 + 1 - 1)        # hard_thresholding_fraction = 1.0
    L = M = modes
    lm = L * M                                    # 64 -> coeff width 2*lm = 128
    hidden = int(embed_dim * mlp_ratio)

    Tf_down = build_forward_sht(H0, W0, L, M)
    Ti_up = build_inverse_sht(H0, W0, L, M)
    Tf_int = build_forward_sht(h_int, w_int, L, M)
    Ti_int = build_inverse_sht(h_int, w_int, L, M)

    key = jax.random.PRNGKey(0)
    key, k_enc, k_dec = jax.random.split(key, 3)
    enc_w = jax.random.normal(k_enc, (in_chans, embed_dim), jnp.float32) * math.sqrt(1.0 / in_chans)
    dec_w = jax.random.normal(k_dec, (embed_dim, out_chans), jnp.float32) * math.sqrt(1.0 / embed_dim)

    raw = {"enc_wT": jnp.asarray(enc_w.T), "dec_wT": jnp.asarray(dec_w.T), "blocks": []}
    params = {
        "enc_blk": jnp.asarray(_blockdiag(np.asarray(enc_w).T, batch_block)),   # (bb*E, bb*Cin)
        "dec_blk": jnp.asarray(_blockdiag(np.asarray(dec_w).T, batch_block)),   # (bb*Cout, bb*E)
        "blocks": [],
    }
    block_meta = []
    for i in range(num_layers):
        first, last = i == 0, i == num_layers - 1
        Tf = Tf_down if first else Tf_int
        Ti = Ti_up if last else Ti_int
        Hin, Win = (H0, W0) if first else (h_int, w_int)
        Ho, Wo = (H0, W0) if last else (h_int, w_int)
        key, k1, k2, k3, k4 = jax.random.split(key, 5)
        gain = 2.0  # GELU act, inner_skip='none'
        Wr = jax.random.normal(k1, (embed_dim, embed_dim), jnp.float32) * math.sqrt(gain / embed_dim)
        Wi = jax.random.normal(k2, (embed_dim, embed_dim), jnp.float32) * math.sqrt(gain / embed_dim)
        # MLP gain = 1.0 (outer_skip='identity'); Conv2d biases are zero-init in the module.
        W1 = jax.random.normal(k3, (embed_dim, hidden), jnp.float32) * math.sqrt(2.0 / embed_dim)
        W2 = jax.random.normal(k4, (hidden, embed_dim), jnp.float32) * math.sqrt(1.0 / hidden)

        Tf_b = jnp.asarray(Tf, jnp.bfloat16)     # bf16 transforms: half the DMA bytes,
        Ti_b = jnp.asarray(Ti, jnp.bfloat16)     # f32 MXU accumulation in the kernel

        raw["blocks"].append({
            "Tf": Tf_b, "Ti": Ti_b,
            "WrT": jnp.asarray(Wr.T), "WiT": jnp.asarray(Wi.T),
            "W1T": jnp.asarray(W1.T), "W2T": jnp.asarray(W2.T),
        })
        wmix_blk = np.concatenate(
            [_blockdiag(np.asarray(Wr).T, batch_block),
             _blockdiag(np.asarray(Wi).T, batch_block)], axis=1)          # (bb*E, 2*bb*E)
        params["blocks"].append({
            "Tf": Tf_b, "Ti": Ti_b,
            "Wmix": jnp.asarray(wmix_blk),
            "W1": jnp.asarray(_blockdiag(np.asarray(W1).T, batch_block)),  # (bb*hid, bb*E)
            "W2": jnp.asarray(_blockdiag(np.asarray(W2).T, batch_block)),  # (bb*E, bb*hid)
        })
        block_meta.append((Hin, Win) != (Ho, Wo))

    meta = {
        "out_chans": out_chans,
        "embed_dim": embed_dim,
        "num_layers": num_layers,
        "lm": lm,
        "batch_block": batch_block,
        "block_meta": tuple(block_meta),
    }

    key, kx = jax.random.split(key)
    x = jax.random.normal(kx, (batch, in_chans, H0, W0), jnp.float32)

    fwd = jax.jit(lambda xx: sfno_forward(xx, params, meta))
    y = jax.block_until_ready(fwd(x))
    assert y.shape == (batch, out_chans, H0, W0), y.shape
    assert bool(jnp.all(jnp.isfinite(y)))

    # self-check against a plain-JAX reference of the same math (bf16 only in the
    # kernel's big matmul operands -> generous tolerance)
    y_ref = jax.block_until_ready(jax.jit(lambda xx: sfno_reference(xx, raw, meta))(x))
    err = float(jnp.max(jnp.abs(y - y_ref)) / (jnp.max(jnp.abs(y_ref)) + 1e-6))
    assert err < 0.1, f"mismatch vs reference: {err}"

    print("KERNEL_OK")
</pallas_src>

<mosaic_0001>
module attributes {stable_mosaic.version = 11 : i64} {
  func.func @_sfno_kernel(%arg0: i32, %arg1: memref<1x24x512xf32, #tpu.memory_space<vmem>>, %arg2: memref<128x24xf32, #tpu.memory_space<vmem>>, %arg3: memref<512x128xbf16, #tpu.memory_space<vmem>>, %arg4: memref<128x128xbf16, #tpu.memory_space<vmem>>, %arg5: memref<128x256xf32, #tpu.memory_space<vmem>>, %arg6: memref<256x128xf32, #tpu.memory_space<vmem>>, %arg7: memref<128x256xf32, #tpu.memory_space<vmem>>, %arg8: memref<128x128xbf16, #tpu.memory_space<vmem>>, %arg9: memref<128x512xbf16, #tpu.memory_space<vmem>>, %arg10: memref<128x256xf32, #tpu.memory_space<vmem>>, %arg11: memref<256x128xf32, #tpu.memory_space<vmem>>, %arg12: memref<128x256xf32, #tpu.memory_space<vmem>>, %arg13: memref<24x128xf32, #tpu.memory_space<vmem>>, %arg14: memref<1x24x512xf32, #tpu.memory_space<vmem>>) attributes {dimension_semantics = [#tpu.dimension_semantics<parallel>], iteration_bounds = array<i64: 2>, scalar_prefetch = 0 : i64, scratch_operands = 0 : i64, tpu.core_type = #tpu.core_type<tc>, window_params = [{transform_indices = @transform_0, window_bounds = array<i64: 1, 24, 512>}, {pipeline_mode = #tpu.pipeline_mode<synchronous>, transform_indices = @transform_1, window_bounds = array<i64: 128, 24>}, {pipeline_mode = #tpu.pipeline_mode<synchronous>, transform_indices = @transform_2, window_bounds = array<i64: 512, 128>}, {pipeline_mode = #tpu.pipeline_mode<synchronous>, transform_indices = @transform_3, window_bounds = array<i64: 128, 128>}, {pipeline_mode = #tpu.pipeline_mode<synchronous>, transform_indices = @transform_4, window_bounds = array<i64: 128, 256>}, {pipeline_mode = #tpu.pipeline_mode<synchronous>, transform_indices = @transform_5, window_bounds = array<i64: 256, 128>}, {pipeline_mode = #tpu.pipeline_mode<synchronous>, transform_indices = @transform_6, window_bounds = array<i64: 128, 256>}, {pipeline_mode = #tpu.pipeline_mode<synchronous>, transform_indices = @transform_7, window_bounds = array<i64: 128, 128>}, {pipeline_mode = #tpu.pipeline_mode<synchronous>, transform_indices = @transform_8, window_bounds = array<i64: 128, 512>}, {pipeline_mode = #tpu.pipeline_mode<synchronous>, transform_indices = @transform_9, window_bounds = array<i64: 128, 256>}, {pipeline_mode = #tpu.pipeline_mode<synchronous>, transform_indices = @transform_10, window_bounds = array<i64: 256, 128>}, {pipeline_mode = #tpu.pipeline_mode<synchronous>, transform_indices = @transform_11, window_bounds = array<i64: 128, 256>}, {pipeline_mode = #tpu.pipeline_mode<synchronous>, transform_indices = @transform_12, window_bounds = array<i64: 24, 128>}, {transform_indices = @transform_13, window_bounds = array<i64: 1, 24, 512>}]} {
    %c0 = arith.constant 0 : index
    %c0_0 = arith.constant 0 : index
    %0 = vector.load %arg2[%c0, %c0_0] : memref<128x24xf32, #tpu.memory_space<vmem>>, vector<128x24xf32>
    %c0_1 = arith.constant 0 : index
    %c0_2 = arith.constant 0 : index
    %c0_3 = arith.constant 0 : index
    %1 = vector.load %arg1[%c0_1, %c0_2, %c0_3] : memref<1x24x512xf32, #tpu.memory_space<vmem>>, vector<1x24x512xf32>
    %2 = vector.shape_cast %1 : vector<1x24x512xf32> to vector<24x512xf32>
    %cst = arith.constant dense<0.000000e+00> : vector<128x512xf32>
    %3 = tpu.matmul %0, %2, %cst {dimension_numbers = #tpu.dot_dimension_numbers<[1], [0], [0], [1], [0, 0, 1, 1], [], []>} : vector<128x24xf32>, vector<24x512xf32>, vector<128x512xf32> -> vector<128x512xf32>
    %4 = tpu.iota {dimensions = array<i32: 1>} : vector<1x128xi32>
    %c64_i32 = arith.constant 64 : i32
    %5 = vector.broadcast %c64_i32 : i32 to vector<1x128xi32>
    %6 = arith.cmpi slt, %4, %5 : vector<1x128xi32>
    %cst_4 = arith.constant -1.000000e+00 : f32
    %cst_5 = arith.constant 1.000000e+00 : f32
    %7 = vector.broadcast %cst_4 : f32 to vector<1x128xf32>
    %8 = vector.broadcast %cst_5 : f32 to vector<1x128xf32>
    %9 = arith.select %6, %7, %8 : vector<1x128xi1>, vector<1x128xf32>
    %10 = arith.truncf %3 : vector<128x512xf32> to vector<128x512xbf16>
    %c0_6 = arith.constant 0 : index
    %c0_7 = arith.constant 0 : index
    %11 = vector.load %arg3[%c0_6, %c0_7] : memref<512x128xbf16, #tpu.memory_space<vmem>>, vector<512x128xbf16>
    %cst_8 = arith.constant dense<0.000000e+00> : vector<128x128xf32>
    %12 = tpu.matmul %10, %11, %cst_8 {dimension_numbers = #tpu.dot_dimension_numbers<[1], [0], [0], [1], [0, 0, 1, 1], [], []>} : vector<128x512xbf16>, vector<512x128xbf16>, vector<128x128xf32> -> vector<128x128xf32>
    %c64_i32_9 = arith.constant 64 : i32
    %13 = tpu.dynamic_rotate %12 by %c64_i32_9 dim 1 : vector<128x128xf32>, i32 -> vector<128x128xf32>
    %14 = vector.broadcast %9 : vector<1x128xf32> to vector<128x128xf32>
    %15 = arith.mulf %13, %14 : vector<128x128xf32>
    %16 = tpu.concatenate %12, %15 in 0 : vector<128x128xf32>, vector<128x128xf32> -> vector<256x128xf32>
    %c0_10 = arith.constant 0 : index
    %c0_11 = arith.constant 0 : index
    %17 = vector.load %arg5[%c0_10, %c0_11] : memref<128x256xf32, #tpu.memory_space<vmem>>, vector<128x256xf32>
    %cst_12 = arith.constant dense<0.000000e+00> : vector<128x128xf32>
    %18 = tpu.matmul %17, %16, %cst_12 {dimension_numbers = #tpu.dot_dimension_numbers<[1], [0], [0], [1], [0, 0, 1, 1], [], []>} : vector<128x256xf32>, vector<256x128xf32>, vector<128x128xf32> -> vector<128x128xf32>
    %19 = tpu.concatenate %12, %18 in 0 : vector<128x128xf32>, vector<128x128xf32> -> vector<256x128xf32>
    %20 = arith.truncf %19 : vector<256x128xf32> to vector<256x128xbf16>
    %c0_13 = arith.constant 0 : index
    %c0_14 = arith.constant 0 : index
    %21 = vector.load %arg4[%c0_13, %c0_14] : memref<128x128xbf16, #tpu.memory_space<vmem>>, vector<128x128xbf16>
    %cst_15 = arith.constant dense<0.000000e+00> : vector<256x128xf32>
    %22 = tpu.matmul %20, %21, %cst_15 {dimension_numbers = #tpu.dot_dimension_numbers<[1], [0], [0], [1], [0, 0, 1, 1], [], []>} : vector<256x128xbf16>, vector<128x128xbf16>, vector<256x128xf32> -> vector<256x128xf32>
    %23 = vector.extract_strided_slice %22 {offsets = [0, 0], sizes = [128, 128], strides = [1, 1]} : vector<256x128xf32> to vector<128x128xf32>
    %24 = vector.extract_strided_slice %22 {offsets = [128, 0], sizes = [128, 128], strides = [1, 1]} : vector<256x128xf32> to vector<128x128xf32>
    %cst_16 = arith.constant 5.000000e-01 : f32
    %25 = vector.broadcast %cst_16 : f32 to vector<128x128xf32>
    %26 = arith.mulf %25, %24 : vector<128x128xf32>
    %cst_17 = arith.constant 4.471500e-02 : f32
    %27 = vector.broadcast %cst_17 : f32 to vector<128x128xf32>
    %28 = arith.mulf %27, %24 : vector<128x128xf32>
    %29 = arith.mulf %28, %24 : vector<128x128xf32>
    %30 = arith.mulf %29, %24 : vector<128x128xf32>
    %31 = arith.addf %24, %30 : vector<128x128xf32>
    %cst_18 = arith.constant 0.797884583 : f32
    %32 = vector.broadcast %cst_18 : f32 to vector<128x128xf32>
    %33 = arith.mulf %32, %31 : vector<128x128xf32>
    %34 = math.tanh %33 : vector<128x128xf32>
    %cst_19 = arith.constant 1.000000e+00 : f32
    %35 = vector.broadcast %cst_19 : f32 to vector<128x128xf32>
    %36 = arith.addf %35, %34 : vector<128x128xf32>
    %37 = arith.mulf %26, %36 : vector<128x128xf32>
    %c0_20 = arith.constant 0 : index
    %c0_21 = arith.constant 0 : index
    %38 = vector.load %arg6[%c0_20, %c0_21] : memref<256x128xf32, #tpu.memory_space<vmem>>, vector<256x128xf32>
    %cst_22 = arith.constant dense<0.000000e+00> : vector<256x128xf32>
    %39 = tpu.matmul %38, %37, %cst_22 {dimension_numbers = #tpu.dot_dimension_numbers<[1], [0], [0], [1], [0, 0, 1, 1], [], []>} : vector<256x128xf32>, vector<128x128xf32>, vector<256x128xf32> -> vector<256x128xf32>
    %cst_23 = arith.constant 5.000000e-01 : f32
    %40 = vector.broadcast %cst_23 : f32 to vector<256x128xf32>
    %41 = arith.mulf %40, %39 : vector<256x128xf32>
    %cst_24 = arith.constant 4.471500e-02 : f32
    %42 = vector.broadcast %cst_24 : f32 to vector<256x128xf32>
    %43 = arith.mulf %42, %39 : vector<256x128xf32>
    %44 = arith.mulf %43, %39 : vector<256x128xf32>
    %45 = arith.mulf %44, %39 : vector<256x128xf32>
    %46 = arith.addf %39, %45 : vector<256x128xf32>
    %cst_25 = arith.constant 0.797884583 : f32
    %47 = vector.broadcast %cst_25 : f32 to vector<256x128xf32>
    %48 = arith.mulf %47, %46 : vector<256x128xf32>
    %49 = math.tanh %48 : vector<256x128xf32>
    %cst_26 = arith.constant 1.000000e+00 : f32
    %50 = vector.broadcast %cst_26 : f32 to vector<256x128xf32>
    %51 = arith.addf %50, %49 : vector<256x128xf32>
    %52 = arith.mulf %41, %51 : vector<256x128xf32>
    %c0_27 = arith.constant 0 : index
    %c0_28 = arith.constant 0 : index
    %53 = vector.load %arg7[%c0_27, %c0_28] : memref<128x256xf32, #tpu.memory_space<vmem>>, vector<128x256xf32>
    %cst_29 = arith.constant dense<0.000000e+00> : vector<128x128xf32>
    %54 = tpu.matmul %53, %52, %cst_29 {dimension_numbers = #tpu.dot_dimension_numbers<[1], [0], [0], [1], [0, 0, 1, 1], [], []>} : vector<128x256xf32>, vector<256x128xf32>, vector<128x128xf32> -> vector<128x128xf32>
    %55 = arith.addf %54, %23 : vector<128x128xf32>
    %56 = arith.truncf %55 : vector<128x128xf32> to vector<128x128xbf16>
    %c0_30 = arith.constant 0 : index
    %c0_31 = arith.constant 0 : index
    %57 = vector.load %arg8[%c0_30, %c0_31] : memref<128x128xbf16, #tpu.memory_space<vmem>>, vector<128x128xbf16>
    %cst_32 = arith.constant dense<0.000000e+00> : vector<128x128xf32>
    %58 = tpu.matmul %56, %57, %cst_32 {dimension_numbers = #tpu.dot_dimension_numbers<[1], [0], [0], [1], [0, 0, 1, 1], [], []>} : vector<128x128xbf16>, vector<128x128xbf16>, vector<128x128xf32> -> vector<128x128xf32>
    %c64_i32_33 = arith.constant 64 : i32
    %59 = tpu.dynamic_rotate %58 by %c64_i32_33 dim 1 : vector<128x128xf32>, i32 -> vector<128x128xf32>
    %60 = vector.broadcast %9 : vector<1x128xf32> to vector<128x128xf32>
    %61 = arith.mulf %59, %60 : vector<128x128xf32>
    %62 = tpu.concatenate %58, %61 in 0 : vector<128x128xf32>, vector<128x128xf32> -> vector<256x128xf32>
    %c0_34 = arith.constant 0 : index
    %c0_35 = arith.constant 0 : index
    %63 = vector.load %arg10[%c0_34, %c0_35] : memref<128x256xf32, #tpu.memory_space<vmem>>, vector<128x256xf32>
    %cst_36 = arith.constant dense<0.000000e+00> : vector<128x128xf32>
    %64 = tpu.matmul %63, %62, %cst_36 {dimension_numbers = #tpu.dot_dimension_numbers<[1], [0], [0], [1], [0, 0, 1, 1], [], []>} : vector<128x256xf32>, vector<256x128xf32>, vector<128x128xf32> -> vector<128x128xf32>
    %65 = tpu.concatenate %58, %64 in 0 : vector<128x128xf32>, vector<128x128xf32> -> vector<256x128xf32>
    %66 = arith.truncf %65 : vector<256x128xf32> to vector<256x128xbf16>
    %c0_37 = arith.constant 0 : index
    %c0_38 = arith.constant 0 : index
    %67 = vector.load %arg9[%c0_37, %c0_38] : memref<128x512xbf16, #tpu.memory_space<vmem>>, vector<128x512xbf16>
    %cst_39 = arith.constant dense<0.000000e+00> : vector<256x512xf32>
    %68 = tpu.matmul %66, %67, %cst_39 {dimension_numbers = #tpu.dot_dimension_numbers<[1], [0], [0], [1], [0, 0, 1, 1], [], []>} : vector<256x128xbf16>, vector<128x512xbf16>, vector<256x512xf32> -> vector<256x512xf32>
    %69 = vector.extract_strided_slice %68 {offsets = [0, 0], sizes = [128, 512], strides = [1, 1]} : vector<256x512xf32> to vector<128x512xf32>
    %70 = vector.extract_strided_slice %68 {offsets = [128, 0], sizes = [128, 512], strides = [1, 1]} : vector<256x512xf32> to vector<128x512xf32>
    %cst_40 = arith.constant 5.000000e-01 : f32
    %71 = vector.broadcast %cst_40 : f32 to vector<128x512xf32>
    %72 = arith.mulf %71, %70 : vector<128x512xf32>
    %cst_41 = arith.constant 4.471500e-02 : f32
    %73 = vector.broadcast %cst_41 : f32 to vector<128x512xf32>
    %74 = arith.mulf %73, %70 : vector<128x512xf32>
    %75 = arith.mulf %74, %70 : vector<128x512xf32>
    %76 = arith.mulf %75, %70 : vector<128x512xf32>
    %77 = arith.addf %70, %76 : vector<128x512xf32>
    %cst_42 = arith.constant 0.797884583 : f32
    %78 = vector.broadcast %cst_42 : f32 to vector<128x512xf32>
    %79 = arith.mulf %78, %77 : vector<128x512xf32>
    %80 = math.tanh %79 : vector<128x512xf32>
    %cst_43 = arith.constant 1.000000e+00 : f32
    %81 = vector.broadcast %cst_43 : f32 to vector<128x512xf32>
    %82 = arith.addf %81, %80 : vector<128x512xf32>
    %83 = arith.mulf %72, %82 : vector<128x512xf32>
    %c0_44 = arith.constant 0 : index
    %c0_45 = arith.constant 0 : index
    %84 = vector.load %arg11[%c0_44, %c0_45] : memref<256x128xf32, #tpu.memory_space<vmem>>, vector<256x128xf32>
    %cst_46 = arith.constant dense<0.000000e+00> : vector<256x512xf32>
    %85 = tpu.matmul %84, %83, %cst_46 {dimension_numbers = #tpu.dot_dimension_numbers<[1], [0], [0], [1], [0, 0, 1, 1], [], []>} : vector<256x128xf32>, vector<128x512xf32>, vector<256x512xf32> -> vector<256x512xf32>
    %cst_47 = arith.constant 5.000000e-01 : f32
    %86 = vector.broadcast %cst_47 : f32 to vector<256x512xf32>
    %87 = arith.mulf %86, %85 : vector<256x512xf32>
    %cst_48 = arith.constant 4.471500e-02 : f32
    %88 = vector.broadcast %cst_48 : f32 to vector<256x512xf32>
    %89 = arith.mulf %88, %85 : vector<256x512xf32>
    %90 = arith.mulf %89, %85 : vector<256x512xf32>
    %91 = arith.mulf %90, %85 : vector<256x512xf32>
    %92 = arith.addf %85, %91 : vector<256x512xf32>
    %cst_49 = arith.constant 0.797884583 : f32
    %93 = vector.broadcast %cst_49 : f32 to vector<256x512xf32>
    %94 = arith.mulf %93, %92 : vector<256x512xf32>
    %95 = math.tanh %94 : vector<256x512xf32>
    %cst_50 = arith.constant 1.000000e+00 : f32
    %96 = vector.broadcast %cst_50 : f32 to vector<256x512xf32>
    %97 = arith.addf %96, %95 : vector<256x512xf32>
    %98 = arith.mulf %87, %97 : vector<256x512xf32>
    %c0_51 = arith.constant 0 : index
    %c0_52 = arith.constant 0 : index
    %99 = vector.load %arg12[%c0_51, %c0_52] : memref<128x256xf32, #tpu.memory_space<vmem>>, vector<128x256xf32>
    %cst_53 = arith.constant dense<0.000000e+00> : vector<128x512xf32>
    %100 = tpu.matmul %99, %98, %cst_53 {dimension_numbers = #tpu.dot_dimension_numbers<[1], [0], [0], [1], [0, 0, 1, 1], [], []>} : vector<128x256xf32>, vector<256x512xf32>, vector<128x512xf32> -> vector<128x512xf32>
    %101 = arith.addf %100, %69 : vector<128x512xf32>
    %c0_54 = arith.constant 0 : index
    %c0_55 = arith.constant 0 : index
    %102 = vector.load %arg13[%c0_54, %c0_55] : memref<24x128xf32, #tpu.memory_space<vmem>>, vector<24x128xf32>
    %cst_56 = arith.constant dense<0.000000e+00> : vector<24x512xf32>
    %103 = tpu.matmul %102, %101, %cst_56 {dimension_numbers = #tpu.dot_dimension_numbers<[1], [0], [0], [1], [0, 0, 1, 1], [], []>} : vector<24x128xf32>, vector<128x512xf32>, vector<24x512xf32> -> vector<24x512xf32>
    %c0_57 = arith.constant 0 : index
    %c0_58 = arith.constant 0 : index
    %c0_59 = arith.constant 0 : index
    %104 = vector.load %arg14[%c0_57, %c0_58, %c0_59] : memref<1x24x512xf32, #tpu.memory_space<vmem>>, vector<1x24x512xf32>
    %105 = vector.shape_cast %104 : vector<1x24x512xf32> to vector<24x512xf32>
    %106 = vector.shape_cast %103 : vector<24x512xf32> to vector<1x24x512xf32>
    tpu.vector_store %arg14[%c0_57, %c0_58, %c0_59], %106 {strides = array<i32>} : memref<1x24x512xf32, #tpu.memory_space<vmem>>, vector<1x24x512xf32>,
    return
  }
  func.func @transform_0(%arg0: i32) -> (i32, i32, i32) {
    %c0_i32 = arith.constant 0 : i32
    %c0_i32_0 = arith.constant 0 : i32
    %c0_i32_1 = arith.constant 0 : i32
    return %arg0, %c0_i32, %c0_i32_0 : i32, i32, i32
  }
  func.func @transform_1(%arg0: i32) -> (i32, i32) {
    %c0_i32 = arith.constant 0 : i32
    %c0_i32_0 = arith.constant 0 : i32
    %c0_i32_1 = arith.constant 0 : i32
    return %c0_i32, %c0_i32_0 : i32, i32
  }
  func.func @transform_2(%arg0: i32) -> (i32, i32) {
    %c0_i32 = arith.constant 0 : i32
    %c0_i32_0 = arith.constant 0 : i32
    %c0_i32_1 = arith.constant 0 : i32
    return %c0_i32, %c0_i32_0 : i32, i32
  }
  func.func @transform_3(%arg0: i32) -> (i32, i32) {
    %c0_i32 = arith.constant 0 : i32
    %c0_i32_0 = arith.constant 0 : i32
    %c0_i32_1 = arith.constant 0 : i32
    return %c0_i32, %c0_i32_0 : i32, i32
  }
  func.func @transform_4(%arg0: i32) -> (i32, i32) {
    %c0_i32 = arith.constant 0 : i32
    %c0_i32_0 = arith.constant 0 : i32
    %c0_i32_1 = arith.constant 0 : i32
    return %c0_i32, %c0_i32_0 : i32, i32
  }
  func.func @transform_5(%arg0: i32) -> (i32, i32) {
    %c0_i32 = arith.constant 0 : i32
    %c0_i32_0 = arith.constant 0 : i32
    %c0_i32_1 = arith.constant 0 : i32
    return %c0_i32, %c0_i32_0 : i32, i32
  }
  func.func @transform_6(%arg0: i32) -> (i32, i32) {
    %c0_i32 = arith.constant 0 : i32
    %c0_i32_0 = arith.constant 0 : i32
    %c0_i32_1 = arith.constant 0 : i32
    return %c0_i32, %c0_i32_0 : i32, i32
  }
  func.func @transform_7(%arg0: i32) -> (i32, i32) {
    %c0_i32 = arith.constant 0 : i32
    %c0_i32_0 = arith.constant 0 : i32
    %c0_i32_1 = arith.constant 0 : i32
    return %c0_i32, %c0_i32_0 : i32, i32
  }
  func.func @transform_8(%arg0: i32) -> (i32, i32) {
    %c0_i32 = arith.constant 0 : i32
    %c0_i32_0 = arith.constant 0 : i32
    %c0_i32_1 = arith.constant 0 : i32
    return %c0_i32, %c0_i32_0 : i32, i32
  }
  func.func @transform_9(%arg0: i32) -> (i32, i32) {
    %c0_i32 = arith.constant 0 : i32
    %c0_i32_0 = arith.constant 0 : i32
    %c0_i32_1 = arith.constant 0 : i32
    return %c0_i32, %c0_i32_0 : i32, i32
  }
  func.func @transform_10(%arg0: i32) -> (i32, i32) {
    %c0_i32 = arith.constant 0 : i32
    %c0_i32_0 = arith.constant 0 : i32
    %c0_i32_1 = arith.constant 0 : i32
    return %c0_i32, %c0_i32_0 : i32, i32
  }
  func.func @transform_11(%arg0: i32) -> (i32, i32) {
    %c0_i32 = arith.constant 0 : i32
    %c0_i32_0 = arith.constant 0 : i32
    %c0_i32_1 = arith.constant 0 : i32
    return %c0_i32, %c0_i32_0 : i32, i32
  }
  func.func @transform_12(%arg0: i32) -> (i32, i32) {
    %c0_i32 = arith.constant 0 : i32
    %c0_i32_0 = arith.constant 0 : i32
    %c0_i32_1 = arith.constant 0 : i32
    return %c0_i32, %c0_i32_0 : i32, i32
  }
  func.func @transform_13(%arg0: i32) -> (i32, i32, i32) {
    %c0_i32 = arith.constant 0 : i32
    %c0_i32_0 = arith.constant 0 : i32
    %c0_i32_1 = arith.constant 0 : i32
    return %arg0, %c0_i32, %c0_i32_0 : i32, i32, i32
  }
}

</mosaic_0001>

<bundles_post_ra>
// kernel: _lambda_.1
= control target key start
LH: loop header
LB: loop body
LE: loop exit
PB: predicated region body
PF: predicated region fallthrough
CT: control target
= control target key end

     0   :  { %s12332_s0 = inlined_call_operand.vmem [shape: f32[2,24,512], index: 0, kind: input, shape index: {}]   ;;  %s12333_s1 = inlined_call_operand.vmem [shape: f32[128,24], index: 1, kind: input, shape index: {}]   ;;  %s12334_s2 = inlined_call_operand.vmem [shape: bf16[512,128], index: 2, kind: input, shape index: {}]   ;;  %s12335_s3 = inlined_call_operand.hbm [shape: bf16[128,128], index: 3, kind: input, shape index: {}]   ;;  %s12336_s4 = inlined_call_operand.hbm [shape: f32[128,256], index: 4, kind: input, shape index: {}]   ;;  %s12337_s5 = inlined_call_operand.hbm [shape: f32[256,128], index: 5, kind: input, shape index: {}]   ;;  %s12338_s6 = inlined_call_operand.hbm [shape: f32[128,256], index: 6, kind: input, shape index: {}]   ;;  %s12339_s7 = inlined_call_operand.vmem [shape: bf16[128,128], index: 7, kind: input, shape index: {}]   ;;  %s12340_s8 = inlined_call_operand.vmem [shape: bf16[128,512], index: 8, kind: input, shape index: {}]   ;;  %s12341_s9 = inlined_call_operand.vmem [shape: f32[128,256], index: 9, kind: input, shape index: {}]   ;;  %s12342_s10 = inlined_call_operand.vmem [shape: f32[256,128], index: 10, kind: input, shape index: {}]   ;;  %s12343_s11 = inlined_call_operand.vmem [shape: f32[128,256], index: 11, kind: input, shape index: {}]   ;;  %s12344_s12 = inlined_call_operand.vmem [shape: f32[24,128], index: 12, kind: input, shape index: {}]   ;;  %s12345_s13 = inlined_call_operand.vmem [shape: f32[2,24,512], index: 13, kind: output, shape index: {}]  }
   0x1   :  { %12448 = sst [smem:[#allocation194_spill]] %s12345_s13 }
   0x2   :  { %18 = vsyncpa [#allocation3], 0 }
   0x3   :  { %19 = vsyncpa [#allocation5], 0 }
   0x4   :  { %20 = vsyncpa [#allocation8], 0  ;;  %s8604_s25 = smov 0  }
   0x5 LB: > { %12449 = sst [smem:[#allocation12_spill]] %s8518_s25  ;;  %s8520_s26 = smov [#allocation4]   ;;  %s8518_s25 = sphi %s8604_s25, %s26_s25  }
   0x6   : > { %s366_s27 = sshll.u32 %s8520_s26, 4  ;;  %s8610_s28 = sadd.s32 4294967295, %s8518_s25   ;;  %s8615_s27 = int_to_ptr.vmem [resolvable:$true] %s366_s27 }
   0x7   : > { %p6613_p0 = scmp.ge.s32.totalorder %s8518_s25, 1  ;;  %p335_p1 = scmp.lt.s32.totalorder %s8518_s25, 3 }
   0x8   : > { %p12348_p2 = scmp.eq.s32.totalorder %s8610_s28, 0  ;;  %s8521_s30 = smov [#allocation2]  }
   0x9   : > { %p8617_p3 = pnand %p6613_p0, %p335_p1  ;;  %s353_s14 = sshll.u32 %s8521_s30, 4  ;;  %s8623_s14 = int_to_ptr.vmem [resolvable:$true] %s353_s14 }
   0xa   : > { %s8522_s16 = smov [#allocation6]   ;;  %s8388_s20 = scalar_lea.hbm %s12336_s4, 4096 }
   0xb   : > { %s12450_s29 = scalar_select %p8617_p3, 1, 0 }
   0xc   : > { %p7769_p4 = pneg %p8617_p3  ;;  %s8631_s17 = sshll.u32 %s8522_s16, 4  ;;  %s380_s17 = int_to_ptr.vmem [resolvable:$true] %s8631_s17 }
   0xd   : > { %p8389_p6 = scmp.ne.s32.totalorder %s12336_s4, %s8388_s20  ;;  %p8395_p10 = scmp.lt.u32.totalorder %s8388_s20, %s12336_s4 }
   0xe   : > { %p8627_p5 = pnand %p12348_p2, %p7769_p4 }
  0x10   : > { %p8641_p7 = pneg %p8627_p5 }
  0x12   : > { %p8391_p8 = pnand %p8641_p7, %p8389_p6 }
  0x14   : > { %p8392_p9 = pneg %p8391_p8 }
  0x16   : > { %p8397_p11 = pnand %p8395_p10, %p8392_p9 }
  0x18   : > { %8400 = shalt.err (!%p8397_p11)
}
  0x19   : > { %s8401_s30 = scalar_lea.vmem %s8615_s27, 4096  ;;  %p8409_p1 = scmp.lt.s32.totalorder %s8615_s27, %s8615_s27 }
  0x1a   : > { %p8402_p12 = scmp.ne.s32.totalorder %s8615_s27, %s8401_s30  ;;  %p8410_p4 = scmp.lt.s32.totalorder %s8401_s30, %s8401_s30 }
  0x1c   : > { %p8404_p13 = pnand %p8402_p12, %p8641_p7  ;;  %p8411_p6 = por %p8410_p4, %p8409_p1 }
  0x1e   : > { %p8405_p0 = pneg %p8404_p13 }
  0x20   : > { %p8412_p8 = pnand %p8411_p6, %p8405_p0 }
  0x22   : > { %8415 = shalt.err (!%p8412_p8)
}
  0x23   : > { %s12347_s16 = smov 256   ;;  %s12350_s18 = smov 16  }
  0x24   : > { %7775 = dma.hbm_to_vmem [thread:$0]  (!%p8627_p5), %s12336_s4, 4096, %s8615_s27, [#allocation5], %s12347_s16, %s12347_s16, %s12350_s18  }
  0x25   : > { %s8416_s24 = scalar_lea.hbm %s12335_s3, 1024 }
  0x26   : > { %p8417_p9 = scmp.ne.s32.totalorder %s12335_s3, %s8416_s24  ;;  %p8423_p12 = scmp.lt.u32.totalorder %s8416_s24, %s12335_s3 }
  0x28   : > { %p8419_p10 = pnand %p8417_p9, %p8641_p7 }
  0x2a   : > { %p8420_p11 = pneg %p8419_p10 }
  0x2c   : > { %p8425_p13 = pnand %p8423_p12, %p8420_p11 }
  0x2e   : > { %8428 = shalt.err (!%p8425_p13)
}
  0x2f   : > { %s8429_s27 = scalar_lea.vmem %s8623_s14, 1024  ;;  %p8437_p6 = scmp.lt.s32.totalorder %s8623_s14, %s8623_s14 }
  0x30   : > { %p8430_p0 = scmp.ne.s32.totalorder %s8623_s14, %s8429_s27  ;;  %p8438_p8 = scmp.lt.s32.totalorder %s8429_s27, %s8429_s27 }
  0x32   : > { %p8432_p1 = pnand %p8430_p0, %p8641_p7  ;;  %p8439_p9 = por %p8438_p8, %p8437_p6 }
  0x34   : > { %p8433_p4 = pneg %p8432_p1 }
  0x36   : > { %p8440_p10 = pnand %p8439_p9, %p8433_p4 }
  0x38   : > { %8443 = shalt.err (!%p8440_p10)
}
  0x39   : > { %s8525_s19 = smov 64   ;;  %s8526_s13 = smov 4  }
  0x3a   : > { %7772 = dma.hbm_to_vmem [thread:$0]  (!%p8627_p5), %s12335_s3, 1024, %s8623_s14, [#allocation3], %s8525_s19, %s8525_s19, %s8526_s13  }
  0x3b   : > { %s8444_s24 = scalar_lea.hbm %s12337_s5, 4096 }
  0x3c   : > { %p8445_p11 = scmp.ne.s32.totalorder %s12337_s5, %s8444_s24  ;;  %p8451_p0 = scmp.lt.u32.totalorder %s8444_s24, %s12337_s5 }
  0x3e   : > { %p8447_p12 = pnand %p8445_p11, %p8641_p7 }
  0x40   : > { %p8448_p13 = pneg %p8447_p12 }
  0x42   : > { %p8453_p1 = pnand %p8451_p0, %p8448_p13 }
  0x44   : > { %8456 = shalt.err (!%p8453_p1)
}
  0x45   : > { %s8457_s25 = scalar_lea.vmem %s380_s17, 4096  ;;  %p8465_p9 = scmp.lt.s32.totalorder %s380_s17, %s380_s17 }
  0x46   : > { %p8458_p4 = scmp.ne.s32.totalorder %s380_s17, %s8457_s25  ;;  %p8466_p10 = scmp.lt.s32.totalorder %s8457_s25, %s8457_s25 }
  0x48   : > { %p8460_p6 = pnand %p8458_p4, %p8641_p7  ;;  %p8467_p2 = por %p8466_p10, %p8465_p9 }
  0x4a   : > { %p8461_p8 = pneg %p8460_p6 }
  0x4c   : > { %p8468_p3 = pnand %p8467_p2, %p8461_p8 }
  0x4e   : > { %8471 = shalt.err (!%p8468_p3)
}
  0x4f   : > { %s8527_s14 = smov 128   ;;  %s8528_s19 = smov 8  }
  0x50   : > { %7778 = dma.hbm_to_vmem [thread:$0]  (!%p8627_p5), %s12337_s5, 4096, %s380_s17, [#allocation5], %s8527_s14, %s8527_s14, %s8528_s19  }
  0x51   : > { %s8529_s20 = smov [#allocation7]   ;;  %s8472_s26 = scalar_lea.hbm %s12338_s6, 4096 }
  0x52   : > { %s392_s21 = sshll.u32 %s8529_s20, 4  ;;  %p8473_p2 = scmp.ne.s32.totalorder %s12338_s6, %s8472_s26  ;;  %s393_s21 = int_to_ptr.vmem [resolvable:$true] %s392_s21 }
  0x53   : > { %p8479_p12 = scmp.lt.u32.totalorder %s8472_s26, %s12338_s6 }
  0x54   : > { %p8475_p3 = pnand %p8473_p2, %p8641_p7 }
  0x56   : > { %p8476_p11 = pneg %p8475_p3 }
  0x58   : > { %p8481_p13 = pnand %p8479_p12, %p8476_p11 }
  0x5a   : > { %8484 = shalt.err (!%p8481_p13)
}
  0x5b   : > { %s8485_s17 = scalar_lea.vmem %s393_s21, 4096  ;;  %p8493_p6 = scmp.lt.s32.totalorder %s393_s21, %s393_s21 }
  0x5c   : > { %p8486_p0 = scmp.ne.s32.totalorder %s393_s21, %s8485_s17  ;;  %p8494_p8 = scmp.lt.s32.totalorder %s8485_s17, %s8485_s17 }
  0x5e   : > { %p8488_p1 = pnand %p8486_p0, %p8641_p7  ;;  %p8495_p9 = por %p8494_p8, %p8493_p6 }
  0x60   : > { %p8489_p4 = pneg %p8488_p1 }
  0x62   : > { %p8496_p10 = pnand %p8495_p9, %p8489_p4 }
  0x64   : > { %8499 = shalt.err (!%p8496_p10)
}
  0x65   : > { %s12453_s14 = smov 16   ;;  %s12454_s19 = smov 256  }
  0x66   : > { %7781 = dma.hbm_to_vmem [thread:$0]  (!%p8627_p5), %s12338_s6, 4096, %s393_s21, [#allocation8], %s12454_s19, %s12454_s19, %s12453_s14  }
  0x67   : > { %p12455_p2 = scmp.ne.s32.totalorder %s12450_s29, 0 }
  0x69   : > { %434 = sbr.rel (%p12455_p2) target bundleno = 3871 (0xf1f), region = 72 }
  0x70   : > { %p12456_p7 = scmp.eq.s32.totalorder %s8610_s28, 0 }
  0x72   : > { %8505 = dma.done.wait (%p12456_p7), [#allocation3], 1024   ;;  %p12457_p3 = pmov %p12456_p7 }
  0x74   : > { %8507 = vsyncadd (%p12457_p3), [#allocation3], 4294966272  ;;  %p12458_p11 = pmov %p12457_p3 }
  0x75   : > { %p12459_p12 = pmov %p12457_p3 }
  0x76   : > { %8509 = dma.done.wait (%p12458_p11), [#allocation5], 8192  }
  0x77   : > { %8511 = vsyncadd (%p12459_p12), [#allocation5], 4294959104  ;;  %p12460_p13 = pmov %p12457_p3 }
  0x78   : > { %p12461_p5 = pmov %p12457_p3 }
  0x79   : > { %8513 = dma.done.wait (%p12460_p13), [#allocation8], 4096  }
  0x7a   : > { %8515 = vsyncadd (%p12461_p5), [#allocation8], 4294963200  ;;  %p490_p0 = scmp.lt.s32.totalorder %s8610_s28, 1  ;;  %v12351_v0 = vmov 0.0   ;;  %v501_v13 = vld [vmem:[%s12333_s1] sm:$0xff]  ;;  %vm529_vm0 = vcmask 195584  }
  0x7b   : > { %642 = vmatprep.mubr.f32.mxu0 %v12351_v0  ;;  %732 = vmatprep.mubr.f32.mxu1 %v12351_v0  ;;  %v8772_v14 = vld [vmem:[%s12333_s1 + $0x78] sm:$0xff]  ;;  %v502_v17 = vld [vmem:[%s12333_s1 + $0x8] sm:$0xff]  ;;  %v7812_v20 = vld [vmem:[%s12334_s2 + $0x40] sm:$0xff]   ;;  %s8531_s20 = smov 64   ;;  %s13080_s18 = sld [smem:[#allocation194_spill]] }
  0x7c   : > { %s13083_s28 = smov (!%p490_p0, %s8610_s28), 1  ;;  %v7813_v21 = vld [vmem:[%s12334_s2] sm:$0xff]   ;;  %v503_v22 = vld [vmem:[%s12333_s1 + $0x10] sm:$0xff]  ;;  %v7814_v23 = vld [vmem:[%s12334_s2 + $0x48] sm:$0xff]  }
  0x7d   : > { %s7752_s29 = smul.u32 96, %s13083_s28  ;;  %v7815_v24 = vld [vmem:[%s12334_s2 + $0x8] sm:$0xff]   ;;  %v7816_v25 = vld [vmem:[%s12334_s2 + $0xc0] sm:$0xff]   ;;  %v504_v27 = vld [vmem:[%s12333_s1 + $0x18] sm:$0xff] }
  0x7e   : > { %v7817_v26 = vld [vmem:[%s12334_s2 + $0x80] sm:$0xff]   ;;  %v7818_v28 = vld [vmem:[%s12334_s2 + $0x50] sm:$0xff]   ;;  %v7820_v30 = vld [vmem:[%s12334_s2 + $0xc8] sm:$0xff]  }
  0x7f   : > { %s8754_s13 = scalar_lea.vmem %s12332_s0, %s7752_s29  ;;  %v7819_v29 = vld [vmem:[%s12334_s2 + $0x10] sm:$0xff]   ;;  %v7821_v31 = vld [vmem:[%s12334_s2 + $0x88] sm:$0xff]   ;;  %v505_v32 = vld [vmem:[%s12333_s1 + $0x20] sm:$0xff] }
  0x80   : > { %v518_v1 = vld [vmem:[%s8754_s13 + $0x8] sm:$0xff]  ;;  %v517_v3 = vld [vmem:[%s8754_s13] sm:$0xff]  ;;  %v520_v8 = vld [vmem:[%s8754_s13 + $0x18] sm:$0xff] }
  0x81   : > { %v522_v2 = vld [vmem:[%s8754_s13 + $0x28] sm:$0xff]  ;;  %v521_v5 = vld [vmem:[%s8754_s13 + $0x20] sm:$0xff]  ;;  %v524_v9 = vld [vmem:[%s8754_s13 + $0x38] sm:$0xff]  ;;  %s499_s16 = scalar_lea.vmem %s13080_s18, %s7752_s29 }
  0x82   : > { %v7356_v4 = vpack.c.bf16 %v522_v2, %v518_v1  ;;  %v7358_v6 = vpack.c.bf16 %v521_v5, %v517_v3  ;;  %v526_v7 = vld [vmem:[%s8754_s13 + $0x48] sm:$0xff]  ;;  %v519_v10 = vld [vmem:[%s8754_s13 + $0x10] sm:$0xff]  ;;  %v525_v12 = vld [vmem:[%s8754_s13 + $0x40] sm:$0xff]  ;;  %v7360_v15 = vpack.c.bf16 %v524_v9, %v520_v8 }
  0x83   : > { %v523_v11 = vld [vmem:[%s8754_s13 + $0x30] sm:$0xff]  ;;  %v528_v18 = vld [vmem:[%s8754_s13 + $0x58] sm:$0xff]  ;;  %v506_v37 = vld [vmem:[%s12333_s1 + $0x28] sm:$0xff] }
  0x84   : > { %7357 = vmatprep.subr.bf16.mxu0 %v7356_v4  ;;  %7748 = vmatprep.subr.bf16.mxu1 %v7356_v4  ;;  %v7362_v16 = vpack.c.bf16 %v523_v11, %v519_v10  ;;  %v527_v19 = vld [vmem:[%s8754_s13 + $0x50] sm:$0xff]  ;;  %v7822_v33 = vld [vmem:[%s12334_s2 + $0x58] sm:$0xff]   ;;  %v7826_v38 = vld [vmem:[%s12334_s2 + $0x60] sm:$0xff]  }
  0x85   : > { %7359 = vmatpush1.bf16.msra.mxu0 %v7358_v6  ;;  %7750 = vmatpush1.bf16.msra.mxu1 %v7358_v6  ;;  %v7823_v34 = vld [vmem:[%s12334_s2 + $0x18] sm:$0xff]   ;;  %v7824_v35 = vld [vmem:[%s12334_s2 + $0xd0] sm:$0xff]   ;;  %v7827_v39 = vld [vmem:[%s12334_s2 + $0x20] sm:$0xff]  }
  0x86   : > { %582 = vmatprep.subr.mxu0 %v526_v7  ;;  %7749 = vmatprep.subr.mxu1 %v526_v7  ;;  %v7825_v36 = vld [vmem:[%s12334_s2 + $0x90] sm:$0xff]   ;;  %v7828_v40 = vld [vmem:[%s12334_s2 + $0xd8] sm:$0xff]   ;;  %v7830_v43 = vld [vmem:[%s12334_s2 + $0x68] sm:$0xff]  }
  0x87   : > { %v7829_v41 = vld [vmem:[%s12334_s2 + $0x98] sm:$0xff]   ;;  %v507_v42 = vld [vmem:[%s12333_s1 + $0x30] sm:$0xff]  ;;  %v7831_v44 = vld [vmem:[%s12334_s2 + $0x28] sm:$0xff]  }
  0x88   : > { %v7832_v45 = vld [vmem:[%s12334_s2 + $0xe0] sm:$0xff]   ;;  %v508_v46 = vld [vmem:[%s12333_s1 + $0x38] sm:$0xff]  ;;  %v510_v48 = vld [vmem:[%s12333_s1 + $0x48] sm:$0xff] }
  0x89   : > { %583 = vmatpush1.msra.mxu0 %v525_v12  ;;  %7751 = vmatpush1.msra.mxu1 %v525_v12  ;;  %v509_v47 = vld [vmem:[%s12333_s1 + $0x40] sm:$0xff]  ;;  %v511_v49 = vld [vmem:[%s12333_s1 + $0x50] sm:$0xff]  ;;  %v512_v50 = vld [vmem:[%s12333_s1 + $0x58] sm:$0xff] }
  0x8a   : > { %6626 = vmatmul.mubr.msk.f32.vlgmr.msra.gmra.mrb[0].mxu0 %vm529_vm0, %v501_v13  ;;  %6641 = vmatmul.mubr.msk.f32.vlgmr.msra.gmra.mrb[0].mxu1 %vm529_vm0, %v8772_v14  ;;  %v513_v51 = vld [vmem:[%s12333_s1 + $0x60] sm:$0xff]  ;;  %v514_v52 = vld [vmem:[%s12333_s1 + $0x68] sm:$0xff]  ;;  %v515_v53 = vld [vmem:[%s12333_s1 + $0x70] sm:$0xff] }
  0x8b   : > { %7361 = vmatprep.subr.bf16.mxu1 %v7360_v15  ;;  %648 = vmatprep.mubr.f32.mxu0 %v12351_v0  ;;  %v7833_v54 = vld [vmem:[%s12334_s2 + $0xa0] sm:$0xff]   ;;  %v7834_v55 = vld [vmem:[%s12334_s2 + $0x70] sm:$0xff]   ;;  %v7836_v57 = vld [vmem:[%s12334_s2 + $0xe8] sm:$0xff]  }
  0x8c   : > { %7363 = vmatpush1.bf16.msra.mxu1 %v7362_v16  ;;  %803 = vmatprep.mubr.f32.mxu1 %v12351_v0  ;;  %v7835_v56 = vld [vmem:[%s12334_s2 + $0x30] sm:$0xff]   ;;  %v7837_v58 = vld [vmem:[%s12334_s2 + $0xa8] sm:$0xff]   ;;  %v7838_v59 = vld [vmem:[%s12334_s2 + $0x78] sm:$0xff]  }
  0x8d   : > { %743 = vmatprep.subr.mxu1 %v528_v18  ;;  %6740 = vmatprep.subr.bf16.mxu0 %v7812_v20  ;;  %v7839_v60 = vld [vmem:[%s12334_s2 + $0x38] sm:$0xff]   ;;  %v7840_v61 = vld [vmem:[%s12334_s2 + $0xf0] sm:$0xff]   ;;  %v7844_v2 = vld [vmem:[#allocation2] sm:$0xff]  }
  0x8e   : > { %6627 = vmatmul.mubr.msk.f32.gmra.mrb[2].mxu0 %vm529_vm0, %v502_v17  ;;  %v7841_v62 = vld [vmem:[%s12334_s2 + $0xb0] sm:$0xff]   ;;  %v7842_v63 = vld [vmem:[%s12334_s2 + $0xf8] sm:$0xff]  }
  0x8f   : > { %654 = vmatprep.mubr.f32.mxu0 %v12351_v0  ;;  %6741 = vmatpush3.bf16.msra.mxu0 %v7813_v21  ;;  %v7843_v1 = vld [vmem:[%s12334_s2 + $0xb8] sm:$0xff]  }
  0x90   : > { %744 = vmatpush1.msra.mxu1 %v527_v19  ;;  %6742 = vmatprep.subr.bf16.mxu0 %v7814_v23  ;;  %v7845_v23 = vld [vmem:[#allocation2 + $0x8] sm:$0xff]  }
  0x91   : > { %6642 = vmatmul.mubr.msk.f32.vlgmr.msra.gmra.mrb[2].mxu1 %vm529_vm0, %v501_v13  ;;  %6804 = vmatprep.subr.bf16.mxu1 %v7816_v25 }
  0x92   : > { %6628 = vmatmul.mubr.msk.f32.gmra.mrb[4].mxu0 %vm529_vm0, %v503_v22  ;;  %809 = vmatprep.mubr.f32.mxu1 %v12351_v0 }
  0x93   : > { %660 = vmatprep.mubr.f32.mxu0 %v12351_v0  ;;  %6743 = vmatpush3.bf16.msra.mxu0 %v7815_v24 }
  0x94   : > { %6805 = vmatpush3.bf16.msra.mxu1 %v7817_v26  ;;  %6744 = vmatprep.subr.bf16.mxu0 %v7818_v28 }
  0x95   : > { %6643 = vmatmul.mubr.msk.f32.gmra.mrb[4].mxu1 %vm529_vm0, %v502_v17  ;;  %6806 = vmatprep.subr.bf16.mxu1 %v7820_v30 }
  0x96   : > { %6629 = vmatmul.mubr.msk.f32.gmra.mrb[6].mxu0 %vm529_vm0, %v504_v27  ;;  %815 = vmatprep.mubr.f32.mxu1 %v12351_v0 }
  0x97   : > { %666 = vmatprep.mubr.f32.mxu0 %v12351_v0  ;;  %6745 = vmatpush3.bf16.msra.mxu0 %v7819_v29 }
  0x98   : > { %6807 = vmatpush3.bf16.msra.mxu1 %v7821_v31  ;;  %6746 = vmatprep.subr.bf16.mxu0 %v7822_v33 }
  0x99   : > { %6644 = vmatmul.mubr.msk.f32.gmra.mrb[6].mxu1 %vm529_vm0, %v503_v22  ;;  %6808 = vmatprep.subr.bf16.mxu1 %v7824_v35 }
  0x9a   : > { %6630 = vmatmul.mubr.msk.f32.gmra.mrb[8].mxu0 %vm529_vm0, %v505_v32  ;;  %821 = vmatprep.mubr.f32.mxu1 %v12351_v0 }
  0x9b   : > { %672 = vmatprep.mubr.f32.mxu0 %v12351_v0  ;;  %6747 = vmatpush3.bf16.msra.mxu0 %v7823_v34 }
  0x9c   : > { %6809 = vmatpush3.bf16.msra.mxu1 %v7825_v36  ;;  %6748 = vmatprep.subr.bf16.mxu0 %v7826_v38 }
  0x9d   : > { %6645 = vmatmul.mubr.msk.f32.gmra.mrb[8].mxu1 %vm529_vm0, %v504_v27  ;;  %6810 = vmatprep.subr.bf16.mxu1 %v7828_v40 }
  0x9e   : > { %6631 = vmatmul.mubr.msk.f32.gmra.mrb[10].mxu0 %vm529_vm0, %v506_v37  ;;  %827 = vmatprep.mubr.f32.mxu1 %v12351_v0 }
  0x9f   : > { %678 = vmatprep.mubr.f32.mxu0 %v12351_v0  ;;  %6749 = vmatpush3.bf16.msra.mxu0 %v7827_v39 }
  0xa0   : > { %6811 = vmatpush3.bf16.msra.mxu1 %v7829_v41  ;;  %6750 = vmatprep.subr.bf16.mxu0 %v7830_v43 }
  0xa1   : > { %6646 = vmatmul.mubr.msk.f32.gmra.mrb[10].mxu1 %vm529_vm0, %v505_v32  ;;  %6812 = vmatprep.subr.bf16.mxu1 %v7832_v45 }
  0xa2   : > { %6632 = vmatmul.mubr.msk.f32.gmra.mrb[12].mxu0 %vm529_vm0, %v507_v42  ;;  %833 = vmatprep.mubr.f32.mxu1 %v12351_v0 }
  0xa3   : > { %684 = vmatprep.mubr.f32.mxu0 %v12351_v0  ;;  %6751 = vmatpush3.bf16.msra.mxu0 %v7831_v44 }
  0xa4   : > { %6813 = vmatpush3.bf16.msra.mxu1 %v7833_v54  ;;  %6752 = vmatprep.subr.bf16.mxu0 %v7834_v55 }
  0xa5   : > { %6647 = vmatmul.mubr.msk.f32.gmra.mrb[12].mxu1 %vm529_vm0, %v506_v37  ;;  %6814 = vmatprep.subr.bf16.mxu1 %v7836_v57 }
  0xa6   : > { %6633 = vmatmul.mubr.msk.f32.gmra.mrb[14].mxu0 %vm529_vm0, %v508_v46  ;;  %839 = vmatprep.mubr.f32.mxu1 %v12351_v0 }
  0xa7   : > { %690 = vmatprep.mubr.f32.mxu0 %v12351_v0  ;;  %6753 = vmatpush3.bf16.msra.mxu0 %v7835_v56 }
  0xa8   : > { %6815 = vmatpush3.bf16.msra.mxu1 %v7837_v58  ;;  %6754 = vmatprep.subr.bf16.mxu0 %v7838_v59 }
  0xa9   : > { %6648 = vmatmul.mubr.msk.f32.gmra.mrb[14].mxu1 %vm529_vm0, %v507_v42  ;;  %6816 = vmatprep.subr.bf16.mxu1 %v7840_v61 }
  0xaa   : > { %6634 = vmatmul.mubr.msk.f32.gmra.mrb[16].mxu0 %vm529_vm0, %v509_v47  ;;  %845 = vmatprep.mubr.f32.mxu1 %v12351_v0 }
  0xab   : > { %696 = vmatprep.mubr.f32.mxu0 %v12351_v0  ;;  %6755 = vmatpush3.bf16.msra.mxu0 %v7839_v60 }
  0xac   : > { %6817 = vmatpush3.bf16.msra.mxu1 %v7841_v62 }
  0xad   : > { %6649 = vmatmul.mubr.msk.f32.gmra.mrb[16].mxu1 %vm529_vm0, %v508_v46  ;;  %6818 = vmatprep.subr.bf16.mxu1 %v7842_v63 }
  0xae   : > { %6635 = vmatmul.mubr.msk.f32.gmra.mrb[18].mxu0 %vm529_vm0, %v510_v48  ;;  %851 = vmatprep.mubr.f32.mxu1 %v12351_v0 }
  0xaf   : > { %702 = vmatprep.mubr.f32.mxu0 %v12351_v0 }
  0xb0   : > { %6819 = vmatpush3.bf16.msra.mxu1 %v7843_v1 }
  0xb1   : > { %6650 = vmatmul.mubr.msk.f32.gmra.mrb[18].mxu1 %vm529_vm0, %v509_v47  ;;  %7196 = vmatprep.subr.bf16.mxu1 %v7844_v2 }
  0xb2   : > { %6636 = vmatmul.mubr.msk.f32.gmra.mrb[20].mxu0 %vm529_vm0, %v511_v49  ;;  %857 = vmatprep.mubr.f32.mxu1 %v12351_v0 }
  0xb3   : > { %708 = vmatprep.mubr.f32.mxu0 %v12351_v0 }
  0xb5   : > { %6651 = vmatmul.mubr.msk.f32.gmra.mrb[20].mxu1 %vm529_vm0, %v510_v48 }
  0xb6   : > { %6637 = vmatmul.mubr.msk.f32.gmra.mrb[22].mxu0 %vm529_vm0, %v512_v50  ;;  %863 = vmatprep.mubr.f32.mxu1 %v12351_v0 }
  0xb7   : > { %714 = vmatprep.mubr.f32.mxu0 %v12351_v0 }
  0xb9   : > { %6652 = vmatmul.mubr.msk.f32.gmra.mrb[22].mxu1 %vm529_vm0, %v511_v49 }
  0xba   : > { %6638 = vmatmul.mubr.msk.f32.gmra.mrb[24].mxu0 %vm529_vm0, %v513_v51  ;;  %869 = vmatprep.mubr.f32.mxu1 %v12351_v0 }
  0xbb   : > { %720 = vmatprep.mubr.f32.mxu0 %v12351_v0 }
  0xbd   : > { %6653 = vmatmul.mubr.msk.f32.gmra.mrb[24].mxu1 %vm529_vm0, %v512_v50 }
  0xbe   : > { %6639 = vmatmul.mubr.msk.f32.gmra.mrb[26].mxu0 %vm529_vm0, %v514_v52  ;;  %875 = vmatprep.mubr.f32.mxu1 %v12351_v0 }
  0xbf   : > { %726 = vmatprep.mubr.f32.mxu0 %v12351_v0 }
  0xc1   : > { %6654 = vmatmul.mubr.msk.f32.gmra.mrb[26].mxu1 %vm529_vm0, %v513_v51 }
  0xc2   : > { %6640 = vmatmul.mubr.msk.f32.gmra.mrb[28].mxu0 %vm529_vm0, %v515_v53  ;;  %881 = vmatprep.mubr.f32.mxu1 %v12351_v0 }
  0xc5   : > { %6655 = vmatmul.mubr.msk.f32.gmra.mrb[28].mxu1 %vm529_vm0, %v514_v52 }
  0xc6   : > { %887 = vmatprep.mubr.f32.mxu1 %v12351_v0 }
  0xc9   : > { %6656 = vmatmul.mubr.msk.f32.gmra.mrb[30].mxu1 %vm529_vm0, %v515_v53 }
  0xca   : > { %893 = vmatprep.mubr.f32.mxu1 %v12351_v0 }
  0xcd   : > { %6657 = vmatmul.mubr.msk.f32.gmra.mrb[32].mxu1 %vm529_vm0, %v8772_v14 }
 0x15d   : > { %v8978_v3 = vpop.f32.mrb[0].mxu1  ;;  %v644_v4 = vpop.f32.mrb[0].mxu0 }
 0x15e   : > { %v8980_v5 = vpop.f32.mrb[1].mxu1  ;;  %v646_v6 = vpop.f32.mrb[1].mxu0 }
 0x161   : > { %v650_v7 = vpop.f32.mrb[2].mxu0 }
 0x162   : > { %v904_v8 = vpack.c.bf16 %v650_v7, %v644_v4  ;;  %v652_v9 = vpop.f32.mrb[3].mxu0 }
 0x163   : > { %v905_v10 = vpack.c.bf16 %v652_v9, %v646_v6 }
 0x164   : > { %v805_v11 = vpop.f32.mrb[2].mxu1 }
 0x165   : > { %v807_v12 = vpop.f32.mrb[3].mxu1  ;;  %1224 = vmatprep.mubr.bf16.mxu0 %v905_v10  ;;  %v656_v13 = vpop.f32.mrb[4].mxu0 }
 0x166   : > { %1225 = vmatmul.mubr.bf16.vlgmr.msra.gmra.mrb[32].mxu0 %v904_v8  ;;  %v658_v14 = vpop.f32.mrb[5].mxu0 }
 0x168   : > { %v811_v15 = vpop.f32.mrb[4].mxu1 }
 0x169   : > { %v906_v16 = vpack.c.bf16 %v811_v15, %v805_v11  ;;  %v813_v17 = vpop.f32.mrb[5].mxu1  ;;  %v662_v18 = vpop.f32.mrb[6].mxu0 }
 0x16a   : > { %v907_v19 = vpack.c.bf16 %v813_v17, %v807_v12  ;;  %v908_v20 = vpack.c.bf16 %v662_v18, %v656_v13  ;;  %v664_v21 = vpop.f32.mrb[7].mxu0 }
 0x16b   : > { %v909_v22 = vpack.c.bf16 %v664_v21, %v658_v14 }
 0x16c   : > { %v817_v24 = vpop.f32.mrb[6].mxu1  ;;  %1321 = vmatprep.mubr.bf16.mxu1 %v907_v19 }
 0x16d   : > { %v819_v25 = vpop.f32.mrb[7].mxu1  ;;  %1322 = vmatmul.mubr.bf16.vlgmr.msra.gmra.mrb[36].mxu1 %v906_v16  ;;  %1232 = vmatprep.mubr.bf16.mxu0 %v909_v22  ;;  %v668_v26 = vpop.f32.mrb[8].mxu0 }
 0x16e   : > { %1233 = vmatmul.mubr.bf16.gmra.mrb[36].mxu0 %v908_v20  ;;  %v670_v27 = vpop.f32.mrb[9].mxu0  ;;  %7197 = vmatpush3.bf16.msra.mxu1 %v7844_v2 }
 0x16f   : > { %7198 = vmatprep.subr.bf16.mxu1 %v7845_v23 }
 0x170   : > { %v823_v28 = vpop.f32.mrb[8].mxu1 }
 0x171   : > { %v910_v29 = vpack.c.bf16 %v823_v28, %v817_v24  ;;  %v825_v30 = vpop.f32.mrb[9].mxu1  ;;  %v674_v31 = vpop.f32.mrb[10].mxu0 }
 0x172   : > { %v911_v32 = vpack.c.bf16 %v825_v30, %v819_v25  ;;  %v912_v33 = vpack.c.bf16 %v674_v31, %v668_v26  ;;  %v676_v34 = vpop.f32.mrb[11].mxu0  ;;  %7199 = vmatpush3.bf16.msra.mxu1 %v7845_v23 }
 0x173   : > { %v913_v35 = vpack.c.bf16 %v676_v34, %v670_v27 }
 0x174   : > { %v829_v36 = vpop.f32.mrb[10].mxu1  ;;  %1329 = vmatprep.mubr.bf16.mxu1 %v911_v32 }
 0x175   : > { %v831_v37 = vpop.f32.mrb[11].mxu1  ;;  %1330 = vmatmul.mubr.bf16.gmra.mrb[40].mxu1 %v910_v29  ;;  %1240 = vmatprep.mubr.bf16.mxu0 %v913_v35  ;;  %v680_v38 = vpop.f32.mrb[12].mxu0 }
 0x176   : > { %1241 = vmatmul.mubr.bf16.gmra.mrb[40].mxu0 %v912_v33  ;;  %v682_v39 = vpop.f32.mrb[13].mxu0 }
 0x178   : > { %v835_v40 = vpop.f32.mrb[12].mxu1 }
 0x179   : > { %v914_v41 = vpack.c.bf16 %v835_v40, %v829_v36  ;;  %v837_v42 = vpop.f32.mrb[13].mxu1  ;;  %v686_v43 = vpop.f32.mrb[14].mxu0  ;;  %v7849_v40 = vld [vmem:[#allocation2 + $0x28] sm:$0xff]  }
 0x17a   : > { %v915_v44 = vpack.c.bf16 %v837_v42, %v831_v37  ;;  %v916_v45 = vpack.c.bf16 %v686_v43, %v680_v38  ;;  %v688_v46 = vpop.f32.mrb[15].mxu0  ;;  %v7851_v42 = vld [vmem:[#allocation2 + $0x38] sm:$0xff]  }
 0x17b   : > { %v917_v47 = vpack.c.bf16 %v688_v46, %v682_v39  ;;  %v7848_v39 = vld [vmem:[#allocation2 + $0x20] sm:$0xff]  }
 0x17c   : > { %v841_v48 = vpop.f32.mrb[14].mxu1  ;;  %1337 = vmatprep.mubr.bf16.mxu1 %v915_v44 }
 0x17d   : > { %v843_v49 = vpop.f32.mrb[15].mxu1  ;;  %1338 = vmatmul.mubr.bf16.gmra.mrb[44].mxu1 %v914_v41  ;;  %1248 = vmatprep.mubr.bf16.mxu0 %v917_v47  ;;  %v692_v50 = vpop.f32.mrb[16].mxu0  ;;  %v7850_v41 = vld [vmem:[#allocation2 + $0x30] sm:$0xff]  }
 0x17e   : > { %1249 = vmatmul.mubr.bf16.gmra.mrb[44].mxu0 %v916_v45  ;;  %v694_v51 = vpop.f32.mrb[17].mxu0 }
 0x180   : > { %v847_v52 = vpop.f32.mrb[16].mxu1 }
 0x181   : > { %v918_v53 = vpack.c.bf16 %v847_v52, %v841_v48  ;;  %v849_v54 = vpop.f32.mrb[17].mxu1  ;;  %v698_v55 = vpop.f32.mrb[18].mxu0 }
 0x182   : > { %v919_v56 = vpack.c.bf16 %v849_v54, %v843_v49  ;;  %v920_v57 = vpack.c.bf16 %v698_v55, %v692_v50  ;;  %v700_v58 = vpop.f32.mrb[19].mxu0 }
 0x183   : > { %v921_v59 = vpack.c.bf16 %v700_v58, %v694_v51 }
 0x184   : > { %v853_v60 = vpop.f32.mrb[18].mxu1  ;;  %1345 = vmatprep.mubr.bf16.mxu1 %v919_v56 }
 0x185   : > { %v855_v61 = vpop.f32.mrb[19].mxu1  ;;  %1346 = vmatmul.mubr.bf16.gmra.mrb[48].mxu1 %v918_v53  ;;  %1256 = vmatprep.mubr.bf16.mxu0 %v921_v59  ;;  %v704_v62 = vpop.f32.mrb[20].mxu0 }
 0x186   : > { %1257 = vmatmul.mubr.bf16.gmra.mrb[48].mxu0 %v920_v57  ;;  %v706_v63 = vpop.f32.mrb[21].mxu0 }
 0x188   : > { %v859_v1 = vpop.f32.mrb[20].mxu1 }
 0x189   : > { %v922_v2 = vpack.c.bf16 %v859_v1, %v853_v60  ;;  %v861_v4 = vpop.f32.mrb[21].mxu1  ;;  %v710_v6 = vpop.f32.mrb[22].mxu0 }
 0x18a   : > { %v923_v7 = vpack.c.bf16 %v861_v4, %v855_v61  ;;  %v924_v8 = vpack.c.bf16 %v710_v6, %v704_v62  ;;  %v712_v9 = vpop.f32.mrb[23].mxu0 }
 0x18b   : > { %v925_v10 = vpack.c.bf16 %v712_v9, %v706_v63 }
 0x18c   : > { %v865_v11 = vpop.f32.mrb[22].mxu1  ;;  %1353 = vmatprep.mubr.bf16.mxu1 %v923_v7 }
 0x18d   : > { %v867_v12 = vpop.f32.mrb[23].mxu1  ;;  %1354 = vmatmul.mubr.bf16.gmra.mrb[52].mxu1 %v922_v2  ;;  %1264 = vmatprep.mubr.bf16.mxu0 %v925_v10  ;;  %v716_v13 = vpop.f32.mrb[24].mxu0 }
 0x18e   : > { %1265 = vmatmul.mubr.bf16.gmra.mrb[52].mxu0 %v924_v8  ;;  %v718_v14 = vpop.f32.mrb[25].mxu0 }
 0x190   : > { %v871_v15 = vpop.f32.mrb[24].mxu1 }
 0x191   : > { %v926_v16 = vpack.c.bf16 %v871_v15, %v865_v11  ;;  %v873_v17 = vpop.f32.mrb[25].mxu1  ;;  %v722_v18 = vpop.f32.mrb[26].mxu0 }
 0x192   : > { %v927_v19 = vpack.c.bf16 %v873_v17, %v867_v12  ;;  %v928_v20 = vpack.c.bf16 %v722_v18, %v716_v13  ;;  %v724_v21 = vpop.f32.mrb[27].mxu0 }
 0x193   : > { %v929_v22 = vpack.c.bf16 %v724_v21, %v718_v14 }
 0x194   : > { %v877_v23 = vpop.f32.mrb[26].mxu1  ;;  %1361 = vmatprep.mubr.bf16.mxu1 %v927_v19 }
 0x195   : > { %v879_v24 = vpop.f32.mrb[27].mxu1  ;;  %1362 = vmatmul.mubr.bf16.gmra.mrb[56].mxu1 %v926_v16  ;;  %v728_v25 = vpop.f32.mrb[28].mxu0  ;;  %1272 = vmatprep.mubr.bf16.mxu0 %v929_v22 }
 0x196   : > { %v932_v26 = vpack.c.bf16 %v8978_v3, %v728_v25  ;;  %v730_v27 = vpop.f32.mrb[29].mxu0  ;;  %1273 = vmatmul.mubr.bf16.gmra.mrb[56].mxu0 %v928_v20  ;;  %v7846_v3 = vld [vmem:[#allocation2 + $0x10] sm:$0xff]  }
 0x197   : > { %v933_v28 = vpack.c.bf16 %v8980_v5, %v730_v27  ;;  %7200 = vmatprep.subr.bf16.mxu1 %v7846_v3  ;;  %v7847_v5 = vld [vmem:[#allocation2 + $0x18] sm:$0xff]  }
 0x198   : > { %v883_v29 = vpop.f32.mrb[28].mxu1  ;;  %7201 = vmatpush3.bf16.msra.mxu1 %v7846_v3 }
 0x199   : > { %v930_v30 = vpack.c.bf16 %v883_v29, %v877_v23  ;;  %v885_v31 = vpop.f32.mrb[29].mxu1  ;;  %1280 = vmatprep.mubr.bf16.mxu0 %v933_v28  ;;  %7202 = vmatprep.subr.bf16.mxu1 %v7847_v5 }
 0x19a   : > { %v931_v32 = vpack.c.bf16 %v885_v31, %v879_v24 }
 0x19c   : > { %v889_v33 = vpop.f32.mrb[30].mxu1  ;;  %1369 = vmatprep.mubr.bf16.mxu1 %v931_v32  ;;  %7203 = vmatpush3.bf16.msra.mxu1 %v7847_v5 }
 0x19d   : > { %v891_v34 = vpop.f32.mrb[31].mxu1  ;;  %1370 = vmatmul.mubr.bf16.gmra.mrb[60].mxu1 %v930_v30  ;;  %7204 = vmatprep.subr.bf16.mxu1 %v7848_v39 }
 0x19e   : > { %1281 = vmatmul.mubr.bf16.gmra.mrb[60].mxu0 %v932_v26 }
 0x1a0   : > { %v895_v35 = vpop.f32.mrb[32].mxu1  ;;  %7205 = vmatpush3.bf16.msra.mxu1 %v7848_v39 }
 0x1a1   : > { %v934_v36 = vpack.c.bf16 %v895_v35, %v889_v33  ;;  %v897_v37 = vpop.f32.mrb[33].mxu1  ;;  %7206 = vmatprep.subr.bf16.mxu1 %v7849_v40 }
 0x1a2   : > { %v935_v38 = vpack.c.bf16 %v897_v37, %v891_v34 }
 0x1a4   : > { %1377 = vmatprep.mubr.bf16.mxu1 %v935_v38  ;;  %7207 = vmatpush3.bf16.msra.mxu1 %v7849_v40 }
 0x1a5   : > { %1378 = vmatmul.mubr.bf16.gmra.mrb[64].mxu1 %v934_v36  ;;  %7208 = vmatprep.subr.bf16.mxu1 %v7850_v41 }
 0x1a8   : > { %7209 = vmatpush3.bf16.msra.mxu1 %v7850_v41 }
 0x1a9   : > { %7210 = vmatprep.subr.bf16.mxu1 %v7851_v42 }
 0x1ac   : > { %7211 = vmatpush3.bf16.msra.mxu1 %v7851_v42 }
 0x239   : > { %v6756_v43 = vpop.f32.mrb[32].mxu0 }
 0x23a   : > { %v6757_v44 = vpop.f32.mrb[33].mxu0 }
 0x23b   : > { %v6759_v45 = vpop.f32.mrb[34].mxu0  ;;  %v6758_v46 = vadd.f32 %v6757_v44, %v6756_v43 }
 0x23c   : > { %v6760_v47 = vpop.f32.mrb[35].mxu0 }
 0x23d   : > { %v6761_v48 = vadd.f32 %v6760_v47, %v6759_v45 }
 0x240   : > { %v6820_v49 = vpop.f32.mrb[36].mxu1 }
 0x241   : > { %v6821_v50 = vpop.f32.mrb[37].mxu1  ;;  %v6762_v51 = vpop.f32.mrb[36].mxu0 }
 0x242   : > { %v6823_v52 = vpop.f32.mrb[38].mxu1  ;;  %v6763_v53 = vpop.f32.mrb[37].mxu0  ;;  %v6822_v54 = vadd.f32 %v6821_v50, %v6820_v49 }
 0x243   : > { %v6824_v55 = vpop.f32.mrb[39].mxu1  ;;  %v6765_v56 = vpop.f32.mrb[38].mxu0  ;;  %v6764_v57 = vadd.f32 %v6763_v53, %v6762_v51 }
 0x244   : > { %v6825_v58 = vadd.f32 %v6824_v55, %v6823_v52  ;;  %v6766_v59 = vpop.f32.mrb[39].mxu0  ;;  %v1324_v60 = vadd.f32 %v6822_v54, %v6758_v46 }
 0x245   : > { %v6767_v61 = vadd.f32 %v6766_v59, %v6765_v56 }
 0x246   : > { %v1327_v62 = vadd.f32 %v6825_v58, %v6761_v48  ;;  %1386 = vrot.lane.b32.xlu0 %v1324_v60, %s8531_s20 }
 0x248   : > { %v8985_v63 = vpack.c.bf16 %v1327_v62, %v1324_v60  ;;  %v6826_v1 = vpop.f32.mrb[40].mxu1 }
 0x249   : > { %v6827_v2 = vpop.f32.mrb[41].mxu1  ;;  %v6768_v4 = vpop.f32.mrb[40].mxu0 }
 0x24a   : > { %v6829_v6 = vpop.f32.mrb[42].mxu1  ;;  %1388 = vrot.lane.b32.xlu0 %v1327_v62, %s8531_s20  ;;  %7212 = vmatprep.mubr.bf16.mxu1 %v8985_v63  ;;  %v6769_v7 = vpop.f32.mrb[41].mxu0  ;;  %v6828_v8 = vadd.f32 %v6827_v2, %v6826_v1 }
 0x24b   : > { %v6770_v9 = vadd.f32 %v6769_v7, %v6768_v4  ;;  %v6830_v10 = vpop.f32.mrb[43].mxu1  ;;  %v6771_v11 = vpop.f32.mrb[42].mxu0 }
 0x24c   : > { %v6831_v12 = vadd.f32 %v6830_v10, %v6829_v6  ;;  %v6772_v13 = vpop.f32.mrb[43].mxu0  ;;  %v1332_v14 = vadd.f32 %v6828_v8, %v6764_v57 }
 0x24d   : > { %v6773_v15 = vadd.f32 %v6772_v13, %v6771_v11 }
 0x24e   : > { %v1335_v16 = vadd.f32 %v6831_v12, %v6767_v61  ;;  %1390 = vrot.lane.b32.xlu1 %v1332_v14, %s8531_s20 }
 0x250   : > { %v8990_v17 = vpack.c.bf16 %v1335_v16, %v1332_v14  ;;  %v6832_v18 = vpop.f32.mrb[44].mxu1 }
 0x251   : > { %v6833_v19 = vpop.f32.mrb[45].mxu1  ;;  %v6774_v20 = vpop.f32.mrb[44].mxu0 }
 0x252   : > { %v6834_v21 = vadd.f32 %v6833_v19, %v6832_v18  ;;  %v6835_v22 = vpop.f32.mrb[46].mxu1  ;;  %1392 = vrot.lane.b32.xlu1 %v1335_v16, %s8531_s20  ;;  %7213 = vmatmul.mubr.bf16.vlgmr.msra.gmra.mrb[68].mxu1 %v8990_v17  ;;  %v6775_v23 = vpop.f32.mrb[45].mxu0 }
 0x253   : > { %v6776_v24 = vadd.f32 %v6775_v23, %v6774_v20  ;;  %v6836_v25 = vpop.f32.mrb[47].mxu1  ;;  %v6777_v26 = vpop.f32.mrb[46].mxu0 }
 0x254   : > { %v6837_v27 = vadd.f32 %v6836_v25, %v6835_v22  ;;  %v6778_v28 = vpop.f32.mrb[47].mxu0  ;;  %v1340_v29 = vadd.f32 %v6834_v21, %v6770_v9 }
 0x255   : > { %v6779_v30 = vadd.f32 %v6778_v28, %v6777_v26 }
 0x256   : > { %1394 = vrot.lane.b32.xlu0 %v1340_v29, %s8531_s20  ;;  %v1343_v31 = vadd.f32 %v6837_v27, %v6773_v15 }
 0x258   : > { %v6838_v32 = vpop.f32.mrb[48].mxu1  ;;  %1396 = vrot.lane.b32.xlu1 %v1343_v31, %s8531_s20  ;;  %v8996_v33 = vpack.c.bf16 %v1343_v31, %v1340_v29 }
 0x259   : > { %v6839_v34 = vpop.f32.mrb[49].mxu1  ;;  %v6780_v35 = vpop.f32.mrb[48].mxu0 }
 0x25a   : > { %v6840_v36 = vadd.f32 %v6839_v34, %v6838_v32  ;;  %v6841_v37 = vpop.f32.mrb[50].mxu1  ;;  %7216 = vmatprep.mubr.bf16.mxu1 %v8996_v33  ;;  %v6781_v38 = vpop.f32.mrb[49].mxu0  ;;  %v1435_v34 = vld [vmem:[#allocation4 + $0x8] sm:$0xff] }
 0x25b   : > { %v6782_v3 = vadd.f32 %v6781_v38, %v6780_v35  ;;  %v6842_v5 = vpop.f32.mrb[51].mxu1  ;;  %v6783_v39 = vpop.f32.mrb[50].mxu0  ;;  %1530 = vmatprep.mubr.f32.mxu0 %v1435_v34  ;;  %v1444_v34 = vld [vmem:[#allocation4 + $0x50] sm:$0xff] }
 0x25c   : > { %v6843_v40 = vadd.f32 %v6842_v5, %v6841_v37  ;;  %v6784_v41 = vpop.f32.mrb[51].mxu0  ;;  %v1348_v42 = vadd.f32 %v6840_v36, %v6776_v24 }
 0x25d   : > { %v6785_v43 = vadd.f32 %v6784_v41, %v6783_v39  ;;  %v900_v41 = vlaneseq }
 0x25e   : > { %1398 = vrot.lane.b32.xlu0 %v1348_v42, %s8531_s20  ;;  %v1351_v44 = vadd.f32 %v6843_v40, %v6779_v30 }
 0x260   : > { %v6844_v45 = vpop.f32.mrb[52].mxu1  ;;  %1400 = vrot.lane.b32.xlu1 %v1351_v44, %s8531_s20  ;;  %v9001_v46 = vpack.c.bf16 %v1351_v44, %v1348_v42  ;;  %v901_v42 = vand.u32 127, %v900_v41  ;;  %v8532_v44 = vmov 1.0   ;;  %v1455_v41 = vld [vmem:[#allocation4 + $0xa8] sm:$0xff] }
 0x261   : > { %v6845_v47 = vpop.f32.mrb[53].mxu1  ;;  %v6786_v48 = vpop.f32.mrb[52].mxu0 }
 0x262   : > { %v6846_v49 = vadd.f32 %v6845_v47, %v6844_v45  ;;  %v6847_v50 = vpop.f32.mrb[54].mxu1  ;;  %7217 = vmatmul.mubr.bf16.gmra.mrb[72].mxu1 %v9001_v46  ;;  %v6787_v51 = vpop.f32.mrb[53].mxu0  ;;  %vm902_vm1 = vcmp.lt.s32.totalorder %v901_v42, 64  ;;  %v1454_v42 = vld [vmem:[#allocation4 + $0xa0] sm:$0xff] }
 0x263   : > { %v6788_v52 = vadd.f32 %v6787_v51, %v6786_v48  ;;  %v6848_v53 = vpop.f32.mrb[55].mxu1  ;;  %v6789_v54 = vpop.f32.mrb[54].mxu0  ;;  %v9021_v45 = vsel %vm902_vm1, -1.0, %v8532_v44  ;;  %v1456_v44 = vld [vmem:[#allocation4 + $0xb0] sm:$0xff] }
 0x264   : > { %v6849_v55 = vadd.f32 %v6848_v53, %v6847_v50  ;;  %v6790_v56 = vpop.f32.mrb[55].mxu0  ;;  %v1356_v57 = vadd.f32 %v6846_v49, %v6782_v3  ;;  %12462 = vst [vmem:[#allocation13_spill] sm:$0xff] %v9021_v45 }
 0x265   : > { %v6791_v58 = vadd.f32 %v6790_v56, %v6789_v54 }
 0x266   : > { %1402 = vrot.lane.b32.xlu0 %v1356_v57, %s8531_s20  ;;  %v1359_v59 = vadd.f32 %v6849_v55, %v6785_v43 }
 0x268   : > { %v6850_v60 = vpop.f32.mrb[56].mxu1  ;;  %1404 = vrot.lane.b32.xlu1 %v1359_v59, %s8531_s20  ;;  %v9006_v61 = vpack.c.bf16 %v1359_v59, %v1356_v57 }
 0x269   : > { %v6851_v62 = vpop.f32.mrb[57].mxu1  ;;  %v6792_v1 = vpop.f32.mrb[56].mxu0 }
 0x26a   : > { %v6852_v2 = vadd.f32 %v6851_v62, %v6850_v60  ;;  %v6853_v4 = vpop.f32.mrb[58].mxu1  ;;  %7220 = vmatprep.mubr.bf16.mxu1 %v9006_v61  ;;  %v6793_v6 = vpop.f32.mrb[57].mxu0 }
 0x26b   : > { %v6794_v7 = vadd.f32 %v6793_v6, %v6792_v1  ;;  %v6854_v8 = vpop.f32.mrb[59].mxu1  ;;  %v6795_v9 = vpop.f32.mrb[58].mxu0 }
 0x26c   : > { %v6855_v10 = vadd.f32 %v6854_v8, %v6853_v4  ;;  %v6796_v11 = vpop.f32.mrb[59].mxu0  ;;  %v1364_v12 = vadd.f32 %v6852_v2, %v6788_v52 }
 0x26d   : > { %v6797_v13 = vadd.f32 %v6796_v11, %v6795_v9 }
 0x26e   : > { %1406 = vrot.lane.b32.xlu0 %v1364_v12, %s8531_s20  ;;  %v1367_v14 = vadd.f32 %v6855_v10, %v6791_v58 }
 0x270   : > { %v6856_v15 = vpop.f32.mrb[60].mxu1  ;;  %1408 = vrot.lane.b32.xlu1 %v1367_v14, %s8531_s20  ;;  %v9011_v16 = vpack.c.bf16 %v1367_v14, %v1364_v12 }
 0x271   : > { %v6857_v18 = vpop.f32.mrb[61].mxu1  ;;  %v6798_v19 = vpop.f32.mrb[60].mxu0 }
 0x272   : > { %v6858_v20 = vadd.f32 %v6857_v18, %v6856_v15  ;;  %v6859_v21 = vpop.f32.mrb[62].mxu1  ;;  %7221 = vmatmul.mubr.bf16.gmra.mrb[76].mxu1 %v9011_v16  ;;  %v6799_v22 = vpop.f32.mrb[61].mxu0 }
 0x273   : > { %v6800_v23 = vadd.f32 %v6799_v22, %v6798_v19  ;;  %v6860_v24 = vpop.f32.mrb[63].mxu1  ;;  %v6801_v25 = vpop.f32.mrb[62].mxu0 }
 0x274   : > { %v6861_v26 = vadd.f32 %v6860_v24, %v6859_v21  ;;  %v6802_v27 = vpop.f32.mrb[63].mxu0  ;;  %v1372_v28 = vadd.f32 %v6858_v20, %v6794_v7  ;;  %v1434_v24 = vld [vmem:[#allocation4] sm:$0xff] }
 0x275   : > { %v6803_v29 = vadd.f32 %v6802_v27, %v6801_v25  ;;  %v1436_v25 = vld [vmem:[#allocation4 + $0x10] sm:$0xff]  ;;  %v1438_v27 = vld [vmem:[#allocation4 + $0x20] sm:$0xff] }
 0x276   : > { %1410 = vrot.lane.b32.xlu0 %v1372_v28, %s8531_s20  ;;  %v1375_v30 = vadd.f32 %v6861_v26, %v6797_v13  ;;  %v1439_v26 = vld [vmem:[#allocation4 + $0x28] sm:$0xff] }
 0x278   : > { %v6862_v31 = vpop.f32.mrb[64].mxu1  ;;  %1412 = vrot.lane.b32.xlu1 %v1375_v30, %s8531_s20  ;;  %v9016_v32 = vpack.c.bf16 %v1375_v30, %v1372_v28  ;;  %v1441_v28 = vld [vmem:[#allocation4 + $0x38] sm:$0xff]  ;;  %v1443_v30 = vld [vmem:[#allocation4 + $0x48] sm:$0xff] }
 0x279   : > { %v6863_v35 = vpop.f32.mrb[65].mxu1 }
 0x27a   : > { %v6864_v36 = vadd.f32 %v6863_v35, %v6862_v31  ;;  %v6865_v37 = vpop.f32.mrb[66].mxu1  ;;  %7224 = vmatprep.mubr.bf16.mxu1 %v9016_v32  ;;  %v1442_v31 = vld [vmem:[#allocation4 + $0x40] sm:$0xff]  ;;  %v1447_v35 = vld [vmem:[#allocation4 + $0x68] sm:$0xff] }
 0x27b   : > { %v6866_v38 = vpop.f32.mrb[67].mxu1 }
 0x27c   : > { %v6867_v3 = vadd.f32 %v6866_v38, %v6865_v37  ;;  %v1380_v5 = vadd.f32 %v6864_v36, %v6800_v23  ;;  %v1446_v36 = vld [vmem:[#allocation4 + $0x60] sm:$0xff]  ;;  %v1449_v37 = vld [vmem:[#allocation4 + $0x78] sm:$0xff]  ;;  %v1448_v38 = vld [vmem:[#allocation4 + $0x70] sm:$0xff] }
 0x27e   : > { %1414 = vrot.lane.b32.xlu0 %v1380_v5, %s8531_s20  ;;  %v1383_v39 = vadd.f32 %v6867_v3, %v6803_v29  ;;  %v1440_v29 = vld [vmem:[#allocation4 + $0x30] sm:$0xff]  ;;  %v1451_v3 = vld [vmem:[#allocation4 + $0x88] sm:$0xff] }
 0x280   : > { %1416 = vrot.lane.b32.xlu1 %v1383_v39, %s8531_s20  ;;  %v7394_v40 = vpack.c.bf16 %v1383_v39, %v1380_v5  ;;  %v1450_v5 = vld [vmem:[#allocation4 + $0x80] sm:$0xff]  ;;  %v1453_v39 = vld [vmem:[#allocation4 + $0x98] sm:$0xff] }
 0x282   : > { %7225 = vmatmul.mubr.bf16.gmra.mrb[80].mxu1 %v7394_v40 }
 0x2b8   : > { %v1387_v43 = vpop.permute.xlu0 %1386 }
 0x2b9   : > { %v1418_v48 = vmul.f32 %v1387_v43, %v9021_v45  ;;  %v1457_v43 = vld [vmem:[#allocation4 + $0xb8] sm:$0xff] }
 0x2bc   : > { %v1389_v47 = vpop.permute.xlu0 %1388 }
 0x2bd   : > { %v1419_v49 = vmul.f32 %v1389_v47, %v9021_v45 }
 0x2bf   : > { %v7364_v50 = vpack.c.bf16 %v1419_v49, %v1418_v48  ;;  %v1459_v48 = vld [vmem:[#allocation4 + $0xc8] sm:$0xff] }
 0x2c0   : > { %v1391_v51 = vpop.permute.xlu1 %1390 }
 0x2c1   : > { %7365 = vmatprep.subr.bf16.mxu0 %v7364_v50  ;;  %v1420_v53 = vmul.f32 %v1391_v51, %v9021_v45 }
 0x2c2   : > { %7367 = vmatpush3.bf16.msra.mxu0 %v8985_v63 }
 0x2c4   : > { %v1393_v52 = vpop.permute.xlu1 %1392 }
 0x2c5   : > { %v1421_v54 = vmul.f32 %v1393_v52, %v9021_v45  ;;  %v1458_v52 = vld [vmem:[#allocation4 + $0xc0] sm:$0xff] }
 0x2c7   : > { %v7368_v55 = vpack.c.bf16 %v1421_v54, %v1420_v53  ;;  %v1461_v53 = vld [vmem:[#allocation4 + $0xd8] sm:$0xff]  ;;  %v1460_v54 = vld [vmem:[#allocation4 + $0xd0] sm:$0xff] }
 0x2c8   : > { %v1395_v56 = vpop.permute.xlu0 %1394 }
 0x2c9   : > { %7369 = vmatprep.subr.bf16.mxu0 %v7368_v55  ;;  %v1422_v58 = vmul.f32 %v1395_v56, %v9021_v45  ;;  %v1463_v55 = vld [vmem:[#allocation4 + $0xe8] sm:$0xff]  ;;  %v1462_v56 = vld [vmem:[#allocation4 + $0xe0] sm:$0xff] }
 0x2ca   : > { %v1397_v57 = vpop.permute.xlu1 %1396  ;;  %7371 = vmatpush3.bf16.msra.mxu0 %v8990_v17 }
 0x2cb   : > { %v1423_v59 = vmul.f32 %v1397_v57, %v9021_v45  ;;  %v1465_v57 = vld [vmem:[#allocation4 + $0xf8] sm:$0xff] }
 0x2cd   : > { %v7372_v60 = vpack.c.bf16 %v1423_v59, %v1422_v58  ;;  %v1464_v58 = vld [vmem:[#allocation4 + $0xf0] sm:$0xff] }
 0x2cf   : > { %7373 = vmatprep.subr.bf16.mxu0 %v7372_v60 }
 0x2d0   : > { %v1399_v62 = vpop.permute.xlu0 %1398  ;;  %7375 = vmatpush3.bf16.msra.mxu0 %v8996_v33 }
 0x2d1   : > { %v1424_v1 = vmul.f32 %v1399_v62, %v9021_v45 }
 0x2d2   : > { %v1401_v63 = vpop.permute.xlu1 %1400 }
 0x2d3   : > { %v1425_v2 = vmul.f32 %v1401_v63, %v9021_v45 }
 0x2d5   : > { %v7376_v4 = vpack.c.bf16 %v1425_v2, %v1424_v1 }
 0x2d7   : > { %7377 = vmatprep.subr.bf16.mxu0 %v7376_v4 }
 0x2d8   : > { %v1403_v6 = vpop.permute.xlu0 %1402  ;;  %7379 = vmatpush3.bf16.msra.mxu0 %v9001_v46 }
 0x2d9   : > { %v1426_v7 = vmul.f32 %v1403_v6, %v9021_v45 }
 0x2da   : > { %v1405_v17 = vpop.permute.xlu1 %1404 }
 0x2db   : > { %v1427_v8 = vmul.f32 %v1405_v17, %v9021_v45 }
 0x2dd   : > { %v7380_v9 = vpack.c.bf16 %v1427_v8, %v1426_v7 }
 0x2df   : > { %7381 = vmatprep.subr.bf16.mxu0 %v7380_v9 }
 0x2e0   : > { %v1407_v10 = vpop.permute.xlu0 %1406  ;;  %7383 = vmatpush3.bf16.msra.mxu0 %v9006_v61 }
 0x2e1   : > { %v1428_v11 = vmul.f32 %v1407_v10, %v9021_v45 }
 0x2e2   : > { %v1409_v33 = vpop.permute.xlu1 %1408 }
 0x2e3   : > { %v1429_v12 = vmul.f32 %v1409_v33, %v9021_v45 }
 0x2e5   : > { %v7384_v13 = vpack.c.bf16 %v1429_v12, %v1428_v11 }
 0x2e7   : > { %7385 = vmatprep.subr.bf16.mxu0 %v7384_v13 }
 0x2e8   : > { %v1411_v14 = vpop.permute.xlu0 %1410  ;;  %7387 = vmatpush3.bf16.msra.mxu0 %v9011_v16  ;;  %v1437_v16 = vld [vmem:[#allocation4 + $0x18] sm:$0xff] }
 0x2e9   : > { %v1430_v15 = vmul.f32 %v1411_v14, %v9021_v45 }
 0x2ea   : > { %v1413_v46 = vpop.permute.xlu1 %1412 }
 0x2eb   : > { %v1431_v18 = vmul.f32 %v1413_v46, %v9021_v45 }
 0x2ed   : > { %v7388_v19 = vpack.c.bf16 %v1431_v18, %v1430_v15 }
 0x2ef   : > { %7389 = vmatprep.subr.bf16.mxu0 %v7388_v19 }
 0x2f0   : > { %7391 = vmatpush3.bf16.msra.mxu0 %v9016_v32  ;;  %v1415_v61 = vpop.permute.xlu0 %1414  ;;  %v1445_v32 = vld [vmem:[#allocation4 + $0x58] sm:$0xff] }
 0x2f1   : > { %v1432_v21 = vmul.f32 %v1415_v61, %v9021_v45 }
 0x2f2   : > { %v1417_v20 = vpop.permute.xlu1 %1416 }
 0x2f3   : > { %v1433_v22 = vmul.f32 %v1417_v20, %v9021_v45 }
 0x2f5   : > { %v7392_v23 = vpack.c.bf16 %v1433_v22, %v1432_v21 }
 0x2f7   : > { %7393 = vmatprep.subr.bf16.mxu0 %v7392_v23 }
 0x2f8   : > { %7395 = vmatpush3.bf16.msra.mxu0 %v7394_v40  ;;  %v1452_v40 = vld [vmem:[#allocation4 + $0x90] sm:$0xff] }
 0x2fb   : > { %1531 = vmatmul.mubr.f32.vlgmr.msra.gmra.mrb[30].mxu0 %v1434_v24 }
 0x2fc   : > { %1535 = vmatprep.mubr.f32.mxu0 %v1437_v16 }
 0x2ff   : > { %1536 = vmatmul.mubr.f32.gmra.mrb[64].mxu0 %v1436_v25 }
 0x300   : > { %1540 = vmatprep.mubr.f32.mxu0 %v1439_v26 }
 0x303   : > { %1541 = vmatmul.mubr.f32.gmra.mrb[66].mxu0 %v1438_v27 }
 0x304   : > { %1545 = vmatprep.mubr.f32.mxu0 %v1441_v28 }
 0x307   : > { %1546 = vmatmul.mubr.f32.gmra.mrb[68].mxu0 %v1440_v29 }
 0x308   : > { %1550 = vmatprep.mubr.f32.mxu0 %v1443_v30 }
 0x30b   : > { %1551 = vmatmul.mubr.f32.gmra.mrb[70].mxu0 %v1442_v31 }
 0x30c   : > { %1555 = vmatprep.mubr.f32.mxu0 %v1445_v32 }
 0x30f   : > { %1556 = vmatmul.mubr.f32.gmra.mrb[72].mxu0 %v1444_v34 }
 0x310   : > { %1560 = vmatprep.mubr.f32.mxu0 %v1447_v35 }
 0x313   : > { %1561 = vmatmul.mubr.f32.gmra.mrb[74].mxu0 %v1446_v36 }
 0x314   : > { %1565 = vmatprep.mubr.f32.mxu0 %v1449_v37 }
 0x317   : > { %1566 = vmatmul.mubr.f32.gmra.mrb[76].mxu0 %v1448_v38 }
 0x318   : > { %1570 = vmatprep.mubr.f32.mxu0 %v1451_v3 }
 0x31b   : > { %1571 = vmatmul.mubr.f32.gmra.mrb[78].mxu0 %v1450_v5 }
 0x31c   : > { %1575 = vmatprep.mubr.f32.mxu0 %v1453_v39 }
 0x31f   : > { %1576 = vmatmul.mubr.f32.gmra.mrb[80].mxu0 %v1452_v40 }
 0x320   : > { %1580 = vmatprep.mubr.f32.mxu0 %v1455_v41 }
 0x323   : > { %1581 = vmatmul.mubr.f32.gmra.mrb[82].mxu0 %v1454_v42 }
 0x324   : > { %1585 = vmatprep.mubr.f32.mxu0 %v1457_v43 }
 0x325   : > { %v9046_v47 = vpop.f32.mrb[68].mxu1 }
 0x326   : > { %v9048_v49 = vpop.f32.mrb[69].mxu1 }
 0x327   : > { %1586 = vmatmul.mubr.f32.gmra.mrb[84].mxu0 %v1456_v44  ;;  %v9050_v50 = vpop.f32.mrb[70].mxu1 }
 0x328   : > { %v9052_v51 = vpop.f32.mrb[71].mxu1  ;;  %1590 = vmatprep.mubr.f32.mxu0 %v1459_v48 }
 0x32b   : > { %1591 = vmatmul.mubr.f32.gmra.mrb[86].mxu0 %v1458_v52 }
 0x32c   : > { %1595 = vmatprep.mubr.f32.mxu0 %v1461_v53 }
 0x32f   : > { %1596 = vmatmul.mubr.f32.gmra.mrb[88].mxu0 %v1460_v54 }
 0x330   : > { %1600 = vmatprep.mubr.f32.mxu0 %v1463_v55 }
 0x333   : > { %1601 = vmatmul.mubr.f32.gmra.mrb[90].mxu0 %v1462_v56 }
 0x334   : > { %1605 = vmatprep.mubr.f32.mxu0 %v1465_v57 }
 0x335   : > { %v9054_v59 = vpop.f32.mrb[72].mxu1 }
 0x336   : > { %12463 = vst [vmem:[#allocation14_spill] sm:$0xff] %v9054_v59  ;;  %v9056_v60 = vpop.f32.mrb[73].mxu1 }
 0x337   : > { %1606 = vmatmul.mubr.f32.gmra.mrb[92].mxu0 %v1464_v58  ;;  %v9058_v62 = vpop.f32.mrb[74].mxu1 }
 0x338   : > { %12464 = vst [vmem:[#allocation15_spill] sm:$0xff] %v9058_v62  ;;  %v9060_v63 = vpop.f32.mrb[75].mxu1 }
 0x345   : > { %v9062_v1 = vpop.f32.mrb[76].mxu1 }
 0x346   : > { %12465 = vst [vmem:[#allocation16_spill] sm:$0xff] %v9062_v1  ;;  %v9064_v2 = vpop.f32.mrb[77].mxu1 }
 0x347   : > { %12466 = vst [vmem:[#allocation17_spill] sm:$0xff] %v9064_v2  ;;  %v9066_v4 = vpop.f32.mrb[78].mxu1 }
 0x348   : > { %12467 = vst [vmem:[#allocation18_spill] sm:$0xff] %v9066_v4  ;;  %v9068_v6 = vpop.f32.mrb[79].mxu1 }
 0x349   : > { %12468 = vst [vmem:[#allocation19_spill] sm:$0xff] %v9068_v6 }
 0x355   : > { %v9070_v17 = vpop.f32.mrb[80].mxu1 }
 0x356   : > { %12469 = vst [vmem:[#allocation20_spill] sm:$0xff] %v9070_v17  ;;  %v9072_v7 = vpop.f32.mrb[81].mxu1 }
 0x357   : > { %12470 = vst [vmem:[#allocation21_spill] sm:$0xff] %v9072_v7  ;;  %v9074_v8 = vpop.f32.mrb[82].mxu1 }
 0x358   : > { %12471 = vst [vmem:[#allocation22_spill] sm:$0xff] %v9074_v8  ;;  %v9076_v9 = vpop.f32.mrb[83].mxu1 }
 0x359   : > { %12472 = vst [vmem:[#allocation23_spill] sm:$0xff] %v9076_v9 }
 0x3ce   : > { %v6900_v10 = vpop.f32.mrb[30].mxu0 }
 0x3cf   : > { %v6901_v33 = vpop.f32.mrb[31].mxu0 }
 0x3d0   : > { %v6902_v11 = vadd.f32 %v6901_v33, %v6900_v10 }
 0x3d2   : > { %v6903_v12 = vpop.f32.mrb[64].mxu0 }
 0x3d3   : > { %v6904_v13 = vpop.f32.mrb[65].mxu0 }
 0x3d4   : > { %v6905_v14 = vadd.f32 %v6904_v13, %v6903_v12 }
 0x3d6   : > { %v1619_v46 = vpack.c.bf16 %v6905_v14, %v6902_v11  ;;  %v6906_v15 = vpop.f32.mrb[66].mxu0 }
 0x3d7   : > { %v6907_v18 = vpop.f32.mrb[67].mxu0 }
 0x3d8   : > { %v6908_v19 = vadd.f32 %v6907_v18, %v6906_v15  ;;  %7228 = vmatprep.mubr.bf16.mxu1 %v1619_v46 }
 0x3da   : > { %v6909_v61 = vpop.f32.mrb[68].mxu0 }
 0x3db   : > { %v6910_v20 = vpop.f32.mrb[69].mxu0 }
 0x3dc   : > { %v6911_v21 = vadd.f32 %v6910_v20, %v6909_v61  ;;  %v1996_v61 = vld [vmem:[#allocation6] sm:$0xff] }
 0x3dd   : > { %7276 = vmatprep.mubr.f32.mxu0 %v1996_v61 }
 0x3de   : > { %v1620_v22 = vpack.c.bf16 %v6911_v21, %v6908_v19  ;;  %v6912_v23 = vpop.f32.mrb[70].mxu0 }
 0x3df   : > { %v6913_v24 = vpop.f32.mrb[71].mxu0 }
 0x3e0   : > { %v6914_v16 = vadd.f32 %v6913_v24, %v6912_v23  ;;  %7229 = vmatmul.mubr.bf16.gmra.mrb[84].mxu1 %v1620_v22 }
 0x3e2   : > { %v6915_v25 = vpop.f32.mrb[72].mxu0 }
 0x3e3   : > { %v6916_v26 = vpop.f32.mrb[73].mxu0 }
 0x3e4   : > { %v6917_v27 = vadd.f32 %v6916_v26, %v6915_v25 }
 0x3e6   : > { %v1621_v28 = vpack.c.bf16 %v6917_v27, %v6914_v16  ;;  %v6918_v29 = vpop.f32.mrb[74].mxu0 }
 0x3e7   : > { %v6919_v30 = vpop.f32.mrb[75].mxu0 }
 0x3e8   : > { %v6920_v31 = vadd.f32 %v6919_v30, %v6918_v29  ;;  %7232 = vmatprep.mubr.bf16.mxu1 %v1621_v28 }
 0x3ea   : > { %v6921_v32 = vpop.f32.mrb[76].mxu0 }
 0x3eb   : > { %v6922_v34 = vpop.f32.mrb[77].mxu0 }
 0x3ec   : > { %v6923_v35 = vadd.f32 %v6922_v34, %v6921_v32 }
 0x3ee   : > { %v1622_v36 = vpack.c.bf16 %v6923_v35, %v6920_v31  ;;  %v6924_v37 = vpop.f32.mrb[78].mxu0 }
 0x3ef   : > { %v6925_v38 = vpop.f32.mrb[79].mxu0 }
 0x3f0   : > { %v6926_v3 = vadd.f32 %v6925_v38, %v6924_v37  ;;  %7233 = vmatmul.mubr.bf16.gmra.mrb[88].mxu1 %v1622_v36 }
 0x3f2   : > { %v6927_v5 = vpop.f32.mrb[80].mxu0 }
 0x3f3   : > { %v6928_v39 = vpop.f32.mrb[81].mxu0 }
 0x3f4   : > { %v6929_v40 = vadd.f32 %v6928_v39, %v6927_v5 }
 0x3f6   : > { %v1623_v41 = vpack.c.bf16 %v6929_v40, %v6926_v3  ;;  %v6930_v42 = vpop.f32.mrb[82].mxu0 }
 0x3f7   : > { %v6931_v43 = vpop.f32.mrb[83].mxu0 }
 0x3f8   : > { %v6932_v44 = vadd.f32 %v6931_v43, %v6930_v42  ;;  %7236 = vmatprep.mubr.bf16.mxu1 %v1623_v41 }
 0x3fa   : > { %v6933_v48 = vpop.f32.mrb[84].mxu0 }
 0x3fb   : > { %v6934_v52 = vpop.f32.mrb[85].mxu0 }
 0x3fc   : > { %v6935_v53 = vadd.f32 %v6934_v52, %v6933_v48 }
 0x3fe   : > { %v1624_v54 = vpack.c.bf16 %v6935_v53, %v6932_v44  ;;  %v6936_v55 = vpop.f32.mrb[86].mxu0 }
 0x3ff   : > { %v6937_v56 = vpop.f32.mrb[87].mxu0 }
 0x400   : > { %v6938_v57 = vadd.f32 %v6937_v56, %v6936_v55  ;;  %7237 = vmatmul.mubr.bf16.gmra.mrb[92].mxu1 %v1624_v54 }
 0x402   : > { %v6939_v58 = vpop.f32.mrb[88].mxu0 }
 0x403   : > { %v6940_v10 = vpop.f32.mrb[89].mxu0 }
 0x404   : > { %v6941_v33 = vadd.f32 %v6940_v10, %v6939_v58 }
 0x406   : > { %v1625_v11 = vpack.c.bf16 %v6941_v33, %v6938_v57  ;;  %v6942_v12 = vpop.f32.mrb[90].mxu0 }
 0x407   : > { %v6943_v13 = vpop.f32.mrb[91].mxu0 }
 0x408   : > { %v6944_v14 = vadd.f32 %v6943_v13, %v6942_v12  ;;  %7240 = vmatprep.mubr.bf16.mxu1 %v1625_v11 }
 0x40a   : > { %v6945_v46 = vpop.f32.mrb[92].mxu0 }
 0x40b   : > { %v6946_v15 = vpop.f32.mrb[93].mxu0 }
 0x40c   : > { %v6947_v18 = vadd.f32 %v6946_v15, %v6945_v46 }
 0x40e   : > { %v1626_v19 = vpack.c.bf16 %v6947_v18, %v6944_v14 }
 0x410   : > { %7241 = vmatmul.mubr.bf16.gmra.mrb[96].mxu1 %v1626_v19 }
 0x4b3   : > { %v7230_v20 = vpop.f32.mrb[84].mxu1 }
 0x4b4   : > { %v1870_v21 = vmul.f32 0.044715, %v7230_v20  ;;  %v1789_v22 = vpop.f32.mrb[85].mxu1  ;;  %v1854_v14 = vmul.f32 0.5, %v7230_v20 }
 0x4b5   : > { %v1868_v23 = vmul.f32 0.044715, %v1789_v22  ;;  %v7231_v24 = vpop.f32.mrb[86].mxu1  ;;  %v1852_v61 = vmul.f32 0.5, %v1789_v22 }
 0x4b6   : > { %v1886_v16 = vmul.f32 %v7230_v20, %v1870_v21  ;;  %v1871_v25 = vmul.f32 0.044715, %v7231_v24  ;;  %v1792_v26 = vpop.f32.mrb[87].mxu1 }
 0x4b7   : > { %v1884_v27 = vmul.f32 %v1868_v23, %v1789_v22  ;;  %v1869_v28 = vmul.f32 0.044715, %v1792_v26 }
 0x4b8   : > { %v1902_v29 = vmul.f32 %v7230_v20, %v1886_v16  ;;  %v1887_v30 = vmul.f32 %v7231_v24, %v1871_v25 }
 0x4b9   : > { %v1900_v31 = vmul.f32 %v1884_v27, %v1789_v22  ;;  %v1885_v32 = vmul.f32 %v1869_v28, %v1792_v26  ;;  %v1855_v27 = vmul.f32 0.5, %v7231_v24 }
 0x4ba   : > { %v1918_v34 = vadd.f32 %v7230_v20, %v1902_v29  ;;  %v1903_v35 = vmul.f32 %v7231_v24, %v1887_v30 }
 0x4bb   : > { %v1916_v36 = vadd.f32 %v1900_v31, %v1789_v22  ;;  %v1901_v37 = vmul.f32 %v1885_v32, %v1792_v26  ;;  %v1853_v31 = vmul.f32 0.5, %v1792_v26 }
 0x4bc   : > { %v1934_v38 = vmul.f32 0.7978846, %v1918_v34  ;;  %v1919_v3 = vadd.f32 %v7231_v24, %v1903_v35 }
 0x4bd   : > { %v1932_v5 = vmul.f32 0.7978846, %v1916_v36  ;;  %v1917_v39 = vadd.f32 %v1901_v37, %v1792_v26 }
 0x4be   : > { %7908 = vtanh.f32 %v1934_v38  ;;  %v1935_v40 = vmul.f32 0.7978846, %v1919_v3 }
 0x4bf   : > { %7910 = vtanh.f32 %v1932_v5  ;;  %v1933_v41 = vmul.f32 0.7978846, %v1917_v39 }
 0x4c0   : > { %7912 = vtanh.f32 %v1935_v40 }
 0x4c1   : > { %7914 = vtanh.f32 %v1933_v41 }
 0x4c3   : > { %v9078_v42 = vpop.f32.mrb[88].mxu1 }
 0x4c4   : > { %v1874_v43 = vmul.f32 0.044715, %v9078_v42  ;;  %v9081_v44 = vpop.f32.mrb[89].mxu1 }
 0x4c5   : > { %v1872_v48 = vmul.f32 0.044715, %v9081_v44  ;;  %v9084_v52 = vpop.f32.mrb[90].mxu1 }
 0x4c6   : > { %v1890_v53 = vmul.f32 %v9078_v42, %v1874_v43  ;;  %v1875_v54 = vmul.f32 0.044715, %v9084_v52  ;;  %v9088_v55 = vpop.f32.mrb[91].mxu1 }
 0x4c7   : > { %v1888_v56 = vmul.f32 %v1872_v48, %v9081_v44  ;;  %v1873_v57 = vmul.f32 0.044715, %v9088_v55 }
 0x4c8   : > { %v7909_v58 = vpop.eup %7908  ;;  %v1906_v10 = vmul.f32 %v9078_v42, %v1890_v53  ;;  %v1891_v33 = vmul.f32 %v9084_v52, %v1875_v54 }
 0x4c9   : > { %v7911_v11 = vpop.eup %7910  ;;  %v1904_v12 = vmul.f32 %v1888_v56, %v9081_v44  ;;  %v1889_v13 = vmul.f32 %v1873_v57, %v9088_v55  ;;  %v1966_v46 = vadd.f32 1.0, %v7909_v58 }
 0x4ca   : > { %v7913_v15 = vpop.eup %7912  ;;  %v1922_v18 = vadd.f32 %v9078_v42, %v1906_v10  ;;  %v1907_v19 = vmul.f32 %v9084_v52, %v1891_v33  ;;  %v1964_v21 = vadd.f32 1.0, %v7911_v11 }
 0x4cb   : > { %v7915_v23 = vpop.eup %7914  ;;  %v1920_v16 = vadd.f32 %v1904_v12, %v9081_v44  ;;  %v1905_v25 = vmul.f32 %v1889_v13, %v9088_v55  ;;  %v1967_v28 = vadd.f32 1.0, %v7913_v15  ;;  %v1982_v35 = vmul.f32 %v1966_v46, %v1854_v14 }
 0x4cc   : > { %v1938_v29 = vmul.f32 0.7978846, %v1922_v18  ;;  %v1923_v30 = vadd.f32 %v9084_v52, %v1907_v19  ;;  %v1965_v20 = vadd.f32 1.0, %v7915_v23  ;;  %v1980_v37 = vmul.f32 %v1964_v21, %v1852_v61 }
 0x4cd   : > { %v1936_v32 = vmul.f32 0.7978846, %v1920_v16  ;;  %v1921_v34 = vadd.f32 %v1905_v25, %v9088_v55  ;;  %v1983_v36 = vmul.f32 %v1967_v28, %v1855_v27  ;;  %v1858_v14 = vmul.f32 0.5, %v9078_v42 }
 0x4ce   : > { %7916 = vtanh.f32 %v1938_v29  ;;  %v1939_v22 = vmul.f32 0.7978846, %v1923_v30  ;;  %v1981_v38 = vmul.f32 %v1965_v20, %v1853_v31  ;;  %v1856_v61 = vmul.f32 0.5, %v9081_v44 }
 0x4cf   : > { %7918 = vtanh.f32 %v1936_v32  ;;  %v1937_v3 = vmul.f32 0.7978846, %v1921_v34  ;;  %v7400_v5 = vpack.c.bf16 %v1983_v36, %v1982_v35  ;;  %v1859_v27 = vmul.f32 0.5, %v9084_v52 }
 0x4d0   : > { %7920 = vtanh.f32 %v1939_v22  ;;  %v7396_v24 = vpack.c.bf16 %v1981_v38, %v1980_v37  ;;  %v1857_v30 = vmul.f32 0.5, %v9088_v55 }
 0x4d1   : > { %7922 = vtanh.f32 %v1937_v3 }
 0x4d2   : > { %7397 = vmatprep.subr.bf16.mxu0 %v7396_v24 }
 0x4d3   : > { %v9102_v39 = vpop.f32.mrb[92].mxu1  ;;  %7399 = vmatpush3.bf16.msra.mxu0 %v7396_v24 }
 0x4d4   : > { %v1878_v26 = vmul.f32 0.044715, %v9102_v39  ;;  %v9105_v40 = vpop.f32.mrb[93].mxu1  ;;  %7401 = vmatprep.subr.bf16.mxu0 %v7400_v5 }
 0x4d5   : > { %v1876_v41 = vmul.f32 0.044715, %v9105_v40  ;;  %v9108_v43 = vpop.f32.mrb[94].mxu1 }
 0x4d6   : > { %v1894_v48 = vmul.f32 %v9102_v39, %v1878_v26  ;;  %v1879_v53 = vmul.f32 0.044715, %v9108_v43  ;;  %v9112_v54 = vpop.f32.mrb[95].mxu1 }
 0x4d7   : > { %v1892_v56 = vmul.f32 %v1876_v41, %v9105_v40  ;;  %v1877_v57 = vmul.f32 0.044715, %v9112_v54  ;;  %7403 = vmatpush3.bf16.msra.mxu0 %v7400_v5 }
 0x4d8   : > { %v7917_v58 = vpop.eup %7916  ;;  %v1910_v10 = vmul.f32 %v9102_v39, %v1894_v48  ;;  %v1895_v33 = vmul.f32 %v9108_v43, %v1879_v53 }
 0x4d9   : > { %v7919_v11 = vpop.eup %7918  ;;  %v1908_v12 = vmul.f32 %v1892_v56, %v9105_v40  ;;  %v1893_v13 = vmul.f32 %v1877_v57, %v9112_v54  ;;  %v1970_v46 = vadd.f32 1.0, %v7917_v58 }
 0x4da   : > { %v7921_v15 = vpop.eup %7920  ;;  %v1926_v18 = vadd.f32 %v9102_v39, %v1910_v10  ;;  %v1911_v19 = vmul.f32 %v9108_v43, %v1895_v33  ;;  %v1968_v21 = vadd.f32 1.0, %v7919_v11 }
 0x4db   : > { %v7923_v23 = vpop.eup %7922  ;;  %v1924_v16 = vadd.f32 %v1908_v12, %v9105_v40  ;;  %v1909_v25 = vmul.f32 %v1893_v13, %v9112_v54  ;;  %v1971_v28 = vadd.f32 1.0, %v7921_v15  ;;  %v1986_v34 = vmul.f32 %v1970_v46, %v1858_v14 }
 0x4dc   : > { %v1942_v29 = vmul.f32 0.7978846, %v1926_v18  ;;  %v1927_v42 = vadd.f32 %v9108_v43, %v1911_v19  ;;  %v1969_v31 = vadd.f32 1.0, %v7923_v23  ;;  %v1984_v36 = vmul.f32 %v1968_v21, %v1856_v61 }
 0x4dd   : > { %v1940_v20 = vmul.f32 0.7978846, %v1924_v16  ;;  %v1925_v32 = vadd.f32 %v1909_v25, %v9112_v54  ;;  %v1987_v44 = vmul.f32 %v1971_v28, %v1859_v27  ;;  %v1862_v14 = vmul.f32 0.5, %v9102_v39 }
 0x4de   : > { %7924 = vtanh.f32 %v1942_v29  ;;  %v1943_v35 = vmul.f32 0.7978846, %v1927_v42  ;;  %v1985_v22 = vmul.f32 %v1969_v31, %v1857_v30  ;;  %v1860_v61 = vmul.f32 0.5, %v9105_v40 }
 0x4df   : > { %7926 = vtanh.f32 %v1940_v20  ;;  %v1941_v37 = vmul.f32 0.7978846, %v1925_v32  ;;  %v7408_v38 = vpack.c.bf16 %v1987_v44, %v1986_v34  ;;  %v1863_v27 = vmul.f32 0.5, %v9108_v43 }
 0x4e0   : > { %7928 = vtanh.f32 %v1943_v35  ;;  %v7404_v52 = vpack.c.bf16 %v1985_v22, %v1984_v36  ;;  %v1861_v30 = vmul.f32 0.5, %v9112_v54 }
 0x4e1   : > { %7930 = vtanh.f32 %v1941_v37 }
 0x4e2   : > { %7405 = vmatprep.subr.bf16.mxu0 %v7404_v52 }
 0x4e3   : > { %v7242_v3 = vpop.f32.mrb[96].mxu1  ;;  %7407 = vmatpush3.bf16.msra.mxu0 %v7404_v52 }
 0x4e4   : > { %v1882_v55 = vmul.f32 0.044715, %v7242_v3  ;;  %v1837_v5 = vpop.f32.mrb[97].mxu1  ;;  %7409 = vmatprep.subr.bf16.mxu0 %v7408_v38 }
 0x4e5   : > { %v1880_v24 = vmul.f32 0.044715, %v1837_v5  ;;  %v7243_v26 = vpop.f32.mrb[98].mxu1 }
 0x4e6   : > { %v1898_v41 = vmul.f32 %v7242_v3, %v1882_v55  ;;  %v1883_v48 = vmul.f32 0.044715, %v7243_v26  ;;  %v1840_v53 = vpop.f32.mrb[99].mxu1 }
 0x4e7   : > { %v1896_v56 = vmul.f32 %v1880_v24, %v1837_v5  ;;  %v1881_v57 = vmul.f32 0.044715, %v1840_v53  ;;  %7411 = vmatpush3.bf16.msra.mxu0 %v7408_v38 }
 0x4e8   : > { %v7925_v58 = vpop.eup %7924  ;;  %v1914_v10 = vmul.f32 %v7242_v3, %v1898_v41  ;;  %v1899_v33 = vmul.f32 %v7243_v26, %v1883_v48  ;;  %v1866_v41 = vmul.f32 0.5, %v7242_v3  ;;  %v1867_v48 = vmul.f32 0.5, %v7243_v26 }
 0x4e9   : > { %v7927_v11 = vpop.eup %7926  ;;  %v1912_v12 = vmul.f32 %v1896_v56, %v1837_v5  ;;  %v1897_v13 = vmul.f32 %v1881_v57, %v1840_v53  ;;  %v1974_v46 = vadd.f32 1.0, %v7925_v58  ;;  %v1864_v57 = vmul.f32 0.5, %v1837_v5 }
 0x4ea   : > { %v7929_v15 = vpop.eup %7928  ;;  %v1930_v18 = vadd.f32 %v7242_v3, %v1914_v10  ;;  %v1915_v19 = vmul.f32 %v7243_v26, %v1899_v33  ;;  %v1972_v21 = vadd.f32 1.0, %v7927_v11  ;;  %v1865_v58 = vmul.f32 0.5, %v1840_v53  ;;  %v1999_v3 = vld [vmem:[#allocation6 + $0x18] sm:$0xff] }
 0x4eb   : > { %v7931_v23 = vpop.eup %7930  ;;  %v1928_v16 = vadd.f32 %v1912_v12, %v1837_v5  ;;  %v1913_v25 = vmul.f32 %v1897_v13, %v1840_v53  ;;  %v1975_v28 = vadd.f32 1.0, %v7929_v15  ;;  %v1990_v32 = vmul.f32 %v1974_v46, %v1862_v14  ;;  %v1997_v15 = vld [vmem:[#allocation6 + $0x8] sm:$0xff] }
 0x4ec   : > { %v1946_v29 = vmul.f32 0.7978846, %v1930_v18  ;;  %v1931_v42 = vadd.f32 %v7243_v26, %v1915_v19  ;;  %v1973_v31 = vadd.f32 1.0, %v7931_v23  ;;  %v1988_v35 = vmul.f32 %v1972_v21, %v1860_v61  ;;  %v1998_v18 = vld [vmem:[#allocation6 + $0x10] sm:$0xff]  ;;  %v2000_v26 = vld [vmem:[#allocation6 + $0x20] sm:$0xff]  ;;  %v2001_v5 = vld [vmem:[#allocation6 + $0x28] sm:$0xff] }
 0x4ed   : > { %v1944_v20 = vmul.f32 0.7978846, %v1928_v16  ;;  %v1929_v39 = vadd.f32 %v1913_v25, %v1840_v53  ;;  %v1991_v34 = vmul.f32 %v1975_v28, %v1863_v27  ;;  %v2002_v53 = vld [vmem:[#allocation6 + $0x30] sm:$0xff]  ;;  %v2003_v19 = vld [vmem:[#allocation6 + $0x38] sm:$0xff]  ;;  %v2004_v61 = vld [vmem:[#allocation6 + $0x40] sm:$0xff] }
 0x4ee   : > { %7932 = vtanh.f32 %v1946_v29  ;;  %v1947_v44 = vmul.f32 0.7978846, %v1931_v42  ;;  %v1989_v40 = vmul.f32 %v1973_v31, %v1861_v30  ;;  %v2005_v21 = vld [vmem:[#allocation6 + $0x48] sm:$0xff]  ;;  %v2006_v23 = vld [vmem:[#allocation6 + $0x50] sm:$0xff]  ;;  %v2007_v16 = vld [vmem:[#allocation6 + $0x58] sm:$0xff] }
 0x4ef   : > { %7934 = vtanh.f32 %v1944_v20  ;;  %v1945_v36 = vmul.f32 0.7978846, %v1929_v39  ;;  %v7416_v22 = vpack.c.bf16 %v1991_v34, %v1990_v32  ;;  %v2008_v25 = vld [vmem:[#allocation6 + $0x60] sm:$0xff]  ;;  %v2009_v27 = vld [vmem:[#allocation6 + $0x68] sm:$0xff]  ;;  %v2010_v28 = vld [vmem:[#allocation6 + $0x70] sm:$0xff] }
 0x4f0   : > { %7936 = vtanh.f32 %v1947_v44  ;;  %v7412_v37 = vpack.c.bf16 %v1989_v40, %v1988_v35  ;;  %v2011_v29 = vld [vmem:[#allocation6 + $0x78] sm:$0xff]  ;;  %v2012_v42 = vld [vmem:[#allocation6 + $0x80] sm:$0xff]  ;;  %v2013_v30 = vld [vmem:[#allocation6 + $0x88] sm:$0xff] }
 0x4f1   : > { %7938 = vtanh.f32 %v1945_v36  ;;  %v2014_v31 = vld [vmem:[#allocation6 + $0x90] sm:$0xff]  ;;  %v2015_v20 = vld [vmem:[#allocation6 + $0x98] sm:$0xff]  ;;  %v2016_v39 = vld [vmem:[#allocation6 + $0xa0] sm:$0xff] }
 0x4f2   : > { %7413 = vmatprep.subr.bf16.mxu0 %v7412_v37  ;;  %v2017_v32 = vld [vmem:[#allocation6 + $0xa8] sm:$0xff]  ;;  %v2018_v34 = vld [vmem:[#allocation6 + $0xb0] sm:$0xff]  ;;  %v2019_v44 = vld [vmem:[#allocation6 + $0xb8] sm:$0xff] }
 0x4f3   : > { %7415 = vmatpush3.bf16.msra.mxu0 %v7412_v37  ;;  %v2020_v35 = vld [vmem:[#allocation6 + $0xc0] sm:$0xff]  ;;  %v2021_v40 = vld [vmem:[#allocation6 + $0xc8] sm:$0xff]  ;;  %v2022_v36 = vld [vmem:[#allocation6 + $0xd0] sm:$0xff] }
 0x4f4   : > { %7417 = vmatprep.subr.bf16.mxu0 %v7416_v22  ;;  %v2024_v37 = vld [vmem:[#allocation6 + $0xe0] sm:$0xff] }
 0x4f7   : > { %7419 = vmatpush3.bf16.msra.mxu0 %v7416_v22  ;;  %v2023_v22 = vld [vmem:[#allocation6 + $0xd8] sm:$0xff] }
 0x4f8   : > { %v7933_v43 = vpop.eup %7932 }
 0x4f9   : > { %v7935_v54 = vpop.eup %7934  ;;  %v1978_v38 = vadd.f32 1.0, %v7933_v43  ;;  %v2025_v43 = vld [vmem:[#allocation6 + $0xe8] sm:$0xff] }
 0x4fa   : > { %v7937_v52 = vpop.eup %7936  ;;  %v1976_v55 = vadd.f32 1.0, %v7935_v54  ;;  %v2026_v54 = vld [vmem:[#allocation6 + $0xf0] sm:$0xff] }
 0x4fb   : > { %v7939_v24 = vpop.eup %7938  ;;  %v1979_v56 = vadd.f32 1.0, %v7937_v52  ;;  %v1994_v33 = vmul.f32 %v1978_v38, %v1866_v41  ;;  %v2027_v38 = vld [vmem:[#allocation6 + $0xf8] sm:$0xff]  ;;  %v2542_v52 = vld [vmem:[#allocation7 + $0x8] sm:$0xff] }
 0x4fc   : > { %v1977_v10 = vadd.f32 1.0, %v7939_v24  ;;  %v1992_v12 = vmul.f32 %v1976_v55, %v1864_v57  ;;  %2637 = vmatprep.mubr.f32.mxu1 %v2542_v52 }
 0x4fd   : > { %v1995_v11 = vmul.f32 %v1979_v56, %v1867_v48 }
 0x4fe   : > { %v1993_v13 = vmul.f32 %v1977_v10, %v1865_v58 }
 0x4ff   : > { %v7424_v14 = vpack.c.bf16 %v1995_v11, %v1994_v33 }
 0x500   : > { %v7420_v46 = vpack.c.bf16 %v1993_v13, %v1992_v12 }
 0x502   : > { %7421 = vmatprep.subr.bf16.mxu0 %v7420_v46 }
 0x503   : > { %7423 = vmatpush3.bf16.msra.mxu0 %v7420_v46 }
 0x504   : > { %7425 = vmatprep.subr.bf16.mxu0 %v7424_v14 }
 0x507   : > { %7427 = vmatpush3.bf16.msra.mxu0 %v7424_v14 }
 0x50a   : > { %7277 = vmatmul.mubr.f32.vlgmr.msra.gmra.mrb[94].mxu0 %v1997_v15 }
 0x50b   : > { %7279 = vmatprep.mubr.f32.mxu0 %v1998_v18 }
 0x50e   : > { %7280 = vmatmul.mubr.f32.gmra.mrb[96].mxu0 %v1999_v3 }
 0x50f   : > { %7282 = vmatprep.mubr.f32.mxu0 %v2000_v26 }
 0x512   : > { %7283 = vmatmul.mubr.f32.gmra.mrb[98].mxu0 %v2001_v5 }
 0x513   : > { %7285 = vmatprep.mubr.f32.mxu0 %v2002_v53 }
 0x516   : > { %7286 = vmatmul.mubr.f32.gmra.mrb[100].mxu0 %v2003_v19 }
 0x517   : > { %7288 = vmatprep.mubr.f32.mxu0 %v2004_v61 }
 0x51a   : > { %7289 = vmatmul.mubr.f32.gmra.mrb[102].mxu0 %v2005_v21 }
 0x51b   : > { %7291 = vmatprep.mubr.f32.mxu0 %v2006_v23 }
 0x51e   : > { %7292 = vmatmul.mubr.f32.gmra.mrb[104].mxu0 %v2007_v16 }
 0x51f   : > { %7294 = vmatprep.mubr.f32.mxu0 %v2008_v25 }
 0x522   : > { %7295 = vmatmul.mubr.f32.gmra.mrb[106].mxu0 %v2009_v27 }
 0x523   : > { %7297 = vmatprep.mubr.f32.mxu0 %v2010_v28 }
 0x526   : > { %7298 = vmatmul.mubr.f32.gmra.mrb[108].mxu0 %v2011_v29 }
 0x527   : > { %7300 = vmatprep.mubr.f32.mxu0 %v2012_v42 }
 0x52a   : > { %7301 = vmatmul.mubr.f32.gmra.mrb[110].mxu0 %v2013_v30 }
 0x52b   : > { %7303 = vmatprep.mubr.f32.mxu0 %v2014_v31 }
 0x52e   : > { %7304 = vmatmul.mubr.f32.gmra.mrb[112].mxu0 %v2015_v20 }
 0x52f   : > { %7306 = vmatprep.mubr.f32.mxu0 %v2016_v39 }
 0x532   : > { %7307 = vmatmul.mubr.f32.gmra.mrb[114].mxu0 %v2017_v32 }
 0x533   : > { %7309 = vmatprep.mubr.f32.mxu0 %v2018_v34 }
 0x536   : > { %7310 = vmatmul.mubr.f32.gmra.mrb[116].mxu0 %v2019_v44 }
 0x537   : > { %7312 = vmatprep.mubr.f32.mxu0 %v2020_v35 }
 0x53a   : > { %7313 = vmatmul.mubr.f32.gmra.mrb[118].mxu0 %v2021_v40 }
 0x53b   : > { %7315 = vmatprep.mubr.f32.mxu0 %v2022_v36 }
 0x53e   : > { %7316 = vmatmul.mubr.f32.gmra.mrb[120].mxu0 %v2023_v22 }
 0x53f   : > { %7318 = vmatprep.mubr.f32.mxu0 %v2024_v37 }
 0x542   : > { %7319 = vmatmul.mubr.f32.gmra.mrb[122].mxu0 %v2025_v43 }
 0x543   : > { %7321 = vmatprep.mubr.f32.mxu0 %v2026_v54 }
 0x546   : > { %7322 = vmatmul.mubr.f32.gmra.mrb[124].mxu0 %v2027_v38 }
 0x5dd   : > { %v7278_v55 = vpop.f32.mrb[94].mxu0 }
 0x5de   : > { %v2286_v24 = vmul.f32 0.044715, %v7278_v55  ;;  %v2094_v41 = vpop.f32.mrb[95].mxu0  ;;  %v9134_v42 = vmul.f32 0.5, %v7278_v55 }
 0x5df   : > { %v2285_v48 = vmul.f32 0.044715, %v2094_v41  ;;  %v9136_v39 = vmul.f32 0.5, %v2094_v41 }
 0x5e0   : > { %v2318_v56 = vmul.f32 %v7278_v55, %v2286_v24 }
 0x5e1   : > { %v2317_v57 = vmul.f32 %v2285_v48, %v2094_v41  ;;  %v7281_v58 = vpop.f32.mrb[96].mxu0 }
 0x5e2   : > { %v2350_v10 = vmul.f32 %v7278_v55, %v2318_v56  ;;  %v2288_v33 = vmul.f32 0.044715, %v7281_v58  ;;  %v2104_v11 = vpop.f32.mrb[97].mxu0  ;;  %v9138_v32 = vmul.f32 0.5, %v7281_v58 }
 0x5e3   : > { %v2349_v12 = vmul.f32 %v2317_v57, %v2094_v41  ;;  %v2287_v13 = vmul.f32 0.044715, %v2104_v11  ;;  %v9140_v35 = vmul.f32 0.5, %v2104_v11 }
 0x5e4   : > { %v2382_v14 = vadd.f32 %v7278_v55, %v2350_v10  ;;  %v2320_v46 = vmul.f32 %v7281_v58, %v2288_v33 }
 0x5e5   : > { %v2381_v15 = vadd.f32 %v2349_v12, %v2094_v41  ;;  %v2319_v18 = vmul.f32 %v2287_v13, %v2104_v11  ;;  %v7284_v3 = vpop.f32.mrb[98].mxu0 }
 0x5e6   : > { %v2414_v26 = vmul.f32 0.7978846, %v2382_v14  ;;  %v2352_v5 = vmul.f32 %v7281_v58, %v2320_v46  ;;  %v2290_v53 = vmul.f32 0.044715, %v7284_v3  ;;  %v2114_v19 = vpop.f32.mrb[99].mxu0  ;;  %v9142_v43 = vmul.f32 0.5, %v7284_v3 }
 0x5e7   : > { %v2413_v61 = vmul.f32 0.7978846, %v2381_v15  ;;  %v2351_v21 = vmul.f32 %v2319_v18, %v2104_v11  ;;  %v2289_v23 = vmul.f32 0.044715, %v2114_v19  ;;  %v9144_v24 = vmul.f32 0.5, %v2114_v19 }
 0x5e8   : > { %7940 = vtanh.f32 %v2414_v26  ;;  %v2322_v16 = vmul.f32 %v7284_v3, %v2290_v53  ;;  %v2384_v25 = vadd.f32 %v7281_v58, %v2352_v5 }
 0x5e9   : > { %7942 = vtanh.f32 %v2413_v61  ;;  %v2383_v27 = vadd.f32 %v2351_v21, %v2104_v11  ;;  %v2321_v28 = vmul.f32 %v2289_v23, %v2114_v19  ;;  %v7287_v29 = vpop.f32.mrb[100].mxu0 }
 0x5ea   : > { %v2354_v30 = vmul.f32 %v7284_v3, %v2322_v16  ;;  %v2292_v31 = vmul.f32 0.044715, %v7287_v29  ;;  %v2124_v20 = vpop.f32.mrb[101].mxu0  ;;  %v2416_v37 = vmul.f32 0.7978846, %v2384_v25  ;;  %v9146_v58 = vmul.f32 0.5, %v7287_v29 }
 0x5eb   : > { %v2353_v34 = vmul.f32 %v2321_v28, %v2114_v19  ;;  %v2291_v44 = vmul.f32 0.044715, %v2124_v20  ;;  %v2415_v40 = vmul.f32 0.7978846, %v2383_v27  ;;  %v9148_v12 = vmul.f32 0.5, %v2124_v20 }
 0x5ec   : > { %v2386_v36 = vadd.f32 %v7284_v3, %v2354_v30  ;;  %v2324_v22 = vmul.f32 %v7287_v29, %v2292_v31 }
 0x5ed   : > { %v2385_v54 = vadd.f32 %v2353_v34, %v2114_v19  ;;  %v2323_v38 = vmul.f32 %v2291_v44, %v2124_v20  ;;  %v7290_v52 = vpop.f32.mrb[102].mxu0  ;;  %7944 = vtanh.f32 %v2415_v40 }
 0x5ee   : > { %v2418_v55 = vmul.f32 0.7978846, %v2386_v36  ;;  %v2356_v41 = vmul.f32 %v7287_v29, %v2324_v22  ;;  %v2294_v48 = vmul.f32 0.044715, %v7290_v52  ;;  %v2134_v56 = vpop.f32.mrb[103].mxu0  ;;  %7946 = vtanh.f32 %v2416_v37 }
 0x5ef   : > { %v2417_v57 = vmul.f32 0.7978846, %v2385_v54  ;;  %v2355_v10 = vmul.f32 %v2323_v38, %v2124_v20  ;;  %v2293_v33 = vmul.f32 0.044715, %v2134_v56  ;;  %v9150_v46 = vmul.f32 0.5, %v7290_v52 }
 0x5f0   : > { %v2388_v11 = vadd.f32 %v7287_v29, %v2356_v41  ;;  %v2326_v13 = vmul.f32 %v7290_v52, %v2294_v48  ;;  %7948 = vtanh.f32 %v2418_v55  ;;  %v9152_v5 = vmul.f32 0.5, %v2134_v56 }
 0x5f1   : > { %v2387_v14 = vadd.f32 %v2355_v10, %v2124_v20  ;;  %v2325_v15 = vmul.f32 %v2293_v33, %v2134_v56  ;;  %v7293_v18 = vpop.f32.mrb[104].mxu0  ;;  %7950 = vtanh.f32 %v2417_v57  ;;  %v7852_v57 = vld [vmem:[%s12339_s7] sm:$0xff]   ;;  %v7853_v10 = vld [vmem:[%s12339_s7 + $0x8] sm:$0xff]  }
 0x5f2   : > { %v7941_v3 = vpop.eup %7940  ;;  %v2358_v26 = vmul.f32 %v7290_v52, %v2326_v13  ;;  %v2296_v53 = vmul.f32 0.044715, %v7293_v18  ;;  %v2144_v19 = vpop.f32.mrb[105].mxu0  ;;  %v2420_v21 = vmul.f32 0.7978846, %v2388_v11  ;;  %v9154_v31 = vmul.f32 0.5, %v7293_v18  ;;  %7324 = vmatprep.subr.bf16.mxu0 %v7852_v57 }
 0x5f3   : > { %v7943_v61 = vpop.eup %7942  ;;  %v2357_v23 = vmul.f32 %v2325_v15, %v2134_v56  ;;  %v2295_v16 = vmul.f32 0.044715, %v2144_v19  ;;  %v2419_v25 = vmul.f32 0.7978846, %v2387_v14  ;;  %v2478_v44 = vadd.f32 1.0, %v7941_v3  ;;  %7325 = vmatpush3.bf16.msra.mxu0 %v7852_v57 }
 0x5f4   : > { %v2390_v27 = vadd.f32 %v7290_v52, %v2358_v26  ;;  %v2328_v28 = vmul.f32 %v7293_v18, %v2296_v53  ;;  %v2477_v29 = vadd.f32 1.0, %v7943_v61  ;;  %v9156_v22 = vmul.f32 0.5, %v2144_v19  ;;  %7326 = vmatprep.subr.bf16.mxu0 %v7853_v10 }
 0x5f5   : > { %v2389_v30 = vadd.f32 %v2357_v23, %v2134_v56  ;;  %v2327_v20 = vmul.f32 %v2295_v16, %v2144_v19  ;;  %v7296_v34 = vpop.f32.mrb[106].mxu0  ;;  %7952 = vtanh.f32 %v2420_v21  ;;  %v9176_v15 = vmul.f32 %v2478_v44, %v9134_v42 }
 0x5f6   : > { %v2422_v40 = vmul.f32 0.7978846, %v2390_v27  ;;  %v2360_v36 = vmul.f32 %v7293_v18, %v2328_v28  ;;  %v2298_v37 = vmul.f32 0.044715, %v7296_v34  ;;  %v9158_v54 = vpop.f32.mrb[107].mxu0  ;;  %7954 = vtanh.f32 %v2419_v25  ;;  %v7854_v28 = vld [vmem:[%s12339_s7 + $0x10] sm:$0xff]  }
 0x5f7   : > { %v2421_v38 = vmul.f32 0.7978846, %v2389_v30  ;;  %v2359_v55 = vmul.f32 %v2327_v20, %v2144_v19  ;;  %v2297_v52 = vmul.f32 0.044715, %v9158_v54  ;;  %v9162_v56 = vmul.f32 %v2477_v29, %v9136_v39  ;;  %v7945_v39 = vpop.eup %7944  ;;  %7327 = vmatpush3.bf16.msra.mxu0 %v7853_v10 }
 0x5f8   : > { %v2392_v41 = vadd.f32 %v7293_v18, %v2360_v36  ;;  %v2330_v48 = vmul.f32 %v7296_v34, %v2298_v37  ;;  %v9170_v11 = vmul.f32 0.5, %v7296_v34  ;;  %7956 = vtanh.f32 %v2422_v40  ;;  %v7947_v61 = vpop.eup %7946  ;;  %7328 = vmatprep.subr.bf16.mxu0 %v7854_v28 }
 0x5f9   : > { %v2391_v33 = vadd.f32 %v2359_v55, %v2144_v19  ;;  %v2329_v13 = vmul.f32 %v2297_v52, %v9158_v54  ;;  %v9173_v14 = vpop.f32.mrb[108].mxu0  ;;  %7958 = vtanh.f32 %v2421_v38  ;;  %v2479_v40 = vadd.f32 1.0, %v7945_v39 }
 0x5fa   : > { %v2424_v18 = vmul.f32 0.7978846, %v2392_v41  ;;  %v2362_v3 = vmul.f32 %v7296_v34, %v2330_v48  ;;  %v2300_v26 = vmul.f32 0.044715, %v9173_v14  ;;  %v9179_v53 = vpop.f32.mrb[109].mxu0  ;;  %v9183_v16 = vpop.eup %7948 }
 0x5fb   : > { %v2423_v19 = vmul.f32 0.7978846, %v2391_v33  ;;  %v2361_v21 = vmul.f32 %v2329_v13, %v9158_v54  ;;  %v2299_v23 = vmul.f32 0.044715, %v9179_v53  ;;  %v7951_v29 = vpop.eup %7950  ;;  %7329 = vmatpush3.bf16.msra.mxu0 %v7854_v28 }
 0x5fc   : > { %7960 = vtanh.f32 %v2424_v18  ;;  %v2394_v42 = vadd.f32 %v7296_v34, %v2362_v3  ;;  %v2332_v25 = vmul.f32 %v9173_v14, %v2300_v26  ;;  %v2480_v18 = vadd.f32 1.0, %v7947_v61 }
 0x5fd   : > { %7962 = vtanh.f32 %v2423_v19  ;;  %v2393_v30 = vadd.f32 %v2361_v21, %v9158_v54  ;;  %v2331_v20 = vmul.f32 %v2299_v23, %v9179_v53  ;;  %v7302_v44 = vpop.f32.mrb[110].mxu0  ;;  %v9204_v21 = vmul.f32 %v2479_v40, %v9140_v35 }
 0x5fe   : > { %v2426_v36 = vmul.f32 0.7978846, %v2394_v42  ;;  %v2364_v34 = vmul.f32 %v9173_v14, %v2332_v25  ;;  %v2302_v37 = vmul.f32 0.044715, %v7302_v44  ;;  %v2174_v38 = vpop.f32.mrb[111].mxu0  ;;  %v9194_v55 = vmul.f32 0.5, %v7302_v44 }
 0x5ff   : > { %v2425_v52 = vmul.f32 0.7978846, %v2393_v30  ;;  %v2363_v41 = vmul.f32 %v2331_v20, %v9179_v53  ;;  %v2301_v48 = vmul.f32 0.044715, %v2174_v38  ;;  %v9197_v57 = vmul.f32 0.5, %v2174_v38  ;;  %v9200_v39 = vpop.eup %7952 }
 0x600   : > { %7964 = vtanh.f32 %v2426_v36  ;;  %v2396_v33 = vadd.f32 %v9173_v14, %v2364_v34  ;;  %v2334_v13 = vmul.f32 %v7302_v44, %v2302_v37  ;;  %v9206_v23 = vpop.eup %7954  ;;  %v9215_v40 = vmul.f32 %v2480_v18, %v9138_v32 }
 0x601   : > { %7966 = vtanh.f32 %v2425_v52  ;;  %v2395_v3 = vadd.f32 %v2363_v41, %v9179_v53  ;;  %v2333_v26 = vmul.f32 %v2301_v48, %v2174_v38  ;;  %v7305_v19 = vpop.f32.mrb[112].mxu0 }
 0x602   : > { %v2428_v42 = vmul.f32 0.7978846, %v2396_v33  ;;  %v2366_v10 = vmul.f32 %v7302_v44, %v2334_v13  ;;  %v2304_v25 = vmul.f32 0.044715, %v7305_v19  ;;  %v2184_v30 = vpop.f32.mrb[113].mxu0  ;;  %v9208_v20 = vmul.f32 0.5, %v7305_v19  ;;  %v9212_v52 = vpop.eup %7956 }
 0x603   : > { %v2427_v61 = vmul.f32 0.7978846, %v2395_v3  ;;  %v2365_v36 = vmul.f32 %v2333_v26, %v2174_v38  ;;  %v2303_v34 = vmul.f32 0.044715, %v2184_v30  ;;  %v9210_v37 = vmul.f32 0.5, %v2184_v30  ;;  %v9217_v48 = vpop.eup %7958 }
 0x604   : > { %7968 = vtanh.f32 %v2428_v42  ;;  %v2398_v41 = vadd.f32 %v7302_v44, %v2366_v10  ;;  %v2336_v35 = vmul.f32 %v7305_v19, %v2304_v25  ;;  %v2481_v3 = vadd.f32 1.0, %v7951_v29 }
 0x605   : > { %7970 = vtanh.f32 %v2427_v61  ;;  %v2397_v33 = vadd.f32 %v2365_v36, %v2174_v38  ;;  %v2335_v13 = vmul.f32 %v2303_v34, %v2184_v30  ;;  %v7308_v0 = vpop.f32.mrb[114].mxu0 }
 0x606   : > { %v9219_v26 = vpop.eup %7960  ;;  %v2430_v27 = vmul.f32 0.7978846, %v2398_v41  ;;  %v2368_v45 = vmul.f32 %v7305_v19, %v2336_v35  ;;  %v2306_v28 = vmul.f32 0.044715, %v7308_v0  ;;  %v2194_v8 = vpop.f32.mrb[115].mxu0  ;;  %v9227_v29 = vmul.f32 0.5, %v7308_v0 }
 0x607   : > { %v9223_v42 = vpop.eup %7962  ;;  %v2429_v32 = vmul.f32 0.7978846, %v2397_v33  ;;  %v2367_v18 = vmul.f32 %v2335_v13, %v2184_v30  ;;  %v2305_v10 = vmul.f32 0.044715, %v2194_v8  ;;  %v9225_v25 = vmul.f32 0.5, %v2194_v8 }
 0x608   : > { %7972 = vtanh.f32 %v2430_v27  ;;  %v2400_v38 = vadd.f32 %v7305_v19, %v2368_v45  ;;  %v2338_v61 = vmul.f32 %v7308_v0, %v2306_v28  ;;  %v2482_v35 = vadd.f32 1.0, %v9183_v16 }
 0x609   : > { %7974 = vtanh.f32 %v2429_v32  ;;  %v2399_v36 = vadd.f32 %v2367_v18, %v2184_v30  ;;  %v2337_v34 = vmul.f32 %v2305_v10, %v2194_v8  ;;  %v7311_v41 = vpop.f32.mrb[116].mxu0  ;;  %v9233_v7 = vmul.f32 %v2481_v3, %v9144_v24 }
 0x60a   : > { %v9230_v17 = vpop.eup %7964  ;;  %v2432_v44 = vmul.f32 0.7978846, %v2400_v38  ;;  %v2370_v9 = vmul.f32 %v7308_v0, %v2338_v61  ;;  %v2308_v33 = vmul.f32 0.044715, %v7311_v41  ;;  %v2204_v13 = vpop.f32.mrb[117].mxu0  ;;  %v9238_v30 = vmul.f32 %v2482_v35, %v9142_v43 }
 0x60b   : > { %v9235_v27 = vpop.eup %7966  ;;  %v2431_v45 = vmul.f32 0.7978846, %v2399_v36  ;;  %v2369_v19 = vmul.f32 %v2337_v34, %v2194_v8  ;;  %v2307_v28 = vmul.f32 0.044715, %v2204_v13  ;;  %v9240_v18 = vmul.f32 0.5, %v2204_v13 }
 0x60c   : > { %7976 = vtanh.f32 %v2432_v44  ;;  %v2402_v32 = vadd.f32 %v7308_v0, %v2370_v9  ;;  %v2340_v16 = vmul.f32 %v7311_v41, %v2308_v33  ;;  %v9251_v0 = vmul.f32 0.5, %v7311_v41 }
 0x60d   : > { %7978 = vtanh.f32 %v2431_v45  ;;  %v2401_v10 = vadd.f32 %v2369_v19, %v2194_v8  ;;  %v2339_v38 = vmul.f32 %v2307_v28, %v2204_v13  ;;  %v9242_v61 = vpop.f32.mrb[118].mxu0  ;;  %v2483_v45 = vadd.f32 1.0, %v9206_v23 }
 0x60e   : > { %v9246_v3 = vpop.eup %7968  ;;  %v2434_v36 = vmul.f32 0.7978846, %v2402_v32  ;;  %v2372_v34 = vmul.f32 %v7311_v41, %v2340_v16  ;;  %v2310_v43 = vmul.f32 0.044715, %v9242_v61  ;;  %v9249_v35 = vpop.f32.mrb[119].mxu0  ;;  %v2484_v32 = vadd.f32 1.0, %v9200_v39 }
 0x60f   : > { %v9253_v9 = vpop.eup %7970  ;;  %v2433_v44 = vmul.f32 0.7978846, %v2401_v10  ;;  %v2371_v8 = vmul.f32 %v2339_v38, %v2204_v13  ;;  %v2309_v33 = vmul.f32 0.044715, %v9249_v35  ;;  %v9263_v1 = vmul.f32 %v2483_v45, %v9148_v12 }
 0x610   : > { %7980 = vtanh.f32 %v2434_v36  ;;  %v2404_v19 = vadd.f32 %v7311_v41, %v2372_v34  ;;  %v2342_v28 = vmul.f32 %v9242_v61, %v2310_v43  ;;  %v9270_v36 = vmul.f32 %v2484_v32, %v9146_v58 }
 0x611   : > { %7982 = vtanh.f32 %v2433_v44  ;;  %v2403_v16 = vadd.f32 %v2371_v8, %v2204_v13  ;;  %v2341_v24 = vmul.f32 %v2309_v33, %v9249_v35  ;;  %v9260_v4 = vpop.f32.mrb[120].mxu0 }
 0x612   : > { %v7973_v10 = vpop.eup %7972  ;;  %v2436_v38 = vmul.f32 0.7978846, %v2404_v19  ;;  %v2374_v6 = vmul.f32 %v9242_v61, %v2342_v28  ;;  %v2312_v23 = vmul.f32 0.044715, %v9260_v4  ;;  %v9267_v41 = vpop.f32.mrb[121].mxu0 }
 0x613   : > { %v7975_v39 = vpop.eup %7974  ;;  %v2435_v13 = vmul.f32 0.7978846, %v2403_v16  ;;  %v2373_v34 = vmul.f32 %v2341_v24, %v9249_v35  ;;  %v2311_v43 = vmul.f32 0.044715, %v9267_v41  ;;  %v2494_v44 = vadd.f32 1.0, %v7973_v10 }
 0x614   : > { %7984 = vtanh.f32 %v2436_v38  ;;  %v2406_v12 = vadd.f32 %v9242_v61, %v2374_v6  ;;  %v2344_v8 = vmul.f32 %v9260_v4, %v2312_v23  ;;  %v2493_v33 = vadd.f32 1.0, %v7975_v39 }
 0x615   : > { %7986 = vtanh.f32 %v2435_v13  ;;  %v2405_v45 = vadd.f32 %v2373_v34, %v9249_v35  ;;  %v2343_v19 = vmul.f32 %v2311_v43, %v9267_v41  ;;  %v9278_v58 = vpop.f32.mrb[122].mxu0  ;;  %v2526_v28 = vmul.f32 %v2494_v44, %v9194_v55 }
 0x616   : > { %v7977_v32 = vpop.eup %7976  ;;  %v2438_v24 = vmul.f32 0.7978846, %v2406_v12  ;;  %v2376_v16 = vmul.f32 %v9260_v4, %v2344_v8  ;;  %v2314_v10 = vmul.f32 0.044715, %v9278_v58  ;;  %v9283_v38 = vpop.f32.mrb[123].mxu0  ;;  %v2525_v6 = vmul.f32 %v2493_v33, %v9197_v57 }
 0x617   : > { %v7979_v23 = vpop.eup %7978  ;;  %v2437_v39 = vmul.f32 0.7978846, %v2405_v45  ;;  %v2375_v13 = vmul.f32 %v2343_v19, %v9267_v41  ;;  %v2313_v34 = vmul.f32 0.044715, %v9283_v38  ;;  %v2496_v43 = vadd.f32 1.0, %v7977_v32 }
 0x618   : > { %7988 = vtanh.f32 %v2438_v24  ;;  %v2408_v55 = vadd.f32 %v9260_v4, %v2376_v16  ;;  %v2346_v44 = vmul.f32 %v9278_v58, %v2314_v10  ;;  %v7428_v12 = vpack.c.bf16 %v2526_v28, %v2525_v6 }
 0x619   : > { %7990 = vtanh.f32 %v2437_v39  ;;  %v2407_v8 = vadd.f32 %v2375_v13, %v9267_v41  ;;  %v2345_v2 = vmul.f32 %v2313_v34, %v9283_v38  ;;  %v9292_v62 = vpop.f32.mrb[124].mxu0  ;;  %v2495_v57 = vadd.f32 1.0, %v7979_v23 }
 0x61a   : > { %v7981_v33 = vpop.eup %7980  ;;  %v2440_v45 = vmul.f32 0.7978846, %v2408_v55  ;;  %v2378_v19 = vmul.f32 %v9278_v58, %v2346_v44  ;;  %v2316_v32 = vmul.f32 0.044715, %v9292_v62  ;;  %v9296_v24 = vpop.f32.mrb[125].mxu0  ;;  %7429 = vmatprep.subr.bf16.mxu1 %v7428_v12  ;;  %v2528_v16 = vmul.f32 %v2496_v43, %v9208_v20 }
 0x61b   : > { %v7983_v28 = vpop.eup %7982  ;;  %v2439_v10 = vmul.f32 0.7978846, %v2407_v8  ;;  %v2377_v6 = vmul.f32 %v2345_v2, %v9283_v38  ;;  %v2315_v39 = vmul.f32 0.044715, %v9296_v24  ;;  %v12473_v23 = vpack.c.bf16 %v9176_v15, %v9162_v56 }
 0x61c   : > { %v2527_v13 = vmul.f32 %v2495_v57, %v9210_v37  ;;  %7992 = vtanh.f32 %v2440_v45  ;;  %v2410_v34 = vadd.f32 %v9278_v58, %v2378_v19  ;;  %v2348_v55 = vmul.f32 %v9292_v62, %v2316_v32 }
 0x61d   : > { %7431 = vmatpush3.bf16.msra.mxu1 %v12473_v23  ;;  %v2497_v44 = vadd.f32 1.0, %v7983_v28  ;;  %7994 = vtanh.f32 %v2439_v10  ;;  %v2409_v20 = vadd.f32 %v2377_v6, %v9283_v38  ;;  %v2347_v43 = vmul.f32 %v2315_v39, %v9296_v24 }
 0x61e   : > { %v7432_v2 = vpack.c.bf16 %v2528_v16, %v2527_v13  ;;  %v7985_v12 = vpop.eup %7984  ;;  %v2442_v8 = vmul.f32 0.7978846, %v2410_v34  ;;  %v2380_v59 = vmul.f32 %v9292_v62, %v2348_v55  ;;  %v2498_v56 = vadd.f32 1.0, %v7981_v33 }
 0x61f   : > { %v2529_v15 = vmul.f32 %v2497_v44, %v9225_v25  ;;  %v7987_v37 = vpop.eup %7986  ;;  %v2441_v57 = vmul.f32 0.7978846, %v2409_v20  ;;  %v2379_v45 = vmul.f32 %v2347_v43, %v9296_v24  ;;  %v2500_v19 = vadd.f32 1.0, %v7985_v12 }
 0x620   : > { %7433 = vmatprep.subr.bf16.mxu1 %v7432_v2  ;;  %v7442_v32 = vpack.c.bf16 %v9270_v36, %v9263_v1  ;;  %7996 = vtanh.f32 %v2442_v8  ;;  %v2412_v28 = vadd.f32 %v9292_v62, %v2380_v59  ;;  %v12474_v16 = vpack.c.bf16 %v9215_v40, %v9204_v21 }
 0x621   : > { %v2530_v33 = vmul.f32 %v2498_v56, %v9227_v29  ;;  %v2499_v10 = vadd.f32 1.0, %v7987_v37  ;;  %v2265_v25 = vmul.f32 0.5, %v9158_v54  ;;  %7998 = vtanh.f32 %v2441_v57 }
 0x622   : > { %7435 = vmatpush3.bf16.msra.mxu1 %v12474_v16  ;;  %v2411_v6 = vadd.f32 %v2379_v45, %v9296_v24  ;;  %v2532_v39 = vmul.f32 %v2500_v19, %v9251_v0  ;;  %v7989_v23 = vpop.eup %7988  ;;  %v2444_v13 = vmul.f32 0.7978846, %v2412_v28  ;;  %v2278_v59 = vmul.f32 0.5, %v9242_v61 }
 0x623   : > { %v7436_v1 = vpack.c.bf16 %v2530_v33, %v2529_v15  ;;  %v2531_v36 = vmul.f32 %v2499_v10, %v9240_v18  ;;  %v7991_v34 = vpop.eup %7990  ;;  %v2502_v40 = vadd.f32 1.0, %v7989_v23  ;;  %v2485_v29 = vadd.f32 1.0, %v9217_v48 }
 0x624   : > { %v2443_v21 = vmul.f32 0.7978846, %v2411_v6  ;;  %v2486_v55 = vadd.f32 1.0, %v9212_v52  ;;  %8000 = vtanh.f32 %v2444_v13  ;;  %v2277_v44 = vmul.f32 0.5, %v9249_v35 }
 0x625   : > { %7437 = vmatprep.subr.bf16.mxu1 %v7436_v1  ;;  %v7440_v54 = vpack.c.bf16 %v2532_v39, %v2531_v36  ;;  %v2501_v0 = vadd.f32 1.0, %v7991_v34  ;;  %v12475_v20 = vpack.c.bf16 %v9238_v30, %v9233_v7  ;;  %v2534_v18 = vmul.f32 %v2502_v40, %v2278_v59 }
 0x626   : > { %8002 = vtanh.f32 %v2443_v21  ;;  %v2517_v61 = vmul.f32 %v2485_v29, %v9152_v5  ;;  %v2518_v43 = vmul.f32 %v2486_v55, %v9150_v46  ;;  %v7993_v2 = vpop.eup %7992  ;;  %v2268_v48 = vmul.f32 0.5, %v9173_v14  ;;  %v2541_v29 = vld [vmem:[#allocation7] sm:$0xff]  ;;  %v2544_v55 = vld [vmem:[#allocation7 + $0x18] sm:$0xff] }
 0x627   : > { %7439 = vmatpush3.bf16.msra.mxu1 %v12475_v20  ;;  %v2533_v52 = vmul.f32 %v2501_v0, %v2277_v44  ;;  %v2487_v12 = vadd.f32 1.0, %v9223_v42  ;;  %v2488_v35 = vadd.f32 1.0, %v9219_v26  ;;  %v7995_v8 = vpop.eup %7994  ;;  %v2279_v15 = vmul.f32 0.5, %v9267_v41  ;;  %v2545_v44 = vld [vmem:[#allocation7 + $0x20] sm:$0xff]  ;;  %v2548_v0 = vld [vmem:[#allocation7 + $0x38] sm:$0xff]  ;;  %v2550_v20 = vld [vmem:[#allocation7 + $0x48] sm:$0xff] }
 0x628   : > { %7441 = vmatprep.subr.bf16.mxu1 %v7440_v54  ;;  %v7446_v56 = vpack.c.bf16 %v2518_v43, %v2517_v61  ;;  %v2280_v7 = vmul.f32 0.5, %v9260_v4  ;;  %v2504_v30 = vadd.f32 1.0, %v7993_v2  ;;  %v2503_v5 = vadd.f32 1.0, %v7995_v8  ;;  %v2543_v54 = vld [vmem:[#allocation7 + $0x10] sm:$0xff]  ;;  %v2552_v61 = vld [vmem:[#allocation7 + $0x58] sm:$0xff]  ;;  %v2554_v2 = vld [vmem:[#allocation7 + $0x68] sm:$0xff] }
 0x629   : > { %v7444_v37 = vpack.c.bf16 %v2534_v18, %v2533_v52  ;;  %v2519_v46 = vmul.f32 %v2487_v12, %v9156_v22  ;;  %v2520_v57 = vmul.f32 %v2488_v35, %v9154_v31  ;;  %v2267_v14 = vmul.f32 0.5, %v9179_v53  ;;  %v2549_v18 = vld [vmem:[#allocation7 + $0x40] sm:$0xff]  ;;  %v2551_v43 = vld [vmem:[#allocation7 + $0x50] sm:$0xff]  ;;  %v2556_v52 = vld [vmem:[#allocation7 + $0x78] sm:$0xff] }
 0x62a   : > { %v2536_v45 = vmul.f32 %v2504_v30, %v2280_v7  ;;  %v2489_v42 = vadd.f32 1.0, %v9235_v27  ;;  %v2490_v26 = vadd.f32 1.0, %v9230_v17  ;;  %v7997_v19 = vpop.eup %7996  ;;  %v2535_v41 = vmul.f32 %v2503_v5, %v2279_v15  ;;  %v2555_v12 = vld [vmem:[#allocation7 + $0x70] sm:$0xff]  ;;  %v2558_v35 = vld [vmem:[#allocation7 + $0x88] sm:$0xff]  ;;  %v2557_v8 = vld [vmem:[#allocation7 + $0x80] sm:$0xff] }
 0x62b   : > { %7443 = vmatpush3.bf16.msra.mxu1 %v7442_v32  ;;  %v7450_v28 = vpack.c.bf16 %v2520_v57, %v2519_v46  ;;  %v2282_v4 = vmul.f32 0.5, %v9278_v58  ;;  %v2491_v16 = vadd.f32 1.0, %v9253_v9  ;;  %v7999_v33 = vpop.eup %7998  ;;  %v2506_v22 = vadd.f32 1.0, %v7997_v19  ;;  %v2559_v15 = vld [vmem:[#allocation7 + $0x90] sm:$0xff]  ;;  %v2562_v7 = vld [vmem:[#allocation7 + $0xa8] sm:$0xff]  ;;  %v2561_v30 = vld [vmem:[#allocation7 + $0xa0] sm:$0xff] }
 0x62c   : > { %7445 = vmatprep.subr.bf16.mxu1 %v7444_v37  ;;  %v2521_v10 = vmul.f32 %v2489_v42, %v2265_v25  ;;  %v2522_v31 = vmul.f32 %v2490_v26, %v9170_v11  ;;  %v2492_v53 = vadd.f32 1.0, %v9246_v3  ;;  %v7448_v32 = vpack.c.bf16 %v2536_v45, %v2535_v41  ;;  %v2564_v37 = vld [vmem:[#allocation7 + $0xb8] sm:$0xff]  ;;  %v2563_v5 = vld [vmem:[#allocation7 + $0xb0] sm:$0xff]  ;;  %v2566_v46 = vld [vmem:[#allocation7 + $0xc8] sm:$0xff] }
 0x62d   : > { %v2281_v27 = vmul.f32 0.5, %v9283_v38  ;;  %v2505_v6 = vadd.f32 1.0, %v7999_v33  ;;  %v2523_v17 = vmul.f32 %v2491_v16, %v2267_v14  ;;  %v2538_v39 = vmul.f32 %v2506_v22, %v2282_v4  ;;  %v2565_v57 = vld [vmem:[#allocation7 + $0xc0] sm:$0xff]  ;;  %v2568_v14 = vld [vmem:[#allocation7 + $0xd8] sm:$0xff]  ;;  %v2567_v45 = vld [vmem:[#allocation7 + $0xd0] sm:$0xff] }
 0x62e   : > { %v7454_v23 = vpack.c.bf16 %v2522_v31, %v2521_v10  ;;  %v2524_v13 = vmul.f32 %v2492_v53, %v2268_v48  ;;  %v8001_v1 = vpop.eup %8000  ;;  %v2284_v36 = vmul.f32 0.5, %v9292_v62  ;;  %v2283_v3 = vmul.f32 0.5, %v9296_v24  ;;  %v2546_v62 = vld [vmem:[#allocation7 + $0x28] sm:$0xff]  ;;  %v2547_v24 = vld [vmem:[#allocation7 + $0x30] sm:$0xff]  ;;  %v2553_v48 = vld [vmem:[#allocation7 + $0x60] sm:$0xff] }
 0x62f   : > { %7447 = vmatpush3.bf16.msra.mxu1 %v7446_v56  ;;  %v2537_v58 = vmul.f32 %v2505_v6, %v2281_v27  ;;  %v2508_v25 = vadd.f32 1.0, %v8001_v1  ;;  %v2560_v56 = vld [vmem:[#allocation7 + $0x98] sm:$0xff]  ;;  %v2570_v42 = vld [vmem:[#allocation7 + $0xe8] sm:$0xff]  ;;  %v2569_v26 = vld [vmem:[#allocation7 + $0xe0] sm:$0xff] }
 0x630   : > { %7449 = vmatprep.subr.bf16.mxu1 %v7448_v32  ;;  %v8003_v9 = vpop.eup %8002  ;;  %v7458_v59 = vpack.c.bf16 %v2524_v13, %v2523_v17  ;;  %v2572_v19 = vld [vmem:[#allocation7 + $0xf8] sm:$0xff]  ;;  %v2571_v41 = vld [vmem:[#allocation7 + $0xf0] sm:$0xff]  ;;  %v7856_v4 = vld [vmem:[%s12339_s7 + $0x20] sm:$0xff]  }
 0x631   : > { %v7452_v11 = vpack.c.bf16 %v2538_v39, %v2537_v58  ;;  %v2507_v34 = vadd.f32 1.0, %v8003_v9  ;;  %v2540_v38 = vmul.f32 %v2508_v25, %v2284_v36  ;;  %v7857_v16 = vld [vmem:[%s12339_s7 + $0x28] sm:$0xff]   ;;  %v7858_v33 = vld [vmem:[%s12339_s7 + $0x30] sm:$0xff]   ;;  %v7859_v22 = vld [vmem:[%s12339_s7 + $0x38] sm:$0xff]  }
 0x632   : > { %v7862_v10 = vld [vmem:[%s12340_s8 + $0x4] ss:$16 sps:$4 sm:$0xff]  }
 0x633   : > { %7451 = vmatpush3.bf16.msra.mxu1 %v7450_v28  ;;  %v2539_v21 = vmul.f32 %v2507_v34, %v2283_v3  ;;  %v7855_v28 = vld [vmem:[%s12339_s7 + $0x18] sm:$0xff]  }
 0x634   : > { %7453 = vmatprep.subr.bf16.mxu1 %v7452_v11  ;;  %7330 = vmatprep.subr.bf16.mxu0 %v7855_v28 }
 0x635   : > { %v7456_v40 = vpack.c.bf16 %v2540_v38, %v2539_v21  ;;  %7331 = vmatpush3.bf16.msra.mxu0 %v7855_v28  ;;  %v12479_v28 = vld [vmem:[#allocation19_spill] sm:$0xff] }
 0x636   : > { %7332 = vmatprep.subr.bf16.mxu0 %v7856_v4 }
 0x637   : > { %7455 = vmatpush3.bf16.msra.mxu1 %v7454_v23 }
 0x638   : > { %7457 = vmatprep.subr.bf16.mxu1 %v7456_v40  ;;  %v7865_v40 = vld [vmem:[%s12340_s8 + $0x24] ss:$16 sps:$4 sm:$0xff]  }
 0x639   : > { %7333 = vmatpush3.bf16.msra.mxu0 %v7856_v4 }
 0x63a   : > { %7334 = vmatprep.subr.bf16.mxu0 %v7857_v16 }
 0x63b   : > { %7459 = vmatpush3.bf16.msra.mxu1 %v7458_v59 }
 0x63d   : > { %7335 = vmatpush3.bf16.msra.mxu0 %v7857_v16 }
 0x63e   : > { %2638 = vmatmul.mubr.f32.vlgmr.msra.gmra.mrb[34].mxu1 %v2541_v29  ;;  %7336 = vmatprep.subr.bf16.mxu0 %v7858_v33 }
 0x63f   : > { %2642 = vmatprep.mubr.f32.mxu1 %v2544_v55 }
 0x641   : > { %7337 = vmatpush3.bf16.msra.mxu0 %v7858_v33 }
 0x642   : > { %2643 = vmatmul.mubr.f32.gmra.mrb[100].mxu1 %v2543_v54  ;;  %7338 = vmatprep.subr.bf16.mxu0 %v7859_v22 }
 0x643   : > { %2647 = vmatprep.mubr.f32.mxu1 %v2546_v62  ;;  %v7868_v62 = vld [vmem:[%s12340_s8 + $0x44] ss:$16 sps:$4 sm:$0xff]  }
 0x645   : > { %7339 = vmatpush3.bf16.msra.mxu0 %v7859_v22  ;;  %v7878_v22 = vld [vmem:[%s12340_s8 + $0xc0] ss:$16 sps:$4 sm:$0xff]  }
 0x646   : > { %2648 = vmatmul.mubr.f32.gmra.mrb[102].mxu1 %v2545_v44  ;;  %3320 = vmatprep.subr.bf16.mxu0 %v7862_v10 }
 0x647   : > { %2652 = vmatprep.mubr.f32.mxu1 %v2548_v0 }
 0x64a   : > { %2653 = vmatmul.mubr.f32.gmra.mrb[104].mxu1 %v2547_v24 }
 0x64b   : > { %2657 = vmatprep.mubr.f32.mxu1 %v2550_v20 }
 0x64e   : > { %2658 = vmatmul.mubr.f32.gmra.mrb[106].mxu1 %v2549_v18 }
 0x64f   : > { %2662 = vmatprep.mubr.f32.mxu1 %v2552_v61  ;;  %v7871_v61 = vld [vmem:[%s12340_s8 + $0x64] ss:$16 sps:$4 sm:$0xff]  }
 0x652   : > { %2663 = vmatmul.mubr.f32.gmra.mrb[108].mxu1 %v2551_v43  ;;  %v12476_v43 = vld [vmem:[#allocation14_spill] sm:$0xff] }
 0x653   : > { %2667 = vmatprep.mubr.f32.mxu1 %v2554_v2 }
 0x656   : > { %2668 = vmatmul.mubr.f32.gmra.mrb[110].mxu1 %v2553_v48 }
 0x657   : > { %2672 = vmatprep.mubr.f32.mxu1 %v2556_v52 }
 0x65a   : > { %2673 = vmatmul.mubr.f32.gmra.mrb[112].mxu1 %v2555_v12 }
 0x65b   : > { %2677 = vmatprep.mubr.f32.mxu1 %v2558_v35  ;;  %v7874_v35 = vld [vmem:[%s12340_s8 + $0x84] ss:$16 sps:$4 sm:$0xff]  }
 0x65e   : > { %2678 = vmatmul.mubr.f32.gmra.mrb[114].mxu1 %v2557_v8  ;;  %v12477_v8 = vld [vmem:[#allocation15_spill] sm:$0xff] }
 0x65f   : > { %2682 = vmatprep.mubr.f32.mxu1 %v2560_v56 }
 0x662   : > { %2683 = vmatmul.mubr.f32.gmra.mrb[116].mxu1 %v2559_v15 }
 0x663   : > { %2687 = vmatprep.mubr.f32.mxu1 %v2562_v7 }
 0x666   : > { %2688 = vmatmul.mubr.f32.gmra.mrb[118].mxu1 %v2561_v30  ;;  %v7872_v30 = vld [vmem:[%s12340_s8 + $0x80] ss:$16 sps:$4 sm:$0xff]  }
 0x667   : > { %2692 = vmatprep.mubr.f32.mxu1 %v2564_v37 }
 0x66a   : > { %2693 = vmatmul.mubr.f32.gmra.mrb[120].mxu1 %v2563_v5 }
 0x66b   : > { %2697 = vmatprep.mubr.f32.mxu1 %v2566_v46  ;;  %v7877_v46 = vld [vmem:[%s12340_s8 + $0xa4] ss:$16 sps:$4 sm:$0xff]  }
 0x66e   : > { %2698 = vmatmul.mubr.f32.gmra.mrb[122].mxu1 %v2565_v57  ;;  %v12478_v57 = vld [vmem:[#allocation17_spill] sm:$0xff] }
 0x66f   : > { %2702 = vmatprep.mubr.f32.mxu1 %v2568_v14 }
 0x672   : > { %2703 = vmatmul.mubr.f32.gmra.mrb[124].mxu1 %v2567_v45 }
 0x673   : > { %2707 = vmatprep.mubr.f32.mxu1 %v2570_v42 }
 0x676   : > { %2708 = vmatmul.mubr.f32.gmra.mrb[126].mxu1 %v2569_v26  ;;  %v7875_v26 = vld [vmem:[%s12340_s8 + $0xa0] ss:$16 sps:$4 sm:$0xff]  }
 0x677   : > { %2712 = vmatprep.mubr.f32.mxu1 %v2572_v19 }
 0x67a   : > { %2713 = vmatmul.mubr.f32.gmra.mrb[128].mxu1 %v2571_v41  ;;  %v7880_v41 = vld [vmem:[%s12340_s8 + $0xc4] ss:$16 sps:$4 sm:$0xff]  }
 0x711   : > { %v7052_v31 = vpop.f32.mrb[34].mxu1 }
 0x712   : > { %v7053_v53 = vpop.f32.mrb[35].mxu1 }
 0x713   : > { %v7054_v32 = vadd.f32 %v7053_v53, %v7052_v31  ;;  %v12480_v53 = vld [vmem:[#allocation16_spill] sm:$0xff] }
 0x715   : > { %v2640_v27 = vadd.f32 %v7054_v32, %v9048_v49  ;;  %v7055_v6 = vpop.f32.mrb[100].mxu1  ;;  %v7860_v49 = vld [vmem:[%s12340_s8] ss:$16 sps:$4 sm:$0xff]  }
 0x716   : > { %v7056_v17 = vpop.f32.mrb[101].mxu1 }
 0x717   : > { %v7057_v39 = vadd.f32 %v7056_v17, %v7055_v6 }
 0x719   : > { %v2645_v23 = vadd.f32 %v7057_v39, %v9052_v51  ;;  %v7058_v13 = vpop.f32.mrb[102].mxu1  ;;  %v12481_v39 = vld [vmem:[#allocation18_spill] sm:$0xff] }
 0x71a   : > { %v7059_v1 = vpop.f32.mrb[103].mxu1 }
 0x71b   : > { %v7060_v58 = vadd.f32 %v7059_v1, %v7058_v13  ;;  %v2718_v9 = vpack.c.bf16 %v2645_v23, %v2640_v27 }
 0x71d   : > { %v2650_v36 = vadd.f32 %v9046_v47, %v7060_v58  ;;  %v7061_v25 = vpop.f32.mrb[104].mxu1  ;;  %7340 = vmatprep.mubr.bf16.mxu0 %v2718_v9 }
 0x71e   : > { %v7062_v59 = vpop.f32.mrb[105].mxu1 }
 0x71f   : > { %v7063_v11 = vadd.f32 %v7062_v59, %v7061_v25 }
 0x721   : > { %v2655_v3 = vadd.f32 %v9050_v50, %v7063_v11  ;;  %v7064_v34 = vpop.f32.mrb[106].mxu1  ;;  %v7863_v50 = vld [vmem:[%s12340_s8 + $0x20] ss:$16 sps:$4 sm:$0xff]  }
 0x722   : > { %v7065_v38 = vpop.f32.mrb[107].mxu1 }
 0x723   : > { %v2719_v21 = vpack.c.bf16 %v2655_v3, %v2650_v36  ;;  %v7066_v51 = vadd.f32 %v7065_v38, %v7064_v34  ;;  %v12482_v36 = vld [vmem:[#allocation21_spill] sm:$0xff]  ;;  %v12483_v34 = vld [vmem:[#allocation23_spill] sm:$0xff] }
 0x725   : > { %v2660_v47 = vadd.f32 %v7066_v51, %v9056_v60  ;;  %v7067_v29 = vpop.f32.mrb[108].mxu1  ;;  %7341 = vmatmul.mubr.bf16.vlgmr.msra.gmra.mrb[128].mxu0 %v2719_v21  ;;  %v7866_v60 = vld [vmem:[%s12340_s8 + $0x40] ss:$16 sps:$4 sm:$0xff]  }
 0x726   : > { %v7068_v55 = vpop.f32.mrb[109].mxu1  ;;  %3321 = vmatpush1.bf16.msra.mxu0 %v7860_v49 }
 0x727   : > { %v7069_v54 = vadd.f32 %v7068_v55, %v7067_v29  ;;  %3322 = vmatprep.subr.bf16.mxu0 %v7865_v40 }
 0x729   : > { %v2665_v44 = vadd.f32 %v7069_v54, %v9060_v63  ;;  %v7070_v0 = vpop.f32.mrb[110].mxu1  ;;  %v7869_v63 = vld [vmem:[%s12340_s8 + $0x60] ss:$16 sps:$4 sm:$0xff]  }
 0x72a   : > { %v7071_v24 = vpop.f32.mrb[111].mxu1  ;;  %3323 = vmatpush1.bf16.msra.mxu0 %v7863_v50 }
 0x72b   : > { %v7072_v20 = vadd.f32 %v7071_v24, %v7070_v0  ;;  %v2720_v18 = vpack.c.bf16 %v2665_v44, %v2660_v47  ;;  %3324 = vmatprep.subr.bf16.mxu0 %v7868_v62  ;;  %v12484_v47 = vld [vmem:[#allocation20_spill] sm:$0xff]  ;;  %v12485_v62 = vld [vmem:[#allocation22_spill] sm:$0xff]  ;;  %v7881_v24 = vld [vmem:[%s12340_s8 + $0xe0] ss:$16 sps:$4 sm:$0xff]  }
 0x72d   : > { %v2670_v2 = vadd.f32 %v12476_v43, %v7072_v20  ;;  %v7073_v48 = vpop.f32.mrb[112].mxu1  ;;  %7344 = vmatprep.mubr.bf16.mxu0 %v2720_v18  ;;  %v8533_v20 = vmov 0  }
 0x72e   : > { %v7074_v52 = vpop.f32.mrb[113].mxu1  ;;  %3325 = vmatpush1.bf16.msra.mxu0 %v7866_v60  ;;  %v7883_v60 = vld [vmem:[%s12340_s8 + $0xe4] ss:$16 sps:$4 sm:$0xff]  }
 0x72f   : > { %v7075_v12 = vadd.f32 %v7074_v52, %v7073_v48  ;;  %3326 = vmatprep.subr.bf16.mxu0 %v7871_v61 }
 0x731   : > { %v2675_v56 = vadd.f32 %v12477_v8, %v7075_v12  ;;  %v7076_v15 = vpop.f32.mrb[114].mxu1 }
 0x732   : > { %v7077_v7 = vpop.f32.mrb[115].mxu1  ;;  %3327 = vmatpush1.bf16.msra.mxu0 %v7869_v63 }
 0x733   : > { %v7078_v37 = vadd.f32 %v7077_v7, %v7076_v15  ;;  %v2721_v5 = vpack.c.bf16 %v2675_v56, %v2670_v2  ;;  %3328 = vmatprep.subr.bf16.mxu0 %v7874_v35 }
 0x735   : > { %v2680_v14 = vadd.f32 %v7078_v37, %v12478_v57  ;;  %v7079_v45 = vpop.f32.mrb[116].mxu1  ;;  %7345 = vmatmul.mubr.bf16.gmra.mrb[132].mxu0 %v2721_v5 }
 0x736   : > { %v7080_v42 = vpop.f32.mrb[117].mxu1  ;;  %3329 = vmatpush1.bf16.msra.mxu0 %v7872_v30 }
 0x737   : > { %v7081_v19 = vadd.f32 %v7080_v42, %v7079_v45  ;;  %3330 = vmatprep.subr.bf16.mxu0 %v7877_v46  ;;  %v2936_v45 = vld [vmem:[%s12341_s9 + $0x8] sm:$0xff] }
 0x738   : > { %3031 = vmatprep.mubr.f32.mxu1 %v2936_v45  ;;  %v7890_v45 = vld [vmem:[%s12340_s8 + $0x48] ss:$16 sps:$4 sm:$0xff]  }
 0x739   : > { %v2685_v4 = vadd.f32 %v7081_v19, %v12479_v28  ;;  %v7082_v16 = vpop.f32.mrb[118].mxu1 }
 0x73a   : > { %v7083_v33 = vpop.f32.mrb[119].mxu1  ;;  %3331 = vmatpush1.bf16.msra.mxu0 %v7875_v26 }
 0x73b   : > { %v7084_v10 = vadd.f32 %v7083_v33, %v7082_v16  ;;  %v2722_v31 = vpack.c.bf16 %v2685_v4, %v2680_v14  ;;  %3332 = vmatprep.subr.bf16.mxu0 %v7880_v41  ;;  %v12486_v33 = vld [vmem:[#allocation13_spill] sm:$0xff] }
 0x73d   : > { %v2690_v32 = vadd.f32 %v12480_v53, %v7084_v10  ;;  %v7085_v27 = vpop.f32.mrb[120].mxu1  ;;  %7348 = vmatprep.mubr.bf16.mxu0 %v2722_v31 }
 0x73e   : > { %v7086_v6 = vpop.f32.mrb[121].mxu1  ;;  %3333 = vmatpush1.bf16.msra.mxu0 %v7878_v22 }
 0x73f   : > { %v7087_v17 = vadd.f32 %v7086_v6, %v7085_v27  ;;  %3334 = vmatprep.subr.bf16.mxu0 %v7883_v60 }
 0x741   : > { %v2695_v23 = vadd.f32 %v12481_v39, %v7087_v17  ;;  %v7088_v13 = vpop.f32.mrb[122].mxu1 }
 0x742   : > { %v7089_v1 = vpop.f32.mrb[123].mxu1  ;;  %3335 = vmatpush1.bf16.msra.mxu0 %v7881_v24 }
 0x743   : > { %v7090_v58 = vadd.f32 %v7089_v1, %v7088_v13  ;;  %v2723_v9 = vpack.c.bf16 %v2695_v23, %v2690_v32 }
 0x745   : > { %v2700_v25 = vadd.f32 %v7090_v58, %v12482_v36  ;;  %v7091_v59 = vpop.f32.mrb[124].mxu1  ;;  %7349 = vmatmul.mubr.bf16.gmra.mrb[136].mxu0 %v2723_v9 }
 0x746   : > { %v7092_v11 = vpop.f32.mrb[125].mxu1 }
 0x747   : > { %v7093_v3 = vadd.f32 %v7092_v11, %v7091_v59 }
 0x749   : > { %v2705_v38 = vadd.f32 %v7093_v3, %v12483_v34  ;;  %v7094_v49 = vpop.f32.mrb[126].mxu1 }
 0x74a   : > { %v7095_v21 = vpop.f32.mrb[127].mxu1 }
 0x74b   : > { %v7096_v51 = vadd.f32 %v7095_v21, %v7094_v49  ;;  %v2724_v40 = vpack.c.bf16 %v2705_v38, %v2700_v25 }
 0x74d   : > { %v2710_v29 = vadd.f32 %v12484_v47, %v7096_v51  ;;  %v7097_v55 = vpop.f32.mrb[128].mxu1  ;;  %7352 = vmatprep.mubr.bf16.mxu0 %v2724_v40 }
 0x74e   : > { %v7098_v50 = vpop.f32.mrb[129].mxu1 }
 0x74f   : > { %v7099_v54 = vadd.f32 %v7098_v50, %v7097_v55 }
 0x751   : > { %v2715_v44 = vadd.f32 %v12485_v62, %v7099_v54 }
 0x753   : > { %v2725_v0 = vpack.c.bf16 %v2715_v44, %v2710_v29 }
 0x755   : > { %7353 = vmatmul.mubr.bf16.gmra.mrb[140].mxu0 %v2725_v0 }
 0x756   : > { %3352 = vmatprep.mubr.bf16.mxu0 %v8533_v20 }
 0x7f8   : > { %v7342_v18 = vpop.f32.mrb[128].mxu0 }
 0x7f9   : > { %v2824_v61 = vpop.f32.mrb[129].mxu0 }
 0x7fa   : > { %2887 = vrot.lane.b32.xlu0 %v2824_v61, %s8531_s20  ;;  %v7343_v43 = vpop.f32.mrb[130].mxu0 }
 0x7fb   : > { %v9430_v2 = vpack.c.bf16 %v7343_v43, %v7342_v18  ;;  %v2827_v48 = vpop.f32.mrb[131].mxu0 }
 0x7fc   : > { %v9432_v52 = vpack.c.bf16 %v2827_v48, %v2824_v61  ;;  %2889 = vrot.lane.b32.xlu1 %v2827_v48, %s8531_s20  ;;  %v7886_v48 = vld [vmem:[%s12340_s8 + $0xc] ss:$16 sps:$4 sm:$0xff]  }
 0x7fe   : > { %2891 = vrot.lane.b32.xlu0 %v7342_v18, %s8531_s20  ;;  %3353 = vmatmul.mubr.bf16.vlgmr.msra.gmra.mrb[144].mxu0 %v9432_v52 }
 0x7ff   : > { %3362 = vmatprep.mubr.bf16.mxu0 %v8533_v20 }
 0x800   : > { %2893 = vrot.lane.b32.xlu1 %v7343_v43, %s8531_s20 }
 0x806   : > { %3363 = vmatmul.mubr.bf16.gmra.mrb[148].mxu0 %v9430_v2 }
 0x807   : > { %3372 = vmatprep.mubr.bf16.mxu0 %v8533_v20 }
 0x808   : > { %v7346_v63 = vpop.f32.mrb[132].mxu0 }
 0x809   : > { %v2840_v12 = vpop.f32.mrb[133].mxu0 }
 0x80a   : > { %2895 = vrot.lane.b32.xlu0 %v2840_v12, %s8531_s20  ;;  %v7347_v35 = vpop.f32.mrb[134].mxu0 }
 0x80b   : > { %v9442_v8 = vpack.c.bf16 %v7347_v35, %v7346_v63  ;;  %v2843_v56 = vpop.f32.mrb[135].mxu0 }
 0x80c   : > { %v9444_v15 = vpack.c.bf16 %v2843_v56, %v2840_v12  ;;  %2897 = vrot.lane.b32.xlu1 %v2843_v56, %s8531_s20  ;;  %v7884_v12 = vld [vmem:[%s12340_s8 + $0x8] ss:$16 sps:$4 sm:$0xff]   ;;  %v7889_v56 = vld [vmem:[%s12340_s8 + $0x2c] ss:$16 sps:$4 sm:$0xff]  }
 0x80e   : > { %2899 = vrot.lane.b32.xlu0 %v7346_v63, %s8531_s20  ;;  %3373 = vmatmul.mubr.bf16.gmra.mrb[152].mxu0 %v9444_v15  ;;  %v2935_v63 = vld [vmem:[%s12341_s9] sm:$0xff] }
 0x80f   : > { %3382 = vmatprep.mubr.bf16.mxu0 %v8533_v20 }
 0x810   : > { %2901 = vrot.lane.b32.xlu1 %v7347_v35, %s8531_s20  ;;  %v2938_v35 = vld [vmem:[%s12341_s9 + $0x18] sm:$0xff] }
 0x816   : > { %3383 = vmatmul.mubr.bf16.gmra.mrb[156].mxu0 %v9442_v8 }
 0x817   : > { %3392 = vmatprep.mubr.bf16.mxu0 %v8533_v20 }
 0x818   : > { %v7350_v7 = vpop.f32.mrb[136].mxu0 }
 0x819   : > { %v2856_v30 = vpop.f32.mrb[137].mxu0 }
 0x81a   : > { %2903 = vrot.lane.b32.xlu0 %v2856_v30, %s8531_s20  ;;  %v7351_v37 = vpop.f32.mrb[138].mxu0 }
 0x81b   : > { %v9454_v5 = vpack.c.bf16 %v7351_v37, %v7350_v7  ;;  %v2859_v46 = vpop.f32.mrb[139].mxu0 }
 0x81c   : > { %v9456_v57 = vpack.c.bf16 %v2859_v46, %v2856_v30  ;;  %2905 = vrot.lane.b32.xlu1 %v2859_v46, %s8531_s20  ;;  %v7887_v30 = vld [vmem:[%s12340_s8 + $0x28] ss:$16 sps:$4 sm:$0xff]   ;;  %v7892_v46 = vld [vmem:[%s12340_s8 + $0x4c] ss:$16 sps:$4 sm:$0xff]  }
 0x81e   : > { %2907 = vrot.lane.b32.xlu0 %v7350_v7, %s8531_s20  ;;  %3393 = vmatmul.mubr.bf16.gmra.mrb[160].mxu0 %v9456_v57  ;;  %v2937_v7 = vld [vmem:[%s12341_s9 + $0x10] sm:$0xff] }
 0x81f   : > { %3402 = vmatprep.mubr.bf16.mxu0 %v8533_v20 }
 0x820   : > { %2909 = vrot.lane.b32.xlu1 %v7351_v37, %s8531_s20  ;;  %v2940_v37 = vld [vmem:[%s12341_s9 + $0x28] sm:$0xff] }
 0x826   : > { %3403 = vmatmul.mubr.bf16.gmra.mrb[164].mxu0 %v9454_v5 }
 0x827   : > { %3412 = vmatprep.mubr.bf16.mxu0 %v8533_v20 }
 0x828   : > { %v7354_v14 = vpop.f32.mrb[140].mxu0 }
 0x829   : > { %v2872_v42 = vpop.f32.mrb[141].mxu0 }
 0x82a   : > { %2911 = vrot.lane.b32.xlu0 %v2872_v42, %s8531_s20  ;;  %v7355_v26 = vpop.f32.mrb[142].mxu0 }
 0x82b   : > { %v9469_v19 = vpack.c.bf16 %v7355_v26, %v7354_v14  ;;  %v2875_v41 = vpop.f32.mrb[143].mxu0 }
 0x82c   : > { %v9471_v28 = vpack.c.bf16 %v2875_v41, %v2872_v42  ;;  %2913 = vrot.lane.b32.xlu1 %v2875_v41, %s8531_s20  ;;  %v2942_v42 = vld [vmem:[%s12341_s9 + $0x38] sm:$0xff]  ;;  %v2941_v41 = vld [vmem:[%s12341_s9 + $0x30] sm:$0xff] }
 0x82e   : > { %2915 = vrot.lane.b32.xlu0 %v7354_v14, %s8531_s20  ;;  %3413 = vmatmul.mubr.bf16.gmra.mrb[168].mxu0 %v9471_v28  ;;  %v2939_v14 = vld [vmem:[%s12341_s9 + $0x20] sm:$0xff] }
 0x82f   : > { %3422 = vmatprep.mubr.bf16.mxu0 %v8533_v20 }
 0x830   : > { %2917 = vrot.lane.b32.xlu1 %v7355_v26, %s8531_s20  ;;  %v7895_v26 = vld [vmem:[%s12340_s8 + $0x6c] ss:$16 sps:$4 sm:$0xff]  }
 0x836   : > { %3423 = vmatmul.mubr.bf16.gmra.mrb[172].mxu0 %v9469_v19 }
 0x837   : > { %3432 = vmatprep.mubr.bf16.mxu0 %v8533_v20 }
 0x86c   : > { %v2888_v4 = vpop.permute.xlu0 %2887 }
 0x86d   : > { %v2919_v22 = vmul.f32 %v2888_v4, %v12486_v33  ;;  %v7893_v4 = vld [vmem:[%s12340_s8 + $0x68] ss:$16 sps:$4 sm:$0xff]  }
 0x86e   : > { %v2890_v16 = vpop.permute.xlu1 %2889 }
 0x86f   : > { %v2920_v10 = vmul.f32 %v2890_v16, %v12486_v33  ;;  %v2944_v16 = vld [vmem:[%s12341_s9 + $0x48] sm:$0xff] }
 0x870   : > { %v2892_v31 = vpop.permute.xlu0 %2891 }
 0x871   : > { %v7460_v53 = vpack.c.bf16 %v2920_v10, %v2919_v22  ;;  %v2921_v27 = vmul.f32 %v2892_v31, %v12486_v33  ;;  %v2943_v22 = vld [vmem:[%s12341_s9 + $0x40] sm:$0xff]  ;;  %v7896_v10 = vld [vmem:[%s12340_s8 + $0x88] ss:$16 sps:$4 sm:$0xff]  }
 0x872   : > { %v2894_v32 = vpop.permute.xlu1 %2893  ;;  %v2946_v31 = vld [vmem:[%s12341_s9 + $0x58] sm:$0xff] }
 0x873   : > { %v2922_v6 = vmul.f32 %v2894_v32, %v12486_v33  ;;  %7461 = vmatprep.subr.bf16.mxu1 %v7460_v53  ;;  %v7901_v53 = vld [vmem:[%s12340_s8 + $0xac] ss:$16 sps:$4 sm:$0xff]   ;;  %v2945_v32 = vld [vmem:[%s12341_s9 + $0x50] sm:$0xff] }
 0x874   : > { %7463 = vmatpush3.bf16.msra.mxu1 %v9432_v52 }
 0x875   : > { %v7464_v17 = vpack.c.bf16 %v2922_v6, %v2921_v27  ;;  %v7899_v27 = vld [vmem:[%s12340_s8 + $0xa8] ss:$16 sps:$4 sm:$0xff]  }
 0x876   : > { %v2948_v6 = vld [vmem:[%s12341_s9 + $0x68] sm:$0xff] }
 0x877   : > { %7465 = vmatprep.subr.bf16.mxu1 %v7464_v17  ;;  %v7904_v17 = vld [vmem:[%s12340_s8 + $0xcc] ss:$16 sps:$4 sm:$0xff]  }
 0x878   : > { %7467 = vmatpush3.bf16.msra.mxu1 %v9430_v2 }
 0x87c   : > { %v2896_v39 = vpop.permute.xlu0 %2895 }
 0x87d   : > { %v2923_v13 = vmul.f32 %v2896_v39, %v12486_v33  ;;  %v2947_v39 = vld [vmem:[%s12341_s9 + $0x60] sm:$0xff] }
 0x87e   : > { %v2898_v23 = vpop.permute.xlu1 %2897 }
 0x87f   : > { %v2924_v1 = vmul.f32 %v2898_v23, %v12486_v33  ;;  %v7902_v23 = vld [vmem:[%s12340_s8 + $0xc8] ss:$16 sps:$4 sm:$0xff]  }
 0x880   : > { %v2900_v58 = vpop.permute.xlu0 %2899 }
 0x881   : > { %v7468_v9 = vpack.c.bf16 %v2924_v1, %v2923_v13  ;;  %v2925_v25 = vmul.f32 %v2900_v58, %v12486_v33  ;;  %v2950_v13 = vld [vmem:[%s12341_s9 + $0x78] sm:$0xff]  ;;  %v2949_v58 = vld [vmem:[%s12341_s9 + $0x70] sm:$0xff] }
 0x882   : > { %v2902_v36 = vpop.permute.xlu1 %2901  ;;  %v7907_v1 = vld [vmem:[%s12340_s8 + $0xec] ss:$16 sps:$4 sm:$0xff]  }
 0x883   : > { %v2926_v59 = vmul.f32 %v2902_v36, %v12486_v33  ;;  %7469 = vmatprep.subr.bf16.mxu1 %v7468_v9  ;;  %v7905_v9 = vld [vmem:[%s12340_s8 + $0xe8] ss:$16 sps:$4 sm:$0xff]  }
 0x884   : > { %7471 = vmatpush3.bf16.msra.mxu1 %v9444_v15  ;;  %v2952_v36 = vld [vmem:[%s12341_s9 + $0x88] sm:$0xff] }
 0x885   : > { %v7472_v11 = vpack.c.bf16 %v2926_v59, %v2925_v25  ;;  %v2951_v25 = vld [vmem:[%s12341_s9 + $0x80] sm:$0xff]  ;;  %v2954_v59 = vld [vmem:[%s12341_s9 + $0x98] sm:$0xff] }
 0x887   : > { %7473 = vmatprep.subr.bf16.mxu1 %v7472_v11  ;;  %v2953_v11 = vld [vmem:[%s12341_s9 + $0x90] sm:$0xff] }
 0x888   : > { %7475 = vmatpush3.bf16.msra.mxu1 %v9442_v8 }
 0x88c   : > { %v2904_v3 = vpop.permute.xlu0 %2903 }
 0x88d   : > { %v2927_v38 = vmul.f32 %v2904_v3, %v12486_v33  ;;  %v2956_v3 = vld [vmem:[%s12341_s9 + $0xa8] sm:$0xff] }
 0x88e   : > { %v2906_v34 = vpop.permute.xlu1 %2905 }
 0x88f   : > { %v2928_v49 = vmul.f32 %v2906_v34, %v12486_v33  ;;  %v2955_v34 = vld [vmem:[%s12341_s9 + $0xa0] sm:$0xff] }
 0x890   : > { %v2908_v21 = vpop.permute.xlu0 %2907 }
 0x891   : > { %v7476_v51 = vpack.c.bf16 %v2928_v49, %v2927_v38  ;;  %v2929_v47 = vmul.f32 %v2908_v21, %v12486_v33  ;;  %v2958_v49 = vld [vmem:[%s12341_s9 + $0xb8] sm:$0xff] }
 0x892   : > { %v2910_v40 = vpop.permute.xlu1 %2909 }
 0x893   : > { %v2930_v29 = vmul.f32 %v2910_v40, %v12486_v33  ;;  %7477 = vmatprep.subr.bf16.mxu1 %v7476_v51 }
 0x894   : > { %7479 = vmatpush3.bf16.msra.mxu1 %v9456_v57 }
 0x895   : > { %v7480_v55 = vpack.c.bf16 %v2930_v29, %v2929_v47  ;;  %v2957_v47 = vld [vmem:[%s12341_s9 + $0xb0] sm:$0xff]  ;;  %v2960_v29 = vld [vmem:[%s12341_s9 + $0xc8] sm:$0xff] }
 0x897   : > { %7481 = vmatprep.subr.bf16.mxu1 %v7480_v55  ;;  %v2959_v55 = vld [vmem:[%s12341_s9 + $0xc0] sm:$0xff] }
 0x898   : > { %7483 = vmatpush3.bf16.msra.mxu1 %v9454_v5 }
 0x89c   : > { %v2912_v50 = vpop.permute.xlu0 %2911 }
 0x89d   : > { %v2931_v62 = vmul.f32 %v2912_v50, %v12486_v33 }
 0x89e   : > { %v2914_v54 = vpop.permute.xlu1 %2913 }
 0x89f   : > { %v2932_v44 = vmul.f32 %v2914_v54, %v12486_v33  ;;  %v2962_v54 = vld [vmem:[%s12341_s9 + $0xd8] sm:$0xff] }
 0x8a0   : > { %v2916_v0 = vpop.permute.xlu0 %2915 }
 0x8a1   : > { %v7484_v24 = vpack.c.bf16 %v2932_v44, %v2931_v62  ;;  %v2933_v18 = vmul.f32 %v2916_v0, %v12486_v33 }
 0x8a2   : > { %v2918_v60 = vpop.permute.xlu1 %2917 }
 0x8a3   : > { %v2934_v61 = vmul.f32 %v2918_v60, %v12486_v33  ;;  %7485 = vmatprep.subr.bf16.mxu1 %v7484_v24  ;;  %v7898_v33 = vld [vmem:[%s12340_s8 + $0x8c] ss:$16 sps:$4 sm:$0xff]   ;;  %v2961_v24 = vld [vmem:[%s12341_s9 + $0xd0] sm:$0xff] }
 0x8a4   : > { %7487 = vmatpush3.bf16.msra.mxu1 %v9471_v28  ;;  %v2964_v60 = vld [vmem:[%s12341_s9 + $0xe8] sm:$0xff] }
 0x8a5   : > { %v7488_v43 = vpack.c.bf16 %v2934_v61, %v2933_v18  ;;  %v2963_v18 = vld [vmem:[%s12341_s9 + $0xe0] sm:$0xff] }
 0x8a7   : > { %7489 = vmatprep.subr.bf16.mxu1 %v7488_v43  ;;  %v2966_v43 = vld [vmem:[%s12341_s9 + $0xf8] sm:$0xff] }
 0x8a8   : > { %7491 = vmatpush3.bf16.msra.mxu1 %v9469_v19 }
 0x8a9   : > { %3513 = vmatprep.subr.bf16.mxu1 %v7886_v48 }
 0x8ab   : > { %3032 = vmatmul.mubr.f32.vlgmr.msra.gmra.mrb[130].mxu1 %v2935_v63 }
 0x8ac   : > { %3036 = vmatprep.mubr.f32.mxu1 %v2938_v35  ;;  %3514 = vmatpush1.bf16.msra.mxu1 %v7884_v12  ;;  %v2965_v35 = vld [vmem:[%s12341_s9 + $0xf0] sm:$0xff] }
 0x8ad   : > { %3515 = vmatprep.subr.bf16.mxu1 %v7889_v56 }
 0x8af   : > { %3037 = vmatmul.mubr.f32.gmra.mrb[132].mxu1 %v2937_v7 }
 0x8b0   : > { %3041 = vmatprep.mubr.f32.mxu1 %v2940_v37  ;;  %3516 = vmatpush1.bf16.msra.mxu1 %v7887_v30 }
 0x8b1   : > { %3517 = vmatprep.subr.bf16.mxu1 %v7892_v46 }
 0x8b3   : > { %3042 = vmatmul.mubr.f32.gmra.mrb[134].mxu1 %v2939_v14 }
 0x8b4   : > { %3046 = vmatprep.mubr.f32.mxu1 %v2942_v42  ;;  %3518 = vmatpush1.bf16.msra.mxu1 %v7890_v45 }
 0x8b5   : > { %3519 = vmatprep.subr.bf16.mxu1 %v7895_v26 }
 0x8b7   : > { %3047 = vmatmul.mubr.f32.gmra.mrb[136].mxu1 %v2941_v41 }
 0x8b8   : > { %3051 = vmatprep.mubr.f32.mxu1 %v2944_v16  ;;  %3520 = vmatpush1.bf16.msra.mxu1 %v7893_v4 }
 0x8b9   : > { %3521 = vmatprep.subr.bf16.mxu1 %v7898_v33 }
 0x8bb   : > { %3052 = vmatmul.mubr.f32.gmra.mrb[138].mxu1 %v2943_v22 }
 0x8bc   : > { %3056 = vmatprep.mubr.f32.mxu1 %v2946_v31  ;;  %3522 = vmatpush1.bf16.msra.mxu1 %v7896_v10 }
 0x8bd   : > { %3523 = vmatprep.subr.bf16.mxu1 %v7901_v53 }
 0x8bf   : > { %3057 = vmatmul.mubr.f32.gmra.mrb[140].mxu1 %v2945_v32 }
 0x8c0   : > { %3061 = vmatprep.mubr.f32.mxu1 %v2948_v6  ;;  %3524 = vmatpush1.bf16.msra.mxu1 %v7899_v27 }
 0x8c1   : > { %3525 = vmatprep.subr.bf16.mxu1 %v7904_v17 }
 0x8c3   : > { %3062 = vmatmul.mubr.f32.gmra.mrb[142].mxu1 %v2947_v39 }
 0x8c4   : > { %3066 = vmatprep.mubr.f32.mxu1 %v2950_v13  ;;  %3526 = vmatpush1.bf16.msra.mxu1 %v7902_v23 }
 0x8c5   : > { %3527 = vmatprep.subr.bf16.mxu1 %v7907_v1 }
 0x8c7   : > { %3067 = vmatmul.mubr.f32.gmra.mrb[144].mxu1 %v2949_v58 }
 0x8c8   : > { %3071 = vmatprep.mubr.f32.mxu1 %v2952_v36  ;;  %3528 = vmatpush1.bf16.msra.mxu1 %v7905_v9 }
 0x8cb   : > { %3072 = vmatmul.mubr.f32.gmra.mrb[146].mxu1 %v2951_v25 }
 0x8cc   : > { %3076 = vmatprep.mubr.f32.mxu1 %v2954_v59 }
 0x8cf   : > { %3077 = vmatmul.mubr.f32.gmra.mrb[148].mxu1 %v2953_v11 }
 0x8d0   : > { %3081 = vmatprep.mubr.f32.mxu1 %v2956_v3 }
 0x8d1   : > { %v9615_v38 = vpop.f32.mrb[144].mxu0 }
 0x8d2   : > { %12487 = vst [vmem:[#allocation14_spill] sm:$0xff] %v9615_v38  ;;  %v9620_v21 = vpop.f32.mrb[145].mxu0 }
 0x8d3   : > { %12488 = vst [vmem:[#allocation15_spill] sm:$0xff] %v9620_v21  ;;  %3082 = vmatmul.mubr.f32.gmra.mrb[150].mxu1 %v2955_v34  ;;  %v9622_v51 = vpop.f32.mrb[146].mxu0 }
 0x8d4   : > { %12489 = vst [vmem:[#allocation17_spill] sm:$0xff] %v9622_v51  ;;  %v9624_v40 = vpop.f32.mrb[147].mxu0  ;;  %3086 = vmatprep.mubr.f32.mxu1 %v2958_v49 }
 0x8d5   : > { %12490 = vst [vmem:[#allocation19_spill] sm:$0xff] %v9624_v40 }
 0x8d7   : > { %3087 = vmatmul.mubr.f32.gmra.mrb[152].mxu1 %v2957_v47 }
 0x8d8   : > { %3091 = vmatprep.mubr.f32.mxu1 %v2960_v29 }
 0x8d9   : > { %v9635_v50 = vpop.f32.mrb[148].mxu0 }
 0x8da   : > { %12491 = vst [vmem:[#allocation16_spill] sm:$0xff] %v9635_v50  ;;  %v9640_v62 = vpop.f32.mrb[149].mxu0 }
 0x8db   : > { %12492 = vst [vmem:[#allocation18_spill] sm:$0xff] %v9640_v62  ;;  %3092 = vmatmul.mubr.f32.gmra.mrb[154].mxu1 %v2959_v55  ;;  %v9642_v44 = vpop.f32.mrb[150].mxu0 }
 0x8dc   : > { %12493 = vst [vmem:[#allocation21_spill] sm:$0xff] %v9642_v44  ;;  %v9644_v0 = vpop.f32.mrb[151].mxu0  ;;  %3096 = vmatprep.mubr.f32.mxu1 %v2962_v54 }
 0x8dd   : > { %12494 = vst [vmem:[#allocation23_spill] sm:$0xff] %v9644_v0 }
 0x8df   : > { %3097 = vmatmul.mubr.f32.gmra.mrb[156].mxu1 %v2961_v24 }
 0x8e0   : > { %3101 = vmatprep.mubr.f32.mxu1 %v2964_v60 }
 0x8e1   : > { %v9655_v61 = vpop.f32.mrb[152].mxu0 }
 0x8e2   : > { %12495 = vst [vmem:[#allocation20_spill] sm:$0xff] %v9655_v61  ;;  %v9660_v48 = vpop.f32.mrb[153].mxu0 }
 0x8e3   : > { %12496 = vst [vmem:[#allocation22_spill] sm:$0xff] %v9660_v48  ;;  %3102 = vmatmul.mubr.f32.gmra.mrb[158].mxu1 %v2963_v18  ;;  %v9662_v63 = vpop.f32.mrb[154].mxu0 }
 0x8e4   : > { %12497 = vst [vmem:[#allocation13_spill] sm:$0xff] %v9662_v63  ;;  %v9664_v12 = vpop.f32.mrb[155].mxu0  ;;  %3106 = vmatprep.mubr.f32.mxu1 %v2966_v43 }
 0x8e5   : > { %12498 = vst [vmem:[#allocation24_spill] sm:$0xff] %v9664_v12 }
 0x8e7   : > { %3107 = vmatmul.mubr.f32.gmra.mrb[160].mxu1 %v2965_v35 }
 0x8e8   : > { %3545 = vmatprep.mubr.bf16.mxu1 %v8533_v20 }
 0x8e9   : > { %v9670_v56 = vpop.f32.mrb[156].mxu0 }
 0x8ea   : > { %12499 = vst [vmem:[#allocation25_spill] sm:$0xff] %v9670_v56  ;;  %v9672_v7 = vpop.f32.mrb[157].mxu0 }
 0x8eb   : > { %12500 = vst [vmem:[#allocation26_spill] sm:$0xff] %v9672_v7  ;;  %v9674_v30 = vpop.f32.mrb[158].mxu0  ;;  %3546 = vmatmul.mubr.bf16.vlgmr.msra.gmra.mrb[164].mxu1 %v9432_v52 }
 0x8ec   : > { %12501 = vst [vmem:[#allocation27_spill] sm:$0xff] %v9674_v30  ;;  %v9677_v37 = vpop.f32.mrb[159].mxu0  ;;  %3555 = vmatprep.mubr.bf16.mxu1 %v8533_v20 }
 0x8ed   : > { %12502 = vst [vmem:[#allocation28_spill] sm:$0xff] %v9677_v37 }
 0x8f1   : > { %v9680_v46 = vpop.f32.mrb[160].mxu0 }
 0x8f2   : > { %12503 = vst [vmem:[#allocation29_spill] sm:$0xff] %v9680_v46  ;;  %v9682_v14 = vpop.f32.mrb[161].mxu0 }
 0x8f3   : > { %12504 = vst [vmem:[#allocation30_spill] sm:$0xff] %v9682_v14  ;;  %v9684_v45 = vpop.f32.mrb[162].mxu0  ;;  %3556 = vmatmul.mubr.bf16.gmra.mrb[168].mxu1 %v9430_v2 }
 0x8f4   : > { %12505 = vst [vmem:[#allocation31_spill] sm:$0xff] %v9684_v45  ;;  %v9687_v42 = vpop.f32.mrb[163].mxu0  ;;  %3565 = vmatprep.mubr.bf16.mxu1 %v8533_v20 }
 0x8f5   : > { %12506 = vst [vmem:[#allocation32_spill] sm:$0xff] %v9687_v42 }
 0x8f9   : > { %v9690_v26 = vpop.f32.mrb[164].mxu0 }
 0x8fa   : > { %12507 = vst [vmem:[#allocation33_spill] sm:$0xff] %v9690_v26  ;;  %v9692_v41 = vpop.f32.mrb[165].mxu0 }
 0x8fb   : > { %12508 = vst [vmem:[#allocation34_spill] sm:$0xff] %v9692_v41  ;;  %v9694_v52 = vpop.f32.mrb[166].mxu0  ;;  %3566 = vmatmul.mubr.bf16.gmra.mrb[172].mxu1 %v9444_v15 }
 0x8fc   : > { %12509 = vst [vmem:[#allocation35_spill] sm:$0xff] %v9694_v52  ;;  %v9697_v4 = vpop.f32.mrb[167].mxu0  ;;  %3575 = vmatprep.mubr.bf16.mxu1 %v8533_v20 }
 0x8fd   : > { %12510 = vst [vmem:[#allocation36_spill] sm:$0xff] %v9697_v4 }
 0x901   : > { %v9700_v16 = vpop.f32.mrb[168].mxu0 }
 0x902   : > { %12511 = vst [vmem:[#allocation37_spill] sm:$0xff] %v9700_v16  ;;  %v9702_v33 = vpop.f32.mrb[169].mxu0 }
 0x903   : > { %12512 = vst [vmem:[#allocation38_spill] sm:$0xff] %v9702_v33  ;;  %v9704_v2 = vpop.f32.mrb[170].mxu0  ;;  %3576 = vmatmul.mubr.bf16.gmra.mrb[176].mxu1 %v9442_v8 }
 0x904   : > { %12513 = vst [vmem:[#allocation39_spill] sm:$0xff] %v9704_v2  ;;  %v9707_v22 = vpop.f32.mrb[171].mxu0  ;;  %3585 = vmatprep.mubr.bf16.mxu1 %v8533_v20 }
 0x905   : > { %12514 = vst [vmem:[#allocation40_spill] sm:$0xff] %v9707_v22 }
 0x909   : > { %v9710_v10 = vpop.f32.mrb[172].mxu0 }
 0x90a   : > { %12515 = vst [vmem:[#allocation41_spill] sm:$0xff] %v9710_v10  ;;  %v9712_v31 = vpop.f32.mrb[173].mxu0 }
 0x90b   : > { %12516 = vst [vmem:[#allocation42_spill] sm:$0xff] %v9712_v31  ;;  %v9714_v15 = vpop.f32.mrb[174].mxu0  ;;  %3586 = vmatmul.mubr.bf16.gmra.mrb[180].mxu1 %v9456_v57 }
 0x90c   : > { %12517 = vst [vmem:[#allocation43_spill] sm:$0xff] %v9714_v15  ;;  %v9717_v53 = vpop.f32.mrb[175].mxu0  ;;  %3595 = vmatprep.mubr.bf16.mxu1 %v8533_v20 }
 0x90d   : > { %12518 = vst [vmem:[#allocation44_spill] sm:$0xff] %v9717_v53 }
 0x913   : > { %3596 = vmatmul.mubr.bf16.gmra.mrb[184].mxu1 %v9454_v5 }
 0x914   : > { %3605 = vmatprep.mubr.bf16.mxu1 %v8533_v20 }
 0x91b   : > { %3606 = vmatmul.mubr.bf16.gmra.mrb[188].mxu1 %v9471_v28 }
 0x91c   : > { %3615 = vmatprep.mubr.bf16.mxu1 %v8533_v20 }
 0x923   : > { %3616 = vmatmul.mubr.bf16.gmra.mrb[192].mxu1 %v9469_v19 }
 0x924   : > { %3625 = vmatprep.mubr.bf16.mxu1 %v8533_v20 }
 0x97e   : > { %v7148_v8 = vpop.f32.mrb[130].mxu1 }
 0x97f   : > { %v7149_v32 = vpop.f32.mrb[131].mxu1 }
 0x980   : > { %v7150_v27 = vadd.f32 %v7149_v32, %v7148_v8 }
 0x982   : > { %v7151_v57 = vpop.f32.mrb[132].mxu1 }
 0x983   : > { %v7152_v6 = vpop.f32.mrb[133].mxu1 }
 0x984   : > { %v7153_v17 = vadd.f32 %v7152_v6, %v7151_v57 }
 0x986   : > { %v3120_v39 = vpack.c.bf16 %v7153_v17, %v7150_v27  ;;  %v7154_v23 = vpop.f32.mrb[134].mxu1 }
 0x987   : > { %v7155_v13 = vpop.f32.mrb[135].mxu1 }
 0x988   : > { %3433 = vmatmul.mubr.bf16.gmra.mrb[176].mxu0 %v3120_v39  ;;  %3626 = vmatmul.mubr.bf16.gmra.mrb[196].mxu1 %v3120_v39  ;;  %v7156_v5 = vadd.f32 %v7155_v13, %v7154_v23 }
 0x989   : > { %3442 = vmatprep.mubr.bf16.mxu0 %v8533_v20  ;;  %3635 = vmatprep.mubr.bf16.mxu1 %v8533_v20 }
 0x98a   : > { %v7157_v28 = vpop.f32.mrb[136].mxu1 }
 0x98b   : > { %v7158_v19 = vpop.f32.mrb[137].mxu1 }
 0x98c   : > { %v7159_v1 = vadd.f32 %v7158_v19, %v7157_v28 }
 0x98e   : > { %v3121_v58 = vpack.c.bf16 %v7159_v1, %v7156_v5  ;;  %v7160_v9 = vpop.f32.mrb[138].mxu1 }
 0x98f   : > { %v7161_v36 = vpop.f32.mrb[139].mxu1 }
 0x990   : > { %3443 = vmatmul.mubr.bf16.gmra.mrb[180].mxu0 %v3121_v58  ;;  %3636 = vmatmul.mubr.bf16.gmra.mrb[200].mxu1 %v3121_v58  ;;  %v7162_v25 = vadd.f32 %v7161_v36, %v7160_v9 }
 0x991   : > { %3452 = vmatprep.mubr.bf16.mxu0 %v8533_v20  ;;  %3645 = vmatprep.mubr.bf16.mxu1 %v8533_v20 }
 0x992   : > { %v7163_v59 = vpop.f32.mrb[140].mxu1 }
 0x993   : > { %v7164_v11 = vpop.f32.mrb[141].mxu1 }
 0x994   : > { %v7165_v3 = vadd.f32 %v7164_v11, %v7163_v59 }
 0x996   : > { %v3122_v34 = vpack.c.bf16 %v7165_v3, %v7162_v25  ;;  %v7166_v49 = vpop.f32.mrb[142].mxu1 }
 0x997   : > { %v7167_v47 = vpop.f32.mrb[143].mxu1 }
 0x998   : > { %3453 = vmatmul.mubr.bf16.gmra.mrb[184].mxu0 %v3122_v34  ;;  %3646 = vmatmul.mubr.bf16.gmra.mrb[204].mxu1 %v3122_v34  ;;  %v7168_v29 = vadd.f32 %v7167_v47, %v7166_v49 }
 0x999   : > { %3462 = vmatprep.mubr.bf16.mxu0 %v8533_v20  ;;  %3655 = vmatprep.mubr.bf16.mxu1 %v8533_v20 }
 0x99a   : > { %v7169_v55 = vpop.f32.mrb[144].mxu1 }
 0x99b   : > { %v7170_v54 = vpop.f32.mrb[145].mxu1 }
 0x99c   : > { %v7171_v24 = vadd.f32 %v7170_v54, %v7169_v55 }
 0x99e   : > { %v3123_v60 = vpack.c.bf16 %v7171_v24, %v7168_v29  ;;  %v7172_v18 = vpop.f32.mrb[146].mxu1 }
 0x99f   : > { %v7173_v43 = vpop.f32.mrb[147].mxu1 }
 0x9a0   : > { %3463 = vmatmul.mubr.bf16.gmra.mrb[188].mxu0 %v3123_v60  ;;  %3656 = vmatmul.mubr.bf16.gmra.mrb[208].mxu1 %v3123_v60  ;;  %v7174_v35 = vadd.f32 %v7173_v43, %v7172_v18  ;;  %v12523_v43 = vmov 0.0  }
 0x9a1   : > { %3472 = vmatprep.mubr.bf16.mxu0 %v8533_v20  ;;  %3665 = vmatprep.mubr.bf16.mxu1 %v8533_v20 }
 0x9a2   : > { %v7175_v8 = vpop.f32.mrb[148].mxu1 }
 0x9a3   : > { %v7176_v32 = vpop.f32.mrb[149].mxu1 }
 0x9a4   : > { %v7177_v27 = vadd.f32 %v7176_v32, %v7175_v8 }
 0x9a6   : > { %v3124_v57 = vpack.c.bf16 %v7177_v27, %v7174_v35  ;;  %v7178_v6 = vpop.f32.mrb[150].mxu1 }
 0x9a7   : > { %v7179_v17 = vpop.f32.mrb[151].mxu1 }
 0x9a8   : > { %3473 = vmatmul.mubr.bf16.gmra.mrb[192].mxu0 %v3124_v57  ;;  %3666 = vmatmul.mubr.bf16.gmra.mrb[212].mxu1 %v3124_v57  ;;  %v7180_v39 = vadd.f32 %v7179_v17, %v7178_v6 }
 0x9a9   : > { %3482 = vmatprep.mubr.bf16.mxu0 %v8533_v20  ;;  %3675 = vmatprep.mubr.bf16.mxu1 %v8533_v20 }
 0x9aa   : > { %v7181_v23 = vpop.f32.mrb[152].mxu1 }
 0x9ab   : > { %v7182_v13 = vpop.f32.mrb[153].mxu1 }
 0x9ac   : > { %v7183_v5 = vadd.f32 %v7182_v13, %v7181_v23 }
 0x9ae   : > { %v3125_v28 = vpack.c.bf16 %v7183_v5, %v7180_v39  ;;  %v7184_v19 = vpop.f32.mrb[154].mxu1 }
 0x9af   : > { %v7185_v1 = vpop.f32.mrb[155].mxu1 }
 0x9b0   : > { %3483 = vmatmul.mubr.bf16.gmra.mrb[196].mxu0 %v3125_v28  ;;  %3676 = vmatmul.mubr.bf16.gmra.mrb[216].mxu1 %v3125_v28  ;;  %v7186_v58 = vadd.f32 %v7185_v1, %v7184_v19 }
 0x9b1   : > { %3492 = vmatprep.mubr.bf16.mxu0 %v8533_v20  ;;  %3685 = vmatprep.mubr.bf16.mxu1 %v8533_v20 }
 0x9b2   : > { %v7187_v9 = vpop.f32.mrb[156].mxu1 }
 0x9b3   : > { %v7188_v36 = vpop.f32.mrb[157].mxu1 }
 0x9b4   : > { %v7189_v25 = vadd.f32 %v7188_v36, %v7187_v9 }
 0x9b6   : > { %v3126_v59 = vpack.c.bf16 %v7189_v25, %v7186_v58  ;;  %v7190_v11 = vpop.f32.mrb[158].mxu1 }
 0x9b7   : > { %v7191_v3 = vpop.f32.mrb[159].mxu1 }
 0x9b8   : > { %3493 = vmatmul.mubr.bf16.gmra.mrb[200].mxu0 %v3126_v59  ;;  %3686 = vmatmul.mubr.bf16.gmra.mrb[220].mxu1 %v3126_v59  ;;  %v7192_v34 = vadd.f32 %v7191_v3, %v7190_v11 }
 0x9b9   : > { %3502 = vmatprep.mubr.bf16.mxu0 %v8533_v20  ;;  %3695 = vmatprep.mubr.bf16.mxu1 %v8533_v20 }
 0x9ba   : > { %v7193_v49 = vpop.f32.mrb[160].mxu1 }
 0x9bb   : > { %v7194_v47 = vpop.f32.mrb[161].mxu1 }
 0x9bc   : > { %v7195_v29 = vadd.f32 %v7194_v47, %v7193_v49 }
 0x9be   : > { %v3127_v55 = vpack.c.bf16 %v7195_v29, %v7192_v34  ;;  %v9740_v54 = vpop.f32.mrb[164].mxu1 }
 0x9bf   : > { %12519 = vst [vmem:[#allocation45_spill] sm:$0xff] %v9740_v54  ;;  %v9742_v24 = vpop.f32.mrb[165].mxu1 }
 0x9c0   : > { %12520 = vst [vmem:[#allocation46_spill] sm:$0xff] %v9742_v24  ;;  %3503 = vmatmul.mubr.bf16.gmra.mrb[204].mxu0 %v3127_v55  ;;  %v9744_v60 = vpop.f32.mrb[166].mxu1  ;;  %3696 = vmatmul.mubr.bf16.gmra.mrb[224].mxu1 %v3127_v55 }
 0x9c1   : > { %12521 = vst [vmem:[#allocation47_spill] sm:$0xff] %v9744_v60  ;;  %v9746_v18 = vpop.f32.mrb[167].mxu1  ;;  %4378 = vmatprep.mubr.f32.mxu0 %v12523_v43  ;;  %4635 = vmatprep.mubr.f32.mxu1 %v12523_v43 }
 0x9c2   : > { %12522 = vst [vmem:[#allocation48_spill] sm:$0xff] %v9746_v18 }
 0x9c6   : > { %v9750_v35 = vpop.f32.mrb[168].mxu1 }
 0x9c7   : > { %12524 = vst [vmem:[#allocation49_spill] sm:$0xff] %v9750_v35  ;;  %v9752_v20 = vpop.f32.mrb[169].mxu1 }
 0x9c8   : > { %12525 = vst [vmem:[#allocation50_spill] sm:$0xff] %v9752_v20  ;;  %v9754_v8 = vpop.f32.mrb[170].mxu1 }
 0x9c9   : > { %12526 = vst [vmem:[#allocation51_spill] sm:$0xff] %v9754_v8  ;;  %v9756_v32 = vpop.f32.mrb[171].mxu1 }
 0x9ca   : > { %12527 = vst [vmem:[#allocation52_spill] sm:$0xff] %v9756_v32 }
 0x9ce   : > { %v9758_v27 = vpop.f32.mrb[172].mxu1 }
 0x9cf   : > { %12528 = vst [vmem:[#allocation53_spill] sm:$0xff] %v9758_v27  ;;  %v9760_v57 = vpop.f32.mrb[173].mxu1 }
 0x9d0   : > { %12529 = vst [vmem:[#allocation54_spill] sm:$0xff] %v9760_v57  ;;  %v9762_v6 = vpop.f32.mrb[174].mxu1 }
 0x9d1   : > { %12530 = vst [vmem:[#allocation55_spill] sm:$0xff] %v9762_v6  ;;  %v9764_v17 = vpop.f32.mrb[175].mxu1 }
 0x9d2   : > { %12531 = vst [vmem:[#allocation56_spill] sm:$0xff] %v9764_v17 }
 0x9d6   : > { %v9766_v39 = vpop.f32.mrb[176].mxu1 }
 0x9d7   : > { %12532 = vst [vmem:[#allocation57_spill] sm:$0xff] %v9766_v39  ;;  %v9768_v23 = vpop.f32.mrb[177].mxu1 }
 0x9d8   : > { %12533 = vst [vmem:[#allocation58_spill] sm:$0xff] %v9768_v23  ;;  %v9770_v13 = vpop.f32.mrb[178].mxu1 }
 0x9d9   : > { %12534 = vst [vmem:[#allocation59_spill] sm:$0xff] %v9770_v13  ;;  %v9772_v5 = vpop.f32.mrb[179].mxu1 }
 0x9da   : > { %12535 = vst [vmem:[#allocation60_spill] sm:$0xff] %v9772_v5 }
 0x9de   : > { %v9774_v28 = vpop.f32.mrb[180].mxu1 }
 0x9df   : > { %12536 = vst [vmem:[#allocation61_spill] sm:$0xff] %v9774_v28  ;;  %v9776_v19 = vpop.f32.mrb[181].mxu1 }
 0x9e0   : > { %12537 = vst [vmem:[#allocation62_spill] sm:$0xff] %v9776_v19  ;;  %v9778_v1 = vpop.f32.mrb[182].mxu1 }
 0x9e1   : > { %12538 = vst [vmem:[#allocation63_spill] sm:$0xff] %v9778_v1  ;;  %v9780_v58 = vpop.f32.mrb[183].mxu1 }
 0x9e2   : > { %12539 = vst [vmem:[#allocation64_spill] sm:$0xff] %v9780_v58 }
 0x9e6   : > { %v9782_v9 = vpop.f32.mrb[184].mxu1 }
 0x9e7   : > { %12540 = vst [vmem:[#allocation65_spill] sm:$0xff] %v9782_v9  ;;  %v9784_v36 = vpop.f32.mrb[185].mxu1 }
 0x9e8   : > { %12541 = vst [vmem:[#allocation66_spill] sm:$0xff] %v9784_v36  ;;  %v9786_v25 = vpop.f32.mrb[186].mxu1 }
 0x9e9   : > { %12542 = vst [vmem:[#allocation67_spill] sm:$0xff] %v9786_v25  ;;  %v9788_v59 = vpop.f32.mrb[187].mxu1 }
 0x9ea   : > { %12543 = vst [vmem:[#allocation68_spill] sm:$0xff] %v9788_v59 }
 0x9ee   : > { %v9790_v11 = vpop.f32.mrb[188].mxu1 }
 0x9ef   : > { %12544 = vst [vmem:[#allocation69_spill] sm:$0xff] %v9790_v11  ;;  %v9792_v3 = vpop.f32.mrb[189].mxu1 }
 0x9f0   : > { %12545 = vst [vmem:[#allocation70_spill] sm:$0xff] %v9792_v3  ;;  %v9794_v34 = vpop.f32.mrb[190].mxu1 }
 0x9f1   : > { %12546 = vst [vmem:[#allocation71_spill] sm:$0xff] %v9794_v34  ;;  %v9796_v49 = vpop.f32.mrb[191].mxu1 }
 0x9f2   : > { %12547 = vst [vmem:[#allocation72_spill] sm:$0xff] %v9796_v49 }
 0x9f6   : > { %v9798_v47 = vpop.f32.mrb[192].mxu1 }
 0x9f7   : > { %12548 = vst [vmem:[#allocation73_spill] sm:$0xff] %v9798_v47  ;;  %v9800_v29 = vpop.f32.mrb[193].mxu1 }
 0x9f8   : > { %12549 = vst [vmem:[#allocation74_spill] sm:$0xff] %v9800_v29  ;;  %v9802_v55 = vpop.f32.mrb[194].mxu1 }
 0x9f9   : > { %12550 = vst [vmem:[#allocation75_spill] sm:$0xff] %v9802_v55  ;;  %v9804_v53 = vpop.f32.mrb[195].mxu1 }
 0x9fa   : > { %12551 = vst [vmem:[#allocation76_spill] sm:$0xff] %v9804_v53 }
 0xa5b   : > { %v3434_v15 = vpop.f32.mrb[176].mxu0  ;;  %v3627_v31 = vpop.f32.mrb[196].mxu1 }
 0xa5c   : > { %v3770_v10 = vmul.f32 0.044715, %v3434_v15  ;;  %v3772_v22 = vmul.f32 0.044715, %v3627_v31  ;;  %v9806_v2 = vpop.f32.mrb[177].mxu0  ;;  %v9808_v33 = vpop.f32.mrb[197].mxu1 }
 0xa5d   : > { %v3771_v49 = vmul.f32 0.044715, %v9806_v2  ;;  %v3773_v47 = vmul.f32 0.044715, %v9808_v33  ;;  %v3438_v11 = vpop.f32.mrb[178].mxu0  ;;  %v3631_v29 = vpop.f32.mrb[198].mxu1 }
 0xa5e   : > { %v3834_v3 = vmul.f32 %v3770_v10, %v3434_v15  ;;  %v3836_v34 = vmul.f32 %v3772_v22, %v3627_v31  ;;  %v9812_v16 = vmul.f32 0.5, %v3434_v15  ;;  %v9814_v55 = vmul.f32 0.5, %v3627_v31  ;;  %v9818_v10 = vpop.f32.mrb[179].mxu0  ;;  %v9820_v22 = vpop.f32.mrb[199].mxu1 }
 0xa5f   : > { %v3774_v53 = vmul.f32 0.044715, %v3438_v11  ;;  %v3776_v59 = vmul.f32 0.044715, %v3631_v29  ;;  %v3835_v52 = vmul.f32 %v3771_v49, %v9806_v2  ;;  %v3837_v36 = vmul.f32 %v3773_v47, %v9808_v33 }
 0xa60   : > { %v3898_v4 = vmul.f32 %v3834_v3, %v3434_v15  ;;  %v3900_v25 = vmul.f32 %v3836_v34, %v3627_v31  ;;  %v3775_v26 = vmul.f32 0.044715, %v9818_v10  ;;  %v3777_v58 = vmul.f32 0.044715, %v9820_v22 }
 0xa61   : > { %v3838_v41 = vmul.f32 %v3774_v53, %v3438_v11  ;;  %v3840_v9 = vmul.f32 %v3776_v59, %v3631_v29  ;;  %v3899_v45 = vmul.f32 %v3835_v52, %v9806_v2  ;;  %v3901_v3 = vmul.f32 %v3837_v36, %v9808_v33 }
 0xa62   : > { %v3962_v42 = vadd.f32 %v3898_v4, %v3434_v15  ;;  %v3964_v1 = vadd.f32 %v3900_v25, %v3627_v31  ;;  %v3839_v47 = vmul.f32 %v3775_v26, %v9818_v10  ;;  %v3841_v19 = vmul.f32 %v3777_v58, %v9820_v22 }
 0xa63   : > { %v3902_v34 = vmul.f32 %v3838_v41, %v3438_v11  ;;  %v3904_v49 = vmul.f32 %v3840_v9, %v3631_v29  ;;  %v3444_v14 = vpop.f32.mrb[180].mxu0  ;;  %v3637_v28 = vpop.f32.mrb[200].mxu1  ;;  %v3963_v46 = vadd.f32 %v3899_v45, %v9806_v2  ;;  %v3965_v5 = vadd.f32 %v3901_v3, %v9808_v33 }
 0xa64   : > { %v4026_v53 = vmul.f32 0.7978846, %v3962_v42  ;;  %v4028_v59 = vmul.f32 0.7978846, %v3964_v1  ;;  %v9830_v4 = vpop.f32.mrb[181].mxu0  ;;  %v9832_v31 = vpop.f32.mrb[201].mxu1  ;;  %v3903_v41 = vmul.f32 %v3839_v47, %v9818_v10  ;;  %v3905_v26 = vmul.f32 %v3841_v19, %v9820_v22 }
 0xa65   : > { %v3966_v52 = vadd.f32 %v3902_v34, %v3438_v11  ;;  %v3968_v15 = vadd.f32 %v3904_v49, %v3631_v29  ;;  %v9836_v9 = vpop.f32.mrb[182].mxu0  ;;  %v9838_v58 = vpop.f32.mrb[202].mxu1  ;;  %v4027_v42 = vmul.f32 0.7978846, %v3963_v46  ;;  %v4029_v1 = vmul.f32 0.7978846, %v3965_v5 }
 0xa66   : > { %v9840_v36 = vmul.f32 0.5, %v3438_v11  ;;  %v9842_v45 = vpop.f32.mrb[183].mxu0  ;;  %8004 = vtanh.f32 %v4026_v53  ;;  %v9844_v3 = vmul.f32 0.5, %v3631_v29  ;;  %v3967_v34 = vadd.f32 %v3903_v41, %v9818_v10  ;;  %v9847_v49 = vpop.f32.mrb[203].mxu1 }
 0xa67   : > { %v4030_v25 = vmul.f32 0.7978846, %v3966_v52  ;;  %8006 = vtanh.f32 %v4028_v59  ;;  %v3969_v19 = vadd.f32 %v3905_v26, %v9820_v22  ;;  %v9850_v47 = vmul.f32 0.5, %v3444_v14 }
 0xa68   : > { %v3778_v37 = vmul.f32 0.044715, %v3444_v14  ;;  %8008 = vtanh.f32 %v4027_v42  ;;  %v4032_v46 = vmul.f32 0.7978846, %v3968_v15  ;;  %v3780_v5 = vmul.f32 0.044715, %v3637_v28 }
 0xa69   : > { %v3779_v11 = vmul.f32 0.044715, %v9830_v4  ;;  %8010 = vtanh.f32 %v4029_v1  ;;  %v9853_v52 = vmul.f32 0.5, %v3637_v28  ;;  %v3781_v29 = vmul.f32 0.044715, %v9832_v31 }
 0xa6a   : > { %v3842_v53 = vmul.f32 %v3778_v37, %v3444_v14  ;;  %8012 = vtanh.f32 %v4030_v25  ;;  %v4031_v41 = vmul.f32 0.7978846, %v3967_v34  ;;  %v3844_v13 = vmul.f32 %v3780_v5, %v3637_v28 }
 0xa6b   : > { %12552 = vst [vmem:[#allocation77_spill] sm:$0xff] %v9853_v52  ;;  %v3843_v59 = vmul.f32 %v3779_v11, %v9830_v4  ;;  %v9857_v26 = vpop.f32.mrb[184].mxu0  ;;  %v9859_v30 = vpop.f32.mrb[204].mxu1  ;;  %v4033_v42 = vmul.f32 0.7978846, %v3969_v19  ;;  %v3845_v23 = vmul.f32 %v3781_v29, %v9832_v31  ;;  %8014 = vtanh.f32 %v4032_v46 }
 0xa6c   : > { %v3906_v15 = vmul.f32 %v3842_v53, %v3444_v14  ;;  %v3782_v1 = vmul.f32 0.044715, %v9836_v9  ;;  %v9863_v37 = vpop.f32.mrb[185].mxu0  ;;  %v9865_v7 = vpop.f32.mrb[205].mxu1  ;;  %v3908_v25 = vmul.f32 %v3844_v13, %v3637_v28  ;;  %v9869_v5 = vmul.f32 0.5, %v9836_v9 }
 0xa6d   : > { %12553 = vst [vmem:[#allocation78_spill] sm:$0xff] %v9863_v37  ;;  %12554 = vst [vmem:[#allocation79_spill] sm:$0xff] %v9865_v7  ;;  %v3907_v34 = vmul.f32 %v3843_v59, %v9830_v4  ;;  %v9871_v11 = vpop.f32.mrb[186].mxu0  ;;  %v9873_v39 = vpop.f32.mrb[206].mxu1  ;;  %v3909_v53 = vmul.f32 %v3845_v23, %v9832_v31  ;;  %v3784_v56 = vmul.f32 0.044715, %v9838_v58  ;;  %8016 = vtanh.f32 %v4031_v41 }
 0xa6e   : > { %v3970_v19 = vadd.f32 %v3906_v15, %v3444_v14  ;;  %v3846_v29 = vmul.f32 %v3782_v1, %v9836_v9  ;;  %v9878_v17 = vpop.f32.mrb[187].mxu0  ;;  %v9880_v46 = vpop.f32.mrb[207].mxu1  ;;  %v3972_v13 = vadd.f32 %v3908_v25, %v3637_v28  ;;  %v3783_v12 = vmul.f32 0.044715, %v9842_v45 }
 0xa6f   : > { %12555 = vst [vmem:[#allocation80_spill] sm:$0xff] %v9878_v17  ;;  %12556 = vst [vmem:[#allocation81_spill] sm:$0xff] %v9880_v46  ;;  %v3971_v59 = vadd.f32 %v3907_v34, %v9830_v4  ;;  %v3785_v6 = vmul.f32 0.044715, %v9847_v49  ;;  %v3973_v14 = vadd.f32 %v3909_v53, %v9832_v31  ;;  %v3848_v15 = vmul.f32 %v3784_v56, %v9838_v58 }
 0xa70   : > { %v4034_v63 = vmul.f32 0.7978846, %v3970_v19  ;;  %v3910_v23 = vmul.f32 %v3846_v29, %v9836_v9  ;;  %v9888_v1 = vpop.eup %8004  ;;  %v4036_v57 = vmul.f32 0.7978846, %v3972_v13  ;;  %v3847_v48 = vmul.f32 %v3783_v12, %v9842_v45 }
 0xa71   : > { %v3849_v28 = vmul.f32 %v3785_v6, %v9847_v49  ;;  %v9892_v25 = vpop.eup %8006  ;;  %8018 = vtanh.f32 %v4033_v42  ;;  %v4035_v34 = vmul.f32 0.7978846, %v3971_v59  ;;  %v3912_v53 = vmul.f32 %v3848_v15, %v9838_v58 }
 0xa72   : > { %v3974_v19 = vadd.f32 %v3910_v23, %v9836_v9  ;;  %v9896_v27 = vpop.eup %8008  ;;  %v4037_v29 = vmul.f32 0.7978846, %v3973_v14  ;;  %v9899_v56 = vmul.f32 0.5, %v9838_v58  ;;  %v3911_v41 = vmul.f32 %v3847_v48, %v9842_v45 }
 0xa73   : > { %v3913_v12 = vmul.f32 %v3849_v28, %v9847_v49  ;;  %v9903_v13 = vpop.f32.mrb[188].mxu0  ;;  %v9905_v6 = vpop.f32.mrb[208].mxu1  ;;  %8020 = vtanh.f32 %v4034_v63  ;;  %v3976_v59 = vadd.f32 %v3912_v53, %v9838_v58  ;;  %v3786_v23 = vmul.f32 0.044715, %v9857_v26 }
 0xa74   : > { %12557 = vst [vmem:[#allocation82_spill] sm:$0xff] %v9899_v56  ;;  %v9907_v42 = vpop.eup %8010  ;;  %v4038_v9 = vmul.f32 0.7978846, %v3974_v19  ;;  %v9911_v14 = vpop.f32.mrb[189].mxu0  ;;  %8022 = vtanh.f32 %v4036_v57  ;;  %v3975_v48 = vadd.f32 %v3911_v41, %v9842_v45  ;;  %v9920_v32 = vmul.f32 0.5, %v9857_v26 }
 0xa75   : > { %12558 = vst [vmem:[#allocation83_spill] sm:$0xff] %v9911_v14  ;;  %v9913_v15 = vpop.f32.mrb[209].mxu1  ;;  %v9915_v61 = vpop.eup %8012  ;;  %v3977_v28 = vadd.f32 %v3913_v12, %v9847_v49  ;;  %8024 = vtanh.f32 %v4035_v34  ;;  %v4040_v58 = vmul.f32 0.7978846, %v3976_v59  ;;  %v3850_v53 = vmul.f32 %v3786_v23, %v9857_v26 }
 0xa76   : > { %12559 = vst [vmem:[#allocation84_spill] sm:$0xff] %v9913_v15  ;;  %12560 = vst [vmem:[#allocation85_spill] sm:$0xff] %v9920_v32  ;;  %v9922_v63 = vpop.f32.mrb[190].mxu0  ;;  %v9924_v19 = vpop.f32.mrb[210].mxu1  ;;  %v3788_v0 = vmul.f32 0.044715, %v9859_v30  ;;  %8026 = vtanh.f32 %v4037_v29 }
 0xa77   : > { %v9928_v8 = vpop.f32.mrb[191].mxu0  ;;  %v9930_v57 = vpop.f32.mrb[211].mxu1  ;;  %v4039_v12 = vmul.f32 0.7978846, %v3975_v48  ;;  %v4041_v44 = vmul.f32 0.7978846, %v3977_v28  ;;  %8028 = vtanh.f32 %v4038_v9  ;;  %v3914_v62 = vmul.f32 %v3850_v53, %v9857_v26 }
 0xa78   : > { %12561 = vst [vmem:[#allocation86_spill] sm:$0xff] %v9928_v8  ;;  %v9932_v41 = vpop.eup %8014  ;;  %v3787_v20 = vmul.f32 0.044715, %v9863_v37  ;;  %v3852_v34 = vmul.f32 %v3788_v0, %v9859_v30  ;;  %v3789_v59 = vmul.f32 0.044715, %v9865_v7  ;;  %8030 = vtanh.f32 %v4040_v58 }
 0xa79   : > { %v9939_v23 = vmul.f32 0.5, %v9859_v30  ;;  %v3790_v50 = vmul.f32 0.044715, %v9871_v11  ;;  %8032 = vtanh.f32 %v4039_v12  ;;  %v3978_v29 = vadd.f32 %v3914_v62, %v9857_v26  ;;  %v9946_v28 = vpop.eup %8016 }
 0xa7a   : > { %v3851_v35 = vmul.f32 %v3787_v20, %v9863_v37  ;;  %v3916_v48 = vmul.f32 %v3852_v34, %v9859_v30  ;;  %v3853_v9 = vmul.f32 %v3789_v59, %v9865_v7  ;;  %8034 = vtanh.f32 %v4041_v44 }
 0xa7b   : > { %12562 = vst [vmem:[#allocation87_spill] sm:$0xff] %v9939_v23  ;;  %v3854_v58 = vmul.f32 %v3790_v50, %v9871_v11  ;;  %v3792_v53 = vmul.f32 0.044715, %v9873_v39  ;;  %v9951_v18 = vpop.f32.mrb[192].mxu0  ;;  %v9953_v20 = vpop.f32.mrb[212].mxu1 }
 0xa7c   : > { %v3915_v0 = vmul.f32 %v3851_v35, %v9863_v37  ;;  %v9955_v12 = vpop.eup %8018  ;;  %v4042_v62 = vmul.f32 0.7978846, %v3978_v29  ;;  %v3980_v26 = vadd.f32 %v3916_v48, %v9859_v30  ;;  %v3917_v34 = vmul.f32 %v3853_v9, %v9865_v7  ;;  %v9960_v44 = vpop.f32.mrb[193].mxu0 }
 0xa7d   : > { %v3791_v59 = vmul.f32 0.044715, %v9878_v17  ;;  %v9962_v35 = vpop.f32.mrb[213].mxu1  ;;  %v3918_v40 = vmul.f32 %v3854_v58, %v9871_v11  ;;  %v3856_v60 = vmul.f32 %v3792_v53, %v9873_v39  ;;  %v3793_v51 = vmul.f32 0.044715, %v9880_v46  ;;  %v9968_v24 = vpop.f32.mrb[194].mxu0 }
 0xa7e   : > { %v3979_v50 = vadd.f32 %v3915_v0, %v9863_v37  ;;  %v9970_v29 = vpop.f32.mrb[214].mxu1  ;;  %v9972_v30 = vpop.eup %8020  ;;  %8036 = vtanh.f32 %v4042_v62  ;;  %v4044_v48 = vmul.f32 0.7978846, %v3980_v26  ;;  %v3981_v9 = vadd.f32 %v3917_v34, %v9865_v7 }
 0xa7f   : > { %v3855_v21 = vmul.f32 %v3791_v59, %v9878_v17  ;;  %v9976_v54 = vpop.f32.mrb[195].mxu0  ;;  %v9978_v0 = vpop.f32.mrb[215].mxu1  ;;  %v3982_v38 = vadd.f32 %v3918_v40, %v9871_v11  ;;  %v3920_v43 = vmul.f32 %v3856_v60, %v9873_v39  ;;  %v3857_v23 = vmul.f32 %v3793_v51, %v9880_v46 }
 0xa80   : > { %v9980_v58 = vpop.eup %8022  ;;  %v4043_v53 = vmul.f32 0.7978846, %v3979_v50  ;;  %8038 = vtanh.f32 %v4044_v48  ;;  %v4045_v62 = vmul.f32 0.7978846, %v3981_v9  ;;  %v9988_v26 = vmul.f32 0.5, %v9871_v11 }
 0xa81   : > { %v9985_v32 = vpop.eup %8024  ;;  %v3919_v34 = vmul.f32 %v3855_v21, %v9878_v17  ;;  %v4046_v7 = vmul.f32 0.7978846, %v3982_v38  ;;  %v3984_v50 = vadd.f32 %v3920_v43, %v9873_v39  ;;  %v3921_v40 = vmul.f32 %v3857_v23, %v9880_v46 }
 0xa82   : > { %12563 = vst [vmem:[#allocation88_spill] sm:$0xff] %v9988_v26  ;;  %v9991_v59 = vpop.eup %8026  ;;  %8040 = vtanh.f32 %v4043_v53  ;;  %v9998_v51 = vmul.f32 0.5, %v9873_v39  ;;  %v3794_v11 = vmul.f32 0.044715, %v9903_v13  ;;  %v3796_v43 = vmul.f32 0.044715, %v9905_v6 }
 0xa83   : > { %v9995_v60 = vpop.eup %8028  ;;  %8042 = vtanh.f32 %v4045_v62  ;;  %v3983_v48 = vadd.f32 %v3919_v34, %v9878_v17  ;;  %v4048_v21 = vmul.f32 0.7978846, %v3984_v50  ;;  %v3985_v38 = vadd.f32 %v3921_v40, %v9880_v46  ;;  %v10006_v53 = vpop.f32.mrb[196].mxu0 }
 0xa84   : > { %12564 = vst [vmem:[#allocation89_spill] sm:$0xff] %v9998_v51  ;;  %v10002_v9 = vpop.eup %8030  ;;  %8044 = vtanh.f32 %v4046_v7  ;;  %12565 = vst [vmem:[#allocation90_spill] sm:$0xff] %v10006_v53  ;;  %v10008_v23 = vpop.f32.mrb[216].mxu1  ;;  %v3858_v51 = vmul.f32 %v3794_v11, %v9903_v13  ;;  %v3795_v34 = vmul.f32 0.044715, %v9911_v14  ;;  %v10018_v50 = vmul.f32 0.5, %v9903_v13 }
 0xa85   : > { %12566 = vst [vmem:[#allocation91_spill] sm:$0xff] %v10008_v23  ;;  %v10010_v62 = vpop.eup %8032  ;;  %v4047_v39 = vmul.f32 0.7978846, %v3983_v48  ;;  %v3797_v26 = vmul.f32 0.044715, %v9913_v15  ;;  %8046 = vtanh.f32 %v4048_v21  ;;  %v3860_v40 = vmul.f32 %v3796_v43, %v9905_v6  ;;  %v10021_v53 = vpop.f32.mrb[197].mxu0 }
 0xa86   : > { %v10015_v56 = vpop.eup %8034  ;;  %v4049_v7 = vmul.f32 0.7978846, %v3985_v38  ;;  %12567 = vst [vmem:[#allocation92_spill] sm:$0xff] %v10018_v50  ;;  %12568 = vst [vmem:[#allocation93_spill] sm:$0xff] %v10021_v53  ;;  %v10023_v23 = vpop.f32.mrb[217].mxu1  ;;  %v3922_v48 = vmul.f32 %v3858_v51, %v9903_v13  ;;  %v3859_v11 = vmul.f32 %v3795_v34, %v9911_v14  ;;  %v10033_v38 = vmul.f32 0.5, %v9905_v6 }
 0xa87   : > { %12569 = vst [vmem:[#allocation94_spill] sm:$0xff] %v10023_v23  ;;  %8048 = vtanh.f32 %v4047_v39  ;;  %v3861_v46 = vmul.f32 %v3797_v26, %v9913_v15  ;;  %v10028_v17 = vpop.f32.mrb[198].mxu0  ;;  %v10030_v21 = vpop.f32.mrb[218].mxu1  ;;  %v3924_v43 = vmul.f32 %v3860_v40, %v9905_v6  ;;  %v3798_v50 = vmul.f32 0.044715, %v9922_v63 }
 0xa88   : > { %12570 = vst [vmem:[#allocation95_spill] sm:$0xff] %v10028_v17  ;;  %12571 = vst [vmem:[#allocation96_spill] sm:$0xff] %v10030_v21  ;;  %8050 = vtanh.f32 %v4049_v7  ;;  %v10037_v23 = vpop.f32.mrb[199].mxu0  ;;  %v10039_v39 = vpop.f32.mrb[219].mxu1  ;;  %v3986_v26 = vadd.f32 %v3922_v48, %v9903_v13  ;;  %v3923_v34 = vmul.f32 %v3859_v11, %v9911_v14  ;;  %v3800_v7 = vmul.f32 0.044715, %v9924_v19 }
 0xa89   : > { %12572 = vst [vmem:[#allocation97_spill] sm:$0xff] %v10033_v38  ;;  %12573 = vst [vmem:[#allocation98_spill] sm:$0xff] %v10037_v23  ;;  %v10041_v51 = vpop.eup %8036  ;;  %v3925_v21 = vmul.f32 %v3861_v46, %v9913_v15  ;;  %v3988_v38 = vadd.f32 %v3924_v43, %v9905_v6  ;;  %v3862_v40 = vmul.f32 %v3798_v50, %v9922_v63  ;;  %v3799_v17 = vmul.f32 0.044715, %v9928_v8 }
 0xa8a   : > { %12574 = vst [vmem:[#allocation99_spill] sm:$0xff] %v10039_v39  ;;  %12575 = vst [vmem:[#allocation100_spill] sm:$0xff] %v10041_v51  ;;  %v3801_v23 = vmul.f32 0.044715, %v9930_v57  ;;  %v10051_v53 = vpop.eup %8038  ;;  %v4050_v39 = vmul.f32 0.7978846, %v3986_v26  ;;  %v3987_v51 = vadd.f32 %v3923_v34, %v9911_v14  ;;  %v3864_v48 = vmul.f32 %v3800_v7, %v9924_v19 }
 0xa8b   : > { %v3989_v13 = vadd.f32 %v3925_v21, %v9913_v15  ;;  %v4052_v11 = vmul.f32 0.7978846, %v3988_v38  ;;  %v3926_v6 = vmul.f32 %v3862_v40, %v9922_v63  ;;  %v3863_v50 = vmul.f32 %v3799_v17, %v9928_v8  ;;  %v10061_v37 = vpop.f32.mrb[200].mxu0  ;;  %v10063_v52 = vpop.f32.mrb[220].mxu1 }
 0xa8c   : > { %v10056_v46 = vpop.eup %8040  ;;  %v3865_v43 = vmul.f32 %v3801_v23, %v9930_v57  ;;  %12576 = vst [vmem:[#allocation101_spill] sm:$0xff] %v10063_v52  ;;  %8052 = vtanh.f32 %v4050_v39  ;;  %v4051_v34 = vmul.f32 0.7978846, %v3987_v51  ;;  %v3928_v7 = vmul.f32 %v3864_v48, %v9924_v19  ;;  %v10068_v15 = vpop.f32.mrb[201].mxu0 }
 0xa8d   : > { %v10065_v26 = vpop.eup %8042  ;;  %v4053_v21 = vmul.f32 0.7978846, %v3989_v13  ;;  %v10070_v38 = vpop.f32.mrb[221].mxu1  ;;  %8054 = vtanh.f32 %v4052_v11  ;;  %v3990_v17 = vadd.f32 %v3926_v6, %v9922_v63  ;;  %v3927_v23 = vmul.f32 %v3863_v50, %v9928_v8 }
 0xa8e   : > { %12577 = vst [vmem:[#allocation102_spill] sm:$0xff] %v10070_v38  ;;  %v10072_v40 = vpop.eup %8044  ;;  %v3929_v14 = vmul.f32 %v3865_v43, %v9930_v57  ;;  %v10077_v52 = vpop.f32.mrb[202].mxu0  ;;  %8056 = vtanh.f32 %v4051_v34  ;;  %v10082_v51 = vmul.f32 0.5, %v9922_v63  ;;  %v3992_v13 = vadd.f32 %v3928_v7, %v9924_v19 }
 0xa8f   : > { %12578 = vst [vmem:[#allocation103_spill] sm:$0xff] %v10077_v52  ;;  %v10079_v39 = vpop.f32.mrb[222].mxu1  ;;  %v3707_v48 = vmul.f32 0.5, %v9806_v2  ;;  %v10086_v38 = vpop.f32.mrb[203].mxu0  ;;  %v4054_v50 = vmul.f32 0.7978846, %v3990_v17  ;;  %v3991_v43 = vadd.f32 %v3927_v23, %v9928_v8  ;;  %8058 = vtanh.f32 %v4053_v21 }
 0xa90   : > { %12579 = vst [vmem:[#allocation104_spill] sm:$0xff] %v10079_v39  ;;  %12580 = vst [vmem:[#allocation105_spill] sm:$0xff] %v10082_v51  ;;  %v10088_v11 = vpop.f32.mrb[223].mxu1  ;;  %v10090_v6 = vpop.eup %8046  ;;  %v3993_v52 = vadd.f32 %v3929_v14, %v9930_v57  ;;  %v3711_v34 = vmul.f32 0.5, %v9818_v10  ;;  %v4056_v63 = vmul.f32 0.7978846, %v3992_v13 }
 0xa91   : > { %12581 = vst [vmem:[#allocation106_spill] sm:$0xff] %v10086_v38  ;;  %12582 = vst [vmem:[#allocation107_spill] sm:$0xff] %v10088_v11  ;;  %v10095_v39 = vpop.eup %8048  ;;  %v4155_v7 = vadd.f32 1.0, %v9896_v27  ;;  %v4159_v2 = vadd.f32 1.0, %v9946_v28  ;;  %8060 = vtanh.f32 %v4054_v50  ;;  %v4055_v11 = vmul.f32 0.7978846, %v3991_v43 }
 0xa92   : > { %v10099_v51 = vpop.eup %8050  ;;  %v4057_v38 = vmul.f32 0.7978846, %v3993_v52  ;;  %v3709_v17 = vmul.f32 0.5, %v9808_v33  ;;  %v3713_v14 = vmul.f32 0.5, %v9820_v22  ;;  %v4157_v10 = vadd.f32 1.0, %v9907_v42 }
 0xa93   : > { %v4219_v23 = vmul.f32 %v4155_v7, %v3707_v48  ;;  %v4223_v8 = vmul.f32 %v4159_v2, %v3711_v34  ;;  %8062 = vtanh.f32 %v4056_v63  ;;  %v4161_v21 = vadd.f32 1.0, %v9955_v12  ;;  %v10107_v13 = vpop.f32.mrb[204].mxu0  ;;  %v10109_v50 = vpop.f32.mrb[224].mxu1 }
 0xa94   : > { %v4154_v27 = vadd.f32 1.0, %v9888_v1  ;;  %v4158_v28 = vadd.f32 1.0, %v9915_v61  ;;  %8064 = vtanh.f32 %v4055_v11  ;;  %v4221_v33 = vmul.f32 %v4157_v10, %v3709_v17  ;;  %v10112_v43 = vpop.f32.mrb[205].mxu0  ;;  %v10114_v22 = vpop.f32.mrb[225].mxu1 }
 0xa95   : > { %v7492_v52 = vpack.c.bf16 %v4223_v8, %v4219_v23  ;;  %v4156_v48 = vadd.f32 1.0, %v9892_v25  ;;  %v4225_v42 = vmul.f32 %v4161_v21, %v3713_v14  ;;  %v4160_v61 = vadd.f32 1.0, %v9932_v41  ;;  %v10119_v34 = vpop.f32.mrb[206].mxu0  ;;  %v10121_v63 = vpop.f32.mrb[226].mxu1 }
 0xa96   : > { %v4218_v12 = vmul.f32 %v4154_v27, %v9812_v16  ;;  %v4222_v1 = vmul.f32 %v4158_v28, %v9840_v36  ;;  %v10123_v11 = vpop.eup %8052  ;;  %v10126_v8 = vmul.f32 0.5, %v9924_v19  ;;  %8066 = vtanh.f32 %v4057_v38  ;;  %v10130_v16 = vpop.f32.mrb[207].mxu0 }
 0xa97   : > { %7493 = vmatprep.subr.bf16.mxu0 %v7492_v52  ;;  %v4220_v25 = vmul.f32 %v4156_v48, %v9814_v55  ;;  %v3802_v7 = vmul.f32 0.044715, %v9951_v18  ;;  %v10132_v36 = vpop.f32.mrb[227].mxu1  ;;  %v10134_v41 = vpop.eup %8054  ;;  %v7524_v2 = vpack.c.bf16 %v4225_v42, %v4221_v33  ;;  %v4224_v23 = vmul.f32 %v4160_v61, %v9844_v3 }
 0xa98   : > { %12583 = vst [vmem:[#allocation108_spill] sm:$0xff] %v10132_v36  ;;  %v7494_v17 = vpack.c.bf16 %v4222_v1, %v4218_v12  ;;  %v3804_v14 = vmul.f32 0.044715, %v9953_v20  ;;  %v10138_v19 = vpop.eup %8056  ;;  %v10141_v38 = vmul.f32 0.5, %v9951_v18  ;;  %v3803_v10 = vmul.f32 0.044715, %v9960_v44 }
 0xa99   : > { %v3866_v55 = vmul.f32 %v3802_v7, %v9951_v18  ;;  %v3805_v21 = vmul.f32 0.044715, %v9962_v35  ;;  %7525 = vmatprep.subr.bf16.mxu1 %v7524_v2  ;;  %v7526_v27 = vpack.c.bf16 %v4224_v23, %v4220_v25  ;;  %v10147_v28 = vmul.f32 0.5, %v9953_v20  ;;  %v10151_v33 = vpop.eup %8058 }
 0xa9a   : > { %12584 = vst [vmem:[#allocation109_spill] sm:$0xff] %v10141_v38  ;;  %7495 = vmatpush1.bf16.msra.mxu0 %v7494_v17  ;;  %v3868_v3 = vmul.f32 %v3804_v14, %v9953_v20  ;;  %v3806_v52 = vmul.f32 0.044715, %v9968_v24  ;;  %v3867_v42 = vmul.f32 %v3803_v10, %v9960_v44  ;;  %v3808_v1 = vmul.f32 0.044715, %v9970_v29 }
 0xa9b   : > { %12585 = vst [vmem:[#allocation110_spill] sm:$0xff] %v10147_v28  ;;  %v3930_v48 = vmul.f32 %v3866_v55, %v9951_v18  ;;  %v3869_v12 = vmul.f32 %v3805_v21, %v9962_v35  ;;  %v10157_v61 = vpop.eup %8060  ;;  %7527 = vmatpush1.bf16.msra.mxu1 %v7526_v27  ;;  %v3807_v2 = vmul.f32 0.044715, %v9976_v54  ;;  %v3809_v17 = vmul.f32 0.044715, %v9978_v0 }
 0xa9c   : > { %v3932_v25 = vmul.f32 %v3868_v3, %v9953_v20  ;;  %v3870_v7 = vmul.f32 %v3806_v52, %v9968_v24  ;;  %v3931_v14 = vmul.f32 %v3867_v42, %v9960_v44  ;;  %v3872_v10 = vmul.f32 %v3808_v1, %v9970_v29 }
 0xa9d   : > { %v3994_v23 = vadd.f32 %v3930_v48, %v9951_v18  ;;  %v3933_v55 = vmul.f32 %v3869_v12, %v9962_v35  ;;  %v10167_v21 = vpop.eup %8062  ;;  %v3871_v52 = vmul.f32 %v3807_v2, %v9976_v54  ;;  %v3873_v28 = vmul.f32 %v3809_v17, %v9978_v0 }
 0xa9e   : > { %v3996_v27 = vadd.f32 %v3932_v25, %v9953_v20  ;;  %v3934_v3 = vmul.f32 %v3870_v7, %v9968_v24  ;;  %v10173_v38 = vpop.eup %8064  ;;  %v3995_v18 = vadd.f32 %v3931_v14, %v9960_v44  ;;  %v3936_v42 = vmul.f32 %v3872_v10, %v9970_v29 }
 0xa9f   : > { %v4058_v36 = vmul.f32 0.7978846, %v3994_v23  ;;  %v3997_v48 = vadd.f32 %v3933_v55, %v9962_v35  ;;  %v3935_v20 = vmul.f32 %v3871_v52, %v9976_v54  ;;  %v3937_v25 = vmul.f32 %v3873_v28, %v9978_v0 }
 0xaa0   : > { %v4060_v12 = vmul.f32 0.7978846, %v3996_v27  ;;  %v3998_v1 = vadd.f32 %v3934_v3, %v9968_v24  ;;  %v10181_v7 = vpop.eup %8066  ;;  %v4059_v2 = vmul.f32 0.7978846, %v3995_v18  ;;  %v4000_v23 = vadd.f32 %v3936_v42, %v9970_v29 }
 0xaa1   : > { %8068 = vtanh.f32 %v4058_v36  ;;  %v4061_v17 = vmul.f32 0.7978846, %v3997_v48  ;;  %v3999_v55 = vadd.f32 %v3935_v20, %v9976_v54  ;;  %v4001_v10 = vadd.f32 %v3937_v25, %v9978_v0 }
 0xaa2   : > { %8070 = vtanh.f32 %v4060_v12  ;;  %v4062_v14 = vmul.f32 0.7978846, %v3998_v1  ;;  %v10187_v27 = vmul.f32 0.5, %v9968_v24  ;;  %v10190_v3 = vmul.f32 0.5, %v9970_v29 }
 0xaa3   : > { %8072 = vtanh.f32 %v4059_v2  ;;  %v4064_v28 = vmul.f32 0.7978846, %v4000_v23  ;;  %v3715_v36 = vmul.f32 0.5, %v9830_v4  ;;  %v3719_v52 = vmul.f32 0.5, %v9842_v45 }
 0xaa4   : > { %8074 = vtanh.f32 %v4061_v17  ;;  %v4163_v18 = vadd.f32 1.0, %v9985_v32  ;;  %v4063_v48 = vmul.f32 0.7978846, %v3999_v55  ;;  %v4065_v42 = vmul.f32 0.7978846, %v4001_v10  ;;  %v12587_v10 = vld [vmem:[#allocation78_spill] sm:$0xff] }
 0xaa5   : > { %8076 = vtanh.f32 %v4062_v14  ;;  %v4167_v12 = vadd.f32 1.0, %v10010_v62  ;;  %v3717_v1 = vmul.f32 0.5, %v9832_v31  ;;  %v3721_v24 = vmul.f32 0.5, %v9847_v49 }
 0xaa6   : > { %v4165_v29 = vadd.f32 1.0, %v9991_v59  ;;  %v4169_v20 = vadd.f32 1.0, %v10015_v56  ;;  %v4227_v25 = vmul.f32 %v4163_v18, %v3715_v36  ;;  %v4162_v4 = vadd.f32 1.0, %v9972_v30  ;;  %v12586_v56 = vld [vmem:[#allocation77_spill] sm:$0xff]  ;;  %v12588_v30 = vld [vmem:[#allocation80_spill] sm:$0xff]  ;;  %v12589_v18 = vld [vmem:[#allocation82_spill] sm:$0xff] }
 0xaa7   : > { %v4231_v2 = vmul.f32 %v4167_v12, %v3719_v52  ;;  %v4166_v45 = vadd.f32 1.0, %v9995_v60  ;;  %8078 = vtanh.f32 %v4064_v28  ;;  %v4164_v23 = vadd.f32 1.0, %v9980_v58 }
 0xaa8   : > { %v4229_v32 = vmul.f32 %v4165_v29, %v3717_v1  ;;  %v4233_v17 = vmul.f32 %v4169_v20, %v3721_v24  ;;  %v4226_v31 = vmul.f32 %v4162_v4, %v9850_v47  ;;  %v4168_v59 = vadd.f32 1.0, %v10002_v9  ;;  %v12590_v9 = vld [vmem:[#allocation79_spill] sm:$0xff]  ;;  %v12591_v24 = vld [vmem:[#allocation81_spill] sm:$0xff] }
 0xaa9   : > { %v7496_v62 = vpack.c.bf16 %v4231_v2, %v4227_v25  ;;  %v4230_v49 = vmul.f32 %v4166_v45, %v9869_v5  ;;  %v4228_v55 = vmul.f32 %v4164_v23, %v12586_v56  ;;  %v3723_v36 = vmul.f32 0.5, %v12587_v10  ;;  %v12592_v23 = vld [vmem:[#allocation90_spill] sm:$0xff] }
 0xaaa   : > { %v7528_v14 = vpack.c.bf16 %v4233_v17, %v4229_v32  ;;  %v3727_v52 = vmul.f32 0.5, %v12588_v30  ;;  %v4232_v58 = vmul.f32 %v4168_v59, %v12589_v18  ;;  %v4171_v12 = vadd.f32 1.0, %v10056_v46  ;;  %v12594_v59 = vld [vmem:[#allocation100_spill] sm:$0xff]  ;;  %v12595_v30 = vld [vmem:[#allocation85_spill] sm:$0xff] }
 0xaab   : > { %v10209_v60 = vpop.eup %8068  ;;  %7497 = vmatprep.subr.bf16.mxu0 %v7496_v62  ;;  %v7498_v28 = vpack.c.bf16 %v4230_v49, %v4226_v31  ;;  %v4175_v47 = vadd.f32 1.0, %v10095_v39  ;;  %v3725_v1 = vmul.f32 0.5, %v12590_v9  ;;  %v3729_v29 = vmul.f32 0.5, %v12591_v24  ;;  %v12593_v49 = vld [vmem:[#allocation91_spill] sm:$0xff]  ;;  %v12599_v24 = vld [vmem:[#allocation89_spill] sm:$0xff] }
 0xaac   : > { %v10214_v5 = vpop.eup %8070  ;;  %7529 = vmatprep.subr.bf16.mxu1 %v7528_v14  ;;  %v4173_v20 = vadd.f32 1.0, %v10065_v26  ;;  %v4177_v25 = vadd.f32 1.0, %v10099_v51  ;;  %8080 = vtanh.f32 %v4063_v48  ;;  %v7530_v4 = vpack.c.bf16 %v4232_v58, %v4228_v55  ;;  %v12597_v58 = vld [vmem:[#allocation93_spill] sm:$0xff]  ;;  %v12598_v9 = vld [vmem:[#allocation87_spill] sm:$0xff] }
 0xaad   : > { %v10220_v2 = vpop.eup %8072  ;;  %7499 = vmatpush1.bf16.msra.mxu0 %v7498_v28  ;;  %v4235_v45 = vmul.f32 %v4171_v12, %v3723_v36  ;;  %v4239_v46 = vmul.f32 %v4175_v47, %v3727_v52  ;;  %8082 = vtanh.f32 %v4065_v42  ;;  %v3810_v62 = vmul.f32 0.044715, %v12592_v23  ;;  %v12596_v28 = vld [vmem:[#allocation88_spill] sm:$0xff] }
 0xaae   : > { %v10222_v32 = vpop.eup %8074  ;;  %v4237_v39 = vmul.f32 %v4173_v20, %v3725_v1  ;;  %v4241_v17 = vmul.f32 %v4177_v25, %v3729_v29  ;;  %7531 = vmatpush1.bf16.msra.mxu1 %v7530_v4  ;;  %v3812_v51 = vmul.f32 0.044715, %v12593_v49  ;;  %v4170_v14 = vadd.f32 1.0, %v12594_v59  ;;  %v12600_v29 = vld [vmem:[#allocation94_spill] sm:$0xff] }
 0xaaf   : > { %v10225_v31 = vpop.eup %8076  ;;  %v7500_v26 = vpack.c.bf16 %v4239_v46, %v4235_v45  ;;  %v4174_v48 = vadd.f32 1.0, %v10072_v40  ;;  %v3874_v55 = vmul.f32 %v3810_v62, %v12592_v23  ;;  %v4172_v10 = vadd.f32 1.0, %v10051_v53  ;;  %v12601_v62 = vld [vmem:[#allocation95_spill] sm:$0xff] }
 0xab0   : > { %v7532_v56 = vpack.c.bf16 %v4241_v17, %v4237_v39  ;;  %v4176_v42 = vadd.f32 1.0, %v10090_v6  ;;  %v3876_v36 = vmul.f32 %v3812_v51, %v12593_v49  ;;  %v4234_v52 = vmul.f32 %v4170_v14, %v12595_v30 }
 0xab1   : > { %7501 = vmatprep.subr.bf16.mxu0 %v7500_v26  ;;  %v4238_v18 = vmul.f32 %v4174_v48, %v12596_v28  ;;  %v3811_v12 = vmul.f32 0.044715, %v12597_v58  ;;  %v10237_v47 = vpop.eup %8078  ;;  %v3938_v40 = vmul.f32 %v3874_v55, %v12592_v23  ;;  %v4236_v1 = vmul.f32 %v4172_v10, %v12598_v9  ;;  %v12603_v48 = vld [vmem:[#allocation96_spill] sm:$0xff] }
 0xab2   : > { %7533 = vmatprep.subr.bf16.mxu1 %v7532_v56  ;;  %v4240_v53 = vmul.f32 %v4176_v42, %v12599_v24  ;;  %v3813_v6 = vmul.f32 0.044715, %v12600_v29  ;;  %v10244_v20 = vmul.f32 0.5, %v12592_v23  ;;  %v3940_v25 = vmul.f32 %v3876_v36, %v12593_v49  ;;  %v12604_v42 = vld [vmem:[#allocation98_spill] sm:$0xff] }
 0xab3   : > { %v7502_v4 = vpack.c.bf16 %v4238_v18, %v4234_v52  ;;  %v3875_v45 = vmul.f32 %v3811_v12, %v12597_v58  ;;  %v4002_v46 = vadd.f32 %v3938_v40, %v12592_v23  ;;  %v3814_v26 = vmul.f32 0.044715, %v12601_v62  ;;  %v12605_v18 = vld [vmem:[#allocation99_spill] sm:$0xff] }
 0xab4   : > { %v7534_v39 = vpack.c.bf16 %v4240_v53, %v4236_v1  ;;  %v3877_v17 = vmul.f32 %v3813_v6, %v12600_v29  ;;  %v10252_v51 = vmul.f32 0.5, %v12593_v49  ;;  %v4004_v59 = vadd.f32 %v3940_v25, %v12593_v49 }
 0xab5   : > { %7503 = vmatpush1.bf16.msra.mxu0 %v7502_v4  ;;  %v3939_v14 = vmul.f32 %v3875_v45, %v12597_v58  ;;  %v3816_v56 = vmul.f32 0.044715, %v12603_v48  ;;  %v4066_v55 = vmul.f32 0.7978846, %v4002_v46  ;;  %v3878_v23 = vmul.f32 %v3814_v26, %v12601_v62 }
 0xab6   : > { %12602 = vst [vmem:[#allocation77_spill] sm:$0xff] %v10252_v51  ;;  %7535 = vmatpush1.bf16.msra.mxu1 %v7534_v39  ;;  %v3941_v10 = vmul.f32 %v3877_v17, %v12600_v29  ;;  %v3815_v36 = vmul.f32 0.044715, %v12604_v42  ;;  %v10260_v30 = vpop.eup %8080  ;;  %v4068_v52 = vmul.f32 0.7978846, %v4004_v59  ;;  %v10269_v1 = vmul.f32 0.5, %v12601_v62 }
 0xab7   : > { %v4003_v28 = vadd.f32 %v3939_v14, %v12597_v58  ;;  %v3880_v49 = vmul.f32 %v3816_v56, %v12603_v48  ;;  %v3817_v12 = vmul.f32 0.044715, %v12605_v18  ;;  %v10265_v40 = vpop.eup %8082  ;;  %v3942_v24 = vmul.f32 %v3878_v23, %v12601_v62 }
 0xab8   : > { %v4005_v9 = vadd.f32 %v3941_v10, %v12600_v29  ;;  %v3879_v53 = vmul.f32 %v3815_v36, %v12604_v42  ;;  %v10274_v25 = vmul.f32 0.5, %v12603_v48  ;;  %8084 = vtanh.f32 %v4066_v55 }
 0xab9   : > { %v4067_v6 = vmul.f32 0.7978846, %v4003_v28  ;;  %v3944_v4 = vmul.f32 %v3880_v49, %v12603_v48  ;;  %v3881_v45 = vmul.f32 %v3817_v12, %v12605_v18  ;;  %v4006_v39 = vadd.f32 %v3942_v24, %v12601_v62  ;;  %v12608_v28 = vld [vmem:[#allocation101_spill] sm:$0xff]  ;;  %v12609_v12 = vld [vmem:[#allocation102_spill] sm:$0xff] }
 0xaba   : > { %12606 = vst [vmem:[#allocation78_spill] sm:$0xff] %v10274_v25  ;;  %v4069_v46 = vmul.f32 0.7978846, %v4005_v9  ;;  %v3943_v17 = vmul.f32 %v3879_v53, %v12604_v42  ;;  %8086 = vtanh.f32 %v4068_v52  ;;  %v3818_v14 = vmul.f32 0.044715, %v10061_v37  ;;  %v12617_v25 = vld [vmem:[#allocation86_spill] sm:$0xff] }
 0xabb   : > { %v4008_v26 = vadd.f32 %v3944_v4, %v12603_v48  ;;  %v3945_v59 = vmul.f32 %v3881_v45, %v12605_v18  ;;  %8088 = vtanh.f32 %v4067_v6  ;;  %v4070_v56 = vmul.f32 0.7978846, %v4006_v39 }
 0xabc   : > { %v4007_v10 = vadd.f32 %v3943_v17, %v12604_v42  ;;  %v10285_v23 = vmul.f32 0.5, %v10061_v37  ;;  %v3882_v62 = vmul.f32 %v3818_v14, %v10061_v37  ;;  %v3820_v52 = vmul.f32 0.044715, %v12608_v28 }
 0xabd   : > { %v4072_v55 = vmul.f32 0.7978846, %v4008_v26  ;;  %v4009_v36 = vadd.f32 %v3945_v59, %v12605_v18  ;;  %8090 = vtanh.f32 %v4069_v46  ;;  %v3819_v49 = vmul.f32 0.044715, %v10068_v15  ;;  %v12611_v26 = vld [vmem:[#allocation103_spill] sm:$0xff] }
 0xabe   : > { %12607 = vst [vmem:[#allocation80_spill] sm:$0xff] %v10285_v23  ;;  %v4071_v48 = vmul.f32 0.7978846, %v4007_v10  ;;  %v3821_v9 = vmul.f32 0.044715, %v12609_v12  ;;  %8092 = vtanh.f32 %v4070_v56  ;;  %v3946_v53 = vmul.f32 %v3882_v62, %v10061_v37  ;;  %v12612_v10 = vld [vmem:[#allocation104_spill] sm:$0xff] }
 0xabf   : > { %v4073_v24 = vmul.f32 0.7978846, %v4009_v36  ;;  %v3884_v6 = vmul.f32 %v3820_v52, %v12608_v28  ;;  %8094 = vtanh.f32 %v4072_v55  ;;  %v10295_v4 = vmul.f32 0.5, %v12608_v28 }
 0xac0   : > { %v3883_v45 = vmul.f32 %v3819_v49, %v10068_v15  ;;  %v3885_v39 = vmul.f32 %v3821_v9, %v12609_v12  ;;  %8096 = vtanh.f32 %v4071_v48  ;;  %v4010_v46 = vadd.f32 %v3946_v53, %v10061_v37  ;;  %v12613_v49 = vld [vmem:[#allocation106_spill] sm:$0xff] }
 0xac1   : > { %12610 = vst [vmem:[#allocation82_spill] sm:$0xff] %v10295_v4  ;;  %v3948_v17 = vmul.f32 %v3884_v6, %v12608_v28  ;;  %v3822_v59 = vmul.f32 0.044715, %v12611_v26  ;;  %8098 = vtanh.f32 %v4073_v24  ;;  %v3824_v55 = vmul.f32 0.044715, %v12612_v10  ;;  %v12614_v6 = vld [vmem:[#allocation107_spill] sm:$0xff] }
 0xac2   : > { %v3947_v14 = vmul.f32 %v3883_v45, %v10068_v15  ;;  %v3949_v56 = vmul.f32 %v3885_v39, %v12609_v12  ;;  %v4074_v36 = vmul.f32 0.7978846, %v4010_v46  ;;  %v3823_v48 = vmul.f32 0.044715, %v12613_v49  ;;  %v10308_v9 = vpop.eup %8084 }
 0xac3   : > { %v4012_v62 = vadd.f32 %v3948_v17, %v12608_v28  ;;  %v3886_v52 = vmul.f32 %v3822_v59, %v12611_v26  ;;  %v3888_v24 = vmul.f32 %v3824_v55, %v12612_v10  ;;  %v3825_v45 = vmul.f32 0.044715, %v12614_v6 }
 0xac4   : > { %v4011_v37 = vadd.f32 %v3947_v14, %v10068_v15  ;;  %v4013_v53 = vadd.f32 %v3949_v56, %v12609_v12  ;;  %v10314_v39 = vpop.eup %8086  ;;  %8100 = vtanh.f32 %v4074_v36  ;;  %v3887_v17 = vmul.f32 %v3823_v48, %v12613_v49 }
 0xac5   : > { %v4076_v46 = vmul.f32 0.7978846, %v4012_v62  ;;  %v3950_v28 = vmul.f32 %v3886_v52, %v12611_v26  ;;  %v10318_v59 = vpop.eup %8088  ;;  %v3952_v14 = vmul.f32 %v3888_v24, %v12612_v10  ;;  %v3889_v56 = vmul.f32 %v3825_v45, %v12614_v6 }
 0xac6   : > { %v4075_v4 = vmul.f32 0.7978846, %v4011_v37  ;;  %v4077_v23 = vmul.f32 0.7978846, %v4013_v53  ;;  %v10323_v55 = vmul.f32 0.5, %v12611_v26  ;;  %v3951_v36 = vmul.f32 %v3887_v17, %v12613_v49  ;;  %v12616_v37 = vld [vmem:[#allocation83_spill] sm:$0xff] }
 0xac7   : > { %8102 = vtanh.f32 %v4076_v46  ;;  %v4014_v12 = vadd.f32 %v3950_v28, %v12611_v26  ;;  %v10327_v62 = vpop.eup %8090  ;;  %v4016_v52 = vadd.f32 %v3952_v14, %v12612_v10  ;;  %v3953_v48 = vmul.f32 %v3889_v56, %v12614_v6 }
 0xac8   : > { %12615 = vst [vmem:[#allocation79_spill] sm:$0xff] %v10323_v55  ;;  %8104 = vtanh.f32 %v4075_v4  ;;  %v3731_v53 = vmul.f32 0.5, %v12616_v37  ;;  %v10332_v24 = vpop.eup %8092  ;;  %v4015_v46 = vadd.f32 %v3951_v36, %v12613_v49  ;;  %v3735_v55 = vmul.f32 0.5, %v12617_v25  ;;  %v12619_v36 = vld [vmem:[#allocation84_spill] sm:$0xff] }
 0xac9   : > { %v4078_v45 = vmul.f32 0.7978846, %v4014_v12  ;;  %v4179_v26 = vadd.f32 1.0, %v10138_v19  ;;  %v10337_v28 = vpop.eup %8094  ;;  %8106 = vtanh.f32 %v4077_v23  ;;  %v4080_v17 = vmul.f32 0.7978846, %v4016_v52 }
 0xaca   : > { %v4017_v4 = vadd.f32 %v3953_v48, %v12614_v6  ;;  %v4183_v14 = vadd.f32 1.0, %v10173_v38  ;;  %v10341_v56 = vpop.eup %8096  ;;  %v10344_v37 = vmul.f32 0.5, %v12612_v10  ;;  %v4079_v12 = vmul.f32 0.7978846, %v4015_v46 }
 0xacb   : > { %8108 = vtanh.f32 %v4078_v45  ;;  %v3733_v49 = vmul.f32 0.5, %v12619_v36  ;;  %v10347_v25 = vpop.eup %8098  ;;  %v4243_v19 = vmul.f32 %v4179_v26, %v3731_v53  ;;  %v3737_v23 = vmul.f32 0.5, %v9930_v57 }
 0xacc   : > { %12618 = vst [vmem:[#allocation81_spill] sm:$0xff] %v10344_v37  ;;  %v4247_v51 = vmul.f32 %v4183_v14, %v3735_v55  ;;  %v4181_v52 = vadd.f32 1.0, %v10151_v33  ;;  %8110 = vtanh.f32 %v4080_v17  ;;  %v4081_v48 = vmul.f32 0.7978846, %v4017_v4 }
 0xacd   : > { %v4185_v38 = vadd.f32 1.0, %v10181_v7  ;;  %v3826_v45 = vmul.f32 0.044715, %v10107_v13  ;;  %8112 = vtanh.f32 %v4079_v12  ;;  %v10354_v46 = vmul.f32 0.5, %v10107_v13 }
 0xace   : > { %v7504_v10 = vpack.c.bf16 %v4247_v51, %v4243_v19  ;;  %v4245_v37 = vmul.f32 %v4181_v52, %v3733_v49  ;;  %v10356_v36 = vpop.eup %8100  ;;  %v3828_v57 = vmul.f32 0.044715, %v10109_v50  ;;  %v4178_v33 = vadd.f32 1.0, %v10123_v11  ;;  %v12620_v19 = vld [vmem:[#allocation92_spill] sm:$0xff]  ;;  %v12621_v11 = vld [vmem:[#allocation105_spill] sm:$0xff] }
 0xacf   : > { %v4249_v53 = vmul.f32 %v4185_v38, %v3737_v23  ;;  %v3890_v55 = vmul.f32 %v3826_v45, %v10107_v13  ;;  %v4182_v7 = vadd.f32 1.0, %v10157_v61  ;;  %v4180_v26 = vadd.f32 1.0, %v10134_v41  ;;  %v12622_v61 = vld [vmem:[#allocation97_spill] sm:$0xff] }
 0xad0   : > { %7505 = vmatprep.subr.bf16.mxu0 %v7504_v10  ;;  %v4184_v51 = vadd.f32 1.0, %v10167_v21  ;;  %v3827_v49 = vmul.f32 0.044715, %v10112_v43  ;;  %v3892_v12 = vmul.f32 %v3828_v57, %v10109_v50  ;;  %v4242_v23 = vmul.f32 %v4178_v33, %v12620_v19 }
 0xad1   : > { %v10365_v17 = vpop.eup %8102  ;;  %v7536_v4 = vpack.c.bf16 %v4249_v53, %v4245_v37  ;;  %v3954_v14 = vmul.f32 %v3890_v55, %v10107_v13  ;;  %v4246_v38 = vmul.f32 %v4182_v7, %v12621_v11  ;;  %v4244_v45 = vmul.f32 %v4180_v26, %v12622_v61  ;;  %v12623_v61 = vld [vmem:[#allocation108_spill] sm:$0xff] }
 0xad2   : > { %v10370_v52 = vpop.eup %8104  ;;  %v4248_v41 = vmul.f32 %v4184_v51, %v10126_v8  ;;  %v3891_v21 = vmul.f32 %v3827_v49, %v10112_v43  ;;  %8114 = vtanh.f32 %v4081_v48  ;;  %v3956_v10 = vmul.f32 %v3892_v12, %v10109_v50 }
 0xad3   : > { %7537 = vmatprep.subr.bf16.mxu1 %v7536_v4  ;;  %v4018_v37 = vadd.f32 %v3954_v14, %v10107_v13  ;;  %v3829_v53 = vmul.f32 0.044715, %v10114_v22  ;;  %v10379_v55 = vpop.eup %8106  ;;  %v7506_v57 = vpack.c.bf16 %v4246_v38, %v4242_v23  ;;  %v3830_v26 = vmul.f32 0.044715, %v10119_v34 }
 0xad4   : > { %v7538_v33 = vpack.c.bf16 %v4248_v41, %v4244_v45  ;;  %v3955_v7 = vmul.f32 %v3891_v21, %v10112_v43  ;;  %v4020_v48 = vadd.f32 %v3956_v10, %v10109_v50  ;;  %v10388_v13 = vmul.f32 0.5, %v10119_v34 }
 0xad5   : > { %v10383_v19 = vpop.eup %8108  ;;  %v4082_v8 = vmul.f32 0.7978846, %v4018_v37  ;;  %v3893_v51 = vmul.f32 %v3829_v53, %v10114_v22  ;;  %7507 = vmatpush1.bf16.msra.mxu0 %v7506_v57  ;;  %v3894_v4 = vmul.f32 %v3830_v26, %v10119_v34  ;;  %v3832_v14 = vmul.f32 0.044715, %v10121_v63 }
 0xad6   : > { %7539 = vmatpush1.bf16.msra.mxu1 %v7538_v33  ;;  %v4019_v49 = vadd.f32 %v3955_v7, %v10112_v43  ;;  %v3831_v12 = vmul.f32 0.044715, %v10130_v16  ;;  %v10394_v23 = vpop.eup %8110  ;;  %v4084_v11 = vmul.f32 0.7978846, %v4020_v48  ;;  %v3833_v45 = vmul.f32 0.044715, %v12623_v61 }
 0xad7   : > { %8116 = vtanh.f32 %v4082_v8  ;;  %v3957_v38 = vmul.f32 %v3893_v51, %v10114_v22  ;;  %v10398_v41 = vpop.eup %8112  ;;  %v3958_v37 = vmul.f32 %v3894_v4, %v10119_v34  ;;  %v3896_v10 = vmul.f32 %v3832_v14, %v10121_v63 }
 0xad8   : > { %v4083_v21 = vmul.f32 0.7978846, %v4019_v49  ;;  %v3895_v53 = vmul.f32 %v3831_v12, %v10130_v16  ;;  %8118 = vtanh.f32 %v4084_v11  ;;  %v3897_v33 = vmul.f32 %v3833_v45, %v12623_v61 }
 0xad9   : > { %v4021_v57 = vadd.f32 %v3957_v38, %v10114_v22  ;;  %v3739_v7 = vmul.f32 0.5, %v9960_v44  ;;  %v4022_v26 = vadd.f32 %v3958_v37, %v10119_v34  ;;  %v3960_v8 = vmul.f32 %v3896_v10, %v10121_v63 }
 0xada   : > { %8120 = vtanh.f32 %v4083_v21  ;;  %v3959_v48 = vmul.f32 %v3895_v53, %v10130_v16  ;;  %v3961_v49 = vmul.f32 %v3897_v33, %v12623_v61  ;;  %v3743_v4 = vmul.f32 0.5, %v9976_v54 }
 0xadb   : > { %v4085_v51 = vmul.f32 0.7978846, %v4021_v57  ;;  %v4187_v14 = vadd.f32 1.0, %v10220_v2  ;;  %v4086_v12 = vmul.f32 0.7978846, %v4022_v26  ;;  %v4024_v11 = vadd.f32 %v3960_v8, %v10121_v63 }
 0xadc   : > { %v4023_v38 = vadd.f32 %v3959_v48, %v10130_v16  ;;  %v4191_v44 = vadd.f32 1.0, %v10260_v30  ;;  %v10415_v45 = vpop.eup %8114  ;;  %v4025_v34 = vadd.f32 %v3961_v49, %v12623_v61  ;;  %v3741_v37 = vmul.f32 0.5, %v9962_v35 }
 0xadd   : > { %8122 = vtanh.f32 %v4085_v51  ;;  %v4251_v21 = vmul.f32 %v4187_v14, %v3739_v7  ;;  %v4088_v10 = vmul.f32 0.7978846, %v4024_v11  ;;  %v3745_v57 = vmul.f32 0.5, %v9978_v0  ;;  %v12624_v0 = vld [vmem:[#allocation109_spill] sm:$0xff] }
 0xade   : > { %8124 = vtanh.f32 %v4086_v12  ;;  %v4087_v54 = vmul.f32 0.7978846, %v4023_v38  ;;  %v4255_v53 = vmul.f32 %v4191_v44, %v3743_v4  ;;  %v4089_v2 = vmul.f32 0.7978846, %v4025_v34  ;;  %v12625_v12 = vld [vmem:[#allocation110_spill] sm:$0xff] }
 0xadf   : > { %v4189_v33 = vadd.f32 1.0, %v10222_v32  ;;  %v4193_v26 = vadd.f32 1.0, %v10265_v40  ;;  %8126 = vtanh.f32 %v4088_v10  ;;  %v4186_v8 = vadd.f32 1.0, %v10209_v60 }
 0xae0   : > { %v7508_v30 = vpack.c.bf16 %v4255_v53, %v4251_v21  ;;  %v4190_v48 = vadd.f32 1.0, %v10225_v31  ;;  %8128 = vtanh.f32 %v4087_v54  ;;  %v4188_v49 = vadd.f32 1.0, %v10214_v5 }
 0xae1   : > { %v10424_v7 = vpop.eup %8116  ;;  %v4253_v35 = vmul.f32 %v4189_v33, %v3741_v37  ;;  %v4257_v51 = vmul.f32 %v4193_v26, %v3745_v57  ;;  %8130 = vtanh.f32 %v4089_v2  ;;  %v4250_v4 = vmul.f32 %v4186_v8, %v12624_v0 }
 0xae2   : > { %7509 = vmatprep.subr.bf16.mxu0 %v7508_v30  ;;  %v4254_v32 = vmul.f32 %v4190_v48, %v10187_v27  ;;  %v4192_v40 = vadd.f32 1.0, %v10237_v47  ;;  %v10430_v14 = vpop.eup %8118  ;;  %v4252_v31 = vmul.f32 %v4188_v49, %v12625_v12  ;;  %v3747_v11 = vmul.f32 0.5, %v12597_v58 }
 0xae3   : > { %v7540_v60 = vpack.c.bf16 %v4257_v51, %v4253_v35  ;;  %v3751_v38 = vmul.f32 0.5, %v12604_v42  ;;  %v4195_v21 = vadd.f32 1.0, %v10318_v59  ;;  %v4199_v27 = vadd.f32 1.0, %v10341_v56  ;;  %v12627_v35 = vld [vmem:[#allocation106_spill] sm:$0xff] }
 0xae4   : > { %v10435_v44 = vpop.eup %8120  ;;  %v7510_v5 = vpack.c.bf16 %v4254_v32, %v4250_v4  ;;  %v4256_v34 = vmul.f32 %v4192_v40, %v10190_v3  ;;  %v3749_v47 = vmul.f32 0.5, %v12600_v29  ;;  %v3753_v37 = vmul.f32 0.5, %v12605_v18 }
 0xae5   : > { %7541 = vmatprep.subr.bf16.mxu1 %v7540_v60  ;;  %v4197_v10 = vadd.f32 1.0, %v10327_v62  ;;  %v4201_v58 = vadd.f32 1.0, %v10347_v25  ;;  %v4259_v54 = vmul.f32 %v4195_v21, %v3747_v11  ;;  %v4263_v53 = vmul.f32 %v4199_v27, %v3751_v38 }
 0xae6   : > { %7511 = vmatpush1.bf16.msra.mxu0 %v7510_v5  ;;  %v7542_v42 = vpack.c.bf16 %v4256_v34, %v4252_v31  ;;  %v4194_v2 = vadd.f32 1.0, %v10308_v9  ;;  %v4198_v56 = vadd.f32 1.0, %v10332_v24  ;;  %v4196_v33 = vadd.f32 1.0, %v10314_v39  ;;  %v12626_v9 = vld [vmem:[#allocation77_spill] sm:$0xff]  ;;  %v12628_v24 = vld [vmem:[#allocation78_spill] sm:$0xff] }
 0xae7   : > { %v8123_v3 = vpop.eup %8122  ;;  %v4261_v57 = vmul.f32 %v4197_v10, %v3749_v47  ;;  %v4265_v59 = vmul.f32 %v4201_v58, %v3753_v37  ;;  %v7512_v18 = vpack.c.bf16 %v4263_v53, %v4259_v54  ;;  %v4200_v25 = vadd.f32 1.0, %v10337_v28  ;;  %v12631_v10 = vld [vmem:[#allocation79_spill] sm:$0xff]  ;;  %v12633_v53 = vld [vmem:[#allocation81_spill] sm:$0xff] }
 0xae8   : > { %v8125_v29 = vpop.eup %8124  ;;  %7543 = vmatpush1.bf16.msra.mxu1 %v7542_v42  ;;  %v4258_v62 = vmul.f32 %v4194_v2, %v10244_v20  ;;  %v3755_v26 = vmul.f32 0.5, %v10068_v15  ;;  %v4262_v8 = vmul.f32 %v4198_v56, %v10269_v1  ;;  %v4260_v48 = vmul.f32 %v4196_v33, %v12626_v9  ;;  %v12629_v20 = vld [vmem:[#allocation102_spill] sm:$0xff] }
 0xae9   : > { %v7544_v30 = vpack.c.bf16 %v4265_v59, %v4261_v57  ;;  %v3759_v51 = vmul.f32 0.5, %v12627_v35  ;;  %v8127_v49 = vpop.eup %8126  ;;  %7513 = vmatprep.subr.bf16.mxu0 %v7512_v18  ;;  %v4264_v39 = vmul.f32 %v4200_v25, %v12628_v24  ;;  %v4203_v0 = vadd.f32 1.0, %v10370_v52  ;;  %v12632_v42 = vld [vmem:[#allocation82_spill] sm:$0xff] }
 0xaea   : > { %v4207_v4 = vadd.f32 1.0, %v10398_v41  ;;  %v3757_v32 = vmul.f32 0.5, %v12629_v20  ;;  %v8129_v28 = vpop.eup %8128  ;;  %v7514_v15 = vpack.c.bf16 %v4262_v8, %v4258_v62  ;;  %v3761_v40 = vmul.f32 0.5, %v12614_v6  ;;  %v12630_v6 = vld [vmem:[#allocation80_spill] sm:$0xff]  ;;  %v4290_v20 = vld [vmem:[%s12342_s10 + $0x40] sm:$0xff] }
 0xaeb   : > { %7545 = vmatprep.subr.bf16.mxu1 %v7544_v30  ;;  %v4205_v1 = vadd.f32 1.0, %v10379_v55  ;;  %v4209_v60 = vadd.f32 1.0, %v10415_v45  ;;  %v8131_v12 = vpop.eup %8130  ;;  %v7546_v31 = vpack.c.bf16 %v4264_v39, %v4260_v48  ;;  %v4267_v11 = vmul.f32 %v4203_v0, %v3755_v26  ;;  %v4287_v39 = vld [vmem:[%s12342_s10 + $0x28] sm:$0xff]  ;;  %v4288_v0 = vld [vmem:[%s12342_s10 + $0x30] sm:$0xff] }
 0xaec   : > { %v4271_v38 = vmul.f32 %v4207_v4, %v3759_v51  ;;  %v4202_v5 = vadd.f32 1.0, %v10356_v36  ;;  %7515 = vmatpush1.bf16.msra.mxu0 %v7514_v15  ;;  %v4206_v34 = vadd.f32 1.0, %v10383_v19  ;;  %v4204_v21 = vadd.f32 1.0, %v10365_v17  ;;  %v4289_v4 = vld [vmem:[%s12342_s10 + $0x38] sm:$0xff] }
 0xaed   : > { %v4269_v52 = vmul.f32 %v4205_v1, %v3757_v32  ;;  %v4273_v41 = vmul.f32 %v4209_v60, %v3761_v40  ;;  %7547 = vmatpush1.bf16.msra.mxu1 %v7546_v31  ;;  %v4208_v55 = vadd.f32 1.0, %v10394_v23  ;;  %v3763_v45 = vmul.f32 0.5, %v10112_v43  ;;  %v4291_v32 = vld [vmem:[%s12342_s10 + $0x48] sm:$0xff]  ;;  %v4293_v15 = vld [vmem:[%s12342_s10 + $0x58] sm:$0xff]  ;;  %v4294_v40 = vld [vmem:[%s12342_s10 + $0x60] sm:$0xff] }
 0xaee   : > { %v7516_v27 = vpack.c.bf16 %v4271_v38, %v4267_v11  ;;  %v4266_v47 = vmul.f32 %v4202_v5, %v12630_v6  ;;  %v4270_v58 = vmul.f32 %v4206_v34, %v12631_v10  ;;  %v4268_v36 = vmul.f32 %v4204_v21, %v12632_v42  ;;  %v4295_v1 = vld [vmem:[%s12342_s10 + $0x68] sm:$0xff]  ;;  %v4296_v60 = vld [vmem:[%s12342_s10 + $0x70] sm:$0xff]  ;;  %v4298_v31 = vld [vmem:[%s12342_s10 + $0x80] sm:$0xff] }
 0xaef   : > { %v7548_v37 = vpack.c.bf16 %v4273_v41, %v4269_v52  ;;  %v3767_v54 = vmul.f32 0.5, %v10130_v16  ;;  %v4272_v19 = vmul.f32 %v4208_v55, %v12633_v53  ;;  %v4211_v17 = vadd.f32 1.0, %v10435_v44  ;;  %v4299_v11 = vld [vmem:[%s12342_s10 + $0x88] sm:$0xff]  ;;  %v4300_v38 = vld [vmem:[%s12342_s10 + $0x90] sm:$0xff]  ;;  %v4301_v5 = vld [vmem:[%s12342_s10 + $0x98] sm:$0xff] }
 0xaf0   : > { %7517 = vmatprep.subr.bf16.mxu0 %v7516_v27  ;;  %v4215_v2 = vadd.f32 1.0, %v8129_v28  ;;  %v3765_v57 = vmul.f32 0.5, %v10114_v22  ;;  %v7518_v59 = vpack.c.bf16 %v4270_v58, %v4266_v47  ;;  %v3769_v23 = vmul.f32 0.5, %v12623_v61  ;;  %v4292_v28 = vld [vmem:[%s12342_s10 + $0x50] sm:$0xff]  ;;  %v4302_v52 = vld [vmem:[%s12342_s10 + $0xa0] sm:$0xff]  ;;  %v4303_v41 = vld [vmem:[%s12342_s10 + $0xa8] sm:$0xff] }
 0xaf1   : > { %7549 = vmatprep.subr.bf16.mxu1 %v7548_v37  ;;  %v4213_v43 = vadd.f32 1.0, %v8123_v3  ;;  %v4217_v56 = vadd.f32 1.0, %v8131_v12  ;;  %v7550_v33 = vpack.c.bf16 %v4272_v19, %v4268_v36  ;;  %v4275_v18 = vmul.f32 %v4211_v17, %v3763_v45  ;;  %v4297_v12 = vld [vmem:[%s12342_s10 + $0x78] sm:$0xff]  ;;  %v4304_v34 = vld [vmem:[%s12342_s10 + $0xb0] sm:$0xff]  ;;  %v4306_v27 = vld [vmem:[%s12342_s10 + $0xc0] sm:$0xff] }
 0xaf2   : > { %v4279_v62 = vmul.f32 %v4215_v2, %v3767_v54  ;;  %v4210_v25 = vadd.f32 1.0, %v10424_v7  ;;  %7519 = vmatpush1.bf16.msra.mxu0 %v7518_v59  ;;  %v4214_v30 = vadd.f32 1.0, %v8125_v29  ;;  %v4212_v44 = vadd.f32 1.0, %v10430_v14  ;;  %v4285_v14 = vld [vmem:[%s12342_s10 + $0x18] sm:$0xff]  ;;  %v4307_v6 = vld [vmem:[%s12342_s10 + $0xc8] sm:$0xff]  ;;  %v4308_v47 = vld [vmem:[%s12342_s10 + $0xd0] sm:$0xff] }
 0xaf3   : > { %v4277_v16 = vmul.f32 %v4213_v43, %v3765_v57  ;;  %v4281_v26 = vmul.f32 %v4217_v56, %v3769_v23  ;;  %v3764_v8 = vmul.f32 0.5, %v10109_v50  ;;  %v3768_v22 = vmul.f32 0.5, %v10121_v63  ;;  %7551 = vmatpush1.bf16.msra.mxu1 %v7550_v33  ;;  %v4282_v50 = vld [vmem:[%s12342_s10] sm:$0xff]  ;;  %v4305_v21 = vld [vmem:[%s12342_s10 + $0xb8] sm:$0xff]  ;;  %v4311_v37 = vld [vmem:[%s12342_s10 + $0xe8] sm:$0xff] }
 0xaf4   : > { %v7520_v9 = vpack.c.bf16 %v4279_v62, %v4275_v18  ;;  %v4216_v61 = vadd.f32 1.0, %v8127_v49  ;;  %v4274_v48 = vmul.f32 %v4210_v25, %v10354_v46  ;;  %v4278_v35 = vmul.f32 %v4214_v30, %v10388_v13  ;;  %v4283_v46 = vld [vmem:[%s12342_s10 + $0x8] sm:$0xff]  ;;  %v4284_v13 = vld [vmem:[%s12342_s10 + $0x10] sm:$0xff]  ;;  %v4286_v49 = vld [vmem:[%s12342_s10 + $0x20] sm:$0xff] }
 0xaf5   : > { %v7552_v3 = vpack.c.bf16 %v4281_v26, %v4277_v16  ;;  %v4276_v7 = vmul.f32 %v4212_v44, %v3764_v8  ;;  %v12634_v63 = vmov 0.0   ;;  %v4309_v55 = vld [vmem:[%s12342_s10 + $0xd8] sm:$0xff]  ;;  %v4310_v45 = vld [vmem:[%s12342_s10 + $0xe0] sm:$0xff]  ;;  %v4312_v10 = vld [vmem:[%s12342_s10 + $0xf0] sm:$0xff] }
 0xaf6   : > { %7521 = vmatprep.subr.bf16.mxu0 %v7520_v9  ;;  %v4280_v51 = vmul.f32 %v4216_v61, %v3768_v22  ;;  %v7522_v24 = vpack.c.bf16 %v4278_v35, %v4274_v48  ;;  %v4313_v58 = vld [vmem:[%s12342_s10 + $0xf8] sm:$0xff] }
 0xaf7   : > { %7553 = vmatprep.subr.bf16.mxu1 %v7552_v3 }
 0xaf8   : > { %v7554_v29 = vpack.c.bf16 %v4280_v51, %v4276_v7  ;;  %7523 = vmatpush1.bf16.msra.mxu0 %v7522_v24 }
 0xafa   : > { %7555 = vmatpush1.bf16.msra.mxu1 %v7554_v29 }
 0xafb   : > { %4379 = vmatmul.mubr.f32.vlgmr.msra.gmra.mrb[126].mxu0 %v4282_v50 }
 0xafc   : > { %4384 = vmatprep.mubr.f32.mxu0 %v12634_v63 }
 0xafd   : > { %4636 = vmatmul.mubr.f32.vlgmr.msra.gmra.mrb[162].mxu1 %v4282_v50 }
 0xafe   : > { %4641 = vmatprep.mubr.f32.mxu1 %v12634_v63 }
 0xaff   : > { %4385 = vmatmul.mubr.f32.gmra.mrb[208].mxu0 %v4283_v46 }
 0xb00   : > { %4390 = vmatprep.mubr.f32.mxu0 %v12634_v63 }
 0xb01   : > { %4642 = vmatmul.mubr.f32.gmra.mrb[228].mxu1 %v4283_v46 }
 0xb02   : > { %4647 = vmatprep.mubr.f32.mxu1 %v12634_v63 }
 0xb03   : > { %4391 = vmatmul.mubr.f32.gmra.mrb[210].mxu0 %v4284_v13 }
 0xb04   : > { %4396 = vmatprep.mubr.f32.mxu0 %v12634_v63 }
 0xb05   : > { %4648 = vmatmul.mubr.f32.gmra.mrb[230].mxu1 %v4284_v13 }
 0xb06   : > { %4653 = vmatprep.mubr.f32.mxu1 %v12634_v63 }
 0xb07   : > { %4397 = vmatmul.mubr.f32.gmra.mrb[212].mxu0 %v4285_v14 }
 0xb08   : > { %4402 = vmatprep.mubr.f32.mxu0 %v12634_v63 }
 0xb09   : > { %4654 = vmatmul.mubr.f32.gmra.mrb[232].mxu1 %v4285_v14 }
 0xb0a   : > { %4659 = vmatprep.mubr.f32.mxu1 %v12634_v63 }
 0xb0b   : > { %4403 = vmatmul.mubr.f32.gmra.mrb[214].mxu0 %v4286_v49 }
 0xb0c   : > { %4408 = vmatprep.mubr.f32.mxu0 %v12634_v63 }
 0xb0d   : > { %4660 = vmatmul.mubr.f32.gmra.mrb[234].mxu1 %v4286_v49 }
 0xb0e   : > { %4665 = vmatprep.mubr.f32.mxu1 %v12634_v63 }
 0xb0f   : > { %4409 = vmatmul.mubr.f32.gmra.mrb[216].mxu0 %v4287_v39 }
 0xb10   : > { %4414 = vmatprep.mubr.f32.mxu0 %v12634_v63 }
 0xb11   : > { %4666 = vmatmul.mubr.f32.gmra.mrb[236].mxu1 %v4287_v39 }
 0xb12   : > { %4671 = vmatprep.mubr.f32.mxu1 %v12634_v63 }
 0xb13   : > { %4415 = vmatmul.mubr.f32.gmra.mrb[218].mxu0 %v4288_v0 }
 0xb14   : > { %4420 = vmatprep.mubr.f32.mxu0 %v12634_v63 }
 0xb15   : > { %4672 = vmatmul.mubr.f32.gmra.mrb[238].mxu1 %v4288_v0 }
 0xb16   : > { %4677 = vmatprep.mubr.f32.mxu1 %v12634_v63 }
 0xb17   : > { %4421 = vmatmul.mubr.f32.gmra.mrb[220].mxu0 %v4289_v4 }
 0xb18   : > { %4426 = vmatprep.mubr.f32.mxu0 %v12634_v63 }
 0xb19   : > { %4678 = vmatmul.mubr.f32.gmra.mrb[240].mxu1 %v4289_v4 }
 0xb1a   : > { %4683 = vmatprep.mubr.f32.mxu1 %v12634_v63 }
 0xb1b   : > { %4427 = vmatmul.mubr.f32.gmra.mrb[222].mxu0 %v4290_v20 }
 0xb1c   : > { %4432 = vmatprep.mubr.f32.mxu0 %v12634_v63 }
 0xb1d   : > { %4684 = vmatmul.mubr.f32.gmra.mrb[242].mxu1 %v4290_v20 }
 0xb1e   : > { %4689 = vmatprep.mubr.f32.mxu1 %v12634_v63 }
 0xb1f   : > { %4433 = vmatmul.mubr.f32.gmra.mrb[224].mxu0 %v4291_v32 }
 0xb20   : > { %4438 = vmatprep.mubr.f32.mxu0 %v12634_v63 }
 0xb21   : > { %4690 = vmatmul.mubr.f32.gmra.mrb[244].mxu1 %v4291_v32 }
 0xb22   : > { %4695 = vmatprep.mubr.f32.mxu1 %v12634_v63 }
 0xb23   : > { %4439 = vmatmul.mubr.f32.gmra.mrb[226].mxu0 %v4292_v28 }
 0xb24   : > { %4444 = vmatprep.mubr.f32.mxu0 %v12634_v63 }
 0xb25   : > { %4696 = vmatmul.mubr.f32.gmra.mrb[246].mxu1 %v4292_v28 }
 0xb26   : > { %4701 = vmatprep.mubr.f32.mxu1 %v12634_v63 }
 0xb27   : > { %4445 = vmatmul.mubr.f32.gmra.mrb[228].mxu0 %v4293_v15 }
 0xb28   : > { %4450 = vmatprep.mubr.f32.mxu0 %v12634_v63 }
 0xb29   : > { %4702 = vmatmul.mubr.f32.gmra.mrb[248].mxu1 %v4293_v15 }
 0xb2a   : > { %4707 = vmatprep.mubr.f32.mxu1 %v12634_v63 }
 0xb2b   : > { %4451 = vmatmul.mubr.f32.gmra.mrb[230].mxu0 %v4294_v40 }
 0xb2c   : > { %4456 = vmatprep.mubr.f32.mxu0 %v12634_v63 }
 0xb2d   : > { %4708 = vmatmul.mubr.f32.gmra.mrb[250].mxu1 %v4294_v40 }
 0xb2e   : > { %4713 = vmatprep.mubr.f32.mxu1 %v12634_v63 }
 0xb2f   : > { %4457 = vmatmul.mubr.f32.gmra.mrb[232].mxu0 %v4295_v1 }
 0xb30   : > { %4462 = vmatprep.mubr.f32.mxu0 %v12634_v63 }
 0xb31   : > { %4714 = vmatmul.mubr.f32.gmra.mrb[252].mxu1 %v4295_v1 }
 0xb32   : > { %4719 = vmatprep.mubr.f32.mxu1 %v12634_v63 }
 0xb33   : > { %4463 = vmatmul.mubr.f32.gmra.mrb[234].mxu0 %v4296_v60 }
 0xb34   : > { %4468 = vmatprep.mubr.f32.mxu0 %v12634_v63 }
 0xb35   : > { %4720 = vmatmul.mubr.f32.gmra.mrb[254].mxu1 %v4296_v60 }
 0xb36   : > { %4725 = vmatprep.mubr.f32.mxu1 %v12634_v63 }
 0xb37   : > { %4469 = vmatmul.mubr.f32.gmra.mrb[236].mxu0 %v4297_v12 }
 0xb38   : > { %4474 = vmatprep.mubr.f32.mxu0 %v12634_v63 }
 0xb39   : > { %4726 = vmatmul.mubr.f32.gmra.mrb[0].mxu1 %v4297_v12 }
 0xb3a   : > { %4731 = vmatprep.mubr.f32.mxu1 %v12634_v63 }
 0xb3b   : > { %4475 = vmatmul.mubr.f32.gmra.mrb[238].mxu0 %v4298_v31 }
 0xb3c   : > { %4480 = vmatprep.mubr.f32.mxu0 %v12634_v63 }
 0xb3d   : > { %4732 = vmatmul.mubr.f32.gmra.mrb[2].mxu1 %v4298_v31 }
 0xb3e   : > { %4737 = vmatprep.mubr.f32.mxu1 %v12634_v63 }
 0xb3f   : > { %4481 = vmatmul.mubr.f32.gmra.mrb[240].mxu0 %v4299_v11 }
 0xb40   : > { %4486 = vmatprep.mubr.f32.mxu0 %v12634_v63 }
 0xb41   : > { %4738 = vmatmul.mubr.f32.gmra.mrb[4].mxu1 %v4299_v11 }
 0xb42   : > { %4743 = vmatprep.mubr.f32.mxu1 %v12634_v63 }
 0xb43   : > { %4487 = vmatmul.mubr.f32.gmra.mrb[242].mxu0 %v4300_v38 }
 0xb44   : > { %4492 = vmatprep.mubr.f32.mxu0 %v12634_v63 }
 0xb45   : > { %4744 = vmatmul.mubr.f32.gmra.mrb[6].mxu1 %v4300_v38 }
 0xb46   : > { %4749 = vmatprep.mubr.f32.mxu1 %v12634_v63 }
 0xb47   : > { %4493 = vmatmul.mubr.f32.gmra.mrb[244].mxu0 %v4301_v5 }
 0xb48   : > { %4498 = vmatprep.mubr.f32.mxu0 %v12634_v63 }
 0xb49   : > { %4750 = vmatmul.mubr.f32.gmra.mrb[8].mxu1 %v4301_v5 }
 0xb4a   : > { %4755 = vmatprep.mubr.f32.mxu1 %v12634_v63 }
 0xb4b   : > { %4499 = vmatmul.mubr.f32.gmra.mrb[246].mxu0 %v4302_v52 }
 0xb4c   : > { %4504 = vmatprep.mubr.f32.mxu0 %v12634_v63 }
 0xb4d   : > { %4756 = vmatmul.mubr.f32.gmra.mrb[10].mxu1 %v4302_v52 }
 0xb4e   : > { %4761 = vmatprep.mubr.f32.mxu1 %v12634_v63 }
 0xb4f   : > { %4505 = vmatmul.mubr.f32.gmra.mrb[248].mxu0 %v4303_v41 }
 0xb50   : > { %4510 = vmatprep.mubr.f32.mxu0 %v12634_v63 }
 0xb51   : > { %4762 = vmatmul.mubr.f32.gmra.mrb[12].mxu1 %v4303_v41 }
 0xb52   : > { %4767 = vmatprep.mubr.f32.mxu1 %v12634_v63 }
 0xb53   : > { %4511 = vmatmul.mubr.f32.gmra.mrb[250].mxu0 %v4304_v34 }
 0xb54   : > { %4516 = vmatprep.mubr.f32.mxu0 %v12634_v63 }
 0xb55   : > { %4768 = vmatmul.mubr.f32.gmra.mrb[14].mxu1 %v4304_v34 }
 0xb56   : > { %4773 = vmatprep.mubr.f32.mxu1 %v12634_v63 }
 0xb57   : > { %4517 = vmatmul.mubr.f32.gmra.mrb[252].mxu0 %v4305_v21 }
 0xb58   : > { %4522 = vmatprep.mubr.f32.mxu0 %v12634_v63 }
 0xb59   : > { %4774 = vmatmul.mubr.f32.gmra.mrb[16].mxu1 %v4305_v21 }
 0xb5a   : > { %4779 = vmatprep.mubr.f32.mxu1 %v12634_v63 }
 0xb5b   : > { %4523 = vmatmul.mubr.f32.gmra.mrb[254].mxu0 %v4306_v27 }
 0xb5c   : > { %4528 = vmatprep.mubr.f32.mxu0 %v12634_v63 }
 0xb5d   : > { %4780 = vmatmul.mubr.f32.gmra.mrb[18].mxu1 %v4306_v27 }
 0xb5e   : > { %4785 = vmatprep.mubr.f32.mxu1 %v12634_v63 }
 0xb5f   : > { %4529 = vmatmul.mubr.f32.gmra.mrb[0].mxu0 %v4307_v6 }
 0xb60   : > { %4534 = vmatprep.mubr.f32.mxu0 %v12634_v63 }
 0xb61   : > { %4786 = vmatmul.mubr.f32.gmra.mrb[20].mxu1 %v4307_v6 }
 0xb62   : > { %4791 = vmatprep.mubr.f32.mxu1 %v12634_v63 }
 0xb63   : > { %4535 = vmatmul.mubr.f32.gmra.mrb[2].mxu0 %v4308_v47 }
 0xb64   : > { %4540 = vmatprep.mubr.f32.mxu0 %v12634_v63 }
 0xb65   : > { %4792 = vmatmul.mubr.f32.gmra.mrb[22].mxu1 %v4308_v47 }
 0xb66   : > { %4797 = vmatprep.mubr.f32.mxu1 %v12634_v63 }
 0xb67   : > { %4541 = vmatmul.mubr.f32.gmra.mrb[4].mxu0 %v4309_v55 }
 0xb68   : > { %4546 = vmatprep.mubr.f32.mxu0 %v12634_v63 }
 0xb69   : > { %4798 = vmatmul.mubr.f32.gmra.mrb[24].mxu1 %v4309_v55 }
 0xb6a   : > { %4803 = vmatprep.mubr.f32.mxu1 %v12634_v63 }
 0xb6b   : > { %4547 = vmatmul.mubr.f32.gmra.mrb[6].mxu0 %v4310_v45 }
 0xb6c   : > { %4552 = vmatprep.mubr.f32.mxu0 %v12634_v63 }
 0xb6d   : > { %4804 = vmatmul.mubr.f32.gmra.mrb[26].mxu1 %v4310_v45 }
 0xb6e   : > { %4809 = vmatprep.mubr.f32.mxu1 %v12634_v63 }
 0xb6f   : > { %4553 = vmatmul.mubr.f32.gmra.mrb[8].mxu0 %v4311_v37 }
 0xb70   : > { %4558 = vmatprep.mubr.f32.mxu0 %v12634_v63 }
 0xb71   : > { %4810 = vmatmul.mubr.f32.gmra.mrb[28].mxu1 %v4311_v37 }
 0xb72   : > { %4815 = vmatprep.mubr.f32.mxu1 %v12634_v63 }
 0xb73   : > { %4559 = vmatmul.mubr.f32.gmra.mrb[10].mxu0 %v4312_v10 }
 0xb74   : > { %4564 = vmatprep.mubr.f32.mxu0 %v12634_v63 }
 0xb75   : > { %4816 = vmatmul.mubr.f32.gmra.mrb[30].mxu1 %v4312_v10 }
 0xb76   : > { %4821 = vmatprep.mubr.f32.mxu1 %v12634_v63 }
 0xb77   : > { %4565 = vmatmul.mubr.f32.gmra.mrb[12].mxu0 %v4313_v58 }
 0xb79   : > { %4822 = vmatmul.mubr.f32.gmra.mrb[32].mxu1 %v4313_v58 }
 0xbce   : > { %v4380_v42 = vpop.f32.mrb[126].mxu0 }
 0xbcf   : > { %v4956_v36 = vmul.f32 0.044715, %v4380_v42  ;;  %v4382_v54 = vpop.f32.mrb[127].mxu0  ;;  %v10637_v23 = vmul.f32 0.5, %v4380_v42 }
 0xbd0   : > { %v4637_v53 = vpop.f32.mrb[162].mxu1  ;;  %v4957_v19 = vmul.f32 0.044715, %v4382_v54  ;;  %v10645_v44 = vmul.f32 0.5, %v4382_v54 }
 0xbd1   : > { %v4958_v17 = vmul.f32 0.044715, %v4637_v53  ;;  %v4639_v2 = vpop.f32.mrb[163].mxu1  ;;  %v5084_v57 = vmul.f32 %v4956_v36, %v4380_v42  ;;  %v10639_v33 = vmul.f32 0.5, %v4637_v53 }
 0xbd2   : > { %v4959_v59 = vmul.f32 0.044715, %v4639_v2  ;;  %v5085_v43 = vmul.f32 %v4957_v19, %v4382_v54  ;;  %v4386_v56 = vpop.f32.mrb[208].mxu0  ;;  %v10650_v3 = vmul.f32 0.5, %v4639_v2 }
 0xbd3   : > { %12635 = vst [vmem:[#allocation90_spill] sm:$0xff] %v10639_v33  ;;  %v5086_v18 = vmul.f32 %v4958_v17, %v4637_v53  ;;  %v5212_v62 = vmul.f32 %v5084_v57, %v4380_v42  ;;  %v4960_v25 = vmul.f32 0.044715, %v4386_v56  ;;  %v10641_v16 = vpop.f32.mrb[209].mxu0  ;;  %v10652_v35 = vmul.f32 0.5, %v4386_v56 }
 0xbd4   : > { %v5087_v26 = vmul.f32 %v4959_v59, %v4639_v2  ;;  %v10643_v30 = vpop.f32.mrb[228].mxu1  ;;  %v5213_v8 = vmul.f32 %v5085_v43, %v4382_v54  ;;  %v4961_v22 = vmul.f32 0.044715, %v10641_v16  ;;  %12636 = vst [vmem:[#allocation91_spill] sm:$0xff] %v10650_v3 }
 0xbd5   : > { %v5214_v9 = vmul.f32 %v5086_v18, %v4637_v53  ;;  %v10648_v61 = vpop.f32.mrb[229].mxu1  ;;  %v5340_v48 = vadd.f32 %v5212_v62, %v4380_v42  ;;  %v5088_v7 = vmul.f32 %v4960_v25, %v4386_v56  ;;  %v4962_v13 = vmul.f32 0.044715, %v10643_v30 }
 0xbd6   : > { %v5215_v51 = vmul.f32 %v5087_v26, %v4639_v2  ;;  %v5341_v24 = vadd.f32 %v5213_v8, %v4382_v54  ;;  %v5089_v29 = vmul.f32 %v4961_v22, %v10641_v16  ;;  %v4392_v50 = vpop.f32.mrb[210].mxu0  ;;  %v10659_v4 = vmul.f32 0.5, %v10643_v30 }
 0xbd7   : > { %v5342_v46 = vadd.f32 %v5214_v9, %v4637_v53  ;;  %v5468_v14 = vmul.f32 0.7978846, %v5340_v48  ;;  %v5216_v49 = vmul.f32 %v5088_v7, %v4386_v56  ;;  %v4964_v39 = vmul.f32 0.044715, %v4392_v50  ;;  %v10656_v0 = vpop.f32.mrb[211].mxu0 }
 0xbd8   : > { %12637 = vst [vmem:[#allocation100_spill] sm:$0xff] %v10659_v4  ;;  %v5469_v20 = vmul.f32 0.7978846, %v5341_v24  ;;  %v5217_v32 = vmul.f32 %v5089_v29, %v10641_v16  ;;  %v4965_v28 = vmul.f32 0.044715, %v10656_v0  ;;  %v10664_v1 = vmul.f32 0.5, %v4392_v50 }
 0xbd9   : > { %v4963_v15 = vmul.f32 0.044715, %v10648_v61  ;;  %v5344_v40 = vadd.f32 %v5216_v49, %v4386_v56  ;;  %v5092_v60 = vmul.f32 %v4964_v39, %v4392_v50  ;;  %v5343_v12 = vadd.f32 %v5215_v51, %v4639_v2  ;;  %v10666_v31 = vpop.f32.mrb[230].mxu1 }
 0xbda   : > { %v5345_v11 = vadd.f32 %v5217_v32, %v10641_v16  ;;  %v5093_v38 = vmul.f32 %v4965_v28, %v10656_v0  ;;  %v4398_v5 = vpop.f32.mrb[212].mxu0  ;;  %v5470_v52 = vmul.f32 0.7978846, %v5342_v46  ;;  %v5090_v41 = vmul.f32 %v4962_v13, %v10643_v30  ;;  %v10671_v34 = vpop.f32.mrb[231].mxu1 }
 0xbdb   : > { %12638 = vst [vmem:[#allocation85_spill] sm:$0xff] %v10671_v34  ;;  %8132 = vtanh.f32 %v5468_v14  ;;  %v5472_v21 = vmul.f32 0.7978846, %v5344_v40  ;;  %v5220_v27 = vmul.f32 %v5092_v60, %v4392_v50  ;;  %v4968_v6 = vmul.f32 0.044715, %v4398_v5  ;;  %v10673_v47 = vpop.f32.mrb[213].mxu0 }
 0xbdc   : > { %8134 = vtanh.f32 %v5469_v20  ;;  %v5473_v55 = vmul.f32 0.7978846, %v5345_v11  ;;  %v5221_v45 = vmul.f32 %v5093_v38, %v10656_v0  ;;  %v4969_v37 = vmul.f32 0.044715, %v10673_v47  ;;  %v10677_v10 = vpop.f32.mrb[232].mxu1 }
 0xbdd   : > { %v5348_v58 = vadd.f32 %v5220_v27, %v4392_v50  ;;  %v10679_v42 = vmul.f32 0.5, %v4398_v5  ;;  %v5096_v36 = vmul.f32 %v4968_v6, %v4398_v5  ;;  %v5471_v54 = vmul.f32 0.7978846, %v5343_v12  ;;  %v10681_v53 = vpop.f32.mrb[233].mxu1 }
 0xbde   : > { %12639 = vst [vmem:[#allocation88_spill] sm:$0xff] %v10681_v53  ;;  %v5349_v19 = vadd.f32 %v5221_v45, %v10656_v0  ;;  %v5097_v17 = vmul.f32 %v4969_v37, %v10673_v47  ;;  %v4404_v2 = vpop.f32.mrb[214].mxu0  ;;  %8136 = vtanh.f32 %v5470_v52  ;;  %v5218_v57 = vmul.f32 %v5090_v41, %v10643_v30 }
 0xbdf   : > { %8138 = vtanh.f32 %v5472_v21  ;;  %v5476_v59 = vmul.f32 0.7978846, %v5348_v58  ;;  %v5224_v43 = vmul.f32 %v5096_v36, %v4398_v5  ;;  %v4972_v56 = vmul.f32 0.044715, %v4404_v2  ;;  %v10686_v18 = vpop.f32.mrb[215].mxu0 }
 0xbe0   : > { %8140 = vtanh.f32 %v5473_v55  ;;  %v5477_v62 = vmul.f32 0.7978846, %v5349_v19  ;;  %v5225_v25 = vmul.f32 %v5097_v17, %v10673_v47  ;;  %v4973_v26 = vmul.f32 0.044715, %v10686_v18  ;;  %v10690_v8 = vpop.f32.mrb[234].mxu1 }
 0xbe1   : > { %v5352_v22 = vadd.f32 %v5224_v43, %v4398_v5  ;;  %v10692_v9 = vmul.f32 0.5, %v4404_v2  ;;  %v5100_v48 = vmul.f32 %v4972_v56, %v4404_v2  ;;  %8142 = vtanh.f32 %v5471_v54  ;;  %v10694_v7 = vpop.f32.mrb[235].mxu1 }
 0xbe2   : > { %12640 = vst [vmem:[#allocation93_spill] sm:$0xff] %v10694_v7  ;;  %v5353_v51 = vadd.f32 %v5225_v25, %v10673_v47  ;;  %v5101_v24 = vmul.f32 %v4973_v26, %v10686_v18  ;;  %v4410_v29 = vpop.f32.mrb[216].mxu0  ;;  %v5346_v50 = vadd.f32 %v5218_v57, %v10643_v30  ;;  %v5091_v46 = vmul.f32 %v4963_v15, %v10648_v61 }
 0xbe3   : > { %8144 = vtanh.f32 %v5476_v59  ;;  %v5480_v13 = vmul.f32 0.7978846, %v5352_v22  ;;  %v5228_v14 = vmul.f32 %v5100_v48, %v4404_v2  ;;  %v4976_v49 = vmul.f32 0.044715, %v4410_v29  ;;  %v10700_v39 = vpop.f32.mrb[217].mxu0 }
 0xbe4   : > { %8146 = vtanh.f32 %v5477_v62  ;;  %v5481_v20 = vmul.f32 0.7978846, %v5353_v51  ;;  %v5229_v32 = vmul.f32 %v5101_v24, %v10686_v18  ;;  %v4977_v28 = vmul.f32 0.044715, %v10700_v39  ;;  %v10709_v11 = vpop.f32.mrb[236].mxu1 }
 0xbe5   : > { %v10704_v40 = vpop.eup %8132  ;;  %v5356_v60 = vadd.f32 %v5228_v14, %v4404_v2  ;;  %v10706_v12 = vmul.f32 0.5, %v4410_v29  ;;  %v5104_v30 = vmul.f32 %v4976_v49, %v4410_v29  ;;  %v5219_v15 = vmul.f32 %v5091_v46, %v10648_v61  ;;  %v10715_v27 = vpop.f32.mrb[237].mxu1 }
 0xbe6   : > { %v10711_v38 = vpop.eup %8134  ;;  %8148 = vtanh.f32 %v5480_v13  ;;  %v5357_v5 = vadd.f32 %v5229_v32, %v10686_v18  ;;  %v5105_v52 = vmul.f32 %v4977_v28, %v10700_v39  ;;  %v4416_v41 = vpop.f32.mrb[218].mxu0  ;;  %v5474_v21 = vmul.f32 0.7978846, %v5346_v50  ;;  %12641 = vst [vmem:[#allocation87_spill] sm:$0xff] %v10715_v27 }
 0xbe7   : > { %8150 = vtanh.f32 %v5481_v20  ;;  %v5484_v6 = vmul.f32 0.7978846, %v5356_v60  ;;  %v5232_v55 = vmul.f32 %v5104_v30, %v4410_v29  ;;  %v4980_v45 = vmul.f32 0.044715, %v4416_v41  ;;  %v10717_v37 = vpop.f32.mrb[219].mxu0 }
 0xbe8   : > { %12642 = vst [vmem:[#allocation89_spill] sm:$0xff] %v10717_v37  ;;  %v10719_v58 = vpop.eup %8136  ;;  %v5233_v36 = vmul.f32 %v5105_v52, %v10700_v39  ;;  %v10722_v54 = vmul.f32 0.5, %v4416_v41  ;;  %v4981_v19 = vmul.f32 0.044715, %v10717_v37  ;;  %v10726_v17 = vmul.f32 0.5, %v10666_v31  ;;  %v10728_v2 = vpop.f32.mrb[238].mxu1 }
 0xbe9   : > { %12643 = vst [vmem:[#allocation94_spill] sm:$0xff] %v10719_v58  ;;  %v10730_v57 = vpop.eup %8138  ;;  %v5485_v59 = vmul.f32 0.7978846, %v5357_v5  ;;  %v5360_v43 = vadd.f32 %v5232_v55, %v4410_v29  ;;  %v5108_v56 = vmul.f32 %v4980_v45, %v4416_v41  ;;  %v5347_v62 = vadd.f32 %v5219_v15, %v10648_v61  ;;  %v10733_v25 = vpop.f32.mrb[239].mxu1 }
 0xbea   : > { %12644 = vst [vmem:[#allocation95_spill] sm:$0xff] %v10722_v54  ;;  %12645 = vst [vmem:[#allocation96_spill] sm:$0xff] %v10726_v17  ;;  %v10735_v26 = vpop.eup %8140  ;;  %v5361_v22 = vadd.f32 %v5233_v36, %v10700_v39  ;;  %v5109_v48 = vmul.f32 %v4981_v19, %v10717_v37  ;;  %8152 = vtanh.f32 %v5474_v21  ;;  %v4422_v51 = vpop.f32.mrb[220].mxu0  ;;  %v4966_v24 = vmul.f32 0.044715, %v10666_v31 }
 0xbeb   : > { %12646 = vst [vmem:[#allocation98_spill] sm:$0xff] %v10733_v25  ;;  %v10740_v50 = vpop.eup %8142  ;;  %8154 = vtanh.f32 %v5484_v6  ;;  %v5488_v46 = vmul.f32 0.7978846, %v5360_v43  ;;  %v5236_v29 = vmul.f32 %v5108_v56, %v4416_v41  ;;  %v4984_v13 = vmul.f32 0.044715, %v4422_v51  ;;  %v10742_v14 = vpop.f32.mrb[221].mxu0 }
 0xbec   : > { %12647 = vst [vmem:[#allocation99_spill] sm:$0xff] %v10742_v14  ;;  %v5489_v49 = vmul.f32 0.7978846, %v5361_v22  ;;  %v5237_v20 = vmul.f32 %v5109_v48, %v10717_v37  ;;  %v5475_v32 = vmul.f32 0.7978846, %v5347_v62  ;;  %8156 = vtanh.f32 %v5485_v59  ;;  %v10749_v52 = vpop.f32.mrb[240].mxu1 }
 0xbed   : > { %v4985_v28 = vmul.f32 0.044715, %v10742_v14  ;;  %v10746_v60 = vpop.eup %8144  ;;  %v5364_v30 = vadd.f32 %v5236_v29, %v4416_v41  ;;  %v5112_v15 = vmul.f32 %v4984_v13, %v4422_v51  ;;  %v5094_v5 = vmul.f32 %v4966_v24, %v10666_v31  ;;  %v10758_v19 = vpop.f32.mrb[241].mxu1 }
 0xbee   : > { %v10751_v21 = vpop.eup %8146  ;;  %8158 = vtanh.f32 %v5488_v46  ;;  %v5365_v6 = vadd.f32 %v5237_v20, %v10717_v37  ;;  %v4967_v45 = vmul.f32 0.044715, %v10671_v34  ;;  %v10756_v36 = vpop.f32.mrb[222].mxu0  ;;  %12648 = vst [vmem:[#allocation101_spill] sm:$0xff] %v10758_v19  ;;  %v10767_v48 = vmul.f32 0.5, %v4422_v51 }
 0xbef   : > { %v5113_v55 = vmul.f32 %v4985_v28, %v10742_v14  ;;  %8160 = vtanh.f32 %v5489_v49  ;;  %v5492_v41 = vmul.f32 0.7978846, %v5364_v30  ;;  %v5240_v59 = vmul.f32 %v5112_v15, %v4422_v51  ;;  %v10761_v56 = vpop.f32.mrb[223].mxu0 }
 0xbf0   : > { %v5222_v43 = vmul.f32 %v5094_v5, %v10666_v31  ;;  %12649 = vst [vmem:[#allocation103_spill] sm:$0xff] %v10761_v56  ;;  %v10763_v62 = vpop.f32.mrb[242].mxu1  ;;  %v10765_v22 = vpop.eup %8148  ;;  %12650 = vst [vmem:[#allocation104_spill] sm:$0xff] %v10767_v48  ;;  %8162 = vtanh.f32 %v5475_v32  ;;  %v5095_v46 = vmul.f32 %v4967_v45, %v10671_v34  ;;  %v5493_v49 = vmul.f32 0.7978846, %v5365_v6 }
 0xbf1   : > { %v5241_v24 = vmul.f32 %v5113_v55, %v10742_v14  ;;  %v10771_v29 = vpop.f32.mrb[243].mxu1  ;;  %v10773_v13 = vpop.eup %8150  ;;  %v5368_v20 = vadd.f32 %v5240_v59, %v4422_v51  ;;  %v4970_v30 = vmul.f32 0.044715, %v10677_v10  ;;  %v10780_v32 = vmul.f32 0.5, %v10677_v10 }
 0xbf2   : > { %12651 = vst [vmem:[#allocation107_spill] sm:$0xff] %v10771_v29  ;;  %v5350_v28 = vadd.f32 %v5222_v43, %v10666_v31  ;;  %v5223_v5 = vmul.f32 %v5095_v46, %v10671_v34  ;;  %v4971_v55 = vmul.f32 0.044715, %v10681_v53  ;;  %v10783_v45 = vpop.f32.mrb[224].mxu0  ;;  %8164 = vtanh.f32 %v5492_v41 }
 0xbf3   : > { %v5369_v15 = vadd.f32 %v5241_v24, %v10742_v14  ;;  %12652 = vst [vmem:[#allocation83_spill] sm:$0xff] %v10780_v32  ;;  %v5496_v63 = vmul.f32 0.7978846, %v5368_v20  ;;  %v5098_v51 = vmul.f32 %v4970_v30, %v10677_v10  ;;  %v10786_v6 = vpop.f32.mrb[225].mxu0  ;;  %v4974_v46 = vmul.f32 0.044715, %v10690_v8 }
 0xbf4   : > { %v5478_v17 = vmul.f32 0.7978846, %v5350_v28  ;;  %12653 = vst [vmem:[#allocation86_spill] sm:$0xff] %v10786_v6  ;;  %v10788_v31 = vpop.eup %8152  ;;  %v5351_v43 = vadd.f32 %v5223_v5, %v10671_v34  ;;  %v5099_v24 = vmul.f32 %v4971_v55, %v10681_v53  ;;  %v10793_v32 = vpop.f32.mrb[244].mxu1  ;;  %8166 = vtanh.f32 %v5493_v49 }
 0xbf5   : > { %12654 = vst [vmem:[#allocation84_spill] sm:$0xff] %v10788_v31  ;;  %v5497_v59 = vmul.f32 0.7978846, %v5369_v15  ;;  %v10795_v48 = vpop.eup %8154  ;;  %v5226_v41 = vmul.f32 %v5098_v51, %v10677_v10  ;;  %v10799_v20 = vmul.f32 0.5, %v10690_v8  ;;  %v5725_v28 = vadd.f32 1.0, %v10711_v38  ;;  %v10802_v30 = vpop.f32.mrb[245].mxu1 }
 0xbf6   : > { %12656 = vst [vmem:[#allocation105_spill] sm:$0xff] %v10802_v30  ;;  %8168 = vtanh.f32 %v5496_v63  ;;  %v5227_v15 = vmul.f32 %v5099_v24, %v10681_v53  ;;  %v5102_v5 = vmul.f32 %v4974_v46, %v10690_v8  ;;  %v4833_v55 = vmul.f32 0.5, %v10641_v16  ;;  %v10807_v34 = vpop.f32.mrb[226].mxu0  ;;  %v10809_v54 = vpop.eup %8156 }
 0xbf7   : > { %12655 = vst [vmem:[#allocation92_spill] sm:$0xff] %v10799_v20  ;;  %8170 = vtanh.f32 %v5497_v59  ;;  %v5479_v49 = vmul.f32 0.7978846, %v5351_v43  ;;  %v5354_v51 = vadd.f32 %v5226_v41, %v10677_v10  ;;  %v5729_v20 = vadd.f32 1.0, %v10735_v26  ;;  %v10813_v38 = vpop.f32.mrb[227].mxu0 }
 0xbf8   : > { %12657 = vst [vmem:[#allocation97_spill] sm:$0xff] %v10813_v38  ;;  %v10815_v4 = vpop.f32.mrb[246].mxu1  ;;  %v10817_v63 = vpop.eup %8158  ;;  %8172 = vtanh.f32 %v5478_v17  ;;  %v5355_v24 = vadd.f32 %v5227_v15, %v10681_v53  ;;  %v5230_v16 = vmul.f32 %v5102_v5, %v10690_v8  ;;  %v5853_v46 = vmul.f32 %v5725_v28, %v10645_v44 }
 0xbf9   : > { %v10822_v33 = vpop.f32.mrb[247].mxu1  ;;  %v10824_v59 = vpop.eup %8160  ;;  %v5482_v10 = vmul.f32 0.7978846, %v5354_v51  ;;  %v5857_v43 = vmul.f32 %v5729_v20, %v4833_v55  ;;  %v4988_v26 = vmul.f32 0.044715, %v10756_v36  ;;  %v5724_v15 = vadd.f32 1.0, %v10704_v40 }
 0xbfa   : > { %12658 = vst [vmem:[#allocation108_spill] sm:$0xff] %v10822_v33  ;;  %v4975_v41 = vmul.f32 0.044715, %v10694_v7  ;;  %v10828_v31 = vpop.eup %8162  ;;  %v5483_v58 = vmul.f32 0.7978846, %v5355_v24  ;;  %v5358_v17 = vadd.f32 %v5230_v16, %v10690_v8  ;;  %v5728_v5 = vadd.f32 1.0, %v10730_v57 }
 0xbfb   : > { %12659 = vst [vmem:[#allocation109_spill] sm:$0xff] %v10828_v31  ;;  %v10833_v44 = vpop.f32.mrb[228].mxu0  ;;  %8174 = vtanh.f32 %v5479_v49  ;;  %v7556_v28 = vpack.c.bf16 %v5857_v43, %v5853_v46  ;;  %v5116_v51 = vmul.f32 %v4988_v26, %v10756_v36  ;;  %v10842_v24 = vmul.f32 0.5, %v10756_v36 }
 0xbfc   : > { %v5103_v20 = vmul.f32 %v4975_v41, %v10694_v7  ;;  %v10837_v55 = vpop.f32.mrb[229].mxu0  ;;  %v10839_v53 = vpop.f32.mrb[248].mxu1  ;;  %v5486_v14 = vmul.f32 0.7978846, %v5358_v17  ;;  %v5852_v8 = vmul.f32 %v5724_v15, %v10637_v23  ;;  %v5856_v40 = vmul.f32 %v5728_v5, %v10652_v35 }
 0xbfd   : > { %12660 = vst [vmem:[#allocation110_spill] sm:$0xff] %v10837_v55  ;;  %12661 = vst [vmem:[#allocation77_spill] sm:$0xff] %v10842_v24  ;;  %v10846_v57 = vpop.f32.mrb[249].mxu1  ;;  %v10848_v49 = vpop.eup %8164  ;;  %8176 = vtanh.f32 %v5482_v10  ;;  %7557 = vmatprep.subr.bf16.mxu0 %v7556_v28  ;;  %v5244_v16 = vmul.f32 %v5116_v51, %v10756_v36  ;;  %v4989_v43 = vmul.f32 0.044715, %v10761_v56  ;;  %v10854_v41 = vmul.f32 0.5, %v10709_v11 }
 0xbfe   : > { %12662 = vst [vmem:[#allocation106_spill] sm:$0xff] %v10846_v57  ;;  %12663 = vst [vmem:[#allocation78_spill] sm:$0xff] %v10848_v49  ;;  %v5231_v46 = vmul.f32 %v5103_v20, %v10694_v7  ;;  %8178 = vtanh.f32 %v5483_v58  ;;  %v7558_v26 = vpack.c.bf16 %v5856_v40, %v5852_v8  ;;  %v4978_v23 = vmul.f32 0.044715, %v10709_v11  ;;  %v10857_v35 = vpop.f32.mrb[230].mxu0  ;;  %v10859_v17 = vpop.eup %8166 }
 0xbff   : > { %12664 = vst [vmem:[#allocation102_spill] sm:$0xff] %v10854_v41  ;;  %12665 = vst [vmem:[#allocation80_spill] sm:$0xff] %v10859_v17  ;;  %v5372_v10 = vadd.f32 %v5244_v16, %v10756_v36  ;;  %v5117_v5 = vmul.f32 %v4989_v43, %v10761_v56  ;;  %v4992_v28 = vmul.f32 0.044715, %v10783_v45  ;;  %v10867_v58 = vpop.f32.mrb[231].mxu0  ;;  %8180 = vtanh.f32 %v5486_v14 }
 0xc00   : > { %v5359_v15 = vadd.f32 %v5231_v46, %v10694_v7  ;;  %v10865_v51 = vpop.f32.mrb[250].mxu1  ;;  %12666 = vst [vmem:[#allocation79_spill] sm:$0xff] %v10867_v58  ;;  %v10869_v20 = vpop.eup %8168  ;;  %7559 = vmatpush1.bf16.msra.mxu0 %v7558_v26  ;;  %v5106_v8 = vmul.f32 %v4978_v23, %v10709_v11  ;;  %v4979_v40 = vmul.f32 0.044715, %v10715_v27  ;;  %v4993_v36 = vmul.f32 0.044715, %v10786_v6 }
 0xc01   : > { %12667 = vst [vmem:[#allocation82_spill] sm:$0xff] %v10869_v20  ;;  %v10874_v16 = vpop.f32.mrb[251].mxu1  ;;  %v10876_v46 = vpop.eup %8170  ;;  %v5500_v43 = vmul.f32 0.7978846, %v5372_v10  ;;  %v5245_v41 = vmul.f32 %v5117_v5, %v10761_v56  ;;  %v5120_v7 = vmul.f32 %v4992_v28, %v10783_v45  ;;  %v4982_v20 = vmul.f32 0.044715, %v10728_v2 }
 0xc02   : > { %12668 = vst [vmem:[#allocation81_spill] sm:$0xff] %v10874_v16  ;;  %12669 = vst [vmem:[#allocation111_spill] sm:$0xff] %v10876_v46  ;;  %v5487_v24 = vmul.f32 0.7978846, %v5359_v15  ;;  %v10880_v49 = vpop.eup %8172  ;;  %v5234_v14 = vmul.f32 %v5106_v8, %v10709_v11  ;;  %v5107_v26 = vmul.f32 %v4979_v40, %v10715_v27  ;;  %v5121_v23 = vmul.f32 %v4993_v36, %v10786_v6  ;;  %v10886_v17 = vpop.f32.mrb[232].mxu0 }
 0xc03   : > { %12670 = vst [vmem:[#allocation112_spill] sm:$0xff] %v10880_v49  ;;  %v5373_v46 = vadd.f32 %v5245_v41, %v10761_v56  ;;  %v10890_v10 = vmul.f32 0.5, %v10783_v45  ;;  %v5248_v15 = vmul.f32 %v5120_v7, %v10783_v45  ;;  %v4983_v5 = vmul.f32 0.044715, %v10733_v25  ;;  %v10896_v8 = vpop.f32.mrb[233].mxu0 }
 0xc04   : > { %v10894_v28 = vpop.f32.mrb[252].mxu1  ;;  %12672 = vst [vmem:[#allocation114_spill] sm:$0xff] %v10896_v8  ;;  %8182 = vtanh.f32 %v5500_v43  ;;  %v5362_v40 = vadd.f32 %v5234_v14, %v10709_v11  ;;  %v5235_v36 = vmul.f32 %v5107_v26, %v10715_v27  ;;  %v5249_v49 = vmul.f32 %v5121_v23, %v10786_v6 }
 0xc05   : > { %12671 = vst [vmem:[#allocation113_spill] sm:$0xff] %v10890_v10  ;;  %v10901_v37 = vpop.f32.mrb[253].mxu1  ;;  %v10903_v41 = vpop.eup %8174  ;;  %v5501_v10 = vmul.f32 0.7978846, %v5373_v46  ;;  %v5376_v7 = vadd.f32 %v5248_v15, %v10783_v45  ;;  %v5110_v56 = vmul.f32 %v4982_v20, %v10728_v2  ;;  %v5111_v3 = vmul.f32 %v4983_v5, %v10733_v25 }
 0xc06   : > { %12673 = vst [vmem:[#allocation115_spill] sm:$0xff] %v10901_v37  ;;  %12674 = vst [vmem:[#allocation116_spill] sm:$0xff] %v10903_v41  ;;  %8184 = vtanh.f32 %v5487_v24  ;;  %v5490_v31 = vmul.f32 0.7978846, %v5362_v40  ;;  %v5363_v43 = vadd.f32 %v5235_v36, %v10715_v27  ;;  %v5377_v11 = vadd.f32 %v5249_v49, %v10786_v6  ;;  %v10910_v14 = vpop.f32.mrb[234].mxu0 }
 0xc07   : > { %v10912_v26 = vpop.eup %8176  ;;  %8186 = vtanh.f32 %v5501_v10  ;;  %v5504_v23 = vmul.f32 0.7978846, %v5376_v7  ;;  %v5238_v46 = vmul.f32 %v5110_v56, %v10728_v2  ;;  %v5239_v45 = vmul.f32 %v5111_v3, %v10733_v25  ;;  %v10918_v20 = vpop.f32.mrb[235].mxu0 }
 0xc08   : > { %12675 = vst [vmem:[#allocation117_spill] sm:$0xff] %v10912_v26  ;;  %v10916_v15 = vpop.f32.mrb[254].mxu1  ;;  %12676 = vst [vmem:[#allocation118_spill] sm:$0xff] %v10918_v20  ;;  %v10920_v24 = vpop.eup %8178  ;;  %8188 = vtanh.f32 %v5490_v31  ;;  %v5491_v5 = vmul.f32 0.7978846, %v5363_v43  ;;  %v10931_v6 = vmul.f32 0.5, %v10728_v2 }
 0xc09   : > { %12677 = vst [vmem:[#allocation119_spill] sm:$0xff] %v10920_v24  ;;  %v5505_v40 = vmul.f32 0.7978846, %v5377_v11  ;;  %v4986_v49 = vmul.f32 0.044715, %v10749_v52  ;;  %8190 = vtanh.f32 %v5504_v23  ;;  %v5366_v36 = vadd.f32 %v5238_v46, %v10728_v2  ;;  %v10926_v7 = vpop.f32.mrb[255].mxu1  ;;  %v10928_v3 = vpop.eup %8180 }
 0xc0a   : > { %v5367_v10 = vadd.f32 %v5239_v45, %v10733_v25  ;;  %v4987_v56 = vmul.f32 0.044715, %v10758_v19  ;;  %12678 = vst [vmem:[#allocation120_spill] sm:$0xff] %v10926_v7  ;;  %12679 = vst [vmem:[#allocation121_spill] sm:$0xff] %v10928_v3  ;;  %8192 = vtanh.f32 %v5491_v5  ;;  %v4990_v43 = vmul.f32 0.044715, %v10763_v62 }
 0xc0b   : > { %12680 = vst [vmem:[#allocation122_spill] sm:$0xff] %v10931_v6  ;;  %v5114_v31 = vmul.f32 %v4986_v49, %v10749_v52  ;;  %v10935_v11 = vpop.f32.mrb[236].mxu0  ;;  %8194 = vtanh.f32 %v5505_v40  ;;  %v5494_v23 = vmul.f32 0.7978846, %v5366_v36  ;;  %v4837_v6 = vmul.f32 0.5, %v10656_v0 }
 0xc0c   : > { %v5495_v46 = vmul.f32 0.7978846, %v5367_v10  ;;  %v5115_v45 = vmul.f32 %v4987_v56, %v10758_v19  ;;  %v10938_v25 = vpop.f32.mrb[0].mxu1  ;;  %v10940_v27 = vpop.f32.mrb[237].mxu0  ;;  %v5118_v2 = vmul.f32 %v4990_v43, %v10763_v62  ;;  %v4841_v49 = vmul.f32 0.5, %v10673_v47 }
 0xc0d   : > { %12681 = vst [vmem:[#allocation123_spill] sm:$0xff] %v10940_v27  ;;  %v5242_v5 = vmul.f32 %v5114_v31, %v10749_v52  ;;  %v10946_v3 = vpop.f32.mrb[1].mxu1  ;;  %8196 = vtanh.f32 %v5494_v23  ;;  %v5733_v36 = vadd.f32 1.0, %v10751_v21  ;;  %v5737_v10 = vadd.f32 1.0, %v10773_v13 }
 0xc0e   : > { %12682 = vst [vmem:[#allocation124_spill] sm:$0xff] %v10946_v3  ;;  %v5243_v40 = vmul.f32 %v5115_v45, %v10758_v19  ;;  %v10951_v56 = vpop.eup %8182  ;;  %8198 = vtanh.f32 %v5495_v46  ;;  %v10954_v31 = vmul.f32 0.5, %v10749_v52  ;;  %v5246_v0 = vmul.f32 %v5118_v2, %v10763_v62  ;;  %v10958_v47 = vpop.f32.mrb[238].mxu0 }
 0xc0f   : > { %12683 = vst [vmem:[#allocation125_spill] sm:$0xff] %v10951_v56  ;;  %v5370_v43 = vadd.f32 %v5242_v5, %v10749_v52  ;;  %v5861_v26 = vmul.f32 %v5733_v36, %v4837_v6  ;;  %v5865_v45 = vmul.f32 %v5737_v10, %v4841_v49  ;;  %v4996_v21 = vmul.f32 0.044715, %v10807_v34  ;;  %v10964_v13 = vpop.f32.mrb[239].mxu0 }
 0xc10   : > { %12684 = vst [vmem:[#allocation126_spill] sm:$0xff] %v10954_v31  ;;  %v5371_v23 = vadd.f32 %v5243_v40, %v10758_v19  ;;  %v10962_v24 = vpop.f32.mrb[2].mxu1  ;;  %12685 = vst [vmem:[#allocation127_spill] sm:$0xff] %v10964_v13  ;;  %v10966_v46 = vpop.eup %8184  ;;  %v5374_v31 = vadd.f32 %v5246_v0, %v10763_v62  ;;  %v4991_v52 = vmul.f32 0.044715, %v10771_v29  ;;  %v5732_v5 = vadd.f32 1.0, %v10746_v60 }
 0xc11   : > { %12686 = vst [vmem:[#allocation128_spill] sm:$0xff] %v10966_v46  ;;  %v5498_v56 = vmul.f32 0.7978846, %v5370_v43  ;;  %v10971_v2 = vpop.f32.mrb[3].mxu1  ;;  %v10973_v40 = vpop.eup %8186  ;;  %v7560_v49 = vpack.c.bf16 %v5865_v45, %v5861_v26  ;;  %v5124_v36 = vmul.f32 %v4996_v21, %v10807_v34  ;;  %v5736_v10 = vadd.f32 1.0, %v10765_v22 }
 0xc12   : > { %12687 = vst [vmem:[#allocation129_spill] sm:$0xff] %v10971_v2  ;;  %12688 = vst [vmem:[#allocation130_spill] sm:$0xff] %v10973_v40  ;;  %v5499_v6 = vmul.f32 0.7978846, %v5371_v23  ;;  %v10977_v19 = vpop.eup %8188  ;;  %v10980_v43 = vmul.f32 0.5, %v10763_v62  ;;  %v5119_v46 = vmul.f32 %v4991_v52, %v10771_v29  ;;  %v10983_v60 = vpop.f32.mrb[240].mxu0  ;;  %v5860_v23 = vmul.f32 %v5732_v5, %v10664_v1 }
 0xc13   : > { %12689 = vst [vmem:[#allocation131_spill] sm:$0xff] %v10977_v19  ;;  %8200 = vtanh.f32 %v5498_v56  ;;  %v5502_v0 = vmul.f32 0.7978846, %v5374_v31  ;;  %v10985_v41 = vpop.eup %8190  ;;  %7561 = vmatprep.subr.bf16.mxu0 %v7560_v49  ;;  %v5252_v26 = vmul.f32 %v5124_v36, %v10807_v34  ;;  %v5864_v22 = vmul.f32 %v5736_v10, %v10679_v42  ;;  %v10993_v62 = vpop.f32.mrb[241].mxu0 }
 0xc14   : > { %12690 = vst [vmem:[#allocation132_spill] sm:$0xff] %v10980_v43  ;;  %12691 = vst [vmem:[#allocation133_spill] sm:$0xff] %v10985_v41  ;;  %v4997_v45 = vmul.f32 0.044715, %v10813_v38  ;;  %v10991_v56 = vpop.f32.mrb[4].mxu1  ;;  %v10995_v31 = vpop.eup %8192  ;;  %8202 = vtanh.f32 %v5499_v6  ;;  %v10998_v21 = vmul.f32 0.5, %v10807_v34  ;;  %v5247_v52 = vmul.f32 %v5119_v46, %v10771_v29 }
 0xc15   : > { %12692 = vst [vmem:[#allocation134_spill] sm:$0xff] %v10995_v31  ;;  %v4994_v49 = vmul.f32 0.044715, %v10793_v32  ;;  %v11002_v36 = vpop.f32.mrb[5].mxu1  ;;  %v11004_v1 = vpop.eup %8194  ;;  %8204 = vtanh.f32 %v5502_v0  ;;  %v5380_v42 = vadd.f32 %v5252_v26, %v10807_v34  ;;  %v7562_v5 = vpack.c.bf16 %v5864_v22, %v5860_v23 }
 0xc16   : > { %12693 = vst [vmem:[#allocation135_spill] sm:$0xff] %v10998_v21  ;;  %12694 = vst [vmem:[#allocation136_spill] sm:$0xff] %v11002_v36  ;;  %v5125_v10 = vmul.f32 %v4997_v45, %v10813_v38  ;;  %v5375_v43 = vadd.f32 %v5247_v52, %v10771_v29  ;;  %v5000_v21 = vmul.f32 0.044715, %v10833_v44  ;;  %v4995_v46 = vmul.f32 0.044715, %v10802_v30 }
 0xc17   : > { %12695 = vst [vmem:[#allocation137_spill] sm:$0xff] %v11004_v1  ;;  %v5122_v6 = vmul.f32 %v4994_v49, %v10793_v32  ;;  %v11012_v41 = vpop.f32.mrb[242].mxu0  ;;  %v11014_v19 = vpop.eup %8196  ;;  %7563 = vmatpush1.bf16.msra.mxu0 %v7562_v5  ;;  %v11018_v34 = vmul.f32 0.5, %v10793_v32  ;;  %v11021_v26 = vmul.f32 0.5, %v10833_v44  ;;  %v5001_v23 = vmul.f32 0.044715, %v10837_v55 }
 0xc18   : > { %12696 = vst [vmem:[#allocation138_spill] sm:$0xff] %v11014_v19  ;;  %v5253_v0 = vmul.f32 %v5125_v10, %v10813_v38  ;;  %v11024_v22 = vpop.f32.mrb[6].mxu1  ;;  %v11026_v45 = vpop.eup %8198  ;;  %v5508_v52 = vmul.f32 0.7978846, %v5380_v42  ;;  %v5128_v29 = vmul.f32 %v5000_v21, %v10833_v44  ;;  %v5123_v5 = vmul.f32 %v4995_v46, %v10802_v30 }
 0xc19   : > { %12697 = vst [vmem:[#allocation139_spill] sm:$0xff] %v11018_v34  ;;  %12698 = vst [vmem:[#allocation140_spill] sm:$0xff] %v11021_v26  ;;  %v5250_v49 = vmul.f32 %v5122_v6, %v10793_v32  ;;  %v11031_v10 = vpop.f32.mrb[243].mxu0  ;;  %v11033_v19 = vpop.f32.mrb[7].mxu1  ;;  %v5503_v34 = vmul.f32 0.7978846, %v5375_v43  ;;  %v5129_v1 = vmul.f32 %v5001_v23, %v10837_v55 }
 0xc1a   : > { %12699 = vst [vmem:[#allocation141_spill] sm:$0xff] %v11026_v45  ;;  %12700 = vst [vmem:[#allocation142_spill] sm:$0xff] %v11031_v10  ;;  %v5381_v26 = vadd.f32 %v5253_v0, %v10813_v38  ;;  %v4998_v40 = vmul.f32 0.044715, %v10815_v4  ;;  %v5256_v42 = vmul.f32 %v5128_v29, %v10833_v44  ;;  %v5251_v6 = vmul.f32 %v5123_v5, %v10802_v30  ;;  %v11044_v46 = vpop.f32.mrb[244].mxu0 }
 0xc1b   : > { %12701 = vst [vmem:[#allocation143_spill] sm:$0xff] %v11033_v19  ;;  %v5378_v45 = vadd.f32 %v5250_v49, %v10793_v32  ;;  %v11042_v21 = vmul.f32 0.5, %v10815_v4  ;;  %v5257_v43 = vmul.f32 %v5129_v1, %v10837_v55  ;;  %v4999_v23 = vmul.f32 0.044715, %v10822_v33  ;;  %v11051_v19 = vpop.f32.mrb[245].mxu0 }
 0xc1c   : > { %v5509_v31 = vmul.f32 0.7978846, %v5381_v26  ;;  %v5126_v0 = vmul.f32 %v4998_v40, %v10815_v4  ;;  %v11049_v38 = vpop.f32.mrb[8].mxu1  ;;  %12704 = vst [vmem:[#allocation146_spill] sm:$0xff] %v11051_v19  ;;  %8206 = vtanh.f32 %v5508_v52  ;;  %v5384_v49 = vadd.f32 %v5256_v42, %v10833_v44 }
 0xc1d   : > { %12702 = vst [vmem:[#allocation144_spill] sm:$0xff] %v11042_v21  ;;  %12703 = vst [vmem:[#allocation145_spill] sm:$0xff] %v11049_v38  ;;  %v11053_v32 = vpop.eup %8200  ;;  %v5506_v29 = vmul.f32 0.7978846, %v5378_v45  ;;  %v5379_v5 = vadd.f32 %v5251_v6, %v10802_v30  ;;  %v11057_v21 = vpop.f32.mrb[9].mxu1  ;;  %8208 = vtanh.f32 %v5503_v34  ;;  %v5385_v1 = vadd.f32 %v5257_v43, %v10837_v55 }
 0xc1e   : > { %12705 = vst [vmem:[#allocation147_spill] sm:$0xff] %v11053_v32  ;;  %12706 = vst [vmem:[#allocation148_spill] sm:$0xff] %v11057_v21  ;;  %v5254_v40 = vmul.f32 %v5126_v0, %v10815_v4  ;;  %v5127_v26 = vmul.f32 %v4999_v23, %v10822_v33  ;;  %v11062_v38 = vpop.eup %8202  ;;  %8210 = vtanh.f32 %v5509_v31  ;;  %v5512_v19 = vmul.f32 0.7978846, %v5384_v49  ;;  %v11070_v43 = vpop.f32.mrb[246].mxu0 }
 0xc1f   : > { %12707 = vst [vmem:[#allocation149_spill] sm:$0xff] %v11062_v38  ;;  %v5507_v32 = vmul.f32 0.7978846, %v5379_v5  ;;  %v5002_v45 = vmul.f32 0.044715, %v10839_v53  ;;  %v11065_v52 = vpop.eup %8204  ;;  %8212 = vtanh.f32 %v5506_v29  ;;  %v11075_v31 = vmul.f32 0.5, %v10839_v53 }
 0xc20   : > { %12708 = vst [vmem:[#allocation150_spill] sm:$0xff] %v11065_v52  ;;  %v5513_v44 = vmul.f32 0.7978846, %v5385_v1  ;;  %v5382_v42 = vadd.f32 %v5254_v40, %v10815_v4  ;;  %v5255_v34 = vmul.f32 %v5127_v26, %v10822_v33  ;;  %v5003_v6 = vmul.f32 0.044715, %v10846_v57  ;;  %v11072_v0 = vpop.f32.mrb[10].mxu1 }
 0xc21   : > { %12709 = vst [vmem:[#allocation151_spill] sm:$0xff] %v11075_v31  ;;  %v5130_v23 = vmul.f32 %v5002_v45, %v10839_v53  ;;  %v5004_v49 = vmul.f32 0.044715, %v10857_v35  ;;  %v11079_v5 = vpop.f32.mrb[247].mxu0  ;;  %v11081_v1 = vpop.f32.mrb[11].mxu1  ;;  %8214 = vtanh.f32 %v5512_v19  ;;  %v11087_v52 = vmul.f32 0.5, %v10857_v35 }
 0xc22   : > { %v5510_v4 = vmul.f32 0.7978846, %v5382_v42  ;;  %v5383_v40 = vadd.f32 %v5255_v34, %v10822_v33  ;;  %v5131_v26 = vmul.f32 %v5003_v6, %v10846_v57  ;;  %8216 = vtanh.f32 %v5507_v32  ;;  %v11090_v31 = vpop.f32.mrb[248].mxu0 }
 0xc23   : > { %v5258_v29 = vmul.f32 %v5130_v23, %v10839_v53  ;;  %12710 = vst [vmem:[#allocation152_spill] sm:$0xff] %v11087_v52  ;;  %v5132_v45 = vmul.f32 %v5004_v49, %v10857_v35  ;;  %8218 = vtanh.f32 %v5513_v44  ;;  %v5006_v19 = vmul.f32 0.044715, %v10865_v51  ;;  %v11096_v34 = vpop.f32.mrb[249].mxu0 }
 0xc24   : > { %v5511_v55 = vmul.f32 0.7978846, %v5383_v40  ;;  %v5259_v30 = vmul.f32 %v5131_v26, %v10846_v57  ;;  %v11094_v42 = vpop.f32.mrb[12].mxu1  ;;  %8220 = vtanh.f32 %v5510_v4  ;;  %v4845_v23 = vmul.f32 0.5, %v10686_v18 }
 0xc25   : > { %v5386_v32 = vadd.f32 %v5258_v29, %v10839_v53  ;;  %v5260_v6 = vmul.f32 %v5132_v45, %v10857_v35  ;;  %v11101_v49 = vpop.f32.mrb[13].mxu1  ;;  %v5134_v40 = vmul.f32 %v5006_v19, %v10865_v51  ;;  %v4849_v26 = vmul.f32 0.5, %v10700_v39 }
 0xc26   : > { %v5387_v44 = vadd.f32 %v5259_v30, %v10846_v57  ;;  %v5741_v52 = vadd.f32 1.0, %v10809_v54  ;;  %v11107_v33 = vpop.eup %8206  ;;  %v5745_v53 = vadd.f32 1.0, %v10824_v59  ;;  %v5005_v29 = vmul.f32 0.044715, %v10867_v58  ;;  %v11112_v18 = vpop.f32.mrb[250].mxu0 }
 0xc27   : > { %12711 = vst [vmem:[#allocation153_spill] sm:$0xff] %v11107_v33  ;;  %v5514_v38 = vmul.f32 0.7978846, %v5386_v32  ;;  %v5388_v4 = vadd.f32 %v5260_v6, %v10857_v35  ;;  %12712 = vst [vmem:[#allocation154_spill] sm:$0xff] %v11112_v18  ;;  %v11114_v45 = vpop.eup %8208  ;;  %8222 = vtanh.f32 %v5511_v55  ;;  %v5262_v19 = vmul.f32 %v5134_v40, %v10865_v51  ;;  %v11120_v57 = vpop.f32.mrb[251].mxu0 }
 0xc28   : > { %12713 = vst [vmem:[#allocation155_spill] sm:$0xff] %v11114_v45  ;;  %v5515_v30 = vmul.f32 0.7978846, %v5387_v44  ;;  %v5007_v39 = vmul.f32 0.044715, %v10874_v16  ;;  %v11118_v54 = vpop.f32.mrb[14].mxu1  ;;  %v11122_v32 = vpop.eup %8210  ;;  %v5869_v59 = vmul.f32 %v5741_v52, %v4845_v23  ;;  %v5873_v6 = vmul.f32 %v5745_v53, %v4849_v26 }
 0xc29   : > { %12714 = vst [vmem:[#allocation156_spill] sm:$0xff] %v11120_v57  ;;  %12715 = vst [vmem:[#allocation157_spill] sm:$0xff] %v11122_v32  ;;  %v5516_v35 = vmul.f32 0.7978846, %v5388_v4  ;;  %v5133_v33 = vmul.f32 %v5005_v29, %v10867_v58  ;;  %v11125_v18 = vpop.f32.mrb[15].mxu1  ;;  %8224 = vtanh.f32 %v5514_v38  ;;  %v5390_v55 = vadd.f32 %v5262_v19, %v10865_v51  ;;  %v11130_v45 = vpop.eup %8212 }
 0xc2a   : > { %12716 = vst [vmem:[#allocation158_spill] sm:$0xff] %v11125_v18  ;;  %v5135_v44 = vmul.f32 %v5007_v39, %v10874_v16  ;;  %v5740_v40 = vadd.f32 1.0, %v10795_v48  ;;  %8226 = vtanh.f32 %v5515_v30  ;;  %v7564_v57 = vpack.c.bf16 %v5873_v6, %v5869_v59  ;;  %v11134_v23 = vpop.f32.mrb[252].mxu0 }
 0xc2b   : > { %v5261_v32 = vmul.f32 %v5133_v33, %v10867_v58  ;;  %v5744_v52 = vadd.f32 1.0, %v10817_v63  ;;  %v11136_v26 = vpop.eup %8214  ;;  %8228 = vtanh.f32 %v5516_v35  ;;  %v11139_v38 = vmul.f32 0.5, %v10865_v51  ;;  %v11144_v29 = vpop.f32.mrb[253].mxu0 }
 0xc2c   : > { %12717 = vst [vmem:[#allocation159_spill] sm:$0xff] %v11136_v26  ;;  %v5518_v4 = vmul.f32 0.7978846, %v5390_v55  ;;  %v5263_v53 = vmul.f32 %v5135_v44, %v10874_v16  ;;  %v11142_v48 = vpop.f32.mrb[16].mxu1  ;;  %12719 = vst [vmem:[#allocation161_spill] sm:$0xff] %v11144_v29  ;;  %v11146_v30 = vpop.eup %8216  ;;  %7565 = vmatprep.subr.bf16.mxu0 %v7564_v57  ;;  %v5868_v63 = vmul.f32 %v5740_v40, %v10692_v9  ;;  %v11158_v6 = vmul.f32 0.5, %v10886_v17 }
 0xc2d   : > { %12718 = vst [vmem:[#allocation160_spill] sm:$0xff] %v11139_v38  ;;  %v5389_v33 = vadd.f32 %v5261_v32, %v10867_v58  ;;  %v5872_v19 = vmul.f32 %v5744_v52, %v10706_v12  ;;  %v5008_v39 = vmul.f32 0.044715, %v10886_v17  ;;  %v11152_v51 = vpop.f32.mrb[17].mxu1  ;;  %v11154_v35 = vpop.eup %8218  ;;  %v5010_v55 = vmul.f32 0.044715, %v10894_v28 }
 0xc2e   : > { %12720 = vst [vmem:[#allocation162_spill] sm:$0xff] %v11152_v51  ;;  %v5391_v59 = vadd.f32 %v5263_v53, %v10874_v16  ;;  %12721 = vst [vmem:[#allocation163_spill] sm:$0xff] %v11158_v6  ;;  %v5009_v57 = vmul.f32 0.044715, %v10896_v8  ;;  %v11162_v32 = vpop.eup %8220  ;;  %v5011_v40 = vmul.f32 0.044715, %v10901_v37  ;;  %8230 = vtanh.f32 %v5518_v4 }
 0xc2f   : > { %12722 = vst [vmem:[#allocation164_spill] sm:$0xff] %v11162_v32  ;;  %v5517_v9 = vmul.f32 0.7978846, %v5389_v33  ;;  %v7566_v44 = vpack.c.bf16 %v5872_v19, %v5868_v63  ;;  %v5136_v12 = vmul.f32 %v5008_v39, %v10886_v17  ;;  %v11166_v52 = vpop.f32.mrb[254].mxu0  ;;  %v11169_v53 = vmul.f32 0.5, %v10894_v28 }
 0xc30   : > { %v5138_v38 = vmul.f32 %v5010_v55, %v10894_v28  ;;  %v5137_v6 = vmul.f32 %v5009_v57, %v10896_v8  ;;  %v11173_v16 = vpop.f32.mrb[18].mxu1  ;;  %v11175_v58 = vpop.f32.mrb[255].mxu0  ;;  %v5519_v33 = vmul.f32 0.7978846, %v5391_v59  ;;  %v5139_v19 = vmul.f32 %v5011_v40, %v10901_v37 }
 0xc31   : > { %12723 = vst [vmem:[#allocation165_spill] sm:$0xff] %v11169_v53  ;;  %12724 = vst [vmem:[#allocation166_spill] sm:$0xff] %v11175_v58  ;;  %7567 = vmatpush1.bf16.msra.mxu0 %v7566_v44  ;;  %v5264_v63 = vmul.f32 %v5136_v12, %v10886_v17  ;;  %v5012_v39 = vmul.f32 0.044715, %v10910_v14  ;;  %v11180_v4 = vpop.f32.mrb[19].mxu1  ;;  %v11182_v32 = vpop.eup %8222  ;;  %8232 = vtanh.f32 %v5517_v9  ;;  %v11187_v53 = vmul.f32 0.5, %v10910_v14 }
 0xc32   : > { %12725 = vst [vmem:[#allocation167_spill] sm:$0xff] %v11180_v4  ;;  %12726 = vst [vmem:[#allocation168_spill] sm:$0xff] %v11182_v32  ;;  %v5266_v55 = vmul.f32 %v5138_v38, %v10894_v28  ;;  %v5265_v57 = vmul.f32 %v5137_v6, %v10896_v8  ;;  %v5267_v44 = vmul.f32 %v5139_v19, %v10901_v37  ;;  %v5014_v40 = vmul.f32 0.044715, %v10916_v15  ;;  %v11193_v26 = vpop.f32.mrb[0].mxu0 }
 0xc33   : > { %12727 = vst [vmem:[#allocation169_spill] sm:$0xff] %v11187_v53  ;;  %v5392_v59 = vadd.f32 %v5264_v63, %v10886_v17  ;;  %v5140_v12 = vmul.f32 %v5012_v39, %v10910_v14  ;;  %12728 = vst [vmem:[#allocation170_spill] sm:$0xff] %v11193_v26  ;;  %v11195_v4 = vpop.eup %8224  ;;  %v5013_v6 = vmul.f32 0.044715, %v10918_v20  ;;  %v5015_v53 = vmul.f32 0.044715, %v10926_v7 }
 0xc34   : > { %12729 = vst [vmem:[#allocation171_spill] sm:$0xff] %v11195_v4  ;;  %v5394_v9 = vadd.f32 %v5266_v55, %v10894_v28  ;;  %v5393_v38 = vadd.f32 %v5265_v57, %v10896_v8  ;;  %v11201_v32 = vpop.f32.mrb[20].mxu1  ;;  %v11203_v17 = vpop.f32.mrb[1].mxu0  ;;  %v5395_v39 = vadd.f32 %v5267_v44, %v10901_v37  ;;  %v5142_v4 = vmul.f32 %v5014_v40, %v10916_v15  ;;  %v12743_v37 = vld [vmem:[#allocation109_spill] sm:$0xff] }
 0xc35   : > { %12730 = vst [vmem:[#allocation172_spill] sm:$0xff] %v11201_v32  ;;  %v11205_v63 = vpop.eup %8226  ;;  %v5520_v19 = vmul.f32 0.7978846, %v5392_v59  ;;  %v5268_v26 = vmul.f32 %v5140_v12, %v10910_v14  ;;  %v11210_v28 = vpop.f32.mrb[21].mxu1  ;;  %v5141_v58 = vmul.f32 %v5013_v6, %v10918_v20  ;;  %v5143_v32 = vmul.f32 %v5015_v53, %v10926_v7 }
 0xc36   : > { %12731 = vst [vmem:[#allocation173_spill] sm:$0xff] %v11205_v63  ;;  %v11212_v55 = vpop.eup %8228  ;;  %v5522_v57 = vmul.f32 0.7978846, %v5394_v9  ;;  %v5521_v8 = vmul.f32 0.7978846, %v5393_v38  ;;  %8234 = vtanh.f32 %v5519_v33  ;;  %v11218_v59 = vmul.f32 0.5, %v10916_v15 }
 0xc37   : > { %12732 = vst [vmem:[#allocation174_spill] sm:$0xff] %v11212_v55  ;;  %v5396_v63 = vadd.f32 %v5268_v26, %v10910_v14  ;;  %v5270_v44 = vmul.f32 %v5142_v4, %v10916_v15  ;;  %v11221_v12 = vpop.f32.mrb[2].mxu0  ;;  %8236 = vtanh.f32 %v5520_v19  ;;  %v5523_v40 = vmul.f32 0.7978846, %v5395_v39 }
 0xc38   : > { %12733 = vst [vmem:[#allocation175_spill] sm:$0xff] %v11218_v59  ;;  %v5269_v55 = vmul.f32 %v5141_v58, %v10918_v20  ;;  %v5271_v9 = vmul.f32 %v5143_v32, %v10926_v7  ;;  %v11225_v38 = vpop.f32.mrb[22].mxu1  ;;  %v11227_v6 = vpop.f32.mrb[3].mxu0  ;;  %8238 = vtanh.f32 %v5522_v57  ;;  %v5016_v26 = vmul.f32 0.044715, %v10935_v11 }
 0xc39   : > { %12734 = vst [vmem:[#allocation176_spill] sm:$0xff] %v11227_v6  ;;  %v5524_v53 = vmul.f32 0.7978846, %v5396_v63  ;;  %v5398_v14 = vadd.f32 %v5270_v44, %v10916_v15  ;;  %v11231_v33 = vpop.f32.mrb[23].mxu1  ;;  %v11233_v4 = vpop.eup %8230  ;;  %8240 = vtanh.f32 %v5521_v8  ;;  %v11238_v32 = vmul.f32 0.5, %v10935_v11 }
 0xc3a   : > { %12735 = vst [vmem:[#allocation177_spill] sm:$0xff] %v11231_v33  ;;  %12736 = vst [vmem:[#allocation178_spill] sm:$0xff] %v11233_v4  ;;  %v5397_v19 = vadd.f32 %v5269_v55, %v10918_v20  ;;  %v5399_v58 = vadd.f32 %v5271_v9, %v10926_v7  ;;  %v5144_v57 = vmul.f32 %v5016_v26, %v10935_v11  ;;  %v11242_v63 = vmul.f32 0.5, %v10938_v25  ;;  %v11245_v44 = vpop.f32.mrb[4].mxu0 }
 0xc3b   : > { %12737 = vst [vmem:[#allocation179_spill] sm:$0xff] %v11238_v32  ;;  %v5526_v39 = vmul.f32 0.7978846, %v5398_v14  ;;  %v5018_v15 = vmul.f32 0.044715, %v10938_v25  ;;  %v11247_v59 = vpop.eup %8232  ;;  %8242 = vtanh.f32 %v5523_v40  ;;  %v4835_v40 = vmul.f32 0.5, %v10648_v61 }
 0xc3c   : > { %12738 = vst [vmem:[#allocation180_spill] sm:$0xff] %v11242_v63  ;;  %12739 = vst [vmem:[#allocation181_spill] sm:$0xff] %v11247_v59  ;;  %v5525_v8 = vmul.f32 0.7978846, %v5397_v19  ;;  %v5527_v55 = vmul.f32 0.7978846, %v5399_v58  ;;  %8244 = vtanh.f32 %v5524_v53  ;;  %v5272_v32 = vmul.f32 %v5144_v57, %v10935_v11 }
 0xc3d   : > { %v5017_v9 = vmul.f32 0.044715, %v10940_v27  ;;  %v5146_v14 = vmul.f32 %v5018_v15, %v10938_v25  ;;  %v5019_v26 = vmul.f32 0.044715, %v10946_v3  ;;  %v11253_v7 = vpop.f32.mrb[24].mxu1  ;;  %v11255_v63 = vpop.f32.mrb[5].mxu0  ;;  %8246 = vtanh.f32 %v5526_v39 }
 0xc3e   : > { %12740 = vst [vmem:[#allocation182_spill] sm:$0xff] %v11255_v63  ;;  %v5727_v19 = vadd.f32 1.0, %v10740_v50  ;;  %v11260_v58 = vpop.f32.mrb[25].mxu1  ;;  %8248 = vtanh.f32 %v5525_v8  ;;  %v5400_v53 = vadd.f32 %v5272_v32, %v10935_v11  ;;  %v11265_v4 = vpop.f32.mrb[6].mxu0  ;;  %v12744_v59 = vld [vmem:[#allocation91_spill] sm:$0xff] }
 0xc3f   : > { %v5145_v20 = vmul.f32 %v5017_v9, %v10940_v27  ;;  %12741 = vst [vmem:[#allocation183_spill] sm:$0xff] %v11260_v58  ;;  %v5274_v57 = vmul.f32 %v5146_v14, %v10938_v25  ;;  %v5147_v15 = vmul.f32 %v5019_v26, %v10946_v3  ;;  %12742 = vst [vmem:[#allocation184_spill] sm:$0xff] %v11265_v4  ;;  %8250 = vtanh.f32 %v5527_v55  ;;  %v11272_v50 = vpop.f32.mrb[7].mxu0 }
 0xc40   : > { %v5731_v9 = vadd.f32 1.0, %v12743_v37  ;;  %v5855_v61 = vmul.f32 %v5727_v19, %v12744_v59  ;;  %v11270_v63 = vpop.f32.mrb[26].mxu1  ;;  %12746 = vst [vmem:[#allocation91_spill] sm:$0xff] %v11272_v50  ;;  %v11274_v8 = vpop.eup %8234  ;;  %v5528_v11 = vmul.f32 0.7978846, %v5400_v53  ;;  %v11285_v19 = vmul.f32 0.5, %v10958_v47 }
 0xc41   : > { %v5273_v39 = vmul.f32 %v5145_v20, %v10940_v27  ;;  %12745 = vst [vmem:[#allocation109_spill] sm:$0xff] %v11270_v63  ;;  %12747 = vst [vmem:[#allocation185_spill] sm:$0xff] %v11274_v8  ;;  %v5402_v32 = vadd.f32 %v5274_v57, %v10938_v25  ;;  %v5275_v14 = vmul.f32 %v5147_v15, %v10946_v3  ;;  %v5020_v26 = vmul.f32 0.044715, %v10958_v47  ;;  %v11279_v55 = vpop.f32.mrb[27].mxu1  ;;  %v11281_v20 = vpop.eup %8236 }
 0xc42   : > { %12748 = vst [vmem:[#allocation186_spill] sm:$0xff] %v11279_v55  ;;  %12749 = vst [vmem:[#allocation187_spill] sm:$0xff] %v11281_v20  ;;  %v5859_v59 = vmul.f32 %v5731_v9, %v4835_v40  ;;  %v5022_v50 = vmul.f32 0.044715, %v10962_v24  ;;  %v11288_v63 = vpop.eup %8238  ;;  %8252 = vtanh.f32 %v5528_v11  ;;  %v11292_v15 = vpop.f32.mrb[8].mxu0  ;;  %v12753_v9 = vld [vmem:[#allocation89_spill] sm:$0xff] }
 0xc43   : > { %v5401_v37 = vadd.f32 %v5273_v39, %v10940_v27  ;;  %12750 = vst [vmem:[#allocation188_spill] sm:$0xff] %v11285_v19  ;;  %12751 = vst [vmem:[#allocation189_spill] sm:$0xff] %v11288_v63  ;;  %v5530_v25 = vmul.f32 0.7978846, %v5402_v32  ;;  %v5403_v53 = vadd.f32 %v5275_v14, %v10946_v3  ;;  %v5148_v57 = vmul.f32 %v5020_v26, %v10958_v47  ;;  %v11294_v55 = vpop.eup %8240  ;;  %v11300_v4 = vpop.f32.mrb[9].mxu0  ;;  %v12756_v14 = vld [vmem:[#allocation99_spill] sm:$0xff] }
 0xc44   : > { %12752 = vst [vmem:[#allocation190_spill] sm:$0xff] %v11292_v15  ;;  %v7620_v39 = vpack.c.bf16 %v5859_v59, %v5855_v61  ;;  %v5150_v40 = vmul.f32 %v5022_v50, %v10962_v24  ;;  %v4853_v19 = vmul.f32 0.5, %v12753_v9  ;;  %v11298_v27 = vpop.f32.mrb[28].mxu1  ;;  %12755 = vst [vmem:[#allocation191_spill] sm:$0xff] %v11300_v4  ;;  %v4857_v26 = vmul.f32 0.5, %v12756_v14  ;;  %v12759_v50 = vld [vmem:[#allocation80_spill] sm:$0xff] }
 0xc45   : > { %v5529_v20 = vmul.f32 0.7978846, %v5401_v37  ;;  %12754 = vst [vmem:[#allocation89_spill] sm:$0xff] %v11298_v27  ;;  %8254 = vtanh.f32 %v5530_v25  ;;  %v5531_v11 = vmul.f32 0.7978846, %v5403_v53  ;;  %v5276_v32 = vmul.f32 %v5148_v57, %v10958_v47  ;;  %v11304_v3 = vpop.f32.mrb[29].mxu1  ;;  %v11306_v15 = vpop.eup %8242 }
 0xc46   : > { %12757 = vst [vmem:[#allocation99_spill] sm:$0xff] %v11304_v3  ;;  %12758 = vst [vmem:[#allocation192_spill] sm:$0xff] %v11306_v15  ;;  %7621 = vmatprep.subr.bf16.mxu1 %v7620_v39  ;;  %v5278_v61 = vmul.f32 %v5150_v40, %v10962_v24  ;;  %v5749_v37 = vadd.f32 1.0, %v12759_v50  ;;  %v12760_v59 = vld [vmem:[#allocation111_spill] sm:$0xff]  ;;  %v11311_v27 = vpop.eup %8244  ;;  %v12762_v53 = vld [vmem:[#allocation94_spill] sm:$0xff]  ;;  %v11316_v3 = vpop.f32.mrb[10].mxu0 }
 0xc47   : > { %8256 = vtanh.f32 %v5529_v20  ;;  %v5753_v9 = vadd.f32 1.0, %v12760_v59  ;;  %12761 = vst [vmem:[#allocation80_spill] sm:$0xff] %v11311_v27  ;;  %v5404_v25 = vadd.f32 %v5276_v32, %v10958_v47  ;;  %v5726_v57 = vadd.f32 1.0, %v12762_v53  ;;  %v12763_v14 = vld [vmem:[#allocation84_spill] sm:$0xff]  ;;  %12764 = vst [vmem:[#allocation111_spill] sm:$0xff] %v11316_v3  ;;  %v11318_v63 = vpop.eup %8246 }
 0xc48   : > { %8258 = vtanh.f32 %v5531_v11  ;;  %v5730_v4 = vadd.f32 1.0, %v12763_v14  ;;  %12765 = vst [vmem:[#allocation94_spill] sm:$0xff] %v11318_v63  ;;  %v5406_v20 = vadd.f32 %v5278_v61, %v10962_v24  ;;  %v5877_v39 = vmul.f32 %v5749_v37, %v4853_v19  ;;  %v11322_v59 = vpop.eup %8248  ;;  %v12767_v11 = vld [vmem:[#allocation90_spill] sm:$0xff]  ;;  %v12768_v47 = vld [vmem:[#allocation100_spill] sm:$0xff] }
 0xc49   : > { %v5881_v40 = vmul.f32 %v5753_v9, %v4857_v26  ;;  %v5021_v50 = vmul.f32 0.044715, %v10964_v13  ;;  %12766 = vst [vmem:[#allocation84_spill] sm:$0xff] %v11322_v59  ;;  %v5532_v27 = vmul.f32 0.7978846, %v5404_v25  ;;  %v5854_v15 = vmul.f32 %v5726_v57, %v12767_v11  ;;  %v11327_v14 = vpop.eup %8250  ;;  %v12769_v61 = vld [vmem:[#allocation78_spill] sm:$0xff] }
 0xc4a   : > { %v5858_v32 = vmul.f32 %v5730_v4, %v12768_v47  ;;  %v5023_v53 = vmul.f32 0.044715, %v10971_v2  ;;  %v5534_v3 = vmul.f32 0.7978846, %v5406_v20  ;;  %v5748_v19 = vadd.f32 1.0, %v12769_v61  ;;  %v12770_v9 = vld [vmem:[#allocation82_spill] sm:$0xff] }
 0xc4b   : > { %v7568_v8 = vpack.c.bf16 %v5881_v40, %v5877_v39  ;;  %v5149_v63 = vmul.f32 %v5021_v50, %v10964_v13  ;;  %8260 = vtanh.f32 %v5532_v27  ;;  %v5752_v25 = vadd.f32 1.0, %v12770_v9  ;;  %v11333_v59 = vpop.f32.mrb[30].mxu1  ;;  %v12772_v20 = vld [vmem:[#allocation95_spill] sm:$0xff]  ;;  %v11340_v40 = vpop.f32.mrb[11].mxu0 }
 0xc4c   : > { %v7622_v26 = vpack.c.bf16 %v5858_v32, %v5854_v15  ;;  %v5151_v37 = vmul.f32 %v5023_v53, %v10971_v2  ;;  %v11336_v4 = vmul.f32 0.5, %v10962_v24  ;;  %8262 = vtanh.f32 %v5534_v3  ;;  %12773 = vst [vmem:[#allocation100_spill] sm:$0xff] %v11340_v40  ;;  %v11342_v50 = vpop.eup %8252  ;;  %v12774_v15 = vld [vmem:[#allocation104_spill] sm:$0xff] }
 0xc4d   : > { %7569 = vmatprep.subr.bf16.mxu0 %v7568_v8  ;;  %v5277_v57 = vmul.f32 %v5149_v63, %v10964_v13  ;;  %v5876_v39 = vmul.f32 %v5748_v19, %v12772_v20  ;;  %v5880_v11 = vmul.f32 %v5752_v25, %v12774_v15  ;;  %v11347_v47 = vmul.f32 0.5, %v10983_v60  ;;  %v11359_v25 = vpop.f32.mrb[31].mxu1 }
 0xc4e   : > { %12771 = vst [vmem:[#allocation90_spill] sm:$0xff] %v11336_v4  ;;  %7623 = vmatpush1.bf16.msra.mxu1 %v7622_v26  ;;  %v5279_v27 = vmul.f32 %v5151_v37, %v10971_v2  ;;  %v5024_v24 = vmul.f32 0.044715, %v10983_v60  ;;  %v5026_v63 = vmul.f32 0.044715, %v10991_v56  ;;  %v12777_v37 = vld [vmem:[#allocation85_spill] sm:$0xff] }
 0xc4f   : > { %12775 = vst [vmem:[#allocation78_spill] sm:$0xff] %v11347_v47  ;;  %v5405_v3 = vadd.f32 %v5277_v57, %v10964_v13  ;;  %v5025_v8 = vmul.f32 0.044715, %v10993_v62  ;;  %v5027_v32 = vmul.f32 0.044715, %v11002_v36  ;;  %v11354_v53 = vpop.eup %8254  ;;  %v7570_v19 = vpack.c.bf16 %v5880_v11, %v5876_v39  ;;  %12778 = vst [vmem:[#allocation95_spill] sm:$0xff] %v11359_v25 }
 0xc50   : > { %12776 = vst [vmem:[#allocation82_spill] sm:$0xff] %v11354_v53  ;;  %v5407_v61 = vadd.f32 %v5279_v27, %v10971_v2  ;;  %v5152_v26 = vmul.f32 %v5024_v24, %v10983_v60  ;;  %v4839_v9 = vmul.f32 0.5, %v12777_v37  ;;  %v5154_v15 = vmul.f32 %v5026_v63, %v10991_v56  ;;  %v11366_v13 = vpop.f32.mrb[12].mxu0  ;;  %v12781_v11 = vld [vmem:[#allocation88_spill] sm:$0xff]  ;;  %v11376_v2 = vpop.f32.mrb[32].mxu1 }
 0xc51   : > { %v11361_v20 = vpop.eup %8256  ;;  %v5533_v57 = vmul.f32 0.7978846, %v5405_v3  ;;  %v5153_v4 = vmul.f32 %v5025_v8, %v10993_v62  ;;  %v5155_v47 = vmul.f32 %v5027_v32, %v11002_v36  ;;  %12779 = vst [vmem:[#allocation104_spill] sm:$0xff] %v11366_v13  ;;  %7571 = vmatpush1.bf16.msra.mxu0 %v7570_v19  ;;  %v11372_v27 = vmul.f32 0.5, %v10991_v56  ;;  %v12782_v37 = vld [vmem:[#allocation116_spill] sm:$0xff] }
 0xc52   : > { %v11368_v40 = vpop.eup %8258  ;;  %v5280_v39 = vmul.f32 %v5152_v26, %v10983_v60  ;;  %v4843_v24 = vmul.f32 0.5, %v12781_v11  ;;  %v5735_v3 = vadd.f32 1.0, %v12782_v37  ;;  %v5535_v63 = vmul.f32 0.7978846, %v5407_v61  ;;  %v12783_v26 = vld [vmem:[#allocation119_spill] sm:$0xff] }
 0xc53   : > { %12780 = vst [vmem:[#allocation85_spill] sm:$0xff] %v11372_v27  ;;  %v5282_v8 = vmul.f32 %v5154_v15, %v10991_v56  ;;  %v5281_v32 = vmul.f32 %v5153_v4, %v10993_v62  ;;  %v5283_v13 = vmul.f32 %v5155_v47, %v11002_v36  ;;  %8264 = vtanh.f32 %v5533_v57  ;;  %v11383_v27 = vpop.f32.mrb[13].mxu0  ;;  %v11391_v4 = vpop.f32.mrb[33].mxu1 }
 0xc54   : > { %v5408_v19 = vadd.f32 %v5280_v39, %v10983_v60  ;;  %v5739_v25 = vadd.f32 1.0, %v12783_v26  ;;  %v5863_v53 = vmul.f32 %v5735_v3, %v4839_v9  ;;  %v11389_v15 = vmul.f32 0.5, %v11012_v41 }
 0xc55   : > { %v5410_v11 = vadd.f32 %v5282_v8, %v10991_v56  ;;  %v5409_v37 = vadd.f32 %v5281_v32, %v10993_v62  ;;  %v5411_v61 = vadd.f32 %v5283_v13, %v11002_v36  ;;  %v11393_v47 = vpop.eup %8260  ;;  %v5028_v39 = vmul.f32 0.044715, %v11012_v41 }
 0xc56   : > { %12784 = vst [vmem:[#allocation88_spill] sm:$0xff] %v11389_v15  ;;  %12785 = vst [vmem:[#allocation116_spill] sm:$0xff] %v11393_v47  ;;  %v5536_v57 = vmul.f32 0.7978846, %v5408_v19  ;;  %v5867_v60 = vmul.f32 %v5739_v25, %v4843_v24  ;;  %v11397_v9 = vmul.f32 0.5, %v11024_v22  ;;  %v11399_v3 = vpop.eup %8262  ;;  %8266 = vtanh.f32 %v5535_v63  ;;  %v12788_v19 = vld [vmem:[#allocation112_spill] sm:$0xff] }
 0xc57   : > { %12787 = vst [vmem:[#allocation193_spill] sm:$0xff] %v11399_v3  ;;  %v5538_v56 = vmul.f32 0.7978846, %v5410_v11  ;;  %v5537_v8 = vmul.f32 0.7978846, %v5409_v37  ;;  %v5156_v26 = vmul.f32 %v5028_v39, %v11012_v41  ;;  %v5734_v25 = vadd.f32 1.0, %v12788_v19 }
 0xc58   : > { %12786 = vst [vmem:[#allocation119_spill] sm:$0xff] %v11397_v9  ;;  %v5539_v13 = vmul.f32 0.7978846, %v5411_v61  ;;  %8268 = vtanh.f32 %v5536_v57  ;;  %v7624_v32 = vpack.c.bf16 %v5867_v60, %v5863_v53  ;;  %v5030_v15 = vmul.f32 0.044715, %v11024_v22  ;;  %v12789_v24 = vld [vmem:[#allocation117_spill] sm:$0xff] }
 0xc59   : > { %8270 = vtanh.f32 %v5538_v56  ;;  %v5738_v47 = vadd.f32 1.0, %v12789_v24  ;;  %v5029_v36 = vmul.f32 0.044715, %v11031_v10  ;;  %v5284_v63 = vmul.f32 %v5156_v26, %v11012_v41  ;;  %v12790_v37 = vld [vmem:[#allocation143_spill] sm:$0xff]  ;;  %v12791_v53 = vld [vmem:[#allocation96_spill] sm:$0xff]  ;;  %v12794_v9 = vld [vmem:[#allocation145_spill] sm:$0xff] }
 0xc5a   : > { %8272 = vtanh.f32 %v5537_v8  ;;  %7625 = vmatprep.subr.bf16.mxu1 %v7624_v32  ;;  %v5158_v11 = vmul.f32 %v5030_v15, %v11024_v22  ;;  %v5031_v61 = vmul.f32 0.044715, %v12790_v37  ;;  %v5862_v57 = vmul.f32 %v5734_v25, %v12791_v53  ;;  %v12792_v60 = vld [vmem:[#allocation83_spill] sm:$0xff] }
 0xc5b   : > { %8274 = vtanh.f32 %v5539_v13  ;;  %v5866_v39 = vmul.f32 %v5738_v47, %v12792_v60  ;;  %v5157_v56 = vmul.f32 %v5029_v36, %v11031_v10  ;;  %v5412_v19 = vadd.f32 %v5284_v63, %v11012_v41 }
 0xc5c   : > { %v5286_v24 = vmul.f32 %v5158_v11, %v11024_v22  ;;  %v5159_v8 = vmul.f32 %v5031_v61, %v12790_v37  ;;  %v11416_v32 = vmul.f32 0.5, %v11044_v46  ;;  %v5032_v13 = vmul.f32 0.044715, %v11044_v46 }
 0xc5d   : > { %v7626_v26 = vpack.c.bf16 %v5866_v39, %v5862_v57  ;;  %v5285_v15 = vmul.f32 %v5157_v56, %v11031_v10  ;;  %v11421_v25 = vmul.f32 0.5, %v12794_v9  ;;  %v11423_v47 = vpop.eup %8264  ;;  %v5540_v36 = vmul.f32 0.7978846, %v5412_v19  ;;  %v12796_v57 = vld [vmem:[#allocation146_spill] sm:$0xff] }
 0xc5e   : > { %12793 = vst [vmem:[#allocation112_spill] sm:$0xff] %v11416_v32  ;;  %v5414_v41 = vadd.f32 %v5286_v24, %v11024_v22  ;;  %v5287_v63 = vmul.f32 %v5159_v8, %v12790_v37  ;;  %v5034_v11 = vmul.f32 0.044715, %v12794_v9  ;;  %v5160_v53 = vmul.f32 %v5032_v13, %v11044_v46 }
 0xc5f   : > { %12795 = vst [vmem:[#allocation117_spill] sm:$0xff] %v11421_v25  ;;  %7627 = vmatpush1.bf16.msra.mxu1 %v7626_v26  ;;  %v5413_v61 = vadd.f32 %v5285_v15, %v11031_v10  ;;  %v5033_v60 = vmul.f32 0.044715, %v12796_v57  ;;  %v5035_v39 = vmul.f32 0.044715, %v11057_v21  ;;  %8276 = vtanh.f32 %v5540_v36 }
 0xc60   : > { %v5542_v56 = vmul.f32 0.7978846, %v5414_v41  ;;  %v5415_v25 = vadd.f32 %v5287_v63, %v12790_v37  ;;  %v5162_v19 = vmul.f32 %v5034_v11, %v12794_v9  ;;  %v11434_v22 = vpop.eup %8266  ;;  %v5288_v8 = vmul.f32 %v5160_v53, %v11044_v46  ;;  %v12798_v41 = vld [vmem:[#allocation93_spill] sm:$0xff]  ;;  %v12801_v37 = vld [vmem:[#allocation128_spill] sm:$0xff] }
 0xc61   : > { %v5541_v24 = vmul.f32 0.7978846, %v5413_v61  ;;  %v5161_v26 = vmul.f32 %v5033_v60, %v12796_v57  ;;  %v5163_v15 = vmul.f32 %v5035_v39, %v11057_v21  ;;  %v4847_v10 = vmul.f32 0.5, %v12798_v41 }
 0xc62   : > { %v11439_v13 = vpop.eup %8268  ;;  %8278 = vtanh.f32 %v5542_v56  ;;  %v5543_v32 = vmul.f32 0.7978846, %v5415_v25  ;;  %v5290_v36 = vmul.f32 %v5162_v19, %v12794_v9  ;;  %v5416_v11 = vadd.f32 %v5288_v8, %v11044_v46  ;;  %v12800_v56 = vld [vmem:[#allocation87_spill] sm:$0xff]  ;;  %v12803_v8 = vld [vmem:[#allocation134_spill] sm:$0xff] }
 0xc63   : > { %12797 = vst [vmem:[#allocation96_spill] sm:$0xff] %v11439_v13  ;;  %v11443_v63 = vpop.eup %8270  ;;  %8280 = vtanh.f32 %v5541_v24  ;;  %v5289_v61 = vmul.f32 %v5161_v26, %v12796_v57  ;;  %v5291_v53 = vmul.f32 %v5163_v15, %v11057_v21  ;;  %v4851_v25 = vmul.f32 0.5, %v12800_v56 }
 0xc64   : > { %12799 = vst [vmem:[#allocation83_spill] sm:$0xff] %v11443_v63  ;;  %v11448_v60 = vpop.eup %8272  ;;  %8282 = vtanh.f32 %v5543_v32  ;;  %v5418_v39 = vadd.f32 %v5290_v36, %v12794_v9  ;;  %v5743_v19 = vadd.f32 1.0, %v12801_v37  ;;  %v5544_v41 = vmul.f32 0.7978846, %v5416_v11 }
 0xc65   : > { %v11453_v3 = vpop.eup %8274  ;;  %v5417_v24 = vadd.f32 %v5289_v61, %v12796_v57  ;;  %v5419_v46 = vadd.f32 %v5291_v53, %v11057_v21  ;;  %v5747_v26 = vadd.f32 1.0, %v12803_v8  ;;  %v11459_v13 = vmul.f32 0.5, %v11070_v43  ;;  %v12816_v21 = vld [vmem:[#allocation102_spill] sm:$0xff] }
 0xc66   : > { %12802 = vst [vmem:[#allocation145_spill] sm:$0xff] %v11453_v3  ;;  %v5546_v63 = vmul.f32 0.7978846, %v5418_v39  ;;  %v5871_v15 = vmul.f32 %v5743_v19, %v4847_v10  ;;  %v5036_v9 = vmul.f32 0.044715, %v11070_v43  ;;  %8284 = vtanh.f32 %v5544_v41  ;;  %v12806_v10 = vld [vmem:[#allocation103_spill] sm:$0xff] }
 0xc67   : > { %12804 = vst [vmem:[#allocation93_spill] sm:$0xff] %v11459_v13  ;;  %v5545_v32 = vmul.f32 0.7978846, %v5417_v24  ;;  %v5547_v36 = vmul.f32 0.7978846, %v5419_v46  ;;  %v5875_v37 = vmul.f32 %v5747_v26, %v4851_v25  ;;  %v11464_v61 = vmul.f32 0.5, %v11072_v0 }
 0xc68   : > { %8286 = vtanh.f32 %v5546_v63  ;;  %v5164_v11 = vmul.f32 %v5036_v9, %v11070_v43  ;;  %v5038_v53 = vmul.f32 0.044715, %v11072_v0  ;;  %v4861_v56 = vmul.f32 0.5, %v12806_v10  ;;  %v12807_v19 = vld [vmem:[#allocation86_spill] sm:$0xff]  ;;  %v12810_v46 = vld [vmem:[#allocation137_spill] sm:$0xff] }
 0xc69   : > { %12805 = vst [vmem:[#allocation87_spill] sm:$0xff] %v11464_v61  ;;  %8288 = vtanh.f32 %v5545_v32  ;;  %v7628_v39 = vpack.c.bf16 %v5875_v37, %v5871_v15  ;;  %v4865_v8 = vmul.f32 0.5, %v12807_v19  ;;  %v11469_v13 = vpop.eup %8276  ;;  %v12809_v25 = vld [vmem:[#allocation130_spill] sm:$0xff]  ;;  %v5761_v26 = vadd.f32 1.0, %v12810_v46  ;;  %v12811_v9 = vld [vmem:[#allocation121_spill] sm:$0xff]  ;;  %v12812_v32 = vld [vmem:[#allocation131_spill] sm:$0xff] }
 0xc6a   : > { %12808 = vst [vmem:[#allocation128_spill] sm:$0xff] %v11469_v13  ;;  %8290 = vtanh.f32 %v5547_v36  ;;  %v5292_v41 = vmul.f32 %v5164_v11, %v11070_v43  ;;  %v5166_v63 = vmul.f32 %v5038_v53, %v11072_v0  ;;  %v5757_v24 = vadd.f32 1.0, %v12809_v25  ;;  %v12815_v25 = vld [vmem:[#allocation92_spill] sm:$0xff] }
 0xc6b   : > { %7629 = vmatprep.subr.bf16.mxu1 %v7628_v39  ;;  %v5742_v61 = vadd.f32 1.0, %v12811_v9  ;;  %v5746_v15 = vadd.f32 1.0, %v12812_v32  ;;  %v5037_v37 = vmul.f32 0.044715, %v11079_v5  ;;  %v5039_v53 = vmul.f32 0.044715, %v11081_v1 }
 0xc6c   : > { %v11478_v10 = vpop.eup %8278  ;;  %v5420_v19 = vadd.f32 %v5292_v41, %v11070_v43  ;;  %v5294_v36 = vmul.f32 %v5166_v63, %v11072_v0  ;;  %v5885_v11 = vmul.f32 %v5757_v24, %v4861_v56  ;;  %v5889_v39 = vmul.f32 %v5761_v26, %v4865_v8  ;;  %v12817_v41 = vld [vmem:[#allocation125_spill] sm:$0xff] }
 0xc6d   : > { %12813 = vst [vmem:[#allocation134_spill] sm:$0xff] %v11478_v10  ;;  %v11483_v13 = vpop.eup %8280  ;;  %v5870_v46 = vmul.f32 %v5742_v61, %v12815_v25  ;;  %v5874_v9 = vmul.f32 %v5746_v15, %v12816_v21  ;;  %v5165_v32 = vmul.f32 %v5037_v37, %v11079_v5  ;;  %v5167_v43 = vmul.f32 %v5039_v53, %v11081_v1  ;;  %v12818_v8 = vld [vmem:[#allocation133_spill] sm:$0xff] }
 0xc6e   : > { %12814 = vst [vmem:[#allocation103_spill] sm:$0xff] %v11483_v13  ;;  %v11488_v57 = vpop.eup %8282  ;;  %v5548_v3 = vmul.f32 0.7978846, %v5420_v19  ;;  %v5422_v10 = vadd.f32 %v5294_v36, %v11072_v0  ;;  %v5756_v56 = vadd.f32 1.0, %v12817_v41  ;;  %v7572_v63 = vpack.c.bf16 %v5889_v39, %v5885_v11  ;;  %v12819_v15 = vld [vmem:[#allocation77_spill] sm:$0xff] }
 0xc6f   : > { %v7630_v24 = vpack.c.bf16 %v5874_v9, %v5870_v46  ;;  %v5293_v13 = vmul.f32 %v5165_v32, %v11079_v5  ;;  %v5760_v26 = vadd.f32 1.0, %v12818_v8  ;;  %v5295_v21 = vmul.f32 %v5167_v43, %v11081_v1  ;;  %v12820_v19 = vld [vmem:[#allocation113_spill] sm:$0xff] }
 0xc70   : > { %8292 = vtanh.f32 %v5548_v3  ;;  %v5550_v61 = vmul.f32 0.7978846, %v5422_v10  ;;  %v5884_v37 = vmul.f32 %v5756_v56, %v12819_v15  ;;  %v11497_v25 = vpop.eup %8284  ;;  %7573 = vmatprep.subr.bf16.mxu0 %v7572_v63  ;;  %v11502_v11 = vmul.f32 0.5, %v11090_v31 }
 0xc71   : > { %7631 = vmatpush1.bf16.msra.mxu1 %v7630_v24  ;;  %v5421_v0 = vadd.f32 %v5293_v13, %v11079_v5  ;;  %v5888_v36 = vmul.f32 %v5760_v26, %v12820_v19  ;;  %v5040_v53 = vmul.f32 0.044715, %v11090_v31  ;;  %v5423_v3 = vadd.f32 %v5295_v21, %v11081_v1  ;;  %v12823_v26 = vld [vmem:[#allocation98_spill] sm:$0xff] }
 0xc72   : > { %12821 = vst [vmem:[#allocation86_spill] sm:$0xff] %v11502_v11  ;;  %v11505_v39 = vpop.eup %8286  ;;  %8294 = vtanh.f32 %v5550_v61  ;;  %v11509_v10 = vmul.f32 0.5, %v11094_v42  ;;  %v5042_v46 = vmul.f32 0.044715, %v11094_v42  ;;  %v5041_v41 = vmul.f32 0.044715, %v11096_v34 }
 0xc73   : > { %v11512_v9 = vpop.eup %8288  ;;  %v5549_v13 = vmul.f32 0.7978846, %v5421_v0  ;;  %v7574_v32 = vpack.c.bf16 %v5888_v36, %v5884_v37  ;;  %v5168_v43 = vmul.f32 %v5040_v53, %v11090_v31  ;;  %v5551_v63 = vmul.f32 0.7978846, %v5423_v3  ;;  %v12824_v37 = vld [vmem:[#allocation101_spill] sm:$0xff] }
 0xc74   : > { %12822 = vst [vmem:[#allocation130_spill] sm:$0xff] %v11509_v10  ;;  %v11516_v56 = vpop.eup %8290  ;;  %v5170_v24 = vmul.f32 %v5042_v46, %v11094_v42  ;;  %v5043_v8 = vmul.f32 0.044715, %v11101_v49  ;;  %v4855_v61 = vmul.f32 0.5, %v12823_v26  ;;  %v5169_v15 = vmul.f32 %v5041_v41, %v11096_v34  ;;  %v12825_v53 = vld [vmem:[#allocation141_spill] sm:$0xff] }
 0xc75   : > { %8296 = vtanh.f32 %v5549_v13  ;;  %7575 = vmatpush1.bf16.msra.mxu0 %v7574_v32  ;;  %v5296_v21 = vmul.f32 %v5168_v43, %v11090_v31  ;;  %v4859_v0 = vmul.f32 0.5, %v12824_v37  ;;  %v5751_v3 = vadd.f32 1.0, %v12825_v53  ;;  %v12826_v26 = vld [vmem:[#allocation149_spill] sm:$0xff]  ;;  %v12827_v32 = vld [vmem:[#allocation154_spill] sm:$0xff] }
 0xc76   : > { %8298 = vtanh.f32 %v5551_v63  ;;  %v5298_v19 = vmul.f32 %v5170_v24, %v11094_v42  ;;  %v5171_v36 = vmul.f32 %v5043_v8, %v11101_v49  ;;  %v5297_v10 = vmul.f32 %v5169_v15, %v11096_v34 }
 0xc77   : > { %v5424_v46 = vadd.f32 %v5296_v21, %v11090_v31  ;;  %v5755_v13 = vadd.f32 1.0, %v12826_v26  ;;  %v11531_v11 = vmul.f32 0.5, %v12827_v32  ;;  %v5879_v63 = vmul.f32 %v5751_v3, %v4855_v61 }
 0xc78   : > { %v5426_v43 = vadd.f32 %v5298_v19, %v11094_v42  ;;  %v5299_v41 = vmul.f32 %v5171_v36, %v11101_v49  ;;  %v5044_v24 = vmul.f32 0.044715, %v12827_v32  ;;  %v5425_v8 = vadd.f32 %v5297_v10, %v11096_v34  ;;  %v12831_v36 = vld [vmem:[#allocation138_spill] sm:$0xff] }
 0xc79   : > { %12828 = vst [vmem:[#allocation137_spill] sm:$0xff] %v11531_v11  ;;  %v5552_v37 = vmul.f32 0.7978846, %v5424_v46  ;;  %v5883_v53 = vmul.f32 %v5755_v13, %v4859_v0  ;;  %v11538_v31 = vmul.f32 0.5, %v11118_v54  ;;  %v5046_v42 = vmul.f32 0.044715, %v11118_v54 }
 0xc7a   : > { %v11540_v21 = vpop.eup %8292  ;;  %v5554_v15 = vmul.f32 0.7978846, %v5426_v43  ;;  %v5427_v26 = vadd.f32 %v5299_v41, %v11101_v49  ;;  %v5172_v11 = vmul.f32 %v5044_v24, %v12827_v32  ;;  %v5553_v61 = vmul.f32 0.7978846, %v5425_v8  ;;  %v12832_v43 = vld [vmem:[#allocation147_spill] sm:$0xff]  ;;  %v12833_v24 = vld [vmem:[#allocation122_spill] sm:$0xff] }
 0xc7b   : > { %12829 = vst [vmem:[#allocation121_spill] sm:$0xff] %v11538_v31  ;;  %12830 = vst [vmem:[#allocation131_spill] sm:$0xff] %v11540_v21  ;;  %8300 = vtanh.f32 %v5552_v37  ;;  %v7632_v19 = vpack.c.bf16 %v5883_v53, %v5879_v63  ;;  %v5750_v3 = vadd.f32 1.0, %v12831_v36  ;;  %v5174_v13 = vmul.f32 %v5046_v42, %v11118_v54  ;;  %v12834_v21 = vld [vmem:[#allocation156_spill] sm:$0xff] }
 0xc7c   : > { %v11546_v46 = vpop.eup %8294  ;;  %8302 = vtanh.f32 %v5554_v15  ;;  %v5555_v10 = vmul.f32 0.7978846, %v5427_v26  ;;  %v5300_v0 = vmul.f32 %v5172_v11, %v12827_v32  ;;  %v5754_v41 = vadd.f32 1.0, %v12832_v43  ;;  %v12835_v11 = vld [vmem:[#allocation126_spill] sm:$0xff] }
 0xc7d   : > { %8304 = vtanh.f32 %v5553_v61  ;;  %7633 = vmatprep.subr.bf16.mxu1 %v7632_v19  ;;  %v5878_v31 = vmul.f32 %v5750_v3, %v12833_v24  ;;  %v5045_v37 = vmul.f32 0.044715, %v12834_v21  ;;  %v5302_v8 = vmul.f32 %v5174_v13, %v11118_v54 }
 0xc7e   : > { %8306 = vtanh.f32 %v5555_v10  ;;  %v5428_v63 = vadd.f32 %v5300_v0, %v12827_v32  ;;  %v5047_v53 = vmul.f32 0.044715, %v11125_v18  ;;  %v5882_v26 = vmul.f32 %v5754_v41, %v12835_v11 }
 0xc7f   : > { %v11556_v15 = vpop.eup %8296  ;;  %v5173_v42 = vmul.f32 %v5045_v37, %v12834_v21  ;;  %v11561_v61 = vmul.f32 0.5, %v11134_v23  ;;  %v5048_v19 = vmul.f32 0.044715, %v11134_v23  ;;  %v5430_v32 = vadd.f32 %v5302_v8, %v11118_v54 }
 0xc80   : > { %v11564_v36 = vpop.eup %8298  ;;  %v5556_v3 = vmul.f32 0.7978846, %v5428_v63  ;;  %v5175_v10 = vmul.f32 %v5047_v53, %v11125_v18  ;;  %v11569_v0 = vmul.f32 0.5, %v11142_v48  ;;  %v7634_v13 = vpack.c.bf16 %v5882_v26, %v5878_v31 }
 0xc81   : > { %12836 = vst [vmem:[#allocation92_spill] sm:$0xff] %v11561_v61  ;;  %v5301_v43 = vmul.f32 %v5173_v42, %v12834_v21  ;;  %v5176_v41 = vmul.f32 %v5048_v19, %v11134_v23  ;;  %v5050_v24 = vmul.f32 0.044715, %v11142_v48  ;;  %v5558_v37 = vmul.f32 0.7978846, %v5430_v32  ;;  %v12838_v19 = vld [vmem:[#allocation107_spill] sm:$0xff] }
 0xc82   : > { %12837 = vst [vmem:[#allocation102_spill] sm:$0xff] %v11569_v0  ;;  %8308 = vtanh.f32 %v5556_v3  ;;  %v5303_v11 = vmul.f32 %v5175_v10, %v11125_v18  ;;  %v5049_v63 = vmul.f32 0.044715, %v11144_v29  ;;  %7635 = vmatpush1.bf16.msra.mxu1 %v7634_v13  ;;  %v5051_v31 = vmul.f32 0.044715, %v11152_v51  ;;  %v12840_v61 = vld [vmem:[#allocation105_spill] sm:$0xff] }
 0xc83   : > { %v5429_v54 = vadd.f32 %v5301_v43, %v12834_v21  ;;  %v5304_v8 = vmul.f32 %v5176_v41, %v11134_v23  ;;  %v5178_v53 = vmul.f32 %v5050_v24, %v11142_v48  ;;  %8310 = vtanh.f32 %v5558_v37 }
 0xc84   : > { %v5431_v26 = vadd.f32 %v5303_v11, %v11125_v18  ;;  %v5177_v42 = vmul.f32 %v5049_v63, %v11144_v29  ;;  %v4863_v3 = vmul.f32 0.5, %v12838_v19  ;;  %v5179_v41 = vmul.f32 %v5051_v31, %v11152_v51  ;;  %v12841_v18 = vld [vmem:[#allocation155_spill] sm:$0xff]  ;;  %v5981_v19 = vld [vmem:[%s12343_s11 + $0x8] sm:$0xff] }
 0xc85   : > { %v11583_v32 = vpop.eup %8300  ;;  %v5557_v10 = vmul.f32 0.7978846, %v5429_v54  ;;  %v5432_v13 = vadd.f32 %v5304_v8, %v11134_v23  ;;  %v5306_v43 = vmul.f32 %v5178_v53, %v11142_v48  ;;  %v4867_v11 = vmul.f32 0.5, %v12840_v61  ;;  %6076 = vmatprep.mubr.f32.mxu0 %v5981_v19  ;;  %6237 = vmatprep.mubr.f32.mxu1 %v5981_v19 }
 0xc86   : > { %v11588_v0 = vpop.eup %8302  ;;  %v5559_v24 = vmul.f32 0.7978846, %v5431_v26  ;;  %v5305_v37 = vmul.f32 %v5177_v42, %v11144_v29  ;;  %v5759_v63 = vadd.f32 1.0, %v12841_v18  ;;  %v5307_v53 = vmul.f32 %v5179_v41, %v11152_v51 }
 0xc87   : > { %12839 = vst [vmem:[#allocation125_spill] sm:$0xff] %v11588_v0  ;;  %v11596_v54 = vpop.eup %8304  ;;  %8312 = vtanh.f32 %v5557_v10  ;;  %v5560_v23 = vmul.f32 0.7978846, %v5432_v13  ;;  %v5434_v8 = vadd.f32 %v5306_v43, %v11142_v48  ;;  %v5763_v18 = vadd.f32 1.0, %v11146_v30  ;;  %v12844_v30 = vld [vmem:[#allocation97_spill] sm:$0xff] }
 0xc88   : > { %v11600_v31 = vpop.eup %8306  ;;  %8314 = vtanh.f32 %v5559_v24  ;;  %v5433_v61 = vadd.f32 %v5305_v37, %v11144_v29  ;;  %v5887_v26 = vmul.f32 %v5759_v63, %v4863_v3  ;;  %v5435_v21 = vadd.f32 %v5307_v53, %v11152_v51 }
 0xc89   : > { %8316 = vtanh.f32 %v5560_v23  ;;  %v5562_v42 = vmul.f32 0.7978846, %v5434_v8  ;;  %v11606_v10 = vmul.f32 0.5, %v11166_v52  ;;  %v5891_v13 = vmul.f32 %v5763_v18, %v4867_v11  ;;  %v12846_v8 = vld [vmem:[#allocation110_spill] sm:$0xff] }
 0xc8a   : > { %v5561_v48 = vmul.f32 0.7978846, %v5433_v61  ;;  %v5052_v43 = vmul.f32 0.044715, %v11166_v52  ;;  %v11610_v41 = vmul.f32 0.5, %v11173_v16  ;;  %v4869_v3 = vmul.f32 0.5, %v12844_v30 }
 0xc8b   : > { %12842 = vst [vmem:[#allocation133_spill] sm:$0xff] %v11606_v10  ;;  %8318 = vtanh.f32 %v5562_v42  ;;  %v5563_v24 = vmul.f32 0.7978846, %v5435_v21  ;;  %v5054_v37 = vmul.f32 0.044715, %v11173_v16  ;;  %v7636_v19 = vpack.c.bf16 %v5891_v13, %v5887_v26  ;;  %v12847_v61 = vld [vmem:[#allocation157_spill] sm:$0xff] }
 0xc8c   : > { %12843 = vst [vmem:[#allocation77_spill] sm:$0xff] %v11610_v41  ;;  %v11614_v63 = vpop.eup %8308  ;;  %8320 = vtanh.f32 %v5561_v48  ;;  %v5180_v23 = vmul.f32 %v5052_v43, %v11166_v52  ;;  %v4873_v53 = vmul.f32 0.5, %v12846_v8  ;;  %v5765_v18 = vadd.f32 1.0, %v12847_v61  ;;  %v12849_v41 = vld [vmem:[#allocation150_spill] sm:$0xff] }
 0xc8d   : > { %12845 = vst [vmem:[#allocation113_spill] sm:$0xff] %v11614_v63  ;;  %8322 = vtanh.f32 %v5563_v24  ;;  %v5182_v11 = vmul.f32 %v5054_v37, %v11173_v16  ;;  %v5769_v42 = vadd.f32 1.0, %v11154_v35  ;;  %v11621_v21 = vpop.eup %8310  ;;  %7637 = vmatprep.subr.bf16.mxu1 %v7636_v19  ;;  %v5758_v10 = vadd.f32 1.0, %v12849_v41  ;;  %v12850_v48 = vld [vmem:[#allocation166_spill] sm:$0xff]  ;;  %v12851_v37 = vld [vmem:[#allocation167_spill] sm:$0xff]  ;;  %v12852_v35 = vld [vmem:[#allocation132_spill] sm:$0xff] }
 0xc8e   : > { %12848 = vst [vmem:[#allocation98_spill] sm:$0xff] %v11621_v21  ;;  %v5308_v30 = vmul.f32 %v5180_v23, %v11166_v52  ;;  %v5762_v26 = vadd.f32 1.0, %v11130_v45  ;;  %v5053_v13 = vmul.f32 0.044715, %v12850_v48  ;;  %v5893_v24 = vmul.f32 %v5765_v18, %v4869_v3  ;;  %v12853_v21 = vld [vmem:[#allocation139_spill] sm:$0xff] }
 0xc8f   : > { %v5310_v43 = vmul.f32 %v5182_v11, %v11173_v16  ;;  %v5897_v8 = vmul.f32 %v5769_v42, %v4873_v53  ;;  %v5055_v63 = vmul.f32 0.044715, %v12851_v37  ;;  %v5886_v51 = vmul.f32 %v5758_v10, %v12852_v35  ;;  %v12854_v11 = vld [vmem:[#allocation153_spill] sm:$0xff]  ;;  %v12855_v10 = vld [vmem:[#allocation159_spill] sm:$0xff] }
 0xc90   : > { %v5436_v61 = vadd.f32 %v5308_v30, %v11166_v52  ;;  %v5890_v19 = vmul.f32 %v5762_v26, %v12853_v21  ;;  %v5181_v23 = vmul.f32 %v5053_v13, %v12850_v48  ;;  %v5764_v3 = vadd.f32 1.0, %v12854_v11 }
 0xc91   : > { %v11633_v29 = vpop.eup %8312  ;;  %v5438_v45 = vadd.f32 %v5310_v43, %v11173_v16  ;;  %v7576_v41 = vpack.c.bf16 %v5897_v8, %v5893_v24  ;;  %v5183_v0 = vmul.f32 %v5055_v63, %v12851_v37  ;;  %v5768_v30 = vadd.f32 1.0, %v12855_v10  ;;  %v12856_v16 = vld [vmem:[#allocation135_spill] sm:$0xff]  ;;  %v12857_v24 = vld [vmem:[#allocation170_spill] sm:$0xff] }
 0xc92   : > { %v11638_v53 = vpop.eup %8314  ;;  %v5564_v18 = vmul.f32 0.7978846, %v5436_v61  ;;  %v7638_v42 = vpack.c.bf16 %v5890_v19, %v5886_v51  ;;  %v5309_v52 = vmul.f32 %v5181_v23, %v12850_v48  ;;  %v5892_v43 = vmul.f32 %v5764_v3, %v12856_v16  ;;  %v12859_v51 = vld [vmem:[#allocation140_spill] sm:$0xff] }
 0xc93   : > { %v11642_v21 = vpop.eup %8316  ;;  %v5566_v26 = vmul.f32 0.7978846, %v5438_v45  ;;  %7577 = vmatprep.subr.bf16.mxu0 %v7576_v41  ;;  %v5311_v13 = vmul.f32 %v5183_v0, %v12851_v37  ;;  %v11647_v63 = vmul.f32 0.5, %v12857_v24  ;;  %v5896_v61 = vmul.f32 %v5768_v30, %v12859_v51  ;;  %v12860_v45 = vld [vmem:[#allocation172_spill] sm:$0xff] }
 0xc94   : > { %8324 = vtanh.f32 %v5564_v18  ;;  %7639 = vmatpush1.bf16.msra.mxu1 %v7638_v42  ;;  %v5437_v8 = vadd.f32 %v5309_v52, %v12850_v48  ;;  %v5056_v35 = vmul.f32 0.044715, %v12857_v24  ;;  %v11656_v0 = vmul.f32 0.5, %v12860_v45  ;;  %v12862_v16 = vld [vmem:[#allocation108_spill] sm:$0xff] }
 0xc95   : > { %12858 = vst [vmem:[#allocation101_spill] sm:$0xff] %v11647_v63  ;;  %v11652_v19 = vpop.eup %8318  ;;  %8326 = vtanh.f32 %v5566_v26  ;;  %v5439_v23 = vadd.f32 %v5311_v13, %v12851_v37  ;;  %v5058_v41 = vmul.f32 0.044715, %v12860_v45  ;;  %v7578_v18 = vpack.c.bf16 %v5896_v61, %v5892_v43  ;;  %v12863_v43 = vld [vmem:[#allocation106_spill] sm:$0xff] }
 0xc96   : > { %12861 = vst [vmem:[#allocation141_spill] sm:$0xff] %v11656_v0  ;;  %v11659_v11 = vpop.eup %8320  ;;  %v5565_v3 = vmul.f32 0.7978846, %v5437_v8  ;;  %v5184_v42 = vmul.f32 %v5056_v35, %v12857_v24  ;;  %v5057_v52 = vmul.f32 0.044715, %v11203_v17  ;;  %v4871_v51 = vmul.f32 0.5, %v12862_v16 }
 0xc97   : > { %v11663_v10 = vpop.eup %8322  ;;  %v5567_v30 = vmul.f32 0.7978846, %v5439_v23  ;;  %v5186_v26 = vmul.f32 %v5058_v41, %v12860_v45  ;;  %v5059_v13 = vmul.f32 0.044715, %v11210_v28  ;;  %7579 = vmatpush1.bf16.msra.mxu0 %v7578_v18  ;;  %v4875_v61 = vmul.f32 0.5, %v12863_v43  ;;  %v12864_v23 = vld [vmem:[#allocation168_spill] sm:$0xff] }
 0xc98   : > { %8328 = vtanh.f32 %v5565_v3  ;;  %v5312_v0 = vmul.f32 %v5184_v42, %v12857_v24  ;;  %v5185_v8 = vmul.f32 %v5057_v52, %v11203_v17  ;;  %v5767_v37 = vadd.f32 1.0, %v12864_v23  ;;  %v12865_v16 = vld [vmem:[#allocation173_spill] sm:$0xff] }
 0xc99   : > { %8330 = vtanh.f32 %v5567_v30  ;;  %v5314_v35 = vmul.f32 %v5186_v26, %v12860_v45  ;;  %v5187_v63 = vmul.f32 %v5059_v13, %v11210_v28  ;;  %v5771_v3 = vadd.f32 1.0, %v12865_v16 }
 0xc9a   : > { %v5440_v41 = vadd.f32 %v5312_v0, %v12857_v24  ;;  %v5313_v48 = vmul.f32 %v5185_v8, %v11203_v17  ;;  %v11678_v18 = vmul.f32 0.5, %v11221_v12  ;;  %v5895_v30 = vmul.f32 %v5767_v37, %v4871_v51  ;;  %v12869_v51 = vld [vmem:[#allocation164_spill] sm:$0xff] }
 0xc9b   : > { %v5442_v42 = vadd.f32 %v5314_v35, %v12860_v45  ;;  %v5315_v52 = vmul.f32 %v5187_v63, %v11210_v28  ;;  %v5060_v26 = vmul.f32 0.044715, %v11221_v12  ;;  %v5899_v23 = vmul.f32 %v5771_v3, %v4875_v61 }
 0xc9c   : > { %12866 = vst [vmem:[#allocation149_spill] sm:$0xff] %v11678_v18  ;;  %v5568_v43 = vmul.f32 0.7978846, %v5440_v41  ;;  %v5441_v13 = vadd.f32 %v5313_v48, %v11203_v17  ;;  %v11685_v24 = vmul.f32 0.5, %v11225_v38  ;;  %v5062_v18 = vmul.f32 0.044715, %v11225_v38 }
 0xc9d   : > { %v5570_v0 = vmul.f32 0.7978846, %v5442_v42  ;;  %v5443_v8 = vadd.f32 %v5315_v52, %v11210_v28  ;;  %v5188_v16 = vmul.f32 %v5060_v26, %v11221_v12  ;;  %v7640_v63 = vpack.c.bf16 %v5899_v23, %v5895_v30  ;;  %v12871_v42 = vld [vmem:[#allocation171_spill] sm:$0xff]  ;;  %v12872_v26 = vld [vmem:[#allocation144_spill] sm:$0xff] }
 0xc9e   : > { %12867 = vst [vmem:[#allocation154_spill] sm:$0xff] %v11685_v24  ;;  %v11690_v45 = vpop.eup %8324  ;;  %8332 = vtanh.f32 %v5568_v43  ;;  %v5569_v37 = vmul.f32 0.7978846, %v5441_v13  ;;  %v5766_v35 = vadd.f32 1.0, %v12869_v51  ;;  %v5190_v3 = vmul.f32 %v5062_v18, %v11225_v38 }
 0xc9f   : > { %12868 = vst [vmem:[#allocation138_spill] sm:$0xff] %v11690_v45  ;;  %v11693_v41 = vpop.eup %8326  ;;  %8334 = vtanh.f32 %v5570_v0  ;;  %v5571_v48 = vmul.f32 0.7978846, %v5443_v8  ;;  %v5316_v61 = vmul.f32 %v5188_v16, %v11221_v12  ;;  %7641 = vmatprep.subr.bf16.mxu1 %v7640_v63  ;;  %v5770_v52 = vadd.f32 1.0, %v12871_v42  ;;  %v12873_v8 = vld [vmem:[#allocation151_spill] sm:$0xff] }
 0xca0   : > { %12870 = vst [vmem:[#allocation147_spill] sm:$0xff] %v11693_v41  ;;  %8336 = vtanh.f32 %v5569_v37  ;;  %v5894_v24 = vmul.f32 %v5766_v35, %v12872_v26  ;;  %v5061_v43 = vmul.f32 0.044715, %v11227_v6  ;;  %v5318_v13 = vmul.f32 %v5190_v3, %v11225_v38 }
 0xca1   : > { %8338 = vtanh.f32 %v5571_v48  ;;  %v5444_v30 = vadd.f32 %v5316_v61, %v11221_v12  ;;  %v5063_v23 = vmul.f32 0.044715, %v11231_v33  ;;  %v5898_v16 = vmul.f32 %v5770_v52, %v12873_v8 }
 0xca2   : > { %v11703_v0 = vpop.eup %8328  ;;  %v5189_v18 = vmul.f32 %v5061_v43, %v11227_v6  ;;  %v11708_v37 = vmul.f32 0.5, %v11245_v44  ;;  %v5064_v63 = vmul.f32 0.044715, %v11245_v44  ;;  %v5446_v12 = vadd.f32 %v5318_v13, %v11225_v38 }
 0xca3   : > { %v11711_v51 = vpop.eup %8330  ;;  %v5572_v35 = vmul.f32 0.7978846, %v5444_v30  ;;  %v5191_v48 = vmul.f32 %v5063_v23, %v11231_v33  ;;  %v11716_v61 = vmul.f32 0.5, %v11253_v7  ;;  %v7642_v3 = vpack.c.bf16 %v5898_v16, %v5894_v24 }
 0xca4   : > { %12874 = vst [vmem:[#allocation122_spill] sm:$0xff] %v11708_v37  ;;  %v5317_v42 = vmul.f32 %v5189_v18, %v11227_v6  ;;  %v5192_v52 = vmul.f32 %v5064_v63, %v11245_v44  ;;  %v5066_v26 = vmul.f32 0.044715, %v11253_v7  ;;  %v5574_v43 = vmul.f32 0.7978846, %v5446_v12  ;;  %v12876_v37 = vld [vmem:[#allocation182_spill] sm:$0xff] }
 0xca5   : > { %12875 = vst [vmem:[#allocation126_spill] sm:$0xff] %v11716_v61  ;;  %8340 = vtanh.f32 %v5572_v35  ;;  %v5319_v8 = vmul.f32 %v5191_v48, %v11231_v33  ;;  %v5065_v30 = vmul.f32 0.044715, %v12876_v37  ;;  %7643 = vmatpush1.bf16.msra.mxu1 %v7642_v3  ;;  %v5067_v24 = vmul.f32 0.044715, %v11260_v58  ;;  %v12877_v63 = vld [vmem:[#allocation79_spill] sm:$0xff] }
 0xca6   : > { %v5445_v38 = vadd.f32 %v5317_v42, %v11227_v6  ;;  %v5320_v13 = vmul.f32 %v5192_v52, %v11245_v44  ;;  %v5194_v23 = vmul.f32 %v5066_v26, %v11253_v7  ;;  %8342 = vtanh.f32 %v5574_v43  ;;  %v12880_v6 = vld [vmem:[#allocation114_spill] sm:$0xff] }
 0xca7   : > { %v5447_v16 = vadd.f32 %v5319_v8, %v11231_v33  ;;  %v5193_v18 = vmul.f32 %v5065_v30, %v12876_v37  ;;  %v4877_v35 = vmul.f32 0.5, %v12877_v63  ;;  %v5195_v52 = vmul.f32 %v5067_v24, %v11260_v58  ;;  %v12881_v33 = vld [vmem:[#allocation181_spill] sm:$0xff] }
 0xca8   : > { %v11730_v12 = vpop.eup %8332  ;;  %v5573_v48 = vmul.f32 0.7978846, %v5445_v38  ;;  %v5448_v3 = vadd.f32 %v5320_v13, %v11245_v44  ;;  %v5322_v42 = vmul.f32 %v5194_v23, %v11253_v7  ;;  %v4881_v8 = vmul.f32 0.5, %v12880_v6 }
 0xca9   : > { %12878 = vst [vmem:[#allocation107_spill] sm:$0xff] %v11730_v12  ;;  %v11735_v61 = vpop.eup %8334  ;;  %v5575_v26 = vmul.f32 0.7978846, %v5447_v16  ;;  %v5321_v43 = vmul.f32 %v5193_v18, %v12876_v37  ;;  %v5773_v30 = vadd.f32 1.0, %v12881_v33  ;;  %v5323_v44 = vmul.f32 %v5195_v52, %v11260_v58  ;;  %v12883_v18 = vld [vmem:[#allocation81_spill] sm:$0xff]  ;;  %v12884_v12 = vld [vmem:[#allocation115_spill] sm:$0xff] }
 0xcaa   : > { %12879 = vst [vmem:[#allocation105_spill] sm:$0xff] %v11735_v61  ;;  %v11740_v41 = vpop.eup %8336  ;;  %8344 = vtanh.f32 %v5573_v48  ;;  %v5576_v63 = vmul.f32 0.7978846, %v5448_v3  ;;  %v5450_v38 = vadd.f32 %v5322_v42, %v11253_v7  ;;  %v5777_v24 = vadd.f32 1.0, %v11294_v55  ;;  %v12885_v42 = vld [vmem:[#allocation185_spill] sm:$0xff] }
 0xcab   : > { %v11744_v13 = vpop.eup %8338  ;;  %8346 = vtanh.f32 %v5575_v26  ;;  %v5449_v23 = vadd.f32 %v5321_v43, %v12876_v37  ;;  %v5901_v16 = vmul.f32 %v5773_v30, %v4877_v35  ;;  %v5451_v33 = vadd.f32 %v5323_v44, %v11260_v58  ;;  %v12886_v26 = vld [vmem:[#allocation192_spill] sm:$0xff] }
 0xcac   : > { %12882 = vst [vmem:[#allocation155_spill] sm:$0xff] %v11744_v13  ;;  %8348 = vtanh.f32 %v5576_v63  ;;  %v5578_v6 = vmul.f32 0.7978846, %v5450_v38  ;;  %v4879_v61 = vmul.f32 0.5, %v12883_v18  ;;  %v5905_v3 = vmul.f32 %v5777_v24, %v4881_v8  ;;  %v12887_v43 = vld [vmem:[#allocation184_spill] sm:$0xff]  ;;  %v12890_v38 = vld [vmem:[#allocation109_spill] sm:$0xff] }
 0xcad   : > { %v5577_v48 = vmul.f32 0.7978846, %v5449_v23  ;;  %v4883_v7 = vmul.f32 0.5, %v12884_v12  ;;  %v5775_v52 = vadd.f32 1.0, %v12885_v42  ;;  %v5579_v45 = vmul.f32 0.7978846, %v5451_v33 }
 0xcae   : > { %8350 = vtanh.f32 %v5578_v6  ;;  %v5779_v13 = vadd.f32 1.0, %v12886_v26  ;;  %v11754_v37 = vmul.f32 0.5, %v12887_v43  ;;  %v7580_v35 = vpack.c.bf16 %v5905_v3, %v5901_v16  ;;  %v12893_v6 = vld [vmem:[#allocation174_spill] sm:$0xff]  ;;  %v12894_v18 = vld [vmem:[#allocation187_spill] sm:$0xff] }
 0xcaf   : > { %v11756_v55 = vpop.eup %8340  ;;  %8352 = vtanh.f32 %v5577_v48  ;;  %v5903_v30 = vmul.f32 %v5775_v52, %v4879_v61  ;;  %v5068_v63 = vmul.f32 0.044715, %v12887_v43  ;;  %v11760_v12 = vmul.f32 0.5, %v12890_v38  ;;  %v12895_v16 = vld [vmem:[#allocation178_spill] sm:$0xff]  ;;  %v12897_v42 = vld [vmem:[#allocation91_spill] sm:$0xff] }
 0xcb0   : > { %12888 = vst [vmem:[#allocation97_spill] sm:$0xff] %v11754_v37  ;;  %12889 = vst [vmem:[#allocation110_spill] sm:$0xff] %v11756_v55  ;;  %8354 = vtanh.f32 %v5579_v45  ;;  %v5907_v8 = vmul.f32 %v5779_v13, %v4883_v7  ;;  %v5070_v44 = vmul.f32 0.044715, %v12890_v38  ;;  %v11763_v23 = vpop.eup %8342  ;;  %7581 = vmatprep.subr.bf16.mxu0 %v7580_v35  ;;  %v5772_v33 = vadd.f32 1.0, %v12893_v6  ;;  %v12896_v13 = vld [vmem:[#allocation189_spill] sm:$0xff] }
 0xcb1   : > { %12891 = vst [vmem:[#allocation157_spill] sm:$0xff] %v11760_v12  ;;  %12892 = vst [vmem:[#allocation150_spill] sm:$0xff] %v11763_v23  ;;  %v5196_v24 = vmul.f32 %v5068_v63, %v12887_v43  ;;  %v5776_v48 = vadd.f32 1.0, %v12894_v18  ;;  %v5774_v61 = vadd.f32 1.0, %v12895_v16  ;;  %v5778_v7 = vadd.f32 1.0, %v12896_v13  ;;  %v12898_v12 = vld [vmem:[#allocation152_spill] sm:$0xff] }
 0xcb2   : > { %v7644_v3 = vpack.c.bf16 %v5907_v8, %v5903_v30  ;;  %v5198_v45 = vmul.f32 %v5070_v44, %v12890_v38  ;;  %v5069_v52 = vmul.f32 0.044715, %v12897_v42  ;;  %v5900_v37 = vmul.f32 %v5772_v33, %v12898_v12  ;;  %v12899_v35 = vld [vmem:[#allocation163_spill] sm:$0xff]  ;;  %v12900_v63 = vld [vmem:[#allocation160_spill] sm:$0xff]  ;;  %v12901_v30 = vld [vmem:[#allocation165_spill] sm:$0xff] }
 0xcb3   : > { %v5324_v26 = vmul.f32 %v5196_v24, %v12887_v43  ;;  %v5904_v23 = vmul.f32 %v5776_v48, %v12899_v35  ;;  %v5902_v55 = vmul.f32 %v5774_v61, %v12900_v63  ;;  %v5906_v8 = vmul.f32 %v5778_v7, %v12901_v30  ;;  %v12902_v16 = vld [vmem:[#allocation186_spill] sm:$0xff] }
 0xcb4   : > { %v11776_v6 = vpop.eup %8344  ;;  %7645 = vmatprep.subr.bf16.mxu1 %v7644_v3  ;;  %v5326_v18 = vmul.f32 %v5198_v45, %v12890_v38  ;;  %v5197_v44 = vmul.f32 %v5069_v52, %v12897_v42  ;;  %v5071_v13 = vmul.f32 0.044715, %v12902_v16  ;;  %v12904_v33 = vld [vmem:[#allocation190_spill] sm:$0xff] }
 0xcb5   : > { %v11782_v58 = vpop.eup %8346  ;;  %v5452_v24 = vadd.f32 %v5324_v26, %v12887_v43  ;;  %v7582_v12 = vpack.c.bf16 %v5904_v23, %v5900_v37  ;;  %v11786_v48 = vmul.f32 0.5, %v12904_v33  ;;  %v5072_v61 = vmul.f32 0.044715, %v12904_v33  ;;  %v12907_v43 = vld [vmem:[#allocation89_spill] sm:$0xff] }
 0xcb6   : > { %12903 = vst [vmem:[#allocation132_spill] sm:$0xff] %v11782_v58  ;;  %v11789_v35 = vpop.eup %8348  ;;  %v5454_v3 = vadd.f32 %v5326_v18, %v12890_v38  ;;  %v7646_v45 = vpack.c.bf16 %v5906_v8, %v5902_v55  ;;  %v5325_v7 = vmul.f32 %v5197_v44, %v12897_v42  ;;  %v5199_v52 = vmul.f32 %v5071_v13, %v12902_v16  ;;  %v12910_v18 = vld [vmem:[#allocation191_spill] sm:$0xff] }
 0xcb7   : > { %12905 = vst [vmem:[#allocation139_spill] sm:$0xff] %v11786_v48  ;;  %12906 = vst [vmem:[#allocation153_spill] sm:$0xff] %v11789_v35  ;;  %v5580_v63 = vmul.f32 0.7978846, %v5452_v24  ;;  %7583 = vmatpush1.bf16.msra.mxu0 %v7582_v12  ;;  %v5200_v30 = vmul.f32 %v5072_v61, %v12904_v33  ;;  %v11796_v37 = vmul.f32 0.5, %v12907_v43  ;;  %v12911_v12 = vld [vmem:[#allocation99_spill] sm:$0xff] }
 0xcb8   : > { %v5074_v23 = vmul.f32 0.044715, %v12907_v43  ;;  %v11799_v26 = vpop.eup %8350  ;;  %v5582_v48 = vmul.f32 0.7978846, %v5454_v3  ;;  %7647 = vmatpush1.bf16.msra.mxu1 %v7646_v45  ;;  %v5453_v38 = vadd.f32 %v5325_v7, %v12897_v42  ;;  %v5327_v55 = vmul.f32 %v5199_v52, %v12902_v16  ;;  %v12914_v58 = vld [vmem:[#allocation123_spill] sm:$0xff] }
 0xcb9   : > { %12908 = vst [vmem:[#allocation159_spill] sm:$0xff] %v11796_v37  ;;  %12909 = vst [vmem:[#allocation135_spill] sm:$0xff] %v11799_v26  ;;  %v5073_v8 = vmul.f32 0.044715, %v12910_v18  ;;  %v11804_v44 = vpop.eup %8352  ;;  %8356 = vtanh.f32 %v5580_v63  ;;  %v5328_v13 = vmul.f32 %v5200_v30, %v12904_v33  ;;  %v5075_v61 = vmul.f32 0.044715, %v12911_v12 }
 0xcba   : > { %v5202_v24 = vmul.f32 %v5074_v23, %v12907_v43  ;;  %v11809_v37 = vpop.eup %8354  ;;  %8358 = vtanh.f32 %v5582_v48  ;;  %v5581_v3 = vmul.f32 0.7978846, %v5453_v38  ;;  %v5455_v45 = vadd.f32 %v5327_v55, %v12902_v16  ;;  %v12913_v26 = vld [vmem:[#allocation118_spill] sm:$0xff] }
 0xcbb   : > { %12912 = vst [vmem:[#allocation170_spill] sm:$0xff] %v11809_v37  ;;  %v5201_v7 = vmul.f32 %v5073_v8, %v12910_v18  ;;  %v5456_v52 = vadd.f32 %v5328_v13, %v12904_v33  ;;  %v5203_v63 = vmul.f32 %v5075_v61, %v12911_v12  ;;  %v4885_v30 = vmul.f32 0.5, %v12913_v26  ;;  %v12915_v8 = vld [vmem:[#allocation84_spill] sm:$0xff] }
 0xcbc   : > { %v5330_v42 = vmul.f32 %v5202_v24, %v12907_v43  ;;  %8360 = vtanh.f32 %v5581_v3  ;;  %v5583_v23 = vmul.f32 0.7978846, %v5455_v45  ;;  %v4889_v37 = vmul.f32 0.5, %v12914_v58  ;;  %v12916_v24 = vld [vmem:[#allocation120_spill] sm:$0xff] }
 0xcbd   : > { %v5329_v35 = vmul.f32 %v5201_v7, %v12910_v18  ;;  %v5584_v48 = vmul.f32 0.7978846, %v5456_v52  ;;  %v5331_v55 = vmul.f32 %v5203_v63, %v12911_v12  ;;  %v5781_v16 = vadd.f32 1.0, %v12915_v8  ;;  %v12917_v52 = vld [vmem:[#allocation124_spill] sm:$0xff] }
 0xcbe   : > { %v5458_v38 = vadd.f32 %v5330_v42, %v12907_v43  ;;  %8362 = vtanh.f32 %v5583_v23  ;;  %v5785_v13 = vadd.f32 1.0, %v11361_v20  ;;  %v4887_v26 = vmul.f32 0.5, %v12916_v24 }
 0xcbf   : > { %v5457_v33 = vadd.f32 %v5329_v35, %v12910_v18  ;;  %8364 = vtanh.f32 %v5584_v48  ;;  %v5459_v3 = vadd.f32 %v5331_v55, %v12911_v12  ;;  %v5909_v45 = vmul.f32 %v5781_v16, %v4885_v30  ;;  %v12918_v35 = vld [vmem:[#allocation111_spill] sm:$0xff]  ;;  %v12932_v12 = vld [vmem:[#allocation104_spill] sm:$0xff] }
 0xcc0   : > { %v5586_v61 = vmul.f32 0.7978846, %v5458_v38  ;;  %v5913_v7 = vmul.f32 %v5785_v13, %v4889_v37  ;;  %v4891_v42 = vmul.f32 0.5, %v12917_v52  ;;  %v5783_v43 = vadd.f32 1.0, %v11327_v14  ;;  %v12926_v52 = vld [vmem:[#allocation100_spill] sm:$0xff] }
 0xcc1   : > { %v5585_v58 = vmul.f32 0.7978846, %v5457_v33  ;;  %v5587_v63 = vmul.f32 0.7978846, %v5459_v3  ;;  %v5787_v23 = vadd.f32 1.0, %v11368_v40  ;;  %v11830_v8 = vmul.f32 0.5, %v12918_v35 }
 0xcc2   : > { %8366 = vtanh.f32 %v5586_v61  ;;  %v7584_v20 = vpack.c.bf16 %v5913_v7, %v5909_v45  ;;  %v5911_v48 = vmul.f32 %v5783_v43, %v4887_v26  ;;  %v5076_v38 = vmul.f32 0.044715, %v12918_v35  ;;  %v12923_v33 = vld [vmem:[#allocation80_spill] sm:$0xff]  ;;  %v12924_v26 = vld [vmem:[#allocation94_spill] sm:$0xff] }
 0xcc3   : > { %12919 = vst [vmem:[#allocation140_spill] sm:$0xff] %v11830_v8  ;;  %8368 = vtanh.f32 %v5585_v58  ;;  %v11833_v55 = vpop.eup %8356  ;;  %v5915_v16 = vmul.f32 %v5787_v23, %v4891_v42  ;;  %v11836_v37 = vmul.f32 0.5, %v11333_v59  ;;  %v5078_v14 = vmul.f32 0.044715, %v11333_v59  ;;  %v12925_v58 = vld [vmem:[#allocation82_spill] sm:$0xff]  ;;  %v12927_v23 = vld [vmem:[#allocation169_spill] sm:$0xff] }
 0xcc4   : > { %12920 = vst [vmem:[#allocation172_spill] sm:$0xff] %v11833_v55  ;;  %8370 = vtanh.f32 %v5587_v63  ;;  %v11839_v30 = vpop.eup %8358  ;;  %7585 = vmatprep.subr.bf16.mxu0 %v7584_v20  ;;  %v5204_v40 = vmul.f32 %v5076_v38, %v12918_v35  ;;  %v5780_v13 = vadd.f32 1.0, %v12923_v33  ;;  %v5784_v24 = vadd.f32 1.0, %v11342_v50  ;;  %v12928_v38 = vld [vmem:[#allocation179_spill] sm:$0xff] }
 0xcc5   : > { %12921 = vst [vmem:[#allocation108_spill] sm:$0xff] %v11836_v37  ;;  %12922 = vst [vmem:[#allocation106_spill] sm:$0xff] %v11839_v30  ;;  %v5782_v61 = vadd.f32 1.0, %v12924_v26  ;;  %v7648_v3 = vpack.c.bf16 %v5915_v16, %v5911_v48  ;;  %v5206_v45 = vmul.f32 %v5078_v14, %v11333_v59  ;;  %v5786_v7 = vadd.f32 1.0, %v12925_v58  ;;  %v12929_v33 = vld [vmem:[#allocation175_spill] sm:$0xff]  ;;  %v12930_v48 = vld [vmem:[#allocation180_spill] sm:$0xff] }
 0xcc6   : > { %v5077_v42 = vmul.f32 0.044715, %v12926_v52  ;;  %v11848_v43 = vpop.eup %8360  ;;  %v5332_v63 = vmul.f32 %v5204_v40, %v12918_v35  ;;  %v5908_v20 = vmul.f32 %v5780_v13, %v12927_v23  ;;  %v5912_v37 = vmul.f32 %v5784_v24, %v12928_v38  ;;  %v12931_v26 = vld [vmem:[#allocation95_spill] sm:$0xff] }
 0xcc7   : > { %v5910_v8 = vmul.f32 %v5782_v61, %v12929_v33  ;;  %7649 = vmatprep.subr.bf16.mxu1 %v7648_v3  ;;  %v5334_v50 = vmul.f32 %v5206_v45, %v11333_v59  ;;  %v5914_v16 = vmul.f32 %v5786_v7, %v12930_v48  ;;  %v5079_v58 = vmul.f32 0.044715, %v12931_v26 }
 0xcc8   : > { %v5205_v14 = vmul.f32 %v5077_v42, %v12926_v52  ;;  %v11858_v30 = vpop.eup %8362  ;;  %v5460_v55 = vadd.f32 %v5332_v63, %v12918_v35  ;;  %v7586_v40 = vpack.c.bf16 %v5912_v37, %v5908_v20  ;;  %v11862_v13 = vmul.f32 0.5, %v12932_v12 }
 0xcc9   : > { %v5080_v24 = vmul.f32 0.044715, %v12932_v12  ;;  %v11865_v61 = vpop.eup %8364  ;;  %v5462_v3 = vadd.f32 %v5334_v50, %v11333_v59  ;;  %v7650_v45 = vpack.c.bf16 %v5914_v16, %v5910_v8  ;;  %v5207_v42 = vmul.f32 %v5079_v58, %v12931_v26 }
 0xcca   : > { %12933 = vst [vmem:[#allocation168_spill] sm:$0xff] %v11862_v13  ;;  %v5333_v7 = vmul.f32 %v5205_v14, %v12926_v52  ;;  %v5588_v23 = vmul.f32 0.7978846, %v5460_v55  ;;  %7587 = vmatpush1.bf16.msra.mxu0 %v7586_v40  ;;  %v11872_v35 = vmul.f32 0.5, %v11376_v2  ;;  %v5082_v37 = vmul.f32 0.044715, %v11376_v2 }
 0xccb   : > { %v5208_v38 = vmul.f32 %v5080_v24, %v12932_v12  ;;  %v5590_v20 = vmul.f32 0.7978846, %v5462_v3  ;;  %7651 = vmatpush1.bf16.msra.mxu1 %v7650_v45  ;;  %v5335_v8 = vmul.f32 %v5207_v42, %v12931_v26  ;;  %v5081_v33 = vmul.f32 0.044715, %v11383_v27  ;;  %v12935_v42 = vld [vmem:[#allocation127_spill] sm:$0xff] }
 0xccc   : > { %12934 = vst [vmem:[#allocation173_spill] sm:$0xff] %v11872_v35  ;;  %v11875_v63 = vpop.eup %8366  ;;  %v5461_v59 = vadd.f32 %v5333_v7, %v12926_v52  ;;  %8372 = vtanh.f32 %v5588_v23  ;;  %v5210_v48 = vmul.f32 %v5082_v37, %v11376_v2  ;;  %v5083_v16 = vmul.f32 0.044715, %v11391_v4 }
 0xccd   : > { %v11880_v50 = vpop.eup %8368  ;;  %v5336_v55 = vmul.f32 %v5208_v38, %v12932_v12  ;;  %8374 = vtanh.f32 %v5590_v20  ;;  %v5463_v40 = vadd.f32 %v5335_v8, %v12931_v26  ;;  %v5209_v24 = vmul.f32 %v5081_v33, %v11383_v27 }
 0xcce   : > { %v11885_v14 = vpop.eup %8370  ;;  %v5589_v58 = vmul.f32 0.7978846, %v5461_v59  ;;  %v5338_v45 = vmul.f32 %v5210_v48, %v11376_v2  ;;  %v5211_v7 = vmul.f32 %v5083_v16, %v11391_v4  ;;  %v4893_v23 = vmul.f32 0.5, %v12935_v42  ;;  %v12936_v48 = vld [vmem:[#allocation129_spill] sm:$0xff]  ;;  %v12937_v42 = vld [vmem:[#allocation136_spill] sm:$0xff] }
 0xccf   : > { %v5464_v3 = vadd.f32 %v5336_v55, %v12932_v12  ;;  %v5591_v38 = vmul.f32 0.7978846, %v5463_v40  ;;  %v5337_v37 = vmul.f32 %v5209_v24, %v11383_v27  ;;  %v4897_v35 = vmul.f32 0.5, %v10993_v62 }
 0xcd0   : > { %8376 = vtanh.f32 %v5589_v58  ;;  %v5466_v59 = vadd.f32 %v5338_v45, %v11376_v2  ;;  %v5339_v8 = vmul.f32 %v5211_v7, %v11391_v4  ;;  %v5789_v33 = vadd.f32 1.0, %v11423_v47  ;;  %v12938_v7 = vld [vmem:[#allocation145_spill] sm:$0xff] }
 0xcd1   : > { %v5592_v20 = vmul.f32 0.7978846, %v5464_v3  ;;  %8378 = vtanh.f32 %v5591_v38  ;;  %v5465_v12 = vadd.f32 %v5337_v37, %v11383_v27  ;;  %v5793_v55 = vadd.f32 1.0, %v11448_v60  ;;  %v12939_v37 = vld [vmem:[#allocation116_spill] sm:$0xff] }
 0xcd2   : > { %v4895_v16 = vmul.f32 0.5, %v12936_v48  ;;  %v5594_v58 = vmul.f32 0.7978846, %v5466_v59  ;;  %v5467_v40 = vadd.f32 %v5339_v8, %v11391_v4  ;;  %v5917_v24 = vmul.f32 %v5789_v33, %v4893_v23  ;;  %v12942_v33 = vld [vmem:[#allocation193_spill] sm:$0xff] }
 0xcd3   : > { %8380 = vtanh.f32 %v5592_v20  ;;  %v5593_v62 = vmul.f32 0.7978846, %v5465_v12  ;;  %v5921_v3 = vmul.f32 %v5793_v55, %v4897_v35  ;;  %v4899_v2 = vmul.f32 0.5, %v12937_v42  ;;  %v12940_v20 = vld [vmem:[#allocation96_spill] sm:$0xff]  ;;  %v12944_v55 = vld [vmem:[#allocation78_spill] sm:$0xff] }
 0xcd4   : > { %v5791_v45 = vadd.f32 1.0, %v11434_v22  ;;  %8382 = vtanh.f32 %v5594_v58  ;;  %v5595_v47 = vmul.f32 0.7978846, %v5467_v40  ;;  %v5795_v38 = vadd.f32 1.0, %v12938_v7  ;;  %v12941_v35 = vld [vmem:[#allocation188_spill] sm:$0xff]  ;;  %v12945_v40 = vld [vmem:[#allocation83_spill] sm:$0xff] }
 0xcd5   : > { %v5788_v13 = vadd.f32 1.0, %v12939_v37  ;;  %8384 = vtanh.f32 %v5593_v62  ;;  %v7588_v60 = vpack.c.bf16 %v5921_v3, %v5917_v24  ;;  %v5792_v59 = vadd.f32 1.0, %v12940_v20  ;;  %v12946_v62 = vld [vmem:[#allocation142_spill] sm:$0xff] }
 0xcd6   : > { %v5919_v48 = vmul.f32 %v5791_v45, %v4895_v16  ;;  %v11907_v26 = vpop.eup %8372  ;;  %8386 = vtanh.f32 %v5595_v47  ;;  %v5923_v23 = vmul.f32 %v5795_v38, %v4899_v2  ;;  %v5790_v12 = vadd.f32 1.0, %v12942_v33  ;;  %v12947_v16 = vld [vmem:[#allocation146_spill] sm:$0xff]  ;;  %v12949_v47 = vld [vmem:[#allocation103_spill] sm:$0xff] }
 0xcd7   : > { %v5916_v8 = vmul.f32 %v5788_v13, %v12941_v35  ;;  %v11911_v22 = vpop.eup %8374  ;;  %7589 = vmatprep.subr.bf16.mxu0 %v7588_v60  ;;  %v5920_v58 = vmul.f32 %v5792_v59, %v12944_v55  ;;  %v5794_v42 = vadd.f32 1.0, %v12945_v40  ;;  %v4901_v24 = vmul.f32 0.5, %v12946_v62  ;;  %v12948_v7 = vld [vmem:[#allocation90_spill] sm:$0xff]  ;;  %v12950_v35 = vld [vmem:[#allocation85_spill] sm:$0xff]  ;;  %v12951_v33 = vld [vmem:[#allocation143_spill] sm:$0xff] }
 0xcd8   : > { %12943 = vst [vmem:[#allocation164_spill] sm:$0xff] %v11911_v22  ;;  %v4905_v3 = vmul.f32 0.5, %v12947_v16  ;;  %v7652_v45 = vpack.c.bf16 %v5923_v23, %v5919_v48  ;;  %v5918_v37 = vmul.f32 %v5790_v12, %v12948_v7  ;;  %v5797_v2 = vadd.f32 1.0, %v12949_v47  ;;  %v12952_v55 = vld [vmem:[#allocation148_spill] sm:$0xff] }
 0xcd9   : > { %v5801_v13 = vadd.f32 1.0, %v11512_v9  ;;  %v7590_v20 = vpack.c.bf16 %v5920_v58, %v5916_v8  ;;  %v5922_v60 = vmul.f32 %v5794_v42, %v12950_v35  ;;  %v4903_v59 = vmul.f32 0.5, %v12951_v33  ;;  %v12953_v16 = vld [vmem:[#allocation128_spill] sm:$0xff]  ;;  %v12954_v58 = vld [vmem:[#allocation134_spill] sm:$0xff] }
 0xcda   : > { %v11920_v38 = vpop.eup %8376  ;;  %v4907_v40 = vmul.f32 0.5, %v12952_v55  ;;  %7653 = vmatprep.subr.bf16.mxu1 %v7652_v45  ;;  %v5925_v62 = vmul.f32 %v5797_v2, %v4901_v24  ;;  %v5799_v48 = vadd.f32 1.0, %v11488_v57  ;;  %v5803_v23 = vadd.f32 1.0, %v11516_v56  ;;  %v12955_v57 = vld [vmem:[#allocation88_spill] sm:$0xff]  ;;  %v12958_v55 = vld [vmem:[#allocation117_spill] sm:$0xff] }
 0xcdb   : > { %v5929_v22 = vmul.f32 %v5801_v13, %v4905_v3  ;;  %v11927_v12 = vpop.eup %8378  ;;  %7591 = vmatpush1.bf16.msra.mxu0 %v7590_v20  ;;  %v7654_v9 = vpack.c.bf16 %v5922_v60, %v5918_v37  ;;  %v5796_v7 = vadd.f32 1.0, %v12953_v16  ;;  %v5800_v8 = vadd.f32 1.0, %v11497_v25  ;;  %v12956_v2 = vld [vmem:[#allocation112_spill] sm:$0xff]  ;;  %v12957_v20 = vld [vmem:[#allocation119_spill] sm:$0xff] }
 0xcdc   : > { %v5798_v42 = vadd.f32 1.0, %v12954_v58  ;;  %v5927_v45 = vmul.f32 %v5799_v48, %v4903_v59  ;;  %v5931_v24 = vmul.f32 %v5803_v23, %v4907_v40  ;;  %v5802_v3 = vadd.f32 1.0, %v11505_v39  ;;  %v12959_v58 = vld [vmem:[#allocation131_spill] sm:$0xff] }
 0xcdd   : > { %v11932_v47 = vpop.eup %8380  ;;  %v7592_v35 = vpack.c.bf16 %v5929_v22, %v5925_v62  ;;  %7655 = vmatpush1.bf16.msra.mxu1 %v7654_v9  ;;  %v5924_v56 = vmul.f32 %v5796_v7, %v12955_v57  ;;  %v5928_v13 = vmul.f32 %v5800_v8, %v12956_v2  ;;  %v4909_v60 = vmul.f32 0.5, %v11079_v5  ;;  %v12962_v2 = vld [vmem:[#allocation93_spill] sm:$0xff] }
 0xcde   : > { %v5926_v37 = vmul.f32 %v5798_v42, %v12957_v20  ;;  %v11939_v33 = vpop.eup %8382  ;;  %v7656_v25 = vpack.c.bf16 %v5931_v24, %v5927_v45  ;;  %v5930_v16 = vmul.f32 %v5802_v3, %v12958_v55  ;;  %v4913_v22 = vmul.f32 0.5, %v11096_v34  ;;  %v12960_v45 = vld [vmem:[#allocation125_spill] sm:$0xff]  ;;  %v12961_v3 = vld [vmem:[#allocation156_spill] sm:$0xff]  ;;  %v12964_v20 = vld [vmem:[#allocation87_spill] sm:$0xff] }
 0xcdf   : > { %7593 = vmatprep.subr.bf16.mxu0 %v7592_v35  ;;  %v5805_v59 = vadd.f32 1.0, %v11556_v15  ;;  %v11944_v39 = vpop.eup %8384  ;;  %v7594_v40 = vpack.c.bf16 %v5928_v13, %v5924_v56  ;;  %v5809_v62 = vadd.f32 1.0, %v11596_v54  ;;  %v4911_v48 = vmul.f32 0.5, %v11081_v1  ;;  %v12963_v13 = vld [vmem:[#allocation86_spill] sm:$0xff] }
 0xce0   : > { %v4915_v23 = vmul.f32 0.5, %v11101_v49  ;;  %v11949_v5 = vpop.eup %8386  ;;  %7657 = vmatprep.subr.bf16.mxu1 %v7656_v25  ;;  %v7658_v9 = vpack.c.bf16 %v5930_v16, %v5926_v37  ;;  %v5807_v8 = vadd.f32 1.0, %v11564_v36  ;;  %v5811_v34 = vadd.f32 1.0, %v11600_v31  ;;  %v12965_v25 = vld [vmem:[#allocation130_spill] sm:$0xff] }
 0xce1   : > { %v5933_v7 = vmul.f32 %v5805_v59, %v4909_v60  ;;  %7595 = vmatpush1.bf16.msra.mxu0 %v7594_v40  ;;  %v5937_v15 = vmul.f32 %v5809_v62, %v4913_v22  ;;  %v5804_v42 = vadd.f32 1.0, %v12959_v58  ;;  %v5808_v35 = vadd.f32 1.0, %v11583_v32  ;;  %v12966_v32 = vld [vmem:[#allocation161_spill] sm:$0xff]  ;;  %v12967_v40 = vld [vmem:[#allocation158_spill] sm:$0xff] }
 0xce2   : > { %v5806_v54 = vadd.f32 1.0, %v11546_v46  ;;  %7659 = vmatpush1.bf16.msra.mxu1 %v7658_v9  ;;  %v5935_v1 = vmul.f32 %v5807_v8, %v4911_v48  ;;  %v5939_v49 = vmul.f32 %v5811_v34, %v4915_v23  ;;  %v5810_v24 = vadd.f32 1.0, %v12960_v45  ;;  %v12968_v48 = vld [vmem:[#allocation162_spill] sm:$0xff]  ;;  %v12969_v58 = vld [vmem:[#allocation113_spill] sm:$0xff] }
 0xce3   : > { %v4917_v57 = vmul.f32 0.5, %v12961_v3  ;;  %v7596_v56 = vpack.c.bf16 %v5937_v15, %v5933_v7  ;;  %v5932_v36 = vmul.f32 %v5804_v42, %v12962_v2  ;;  %v5936_v31 = vmul.f32 %v5808_v35, %v12963_v13  ;;  %v12970_v35 = vld [vmem:[#allocation98_spill] sm:$0xff]  ;;  %v12974_v2 = vld [vmem:[#allocation121_spill] sm:$0xff] }
 0xce4   : > { %v5934_v37 = vmul.f32 %v5806_v54, %v12964_v20  ;;  %v7660_v60 = vpack.c.bf16 %v5939_v49, %v5935_v1  ;;  %v5938_v55 = vmul.f32 %v5810_v24, %v12965_v25  ;;  %v4921_v16 = vmul.f32 0.5, %v12966_v32  ;;  %v12971_v45 = vld [vmem:[#allocation166_spill] sm:$0xff]  ;;  %v12976_v25 = vld [vmem:[#allocation167_spill] sm:$0xff] }
 0xce5   : > { %v5813_v46 = vadd.f32 1.0, %v11633_v29  ;;  %7597 = vmatprep.subr.bf16.mxu0 %v7596_v56  ;;  %v7598_v22 = vpack.c.bf16 %v5936_v31, %v5932_v36  ;;  %v5817_v59 = vadd.f32 1.0, %v11659_v11  ;;  %v4919_v62 = vmul.f32 0.5, %v12967_v40  ;;  %v12973_v56 = vld [vmem:[#allocation92_spill] sm:$0xff]  ;;  %v12975_v31 = vld [vmem:[#allocation102_spill] sm:$0xff] }
 0xce6   : > { %v4923_v23 = vmul.f32 0.5, %v12968_v48  ;;  %7661 = vmatprep.subr.bf16.mxu1 %v7660_v60  ;;  %v7662_v9 = vpack.c.bf16 %v5938_v55, %v5934_v37  ;;  %v5815_v8 = vadd.f32 1.0, %v11638_v53  ;;  %v5819_v34 = vadd.f32 1.0, %v11663_v10 }
 0xce7   : > { %v5941_v7 = vmul.f32 %v5813_v46, %v4917_v57  ;;  %7599 = vmatpush1.bf16.msra.mxu0 %v7598_v22  ;;  %v5945_v15 = vmul.f32 %v5817_v59, %v4921_v16  ;;  %v5812_v42 = vadd.f32 1.0, %v12969_v58  ;;  %v5816_v29 = vadd.f32 1.0, %v11642_v21  ;;  %v12972_v57 = vld [vmem:[#allocation137_spill] sm:$0xff]  ;;  %v12977_v59 = vld [vmem:[#allocation155_spill] sm:$0xff] }
 0xce8   : > { %v5814_v54 = vadd.f32 1.0, %v12970_v35  ;;  %7663 = vmatpush1.bf16.msra.mxu1 %v7662_v9  ;;  %v5943_v11 = vmul.f32 %v5815_v8, %v4919_v62  ;;  %v5947_v1 = vmul.f32 %v5819_v34, %v4923_v23  ;;  %v5818_v49 = vadd.f32 1.0, %v11652_v19  ;;  %v12980_v9 = vld [vmem:[#allocation147_spill] sm:$0xff]  ;;  %v12981_v34 = vld [vmem:[#allocation105_spill] sm:$0xff] }
 0xce9   : > { %v4925_v24 = vmul.f32 0.5, %v12971_v45  ;;  %v7600_v3 = vpack.c.bf16 %v5945_v15, %v5941_v7  ;;  %v5940_v53 = vmul.f32 %v5812_v42, %v12972_v57  ;;  %v5944_v10 = vmul.f32 %v5816_v29, %v12973_v56  ;;  %v12982_v15 = vld [vmem:[#allocation176_spill] sm:$0xff]  ;;  %v12983_v29 = vld [vmem:[#allocation133_spill] sm:$0xff] }
 0xcea   : > { %v5942_v36 = vmul.f32 %v5814_v54, %v12974_v2  ;;  %v7664_v13 = vpack.c.bf16 %v5947_v1, %v5943_v11  ;;  %v5946_v20 = vmul.f32 %v5818_v49, %v12975_v31  ;;  %v4929_v21 = vmul.f32 0.5, %v11203_v17  ;;  %v12978_v17 = vld [vmem:[#allocation138_spill] sm:$0xff]  ;;  %v12984_v35 = vld [vmem:[#allocation101_spill] sm:$0xff] }
 0xceb   : > { %v5821_v37 = vadd.f32 1.0, %v11703_v0  ;;  %7601 = vmatprep.subr.bf16.mxu0 %v7600_v3  ;;  %v7602_v60 = vpack.c.bf16 %v5944_v10, %v5940_v53  ;;  %v5825_v19 = vadd.f32 1.0, %v11740_v41  ;;  %v4927_v55 = vmul.f32 0.5, %v12976_v25  ;;  %v12979_v0 = vld [vmem:[#allocation107_spill] sm:$0xff]  ;;  %v12985_v11 = vld [vmem:[#allocation77_spill] sm:$0xff]  ;;  %v12987_v3 = vld [vmem:[#allocation182_spill] sm:$0xff] }
 0xcec   : > { %v4931_v32 = vmul.f32 0.5, %v11210_v28  ;;  %7665 = vmatprep.subr.bf16.mxu1 %v7664_v13  ;;  %v7666_v16 = vpack.c.bf16 %v5946_v20, %v5942_v36  ;;  %v5823_v22 = vadd.f32 1.0, %v11711_v51  ;;  %v5827_v40 = vadd.f32 1.0, %v12977_v59  ;;  %v12986_v45 = vld [vmem:[#allocation141_spill] sm:$0xff]  ;;  %v12989_v13 = vld [vmem:[#allocation183_spill] sm:$0xff] }
 0xced   : > { %v5949_v46 = vmul.f32 %v5821_v37, %v4925_v24  ;;  %7603 = vmatpush1.bf16.msra.mxu0 %v7602_v60  ;;  %v5953_v62 = vmul.f32 %v5825_v19, %v4929_v21  ;;  %v5820_v48 = vadd.f32 1.0, %v12978_v17  ;;  %v5824_v23 = vadd.f32 1.0, %v12979_v0  ;;  %v12988_v2 = vld [vmem:[#allocation177_spill] sm:$0xff]  ;;  %v12990_v37 = vld [vmem:[#allocation132_spill] sm:$0xff]  ;;  %v12991_v19 = vld [vmem:[#allocation170_spill] sm:$0xff] }
 0xcee   : > { %v5822_v7 = vadd.f32 1.0, %v12980_v9  ;;  %7667 = vmatpush1.bf16.msra.mxu1 %v7666_v16  ;;  %v5951_v41 = vmul.f32 %v5823_v22, %v4927_v55  ;;  %v5955_v8 = vmul.f32 %v5827_v40, %v4931_v32  ;;  %v5826_v28 = vadd.f32 1.0, %v12981_v34  ;;  %v12992_v32 = vld [vmem:[#allocation110_spill] sm:$0xff]  ;;  %v12997_v9 = vld [vmem:[#allocation149_spill] sm:$0xff] }
 0xcef   : > { %v4933_v58 = vmul.f32 0.5, %v12982_v15  ;;  %v7604_v42 = vpack.c.bf16 %v5953_v62, %v5949_v46  ;;  %v5948_v51 = vmul.f32 %v5820_v48, %v12983_v29  ;;  %v5952_v54 = vmul.f32 %v5824_v23, %v12984_v35  ;;  %v12994_v22 = vld [vmem:[#allocation150_spill] sm:$0xff]  ;;  %v12995_v62 = vld [vmem:[#allocation135_spill] sm:$0xff] }
 0xcf0   : > { %v5950_v1 = vmul.f32 %v5822_v7, %v12985_v11  ;;  %v7668_v49 = vpack.c.bf16 %v5955_v8, %v5951_v41  ;;  %v5954_v24 = vmul.f32 %v5826_v28, %v12986_v45  ;;  %v4937_v57 = vmul.f32 0.5, %v12987_v3  ;;  %v12996_v48 = vld [vmem:[#allocation91_spill] sm:$0xff]  ;;  %v12998_v41 = vld [vmem:[#allocation122_spill] sm:$0xff] }
 0xcf1   : > { %v5829_v53 = vadd.f32 1.0, %v11776_v6  ;;  %7605 = vmatprep.subr.bf16.mxu0 %v7604_v42  ;;  %v7606_v56 = vpack.c.bf16 %v5952_v54, %v5948_v51  ;;  %v5833_v10 = vadd.f32 1.0, %v11804_v44  ;;  %v4935_v36 = vmul.f32 0.5, %v12988_v2  ;;  %v12993_v6 = vld [vmem:[#allocation153_spill] sm:$0xff]  ;;  %v12999_v34 = vld [vmem:[#allocation154_spill] sm:$0xff] }
 0xcf2   : > { %v4939_v31 = vmul.f32 0.5, %v12989_v13  ;;  %7669 = vmatprep.subr.bf16.mxu1 %v7668_v49  ;;  %v7670_v20 = vpack.c.bf16 %v5954_v24, %v5950_v1  ;;  %v5831_v60 = vadd.f32 1.0, %v12990_v37  ;;  %v5835_v25 = vadd.f32 1.0, %v12991_v19  ;;  %v13001_v11 = vld [vmem:[#allocation186_spill] sm:$0xff]  ;;  %v13002_v49 = vld [vmem:[#allocation99_spill] sm:$0xff]  ;;  %v13005_v37 = vld [vmem:[#allocation97_spill] sm:$0xff] }
 0xcf3   : > { %v5957_v21 = vmul.f32 %v5829_v53, %v4933_v58  ;;  %7607 = vmatpush1.bf16.msra.mxu0 %v7606_v56  ;;  %v5961_v55 = vmul.f32 %v5833_v10, %v4937_v57  ;;  %v5828_v16 = vadd.f32 1.0, %v12992_v32  ;;  %v5832_v46 = vadd.f32 1.0, %v12993_v6  ;;  %v13000_v58 = vld [vmem:[#allocation126_spill] sm:$0xff]  ;;  %v13007_v19 = vld [vmem:[#allocation157_spill] sm:$0xff]  ;;  %v13008_v32 = vld [vmem:[#allocation159_spill] sm:$0xff] }
 0xcf4   : > { %v5830_v59 = vadd.f32 1.0, %v12994_v22  ;;  %7671 = vmatpush1.bf16.msra.mxu1 %v7670_v20  ;;  %v5959_v44 = vmul.f32 %v5831_v60, %v4935_v36  ;;  %v5963_v40 = vmul.f32 %v5835_v25, %v4939_v31  ;;  %v5834_v17 = vadd.f32 1.0, %v12995_v62  ;;  %v13004_v2 = vld [vmem:[#allocation106_spill] sm:$0xff]  ;;  %v13006_v60 = vld [vmem:[#allocation139_spill] sm:$0xff] }
 0xcf5   : > { %v4941_v0 = vmul.f32 0.5, %v12996_v48  ;;  %v7608_v23 = vpack.c.bf16 %v5961_v55, %v5957_v21  ;;  %v5956_v7 = vmul.f32 %v5828_v16, %v12997_v9  ;;  %v5960_v8 = vmul.f32 %v5832_v46, %v12998_v41  ;;  %v13009_v22 = vld [vmem:[#allocation95_spill] sm:$0xff]  ;;  %v13011_v41 = vld [vmem:[#allocation140_spill] sm:$0xff] }
 0xcf6   : > { %v5958_v28 = vmul.f32 %v5830_v59, %v12999_v34  ;;  %v7672_v15 = vpack.c.bf16 %v5963_v40, %v5959_v44  ;;  %v5962_v42 = vmul.f32 %v5834_v17, %v13000_v58  ;;  %v4945_v29 = vmul.f32 0.5, %v12910_v18  ;;  %v13003_v18 = vld [vmem:[#allocation172_spill] sm:$0xff]  ;;  %v13014_v58 = vld [vmem:[#allocation173_spill] sm:$0xff] }
 0xcf7   : > { %v5837_v51 = vadd.f32 1.0, %v11848_v43  ;;  %7609 = vmatprep.subr.bf16.mxu0 %v7608_v23  ;;  %v7610_v35 = vpack.c.bf16 %v5960_v8, %v5956_v7  ;;  %v5841_v54 = vadd.f32 1.0, %v11880_v50  ;;  %v4943_v1 = vmul.f32 0.5, %v13001_v11  ;;  %v13012_v34 = vld [vmem:[#allocation168_spill] sm:$0xff] }
 0xcf8   : > { %v4947_v45 = vmul.f32 0.5, %v13002_v49  ;;  %7673 = vmatprep.subr.bf16.mxu1 %v7672_v15  ;;  %v7674_v24 = vpack.c.bf16 %v5962_v42, %v5958_v28  ;;  %v5839_v57 = vadd.f32 1.0, %v11858_v30  ;;  %v5843_v53 = vadd.f32 1.0, %v11885_v14  ;;  %v13013_v28 = vld [vmem:[#allocation108_spill] sm:$0xff]  ;;  %v5989_v49 = vld [vmem:[%s12343_s11 + $0x48] sm:$0xff] }
 0xcf9   : > { %v5965_v3 = vmul.f32 %v5837_v51, %v4941_v0  ;;  %7611 = vmatpush1.bf16.msra.mxu0 %v7610_v35  ;;  %v5969_v56 = vmul.f32 %v5841_v54, %v4945_v29  ;;  %v5836_v10 = vadd.f32 1.0, %v13003_v18  ;;  %v5840_v43 = vadd.f32 1.0, %v11865_v61  ;;  %v13010_v0 = vld [vmem:[#allocation164_spill] sm:$0xff]  ;;  %v5980_v29 = vld [vmem:[%s12343_s11] sm:$0xff]  ;;  %v5982_v51 = vld [vmem:[%s12343_s11 + $0x10] sm:$0xff] }
 0xcfa   : > { %v5838_v36 = vadd.f32 1.0, %v13004_v2  ;;  %7675 = vmatpush1.bf16.msra.mxu1 %v7674_v24  ;;  %v5967_v50 = vmul.f32 %v5839_v57, %v4943_v1  ;;  %v5971_v13 = vmul.f32 %v5843_v53, %v4947_v45  ;;  %v5842_v31 = vadd.f32 1.0, %v11875_v63  ;;  %v5985_v35 = vld [vmem:[%s12343_s11 + $0x28] sm:$0xff]  ;;  %v5984_v54 = vld [vmem:[%s12343_s11 + $0x20] sm:$0xff]  ;;  %v5987_v11 = vld [vmem:[%s12343_s11 + $0x38] sm:$0xff] }
 0xcfb   : > { %v4949_v20 = vmul.f32 0.5, %v12926_v52  ;;  %v7612_v21 = vpack.c.bf16 %v5969_v56, %v5965_v3  ;;  %v5964_v30 = vmul.f32 %v5836_v10, %v13005_v37  ;;  %v5968_v14 = vmul.f32 %v5840_v43, %v13006_v60  ;;  %v5986_v1 = vld [vmem:[%s12343_s11 + $0x30] sm:$0xff]  ;;  %v5988_v45 = vld [vmem:[%s12343_s11 + $0x40] sm:$0xff]  ;;  %v5991_v24 = vld [vmem:[%s12343_s11 + $0x58] sm:$0xff] }
 0xcfc   : > { %v5966_v25 = vmul.f32 %v5838_v36, %v13007_v19  ;;  %v7676_v55 = vpack.c.bf16 %v5971_v13, %v5967_v50  ;;  %v5970_v16 = vmul.f32 %v5842_v31, %v13008_v32  ;;  %v4953_v61 = vmul.f32 0.5, %v11383_v27  ;;  %v5990_v3 = vld [vmem:[%s12343_s11 + $0x50] sm:$0xff]  ;;  %v5993_v57 = vld [vmem:[%s12343_s11 + $0x68] sm:$0xff]  ;;  %v5992_v53 = vld [vmem:[%s12343_s11 + $0x60] sm:$0xff] }
 0xcfd   : > { %v5845_v6 = vadd.f32 1.0, %v11920_v38  ;;  %7613 = vmatprep.subr.bf16.mxu0 %v7612_v21  ;;  %v7614_v46 = vpack.c.bf16 %v5968_v14, %v5964_v30  ;;  %v5849_v63 = vadd.f32 1.0, %v11944_v39  ;;  %v4951_v52 = vmul.f32 0.5, %v13009_v22  ;;  %v5995_v56 = vld [vmem:[%s12343_s11 + $0x78] sm:$0xff]  ;;  %v5994_v18 = vld [vmem:[%s12343_s11 + $0x70] sm:$0xff]  ;;  %v5997_v10 = vld [vmem:[%s12343_s11 + $0x88] sm:$0xff] }
 0xcfe   : > { %v4955_v59 = vmul.f32 0.5, %v11391_v4  ;;  %7677 = vmatprep.subr.bf16.mxu1 %v7676_v55  ;;  %v7678_v44 = vpack.c.bf16 %v5970_v16, %v5966_v25  ;;  %v5847_v62 = vadd.f32 1.0, %v11927_v12  ;;  %v5851_v17 = vadd.f32 1.0, %v11949_v5  ;;  %v5996_v43 = vld [vmem:[%s12343_s11 + $0x80] sm:$0xff]  ;;  %v5999_v2 = vld [vmem:[%s12343_s11 + $0x98] sm:$0xff]  ;;  %v5998_v36 = vld [vmem:[%s12343_s11 + $0x90] sm:$0xff] }
 0xcff   : > { %v5973_v40 = vmul.f32 %v5845_v6, %v4949_v20  ;;  %7615 = vmatpush1.bf16.msra.mxu0 %v7614_v46  ;;  %v5977_v48 = vmul.f32 %v5849_v63, %v4953_v61  ;;  %v5844_v27 = vadd.f32 1.0, %v11907_v26  ;;  %v5848_v38 = vadd.f32 1.0, %v11932_v47  ;;  %v6001_v50 = vld [vmem:[%s12343_s11 + $0xa8] sm:$0xff]  ;;  %v6000_v13 = vld [vmem:[%s12343_s11 + $0xa0] sm:$0xff]  ;;  %v6003_v31 = vld [vmem:[%s12343_s11 + $0xb8] sm:$0xff] }
 0xd00   : > { %v5846_v23 = vadd.f32 1.0, %v13010_v0  ;;  %7679 = vmatpush1.bf16.msra.mxu1 %v7678_v44  ;;  %v5975_v39 = vmul.f32 %v5847_v62, %v4951_v52  ;;  %v5979_v9 = vmul.f32 %v5851_v17, %v4955_v59  ;;  %v5850_v4 = vadd.f32 1.0, %v11939_v33  ;;  %v5983_v33 = vld [vmem:[%s12343_s11 + $0x18] sm:$0xff]  ;;  %v6002_v20 = vld [vmem:[%s12343_s11 + $0xb0] sm:$0xff]  ;;  %v6005_v21 = vld [vmem:[%s12343_s11 + $0xc8] sm:$0xff] }
 0xd01   : > { %v7616_v7 = vpack.c.bf16 %v5977_v48, %v5973_v40  ;;  %v5972_v8 = vmul.f32 %v5844_v27, %v13011_v41  ;;  %v5976_v12 = vmul.f32 %v5848_v38, %v13012_v34  ;;  %v6004_v37 = vld [vmem:[%s12343_s11 + $0xc0] sm:$0xff]  ;;  %v6007_v30 = vld [vmem:[%s12343_s11 + $0xd8] sm:$0xff]  ;;  %v6006_v60 = vld [vmem:[%s12343_s11 + $0xd0] sm:$0xff]  ;;  %v13015_v32 = vmov 0.0  }
 0xd02   : > { %v5974_v5 = vmul.f32 %v5846_v23, %v13013_v28  ;;  %v7680_v15 = vpack.c.bf16 %v5979_v9, %v5975_v39  ;;  %v5978_v42 = vmul.f32 %v5850_v4, %v13014_v58  ;;  %v6009_v14 = vld [vmem:[%s12343_s11 + $0xe8] sm:$0xff]  ;;  %v6008_v19 = vld [vmem:[%s12343_s11 + $0xe0] sm:$0xff]  ;;  %v6011_v25 = vld [vmem:[%s12343_s11 + $0xf8] sm:$0xff] }
 0xd03   : > { %7617 = vmatprep.subr.bf16.mxu0 %v7616_v7  ;;  %v7618_v26 = vpack.c.bf16 %v5976_v12, %v5972_v8  ;;  %v6010_v55 = vld [vmem:[%s12343_s11 + $0xf0] sm:$0xff]  ;;  %v13016_v61 = vld [vmem:[#allocation14_spill] sm:$0xff]  ;;  %v13017_v22 = vld [vmem:[#allocation45_spill] sm:$0xff] }
 0xd04   : > { %7681 = vmatprep.subr.bf16.mxu1 %v7680_v15  ;;  %v7682_v47 = vpack.c.bf16 %v5978_v42, %v5974_v5  ;;  %v13018_v59 = vld [vmem:[#allocation15_spill] sm:$0xff]  ;;  %v13019_v62 = vld [vmem:[#allocation46_spill] sm:$0xff]  ;;  %v13020_v27 = vld [vmem:[#allocation17_spill] sm:$0xff] }
 0xd05   : > { %7619 = vmatpush1.bf16.msra.mxu0 %v7618_v26  ;;  %v13021_v39 = vld [vmem:[#allocation47_spill] sm:$0xff]  ;;  %v13023_v34 = vld [vmem:[#allocation48_spill] sm:$0xff] }
 0xd06   : > { %7683 = vmatpush1.bf16.msra.mxu1 %v7682_v47  ;;  %v13022_v4 = vld [vmem:[#allocation19_spill] sm:$0xff]  ;;  %v13024_v42 = vld [vmem:[#allocation16_spill] sm:$0xff] }
 0xd08   : > { %6077 = vmatmul.mubr.f32.vlgmr.msra.gmra.mrb[14].mxu0 %v5980_v29 }
 0xd09   : > { %6238 = vmatmul.mubr.f32.vlgmr.msra.gmra.mrb[36].mxu1 %v5980_v29  ;;  %6082 = vmatprep.mubr.f32.mxu0 %v5983_v33 }
 0xd0a   : > { %6243 = vmatprep.mubr.f32.mxu1 %v5983_v33  ;;  %v13025_v33 = vld [vmem:[#allocation49_spill] sm:$0xff] }
 0xd0c   : > { %6083 = vmatmul.mubr.f32.gmra.mrb[16].mxu0 %v5982_v51 }
 0xd0d   : > { %6244 = vmatmul.mubr.f32.gmra.mrb[38].mxu1 %v5982_v51  ;;  %6088 = vmatprep.mubr.f32.mxu0 %v5985_v35 }
 0xd0e   : > { %6249 = vmatprep.mubr.f32.mxu1 %v5985_v35  ;;  %v13026_v35 = vld [vmem:[#allocation18_spill] sm:$0xff] }
 0xd10   : > { %6089 = vmatmul.mubr.f32.gmra.mrb[18].mxu0 %v5984_v54 }
 0xd11   : > { %6250 = vmatmul.mubr.f32.gmra.mrb[40].mxu1 %v5984_v54  ;;  %6094 = vmatprep.mubr.f32.mxu0 %v5987_v11 }
 0xd12   : > { %6255 = vmatprep.mubr.f32.mxu1 %v5987_v11 }
 0xd14   : > { %6095 = vmatmul.mubr.f32.gmra.mrb[20].mxu0 %v5986_v1 }
 0xd15   : > { %6256 = vmatmul.mubr.f32.gmra.mrb[42].mxu1 %v5986_v1  ;;  %6100 = vmatprep.mubr.f32.mxu0 %v5989_v49  ;;  %v13027_v1 = vld [vmem:[#allocation50_spill] sm:$0xff] }
 0xd16   : > { %6261 = vmatprep.mubr.f32.mxu1 %v5989_v49 }
 0xd18   : > { %6101 = vmatmul.mubr.f32.gmra.mrb[22].mxu0 %v5988_v45 }
 0xd19   : > { %6262 = vmatmul.mubr.f32.gmra.mrb[44].mxu1 %v5988_v45  ;;  %6106 = vmatprep.mubr.f32.mxu0 %v5991_v24 }
 0xd1a   : > { %6267 = vmatprep.mubr.f32.mxu1 %v5991_v24  ;;  %v13028_v24 = vld [vmem:[#allocation21_spill] sm:$0xff] }
 0xd1c   : > { %6107 = vmatmul.mubr.f32.gmra.mrb[24].mxu0 %v5990_v3 }
 0xd1d   : > { %6268 = vmatmul.mubr.f32.gmra.mrb[46].mxu1 %v5990_v3  ;;  %6112 = vmatprep.mubr.f32.mxu0 %v5993_v57 }
 0xd1e   : > { %6273 = vmatprep.mubr.f32.mxu1 %v5993_v57 }
 0xd20   : > { %6113 = vmatmul.mubr.f32.gmra.mrb[26].mxu0 %v5992_v53 }
 0xd21   : > { %6274 = vmatmul.mubr.f32.gmra.mrb[48].mxu1 %v5992_v53  ;;  %6118 = vmatprep.mubr.f32.mxu0 %v5995_v56 }
 0xd22   : > { %6279 = vmatprep.mubr.f32.mxu1 %v5995_v56  ;;  %v13029_v56 = vld [vmem:[#allocation51_spill] sm:$0xff] }
 0xd24   : > { %6119 = vmatmul.mubr.f32.gmra.mrb[28].mxu0 %v5994_v18 }
 0xd25   : > { %6280 = vmatmul.mubr.f32.gmra.mrb[50].mxu1 %v5994_v18  ;;  %6124 = vmatprep.mubr.f32.mxu0 %v5997_v10 }
 0xd26   : > { %6285 = vmatprep.mubr.f32.mxu1 %v5997_v10  ;;  %v13030_v10 = vld [vmem:[#allocation23_spill] sm:$0xff] }
 0xd28   : > { %6125 = vmatmul.mubr.f32.gmra.mrb[32].mxu0 %v5996_v43 }
 0xd29   : > { %6286 = vmatmul.mubr.f32.gmra.mrb[52].mxu1 %v5996_v43  ;;  %6130 = vmatprep.mubr.f32.mxu0 %v5999_v2 }
 0xd2a   : > { %6291 = vmatprep.mubr.f32.mxu1 %v5999_v2 }
 0xd2c   : > { %6131 = vmatmul.mubr.f32.gmra.mrb[34].mxu0 %v5998_v36 }
 0xd2d   : > { %6292 = vmatmul.mubr.f32.gmra.mrb[54].mxu1 %v5998_v36  ;;  %6136 = vmatprep.mubr.f32.mxu0 %v6001_v50 }
 0xd2e   : > { %6297 = vmatprep.mubr.f32.mxu1 %v6001_v50  ;;  %v13031_v50 = vld [vmem:[#allocation52_spill] sm:$0xff] }
 0xd30   : > { %6137 = vmatmul.mubr.f32.gmra.mrb[36].mxu0 %v6000_v13 }
 0xd31   : > { %6298 = vmatmul.mubr.f32.gmra.mrb[56].mxu1 %v6000_v13  ;;  %6142 = vmatprep.mubr.f32.mxu0 %v6003_v31 }
 0xd32   : > { %6303 = vmatprep.mubr.f32.mxu1 %v6003_v31 }
 0xd34   : > { %6143 = vmatmul.mubr.f32.gmra.mrb[38].mxu0 %v6002_v20 }
 0xd35   : > { %6304 = vmatmul.mubr.f32.gmra.mrb[58].mxu1 %v6002_v20  ;;  %6148 = vmatprep.mubr.f32.mxu0 %v6005_v21 }
 0xd36   : > { %6309 = vmatprep.mubr.f32.mxu1 %v6005_v21 }
 0xd38   : > { %6149 = vmatmul.mubr.f32.gmra.mrb[40].mxu0 %v6004_v37 }
 0xd39   : > { %6310 = vmatmul.mubr.f32.gmra.mrb[60].mxu1 %v6004_v37  ;;  %6154 = vmatprep.mubr.f32.mxu0 %v6007_v30 }
 0xd3a   : > { %6315 = vmatprep.mubr.f32.mxu1 %v6007_v30  ;;  %v13032_v30 = vld [vmem:[#allocation20_spill] sm:$0xff] }
 0xd3c   : > { %6155 = vmatmul.mubr.f32.gmra.mrb[42].mxu0 %v6006_v60 }
 0xd3d   : > { %6316 = vmatmul.mubr.f32.gmra.mrb[62].mxu1 %v6006_v60  ;;  %6160 = vmatprep.mubr.f32.mxu0 %v6009_v14 }
 0xd3e   : > { %6321 = vmatprep.mubr.f32.mxu1 %v6009_v14 }
 0xd40   : > { %6161 = vmatmul.mubr.f32.gmra.mrb[44].mxu0 %v6008_v19 }
 0xd41   : > { %6322 = vmatmul.mubr.f32.gmra.mrb[64].mxu1 %v6008_v19  ;;  %6166 = vmatprep.mubr.f32.mxu0 %v6011_v25 }
 0xd42   : > { %6327 = vmatprep.mubr.f32.mxu1 %v6011_v25  ;;  %v13033_v25 = vld [vmem:[#allocation53_spill] sm:$0xff] }
 0xd44   : > { %6167 = vmatmul.mubr.f32.gmra.mrb[46].mxu0 %v6010_v55 }
 0xd45   : > { %6328 = vmatmul.mubr.f32.gmra.mrb[66].mxu1 %v6010_v55  ;;  %6401 = vmatprep.mubr.f32.mxu0 %v13015_v32 }
 0xddb   : > { %v6078_v16 = vpop.f32.mrb[14].mxu0 }
 0xddc   : > { %v6079_v6 = vadd.f32 %v6078_v16, %v13016_v61  ;;  %v6239_v46 = vpop.f32.mrb[36].mxu1  ;;  %v6080_v63 = vpop.f32.mrb[15].mxu0  ;;  %v13034_v16 = vld [vmem:[#allocation22_spill] sm:$0xff] }
 0xddd   : > { %v12137_v52 = vadd.f32 %v6239_v46, %v13017_v22  ;;  %v6081_v44 = vadd.f32 %v6080_v63, %v13018_v59  ;;  %v6241_v40 = vpop.f32.mrb[37].mxu1  ;;  %v13035_v46 = vld [vmem:[#allocation54_spill] sm:$0xff]  ;;  %v13036_v59 = vld [vmem:[#allocation13_spill] sm:$0xff] }
 0xdde   : > { %v12141_v17 = vadd.f32 %v6241_v40, %v13019_v62 }
 0xddf   : > { %v6084_v48 = vpop.f32.mrb[16].mxu0 }
 0xde0   : > { %v6085_v38 = vadd.f32 %v6084_v48, %v13020_v27  ;;  %v6245_v0 = vpop.f32.mrb[38].mxu1  ;;  %v6086_v23 = vpop.f32.mrb[17].mxu0  ;;  %v13037_v48 = vld [vmem:[#allocation55_spill] sm:$0xff] }
 0xde1   : > { %v12145_v9 = vadd.f32 %v6245_v0, %v13021_v39  ;;  %v6087_v7 = vadd.f32 %v6086_v23, %v13022_v4  ;;  %v6247_v41 = vpop.f32.mrb[39].mxu1  ;;  %v13039_v4 = vld [vmem:[#allocation56_spill] sm:$0xff] }
 0xde2   : > { %v7686_v8 = vpack.c.bf16 %v6085_v38, %v6079_v6  ;;  %v12149_v12 = vadd.f32 %v6247_v41, %v13023_v34  ;;  %v13038_v38 = vld [vmem:[#allocation24_spill] sm:$0xff] }
 0xde3   : > { %v7718_v28 = vpack.c.bf16 %v12145_v9, %v12137_v52  ;;  %v7684_v5 = vpack.c.bf16 %v6087_v7, %v6081_v44  ;;  %v6090_v15 = vpop.f32.mrb[18].mxu0  ;;  %v6336_v52 = vld [vmem:[%s12344_s12 + $0x10] sm:$0xff] }
 0xde4   : > { %v7716_v58 = vpack.c.bf16 %v12149_v12, %v12141_v17  ;;  %v6091_v26 = vadd.f32 %v6090_v15, %v13024_v42  ;;  %v6251_v47 = vpop.f32.mrb[40].mxu1  ;;  %v6092_v29 = vpop.f32.mrb[19].mxu0  ;;  %v13040_v15 = vld [vmem:[#allocation25_spill] sm:$0xff] }
 0xde5   : > { %v12157_v51 = vadd.f32 %v6251_v47, %v13025_v33  ;;  %v6093_v54 = vadd.f32 %v6092_v29, %v13026_v35  ;;  %v6253_v11 = vpop.f32.mrb[41].mxu1  ;;  %7685 = vmatprep.subr.bf16.mxu0 %v7684_v5  ;;  %v13041_v29 = vld [vmem:[#allocation57_spill] sm:$0xff]  ;;  %v13042_v35 = vld [vmem:[#allocation26_spill] sm:$0xff] }
 0xde6   : > { %v12161_v49 = vadd.f32 %v6253_v11, %v13027_v1  ;;  %7687 = vmatpush1.bf16.msra.mxu0 %v7686_v8  ;;  %v13043_v1 = vld [vmem:[#allocation58_spill] sm:$0xff] }
 0xde7   : > { %v6096_v45 = vpop.f32.mrb[20].mxu0 }
 0xde8   : > { %v6097_v3 = vadd.f32 %v6096_v45, %v13028_v24  ;;  %v6257_v57 = vpop.f32.mrb[42].mxu1  ;;  %v6098_v53 = vpop.f32.mrb[21].mxu0 }
 0xde9   : > { %v12165_v18 = vadd.f32 %v6257_v57, %v13029_v56  ;;  %v6099_v43 = vadd.f32 %v6098_v53, %v13030_v10  ;;  %v6259_v2 = vpop.f32.mrb[43].mxu1  ;;  %v13045_v10 = vld [vmem:[#allocation59_spill] sm:$0xff] }
 0xdea   : > { %v7690_v36 = vpack.c.bf16 %v6097_v3, %v6091_v26  ;;  %v12169_v13 = vadd.f32 %v6259_v2, %v13031_v50  ;;  %v13044_v3 = vld [vmem:[#allocation27_spill] sm:$0xff]  ;;  %v13046_v2 = vld [vmem:[#allocation28_spill] sm:$0xff] }
 0xdeb   : > { %v7722_v31 = vpack.c.bf16 %v12165_v18, %v12157_v51  ;;  %v7688_v20 = vpack.c.bf16 %v6099_v43, %v6093_v54  ;;  %v6102_v21 = vpop.f32.mrb[22].mxu0 }
 0xdec   : > { %v7720_v37 = vpack.c.bf16 %v12169_v13, %v12161_v49  ;;  %v6103_v60 = vadd.f32 %v6102_v21, %v13032_v30  ;;  %v6263_v14 = vpop.f32.mrb[44].mxu1  ;;  %v6104_v19 = vpop.f32.mrb[23].mxu0  ;;  %v13047_v21 = vld [vmem:[#allocation60_spill] sm:$0xff] }
 0xded   : > { %v12177_v55 = vadd.f32 %v6263_v14, %v13033_v25  ;;  %v6105_v61 = vadd.f32 %v6104_v19, %v13034_v16  ;;  %v6265_v6 = vpop.f32.mrb[45].mxu1  ;;  %7689 = vmatprep.subr.bf16.mxu0 %v7688_v20  ;;  %v13048_v16 = vld [vmem:[#allocation29_spill] sm:$0xff] }
 0xdee   : > { %v12181_v63 = vadd.f32 %v6265_v6, %v13035_v46  ;;  %7691 = vmatpush1.bf16.msra.mxu0 %v7690_v36 }
 0xdef   : > { %v6108_v22 = vpop.f32.mrb[24].mxu0 }
 0xdf0   : > { %v6109_v44 = vadd.f32 %v6108_v22, %v13036_v59  ;;  %v6269_v40 = vpop.f32.mrb[46].mxu1  ;;  %v6110_v62 = vpop.f32.mrb[25].mxu0  ;;  %v13049_v22 = vld [vmem:[#allocation61_spill] sm:$0xff] }
 0xdf1   : > { %v12185_v27 = vadd.f32 %v6269_v40, %v13037_v48  ;;  %v6111_v0 = vadd.f32 %v6110_v62, %v13038_v38  ;;  %v6271_v23 = vpop.f32.mrb[47].mxu1  ;;  %v13051_v48 = vld [vmem:[#allocation62_spill] sm:$0xff] }
 0xdf2   : > { %v7694_v39 = vpack.c.bf16 %v6109_v44, %v6103_v60  ;;  %v12189_v7 = vadd.f32 %v6271_v23, %v13039_v4  ;;  %v13050_v44 = vld [vmem:[#allocation30_spill] sm:$0xff]  ;;  %v13052_v23 = vld [vmem:[#allocation31_spill] sm:$0xff] }
 0xdf3   : > { %v7726_v41 = vpack.c.bf16 %v12185_v27, %v12177_v55  ;;  %v7692_v8 = vpack.c.bf16 %v6111_v0, %v6105_v61  ;;  %v6114_v34 = vpop.f32.mrb[26].mxu0 }
 0xdf4   : > { %v7724_v5 = vpack.c.bf16 %v12189_v7, %v12181_v63  ;;  %v6115_v42 = vadd.f32 %v6114_v34, %v13040_v15  ;;  %v6275_v26 = vpop.f32.mrb[48].mxu1  ;;  %v6116_v47 = vpop.f32.mrb[27].mxu0  ;;  %v13053_v34 = vld [vmem:[#allocation63_spill] sm:$0xff] }
 0xdf5   : > { %v12197_v33 = vadd.f32 %v6275_v26, %v13041_v29  ;;  %v6117_v54 = vadd.f32 %v6116_v47, %v13042_v35  ;;  %v6277_v11 = vpop.f32.mrb[49].mxu1  ;;  %7693 = vmatprep.subr.bf16.mxu0 %v7692_v8  ;;  %v13055_v35 = vld [vmem:[#allocation64_spill] sm:$0xff] }
 0xdf6   : > { %v12201_v45 = vadd.f32 %v6277_v11, %v13043_v1  ;;  %7695 = vmatpush1.bf16.msra.mxu0 %v7694_v39 }
 0xdf7   : > { %v6120_v24 = vpop.f32.mrb[28].mxu0 }
 0xdf8   : > { %v6121_v57 = vadd.f32 %v6120_v24, %v13044_v3  ;;  %v6281_v53 = vpop.f32.mrb[50].mxu1  ;;  %v6122_v56 = vpop.f32.mrb[29].mxu0 }
 0xdf9   : > { %v12205_v43 = vadd.f32 %v6281_v53, %v13045_v10  ;;  %v6123_v36 = vadd.f32 %v6122_v56, %v13046_v2  ;;  %v6283_v50 = vpop.f32.mrb[51].mxu1  ;;  %v13057_v2 = vld [vmem:[#allocation65_spill] sm:$0xff] }
 0xdfa   : > { %v7698_v20 = vpack.c.bf16 %v6121_v57, %v6115_v42  ;;  %v12209_v30 = vadd.f32 %v6283_v50, %v13047_v21  ;;  %v13054_v42 = vld [vmem:[#allocation32_spill] sm:$0xff]  ;;  %v13056_v57 = vld [vmem:[#allocation33_spill] sm:$0xff]  ;;  %v13058_v50 = vld [vmem:[#allocation34_spill] sm:$0xff] }
 0xdfb   : > { %v7730_v60 = vpack.c.bf16 %v12205_v43, %v12197_v33  ;;  %v7696_v14 = vpack.c.bf16 %v6123_v36, %v6117_v54  ;;  %v6126_v19 = vpop.f32.mrb[32].mxu0 }
 0xdfc   : > { %v7728_v25 = vpack.c.bf16 %v12209_v30, %v12201_v45  ;;  %v6127_v61 = vadd.f32 %v6126_v19, %v13048_v16  ;;  %v6287_v6 = vpop.f32.mrb[52].mxu1  ;;  %v6128_v46 = vpop.f32.mrb[33].mxu0 }
 0xdfd   : > { %v12217_v59 = vadd.f32 %v6287_v6, %v13049_v22  ;;  %v6129_v40 = vadd.f32 %v6128_v46, %v13050_v44  ;;  %v6289_v62 = vpop.f32.mrb[53].mxu1  ;;  %7697 = vmatprep.subr.bf16.mxu0 %v7696_v14  ;;  %v13059_v14 = vld [vmem:[#allocation66_spill] sm:$0xff]  ;;  %v13061_v44 = vld [vmem:[#allocation67_spill] sm:$0xff] }
 0xdfe   : > { %v12221_v38 = vadd.f32 %v6289_v62, %v13051_v48  ;;  %7699 = vmatpush1.bf16.msra.mxu0 %v7698_v20  ;;  %v13062_v62 = vld [vmem:[#allocation36_spill] sm:$0xff] }
 0xdff   : > { %v6132_v0 = vpop.f32.mrb[34].mxu0 }
 0xe00   : > { %v6133_v39 = vadd.f32 %v6132_v0, %v13052_v23  ;;  %v6293_v4 = vpop.f32.mrb[54].mxu1  ;;  %v6134_v8 = vpop.f32.mrb[35].mxu0 }
 0xe01   : > { %v12225_v15 = vadd.f32 %v6293_v4, %v13053_v34  ;;  %v6135_v26 = vadd.f32 %v6134_v8, %v13054_v42  ;;  %v6295_v47 = vpop.f32.mrb[55].mxu1 }
 0xe02   : > { %v7702_v29 = vpack.c.bf16 %v6133_v39, %v6127_v61  ;;  %v12229_v54 = vadd.f32 %v6295_v47, %v13055_v35  ;;  %v13060_v61 = vld [vmem:[#allocation35_spill] sm:$0xff]  ;;  %v13063_v39 = vld [vmem:[#allocation68_spill] sm:$0xff]  ;;  %v13064_v47 = vld [vmem:[#allocation37_spill] sm:$0xff] }
 0xe03   : > { %v7734_v11 = vpack.c.bf16 %v12225_v15, %v12217_v59  ;;  %v7700_v1 = vpack.c.bf16 %v6135_v26, %v6129_v40  ;;  %v6138_v24 = vpop.f32.mrb[36].mxu0 }
 0xe04   : > { %v7732_v3 = vpack.c.bf16 %v12229_v54, %v12221_v38  ;;  %v6139_v53 = vadd.f32 %v6138_v24, %v13056_v57  ;;  %v6299_v56 = vpop.f32.mrb[56].mxu1  ;;  %v6140_v10 = vpop.f32.mrb[37].mxu0  ;;  %v13065_v24 = vld [vmem:[#allocation69_spill] sm:$0xff] }
 0xe05   : > { %v12237_v36 = vadd.f32 %v6299_v56, %v13057_v2  ;;  %v6141_v20 = vadd.f32 %v6140_v10, %v13058_v50  ;;  %v6301_v21 = vpop.f32.mrb[57].mxu1  ;;  %7701 = vmatprep.subr.bf16.mxu0 %v7700_v1  ;;  %v13066_v56 = vld [vmem:[#allocation38_spill] sm:$0xff] }
 0xe06   : > { %v12241_v19 = vadd.f32 %v6301_v21, %v13059_v14  ;;  %7703 = vmatpush1.bf16.msra.mxu0 %v7702_v29  ;;  %v13067_v2 = vld [vmem:[#allocation70_spill] sm:$0xff] }
 0xe07   : > { %v6144_v16 = vpop.f32.mrb[38].mxu0 }
 0xe08   : > { %v6145_v6 = vadd.f32 %v6144_v16, %v13060_v61  ;;  %v6305_v46 = vpop.f32.mrb[58].mxu1  ;;  %v6146_v22 = vpop.f32.mrb[39].mxu0 }
 0xe09   : > { %v12245_v40 = vadd.f32 %v6305_v46, %v13061_v44  ;;  %v6147_v48 = vadd.f32 %v6146_v22, %v13062_v62  ;;  %v6307_v0 = vpop.f32.mrb[59].mxu1  ;;  %v13070_v22 = vld [vmem:[#allocation40_spill] sm:$0xff] }
 0xe0a   : > { %v7706_v23 = vpack.c.bf16 %v6145_v6, %v6139_v53  ;;  %v12249_v4 = vadd.f32 %v6307_v0, %v13063_v39  ;;  %v13069_v6 = vld [vmem:[#allocation71_spill] sm:$0xff]  ;;  %v13071_v0 = vld [vmem:[#allocation72_spill] sm:$0xff] }
 0xe0b   : > { %v7738_v8 = vpack.c.bf16 %v12245_v40, %v12237_v36  ;;  %v7704_v34 = vpack.c.bf16 %v6147_v48, %v6141_v20  ;;  %v6150_v42 = vpop.f32.mrb[40].mxu0  ;;  %v13068_v20 = vld [vmem:[#allocation39_spill] sm:$0xff] }
 0xe0c   : > { %v7736_v26 = vpack.c.bf16 %v12249_v4, %v12241_v19  ;;  %v6151_v29 = vadd.f32 %v6150_v42, %v13064_v47  ;;  %v6311_v35 = vpop.f32.mrb[60].mxu1  ;;  %v6152_v1 = vpop.f32.mrb[41].mxu0 }
 0xe0d   : > { %v12257_v57 = vadd.f32 %v6311_v35, %v13065_v24  ;;  %v6153_v53 = vadd.f32 %v6152_v1, %v13066_v56  ;;  %v6313_v10 = vpop.f32.mrb[61].mxu1  ;;  %7705 = vmatprep.subr.bf16.mxu0 %v7704_v34  ;;  %v13072_v1 = vld [vmem:[#allocation41_spill] sm:$0xff] }
 0xe0e   : > { %v6314_v50 = vadd.f32 %v6313_v10, %v13067_v2  ;;  %7707 = vmatpush1.bf16.msra.mxu0 %v7706_v23  ;;  %v13073_v10 = vld [vmem:[#allocation73_spill] sm:$0xff] }
 0xe0f   : > { %v6156_v21 = vpop.f32.mrb[42].mxu0 }
 0xe10   : > { %v6157_v14 = vadd.f32 %v6156_v21, %v13068_v20  ;;  %v6317_v16 = vpop.f32.mrb[62].mxu1  ;;  %v6158_v61 = vpop.f32.mrb[43].mxu0  ;;  %v13074_v21 = vld [vmem:[#allocation42_spill] sm:$0xff] }
 0xe11   : > { %v6318_v46 = vadd.f32 %v6317_v16, %v13069_v6  ;;  %v6159_v44 = vadd.f32 %v6158_v61, %v13070_v22  ;;  %v6319_v62 = vpop.f32.mrb[63].mxu1  ;;  %v13075_v61 = vld [vmem:[#allocation74_spill] sm:$0xff] }
 0xe12   : > { %v7710_v48 = vpack.c.bf16 %v6157_v14, %v6151_v29  ;;  %v6320_v39 = vadd.f32 %v6319_v62, %v13071_v0  ;;  %v13076_v14 = vld [vmem:[#allocation43_spill] sm:$0xff] }
 0xe13   : > { %v7742_v42 = vpack.c.bf16 %v6318_v46, %v12257_v57  ;;  %v7708_v47 = vpack.c.bf16 %v6159_v44, %v6153_v53  ;;  %v6162_v34 = vpop.f32.mrb[44].mxu0  ;;  %v13077_v46 = vld [vmem:[#allocation75_spill] sm:$0xff]  ;;  %v13078_v44 = vld [vmem:[#allocation44_spill] sm:$0xff] }
 0xe14   : > { %v7740_v35 = vpack.c.bf16 %v6320_v39, %v6314_v50  ;;  %v6163_v23 = vadd.f32 %v6162_v34, %v13072_v1  ;;  %v6323_v24 = vpop.f32.mrb[64].mxu1  ;;  %v6164_v56 = vpop.f32.mrb[45].mxu0  ;;  %v13079_v34 = vld [vmem:[#allocation76_spill] sm:$0xff] }
 0xe15   : > { %v6324_v2 = vadd.f32 %v6323_v24, %v13073_v10  ;;  %v6165_v20 = vadd.f32 %v6164_v56, %v13074_v21  ;;  %v6325_v16 = vpop.f32.mrb[65].mxu1  ;;  %7709 = vmatprep.subr.bf16.mxu0 %v7708_v47  ;;  %v6335_v47 = vld [vmem:[%s12344_s12 + $0x8] sm:$0xff] }
 0xe16   : > { %v6326_v6 = vadd.f32 %v6325_v16, %v13075_v61  ;;  %7711 = vmatpush1.bf16.msra.mxu0 %v7710_v48  ;;  %v6334_v48 = vld [vmem:[%s12344_s12] sm:$0xff] }
 0xe17   : > { %v6168_v29 = vpop.f32.mrb[46].mxu0 }
 0xe18   : > { %v6169_v22 = vadd.f32 %v6168_v29, %v13076_v14  ;;  %v6329_v57 = vpop.f32.mrb[66].mxu1  ;;  %v6170_v53 = vpop.f32.mrb[47].mxu0 }
 0xe19   : > { %v6330_v50 = vadd.f32 %v6329_v57, %v13077_v46  ;;  %v6171_v62 = vadd.f32 %v6170_v53, %v13078_v44  ;;  %v6331_v0 = vpop.f32.mrb[67].mxu1 }
 0xe1a   : > { %v7714_v39 = vpack.c.bf16 %v6169_v22, %v6163_v23  ;;  %v6332_v1 = vadd.f32 %v6331_v0, %v13079_v34 }
 0xe1b   : > { %v7746_v24 = vpack.c.bf16 %v6330_v50, %v6324_v2  ;;  %v7712_v56 = vpack.c.bf16 %v6171_v62, %v6165_v20 }
 0xe1c   : > { %v7744_v10 = vpack.c.bf16 %v6332_v1, %v6326_v6 }
 0xe1d   : > { %7713 = vmatprep.subr.bf16.mxu0 %v7712_v56 }
 0xe1e   : > { %7715 = vmatpush1.bf16.msra.mxu0 %v7714_v39 }
 0xe1f   : > { %7717 = vmatprep.subr.bf16.mxu0 %v7716_v58 }
 0xe21   : > { %6402 = vmatmul.mubr.f32.vlgmr.msra.gmra.mrb[48].mxu0 %v6334_v48 }
 0xe22   : > { %7719 = vmatpush1.bf16.msra.mxu0 %v7718_v28  ;;  %6407 = vmatprep.mubr.f32.mxu0 %v13015_v32 }
 0xe23   : > { %7721 = vmatprep.subr.bf16.mxu0 %v7720_v37 }
 0xe25   : > { %6408 = vmatmul.mubr.f32.gmra.mrb[50].mxu0 %v6335_v47 }
 0xe26   : > { %7723 = vmatpush1.bf16.msra.mxu0 %v7722_v31  ;;  %6413 = vmatprep.mubr.f32.mxu0 %v13015_v32 }
 0xe27   : > { %7725 = vmatprep.subr.bf16.mxu0 %v7724_v5 }
 0xe29   : > { %6414 = vmatmul.mubr.f32.gmra.mrb[52].mxu0 %v6336_v52 }
 0xe2a   : > { %7727 = vmatpush1.bf16.msra.mxu0 %v7726_v41  ;;  %6484 = vmatprep.mubr.f32.mxu0 %v13015_v32 }
 0xe2b   : > { %7729 = vmatprep.subr.bf16.mxu0 %v7728_v25 }
 0xe2e   : > { %7731 = vmatpush1.bf16.msra.mxu0 %v7730_v60 }
 0xe2f   : > { %7733 = vmatprep.subr.bf16.mxu0 %v7732_v3 }
 0xe32   : > { %7735 = vmatpush1.bf16.msra.mxu0 %v7734_v11 }
 0xe33   : > { %7737 = vmatprep.subr.bf16.mxu0 %v7736_v26 }
 0xe36   : > { %7739 = vmatpush1.bf16.msra.mxu0 %v7738_v8 }
 0xe37   : > { %7741 = vmatprep.subr.bf16.mxu0 %v7740_v35 }
 0xe3a   : > { %7743 = vmatpush1.bf16.msra.mxu0 %v7742_v42 }
 0xe3b   : > { %7745 = vmatprep.subr.bf16.mxu0 %v7744_v10 }
 0xe3e   : > { %7747 = vmatpush1.bf16.msra.mxu0 %v7746_v24 }
 0xe41   : > { %6485 = vmatmul.mubr.f32.vlgmr.msra.gmra.mrb[54].mxu0 %v6334_v48 }
 0xe42   : > { %6490 = vmatprep.mubr.f32.mxu0 %v13015_v32 }
 0xe45   : > { %6491 = vmatmul.mubr.f32.gmra.mrb[56].mxu0 %v6335_v47 }
 0xe46   : > { %6496 = vmatprep.mubr.f32.mxu0 %v13015_v32 }
 0xe49   : > { %6497 = vmatmul.mubr.f32.gmra.mrb[58].mxu0 %v6336_v52 }
 0xef4   : > { %v6403_v17 = vpop.f32.mrb[48].mxu0 }
 0xef5   : > { %6503 = vst [vmem:[%s499_s16] sm:$0xff] %v6403_v17  ;;  %v6405_v9 = vpop.f32.mrb[49].mxu0 }
 0xef6   : > { %6504 = vst [vmem:[%s499_s16 + $0x8] sm:$0xff] %v6405_v9 }
 0xef8   : > { %v6409_v12 = vpop.f32.mrb[50].mxu0 }
 0xef9   : > { %6507 = vst [vmem:[%s499_s16 + $0x20] sm:$0xff] %v6409_v12  ;;  %v6411_v28 = vpop.f32.mrb[51].mxu0 }
 0xefa   : > { %6508 = vst [vmem:[%s499_s16 + $0x28] sm:$0xff] %v6411_v28 }
 0xefc   : > { %v6415_v58 = vpop.f32.mrb[52].mxu0 }
 0xefd   : > { %6511 = vst [vmem:[%s499_s16 + $0x40] sm:$0xff] %v6415_v58  ;;  %v6417_v51 = vpop.f32.mrb[53].mxu0 }
 0xefe   : > { %6512 = vst [vmem:[%s499_s16 + $0x48] sm:$0xff] %v6417_v51 }
 0xf14   : > { %v6486_v49 = vpop.f32.mrb[54].mxu0 }
 0xf15   : > { %6505 = vst [vmem:[%s499_s16 + $0x10] sm:$0xff] %v6486_v49  ;;  %v6488_v32 = vpop.f32.mrb[55].mxu0 }
 0xf16   : > { %6506 = vst [vmem:[%s499_s16 + $0x18] sm:$0xff] %v6488_v32 }
 0xf18   : > { %v6492_v18 = vpop.f32.mrb[56].mxu0 }
 0xf19   : > { %6509 = vst [vmem:[%s499_s16 + $0x30] sm:$0xff] %v6492_v18  ;;  %v6494_v13 = vpop.f32.mrb[57].mxu0 }
 0xf1a   : > { %6510 = vst [vmem:[%s499_s16 + $0x38] sm:$0xff] %v6494_v13 }
 0xf1c   : > { %v6498_v31 = vpop.f32.mrb[58].mxu0 }
 0xf1d   : > { %6513 = vst [vmem:[%s499_s16 + $0x50] sm:$0xff] %v6498_v31  ;;  %v6500_v37 = vpop.f32.mrb[59].mxu0 }
 0xf1e   : > { %6514 = vst [vmem:[%s499_s16 + $0x58] sm:$0xff] %v6500_v37 }
 0xf1f PF: > { %s13081_s28 = sld [smem:[#allocation12_spill]] }
 0xf25   : > { %s26_s25 = sadd.s32 1, %s13081_s28  }
 0xf26   : > { %p23_p1 = scmp.ge.s32.totalorder %s26_s25, 4  }
 0xf28   :  { %25 = sbr.rel (!%p23_p1) target bundleno = 5 (0x5), region = 119 }
 0xf2f   :  { %6536 = vsyncpa [#allocation3], 1 }
 0xf30   :  { %6538 = vsyncpa [#allocation3 + $0x1], 1 }
 0xf31   :  { %6539 = vsyncpa [#allocation5], 1 }
 0xf32   :  { %6540 = vsyncpa [#allocation8], 1 }

</bundles_post_ra>
